<compile_context>
chip_gen: v6e
topology: v6e:2x2x1
jax: 0.10.0
libtpu: 0.0.40
codegen_flags: <defaults>
</compile_context>

<pallas_src>
import functools

import jax
import jax.numpy as jnp
from jax.experimental import pallas as pl
from jax.experimental.pallas import tpu as pltpu


def attmil_kernel(x_ref, w1_ref, b1_ref, wvu_ref, bvu_ref, wwt_ref, bw_ref,
                  wct_ref, bc_ref, y_ref, a_ref, *, bags, insts):
    hd1 = w1_ref.shape[1]
    hd2p = wvu_ref.shape[1] // 2          # lane-aligned gating half-width (256)

    x = x_ref[...]                        # (bags*insts, D_in) bf16, contiguous

    # feature_extractor: Linear(768 -> hd1) + ReLU  (MXU, f32 accumulate)
    h = jnp.dot(x, w1_ref[...], preferred_element_type=jnp.float32) + b1_ref[...]
    h = jnp.maximum(h, 0.0)                                          # (R, hd1) f32

    # attention_V | attention_U fused into one lane-aligned 2*hd2p-wide matmul.
    # Pad lanes carry zero weight + zero bias, so tanh(0) = 0 zeroes them out.
    g = jnp.dot(h.astype(jnp.bfloat16), wvu_ref[...],
                preferred_element_type=jnp.float32) + bvu_ref[...]   # (R, 2*hd2p)
    gated = jnp.tanh(g[:, :hd2p]) * jax.nn.sigmoid(g[:, hd2p:])      # (R, hd2p) f32

    # attention_weights: width-1 linear -> VPU multiply + lane reduce
    # (wwt pad lanes are exactly zero, so pad columns contribute nothing).
    gated3 = gated.reshape(bags, insts, hd2p)
    s = jnp.sum(gated3 * wwt_ref[...], axis=-1) + bw_ref[...]        # (bags, insts)

    # softmax over the instance axis (lane-major); divide on the idle EUP slot.
    m = jnp.max(s, axis=-1, keepdims=True)
    e = jnp.exp(s - m)
    w = e * pl.reciprocal(jnp.sum(e, axis=-1, keepdims=True), approx=True)

    # M = A @ h per bag: weighted sum over instances (VPU + sublane reduce)
    hb = h.reshape(bags, insts, hd1)
    M = jnp.sum(w[:, :, None] * hb, axis=1)                          # (bags, hd1)

    # classifier: width-1 linear -> VPU multiply + lane reduce
    y = jnp.sum(M * wct_ref[...], axis=-1, keepdims=True) + bc_ref[...]  # (bags, 1)

    y_ref[...] = y
    a_ref[...] = w        # lane-major A; wrapper reshapes to (B, 1, N)


def _choose_block_bags(B, N, d_in=768, target_rows=512,
                       vmem_budget_bytes=24 * 1024 * 1024):
    """Pick bags-per-step Bt.

    Constraints: Bt | B and (Bt == B or Bt % 8 == 0) so every BlockSpec dim is a
    multiple of 8 or the full extent.  Preferences: (a) keep grid length >= 2 so
    a v7x megacore can shard the bag axis, (b) the largest Bt with
    Bt*N <= target_rows (amortizes per-step overhead + MXU weight re-push).
    A hard VMEM-derived row cap keeps the double-buffered bf16 x block bounded;
    if nothing fits, fall back to the *smallest* valid divisor, never Bt=B.
    """
    row_cap_vmem = max(1, vmem_budget_bytes // (2 * d_in * 2))   # 2 bufs, bf16
    row_cap = min(target_rows, row_cap_vmem)

    valid = [d for d in range(1, B + 1)
             if B % d == 0 and (d == B or d % 8 == 0)]
    if not valid:
        return B
    fits = [d for d in valid if d * N <= row_cap]
    if fits:
        split = [d for d in fits if B // d >= 2]     # keep both TCs busy on v7x
        return max(split) if split else max(fits)
    return min(valid)                                # minimal-VMEM fallback


def attmil_forward(x, params, *, block_bags=None):
    """x: (B, N, D_in) float32. Returns (Y_prob (B,1) logits, A (B,1,N))."""
    B, N, D_in = x.shape
    w1, b1, wv, bv, wu, bu, ww, bw, wc, bc = params
    hd1 = w1.shape[1]
    hd2 = wv.shape[1]
    hd2p = ((hd2 + 127) // 128) * 128            # lane-aligned half (192 -> 256)

    # Fuse V|U into one lane-aligned (hd1, 2*hd2p) matmul. Pad columns
    # hd2..hd2p-1 (V half) and hd2p+hd2..2*hd2p-1 (U half) with exact zeros,
    # and pad wwt with exact zeros, so pad lanes contribute nothing.
    wvu = jnp.zeros((hd1, 2 * hd2p), jnp.float32)
    wvu = wvu.at[:, :hd2].set(wv).at[:, hd2p:hd2p + hd2].set(wu)
    bvu = jnp.zeros((1, 2 * hd2p), jnp.float32)
    bvu = bvu.at[:, :hd2].set(bv).at[:, hd2p:hd2p + hd2].set(bu)
    wwt = jnp.zeros((1, hd2p), jnp.float32).at[:, :hd2].set(jnp.transpose(ww))
    wct = jnp.transpose(wc)                      # (1, hd1)

    # Flatten x in the wrapper: contiguous bf16 DMA, MXU-native 2D LHS.
    x_flat = x.reshape(B * N, D_in).astype(jnp.bfloat16)
    w1_bf = w1.astype(jnp.bfloat16)
    wvu_bf = wvu.astype(jnp.bfloat16)

    Bt = block_bags if block_bags is not None else _choose_block_bags(B, N, D_in)
    Rt = Bt * N
    grid = (B // Bt,)

    kernel = functools.partial(attmil_kernel, bags=Bt, insts=N)

    def rep(shape):  # replicated weight / bias: same full block every step
        return pl.BlockSpec(shape, lambda i: tuple(0 for _ in shape))

    y2, a2 = pl.pallas_call(
        kernel,
        out_shape=(
            jax.ShapeDtypeStruct((B, 1), jnp.float32),   # Y_prob (logits)
            jax.ShapeDtypeStruct((B, N), jnp.float32),   # A (lane-major)
        ),
        grid_spec=pltpu.PrefetchScalarGridSpec(
            num_scalar_prefetch=0,
            grid=grid,
            in_specs=[
                pl.BlockSpec((Rt, D_in), lambda i: (i, 0)),
                rep((D_in, hd1)), rep((1, hd1)),
                rep((hd1, 2 * hd2p)), rep((1, 2 * hd2p)),
                rep((1, hd2p)), rep((1, 1)),
                rep((1, hd1)), rep((1, 1)),
            ],
            out_specs=[
                pl.BlockSpec((Bt, 1), lambda i: (i, 0)),
                pl.BlockSpec((Bt, N), lambda i: (i, 0)),
            ],
        ),
        compiler_params=pltpu.CompilerParams(
            dimension_semantics=("parallel",),
            vmem_limit_bytes=32 * 1024 * 1024,   # explicit; safe on v5e/v6e/v7x
        ),
    )(x_flat, w1_bf, b1, wvu_bf, bvu, wwt, bw, wct, bc)

    return y2, a2.reshape(B, 1, N)


def init_params(key, d_in=768, hd1=384, hd2=192):
    """Deterministic synthetic weights, PyTorch-Linear-style uniform init,
    stored as (in_features, out_features)."""
    ks = jax.random.split(key, 10)

    def lin(kw, kb, fan_in, fan_out):
        bound = 1.0 / jnp.sqrt(fan_in)
        w = jax.random.uniform(kw, (fan_in, fan_out), jnp.float32, -bound, bound)
        b = jax.random.uniform(kb, (1, fan_out), jnp.float32, -bound, bound)
        return w, b

    w1, b1 = lin(ks[0], ks[1], d_in, hd1)    # feature_extractor
    wv, bv = lin(ks[2], ks[3], hd1, hd2)     # attention_V
    wu, bu = lin(ks[4], ks[5], hd1, hd2)     # attention_U
    ww, bw = lin(ks[6], ks[7], hd2, 1)       # attention_weights
    wc, bc = lin(ks[8], ks[9], hd1, 1)       # classifier
    return (w1, b1, wv, bv, wu, bu, ww, bw, wc, bc)


def reference_forward(x, params):
    """Pure-JAX f32 reference mirroring the PyTorch forward exactly."""
    w1, b1, wv, bv, wu, bu, ww, bw, wc, bc = params
    h = jax.nn.relu(x @ w1 + b1)                     # (B, N, hd1)
    av = jnp.tanh(h @ wv + bv)
    au = jax.nn.sigmoid(h @ wu + bu)
    a = (av * au) @ ww + bw                          # (B, N, 1)
    a = jnp.transpose(a, (0, 2, 1))                  # (B, 1, N)
    a = jax.nn.softmax(a, axis=2)
    m = jnp.matmul(a, h)                             # (B, 1, hd1)
    m = m.reshape(-1, h.shape[-1])
    y = m @ wc + bc                                  # (B, 1)
    return y, a


if __name__ == "__main__":
    # 64 bags of 8 instances -> Bt=32 bags/step (256-row MXU tiles), grid of 2
    # parallel steps (fills both v7x TensorCores).
    B, N, D_IN, HD1, HD2 = 64, 8, 768, 384, 192

    key = jax.random.PRNGKey(0)
    kx, kp = jax.random.split(key)
    x = jax.random.normal(kx, (B, N, D_IN), jnp.float32)
    params = init_params(kp, D_IN, HD1, HD2)

    y_prob, attn = jax.block_until_ready(attmil_forward(x, params))

    y_ref, a_ref = reference_forward(x, params)
    assert y_prob.shape == (B, 1) and attn.shape == (B, 1, N)
    # bf16 MXU inputs (f32 accumulation) + approx reciprocal -> compare to the
    # f32 reference with correspondingly loosened tolerances.
    assert jnp.allclose(y_prob, y_ref, atol=3e-2, rtol=3e-2)
    assert jnp.allclose(attn, a_ref, atol=1e-2, rtol=1e-2)

    print("KERNEL_OK")
</pallas_src>

<mosaic_0001>
module attributes {stable_mosaic.version = 11 : i64} {
  func.func @attmil_kernel(%arg0: i32, %arg1: memref<256x768xbf16, #tpu.memory_space<vmem>>, %arg2: memref<768x384xbf16, #tpu.memory_space<vmem>>, %arg3: memref<1x384xf32, #tpu.memory_space<vmem>>, %arg4: memref<384x512xbf16, #tpu.memory_space<vmem>>, %arg5: memref<1x512xf32, #tpu.memory_space<vmem>>, %arg6: memref<1x256xf32, #tpu.memory_space<vmem>>, %arg7: memref<1x1xf32, #tpu.memory_space<vmem>>, %arg8: memref<1x384xf32, #tpu.memory_space<vmem>>, %arg9: memref<1x1xf32, #tpu.memory_space<vmem>>, %arg10: memref<32x1xf32, #tpu.memory_space<vmem>>, %arg11: memref<32x8xf32, #tpu.memory_space<vmem>>) attributes {dimension_semantics = [#tpu.dimension_semantics<parallel>], iteration_bounds = array<i64: 2>, scalar_prefetch = 0 : i64, scratch_operands = 0 : i64, tpu.core_type = #tpu.core_type<tc>, window_params = [{transform_indices = @transform_0, window_bounds = array<i64: 256, 768>}, {pipeline_mode = #tpu.pipeline_mode<synchronous>, transform_indices = @transform_1, window_bounds = array<i64: 768, 384>}, {pipeline_mode = #tpu.pipeline_mode<synchronous>, transform_indices = @transform_2, window_bounds = array<i64: 1, 384>}, {pipeline_mode = #tpu.pipeline_mode<synchronous>, transform_indices = @transform_3, window_bounds = array<i64: 384, 512>}, {pipeline_mode = #tpu.pipeline_mode<synchronous>, transform_indices = @transform_4, window_bounds = array<i64: 1, 512>}, {pipeline_mode = #tpu.pipeline_mode<synchronous>, transform_indices = @transform_5, window_bounds = array<i64: 1, 256>}, {pipeline_mode = #tpu.pipeline_mode<synchronous>, transform_indices = @transform_6, window_bounds = array<i64: 1, 1>}, {pipeline_mode = #tpu.pipeline_mode<synchronous>, transform_indices = @transform_7, window_bounds = array<i64: 1, 384>}, {pipeline_mode = #tpu.pipeline_mode<synchronous>, transform_indices = @transform_8, window_bounds = array<i64: 1, 1>}, {transform_indices = @transform_9, window_bounds = array<i64: 32, 1>}, {transform_indices = @transform_10, window_bounds = array<i64: 32, 8>}]} {
    %c0 = arith.constant 0 : index
    %c0_0 = arith.constant 0 : index
    %0 = vector.load %arg1[%c0, %c0_0] : memref<256x768xbf16, #tpu.memory_space<vmem>>, vector<256x768xbf16>
    %c0_1 = arith.constant 0 : index
    %c0_2 = arith.constant 0 : index
    %1 = vector.load %arg2[%c0_1, %c0_2] : memref<768x384xbf16, #tpu.memory_space<vmem>>, vector<768x384xbf16>
    %cst = arith.constant dense<0.000000e+00> : vector<256x384xf32>
    %2 = tpu.matmul %0, %1, %cst {dimension_numbers = #tpu.dot_dimension_numbers<[1], [0], [0], [1], [0, 0, 1, 1], [], []>} : vector<256x768xbf16>, vector<768x384xbf16>, vector<256x384xf32> -> vector<256x384xf32>
    %c0_3 = arith.constant 0 : index
    %c0_4 = arith.constant 0 : index
    %3 = vector.load %arg3[%c0_3, %c0_4] : memref<1x384xf32, #tpu.memory_space<vmem>>, vector<1x384xf32>
    %4 = vector.broadcast %3 : vector<1x384xf32> to vector<256x384xf32>
    %5 = arith.addf %2, %4 : vector<256x384xf32>
    %cst_5 = arith.constant 0.000000e+00 : f32
    %6 = vector.broadcast %cst_5 : f32 to vector<256x384xf32>
    %7 = arith.maximumf %5, %6 : vector<256x384xf32>
    %8 = arith.truncf %7 : vector<256x384xf32> to vector<256x384xbf16>
    %c0_6 = arith.constant 0 : index
    %c0_7 = arith.constant 0 : index
    %9 = vector.load %arg4[%c0_6, %c0_7] : memref<384x512xbf16, #tpu.memory_space<vmem>>, vector<384x512xbf16>
    %cst_8 = arith.constant dense<0.000000e+00> : vector<256x512xf32>
    %10 = tpu.matmul %8, %9, %cst_8 {dimension_numbers = #tpu.dot_dimension_numbers<[1], [0], [0], [1], [0, 0, 1, 1], [], []>} : vector<256x384xbf16>, vector<384x512xbf16>, vector<256x512xf32> -> vector<256x512xf32>
    %c0_9 = arith.constant 0 : index
    %c0_10 = arith.constant 0 : index
    %11 = vector.load %arg5[%c0_9, %c0_10] : memref<1x512xf32, #tpu.memory_space<vmem>>, vector<1x512xf32>
    %12 = vector.broadcast %11 : vector<1x512xf32> to vector<256x512xf32>
    %13 = arith.addf %10, %12 : vector<256x512xf32>
    %14 = vector.extract_strided_slice %13 {offsets = [0, 0], sizes = [256, 256], strides = [1, 1]} : vector<256x512xf32> to vector<256x256xf32>
    %15 = math.tanh %14 : vector<256x256xf32>
    %16 = vector.extract_strided_slice %13 {offsets = [0, 256], sizes = [256, 256], strides = [1, 1]} : vector<256x512xf32> to vector<256x256xf32>
    %17 = arith.negf %16 : vector<256x256xf32>
    %18 = math.exp %17 : vector<256x256xf32>
    %cst_11 = arith.constant 1.000000e+00 : f32
    %19 = vector.broadcast %cst_11 : f32 to vector<256x256xf32>
    %20 = arith.addf %19, %18 : vector<256x256xf32>
    %21 = arith.divf %19, %20 : vector<256x256xf32>
    %22 = arith.mulf %15, %21 : vector<256x256xf32>
    %23 = vector.shape_cast %22 : vector<256x256xf32> to vector<32x8x256xf32>
    %c0_12 = arith.constant 0 : index
    %c0_13 = arith.constant 0 : index
    %24 = vector.load %arg6[%c0_12, %c0_13] : memref<1x256xf32, #tpu.memory_space<vmem>>, vector<1x256xf32>
    %25 = vector.shape_cast %24 : vector<1x256xf32> to vector<1x1x256xf32>
    %26 = vector.broadcast %25 : vector<1x1x256xf32> to vector<32x8x256xf32>
    %27 = arith.mulf %23, %26 : vector<32x8x256xf32>
    %cst_14 = arith.constant dense<0.000000e+00> : vector<32x8xf32>
    %28 = vector.multi_reduction <add>, %27, %cst_14 [2] : vector<32x8x256xf32> to vector<32x8xf32>
    %c0_15 = arith.constant 0 : index
    %c0_16 = arith.constant 0 : index
    %29 = vector.load %arg7[%c0_15, %c0_16] : memref<1x1xf32, #tpu.memory_space<vmem>>, vector<1x1xf32>
    %30 = vector.broadcast %29 : vector<1x1xf32> to vector<32x8xf32>
    %31 = arith.addf %28, %30 : vector<32x8xf32>
    %cst_17 = arith.constant dense<0xFF800000> : vector<32xf32>
    %32 = vector.multi_reduction <maximumf>, %31, %cst_17 [1] : vector<32x8xf32> to vector<32xf32>
    %33 = vector.shape_cast %32 : vector<32xf32> to vector<32x1xf32>
    %34 = vector.broadcast %33 : vector<32x1xf32> to vector<32x8xf32>
    %35 = arith.subf %31, %34 : vector<32x8xf32>
    %36 = math.exp %35 : vector<32x8xf32>
    %cst_18 = arith.constant dense<0.000000e+00> : vector<32xf32>
    %37 = vector.multi_reduction <add>, %36, %cst_18 [1] : vector<32x8xf32> to vector<32xf32>
    %38 = vector.shape_cast %37 : vector<32xf32> to vector<32x1xf32>
    %39 = tpu.reciprocal %38 {approx = true} : vector<32x1xf32> -> vector<32x1xf32>
    %40 = vector.broadcast %39 : vector<32x1xf32> to vector<32x8xf32>
    %41 = arith.mulf %36, %40 : vector<32x8xf32>
    %42 = vector.shape_cast %7 : vector<256x384xf32> to vector<32x8x384xf32>
    %43 = vector.shape_cast %41 : vector<32x8xf32> to vector<32x8x1xf32>
    %44 = vector.broadcast %43 : vector<32x8x1xf32> to vector<32x8x384xf32>
    %45 = arith.mulf %44, %42 : vector<32x8x384xf32>
    %cst_19 = arith.constant dense<0.000000e+00> : vector<32x384xf32>
    %46 = vector.multi_reduction <add>, %45, %cst_19 [1] : vector<32x8x384xf32> to vector<32x384xf32>
    %c0_20 = arith.constant 0 : index
    %c0_21 = arith.constant 0 : index
    %47 = vector.load %arg8[%c0_20, %c0_21] : memref<1x384xf32, #tpu.memory_space<vmem>>, vector<1x384xf32>
    %48 = vector.broadcast %47 : vector<1x384xf32> to vector<32x384xf32>
    %49 = arith.mulf %46, %48 : vector<32x384xf32>
    %cst_22 = arith.constant dense<0.000000e+00> : vector<32xf32>
    %50 = vector.multi_reduction <add>, %49, %cst_22 [1] : vector<32x384xf32> to vector<32xf32>
    %51 = vector.shape_cast %50 : vector<32xf32> to vector<32x1xf32>
    %c0_23 = arith.constant 0 : index
    %c0_24 = arith.constant 0 : index
    %52 = vector.load %arg9[%c0_23, %c0_24] : memref<1x1xf32, #tpu.memory_space<vmem>>, vector<1x1xf32>
    %53 = vector.broadcast %52 : vector<1x1xf32> to vector<32x1xf32>
    %54 = arith.addf %51, %53 : vector<32x1xf32>
    %c0_25 = arith.constant 0 : index
    %c0_26 = arith.constant 0 : index
    %55 = vector.load %arg10[%c0_25, %c0_26] : memref<32x1xf32, #tpu.memory_space<vmem>>, vector<32x1xf32>
    tpu.vector_store %arg10[%c0_25, %c0_26], %54 {strides = array<i32>} : memref<32x1xf32, #tpu.memory_space<vmem>>, vector<32x1xf32>,
    %c0_27 = arith.constant 0 : index
    %c0_28 = arith.constant 0 : index
    %56 = vector.load %arg11[%c0_27, %c0_28] : memref<32x8xf32, #tpu.memory_space<vmem>>, vector<32x8xf32>
    tpu.vector_store %arg11[%c0_27, %c0_28], %41 {strides = array<i32>} : memref<32x8xf32, #tpu.memory_space<vmem>>, vector<32x8xf32>,
    return
  }
  func.func @transform_0(%arg0: i32) -> (i32, i32) {
    %c0_i32 = arith.constant 0 : i32
    %c0_i32_0 = arith.constant 0 : i32
    return %arg0, %c0_i32 : i32, i32
  }
  func.func @transform_1(%arg0: i32) -> (i32, i32) {
    %c0_i32 = arith.constant 0 : i32
    %c0_i32_0 = arith.constant 0 : i32
    %c0_i32_1 = arith.constant 0 : i32
    return %c0_i32, %c0_i32_0 : i32, i32
  }
  func.func @transform_2(%arg0: i32) -> (i32, i32) {
    %c0_i32 = arith.constant 0 : i32
    %c0_i32_0 = arith.constant 0 : i32
    %c0_i32_1 = arith.constant 0 : i32
    return %c0_i32, %c0_i32_0 : i32, i32
  }
  func.func @transform_3(%arg0: i32) -> (i32, i32) {
    %c0_i32 = arith.constant 0 : i32
    %c0_i32_0 = arith.constant 0 : i32
    %c0_i32_1 = arith.constant 0 : i32
    return %c0_i32, %c0_i32_0 : i32, i32
  }
  func.func @transform_4(%arg0: i32) -> (i32, i32) {
    %c0_i32 = arith.constant 0 : i32
    %c0_i32_0 = arith.constant 0 : i32
    %c0_i32_1 = arith.constant 0 : i32
    return %c0_i32, %c0_i32_0 : i32, i32
  }
  func.func @transform_5(%arg0: i32) -> (i32, i32) {
    %c0_i32 = arith.constant 0 : i32
    %c0_i32_0 = arith.constant 0 : i32
    %c0_i32_1 = arith.constant 0 : i32
    return %c0_i32, %c0_i32_0 : i32, i32
  }
  func.func @transform_6(%arg0: i32) -> (i32, i32) {
    %c0_i32 = arith.constant 0 : i32
    %c0_i32_0 = arith.constant 0 : i32
    %c0_i32_1 = arith.constant 0 : i32
    return %c0_i32, %c0_i32_0 : i32, i32
  }
  func.func @transform_7(%arg0: i32) -> (i32, i32) {
    %c0_i32 = arith.constant 0 : i32
    %c0_i32_0 = arith.constant 0 : i32
    %c0_i32_1 = arith.constant 0 : i32
    return %c0_i32, %c0_i32_0 : i32, i32
  }
  func.func @transform_8(%arg0: i32) -> (i32, i32) {
    %c0_i32 = arith.constant 0 : i32
    %c0_i32_0 = arith.constant 0 : i32
    %c0_i32_1 = arith.constant 0 : i32
    return %c0_i32, %c0_i32_0 : i32, i32
  }
  func.func @transform_9(%arg0: i32) -> (i32, i32) {
    %c0_i32 = arith.constant 0 : i32
    %c0_i32_0 = arith.constant 0 : i32
    return %arg0, %c0_i32 : i32, i32
  }
  func.func @transform_10(%arg0: i32) -> (i32, i32) {
    %c0_i32 = arith.constant 0 : i32
    %c0_i32_0 = arith.constant 0 : i32
    return %arg0, %c0_i32 : i32, i32
  }
}

</mosaic_0001>

<bundles_post_ra>
// kernel: tpu_custom_call.1
= control target key start
LH: loop header
LB: loop body
LE: loop exit
PB: predicated region body
PF: predicated region fallthrough
CT: control target
= control target key end

     0   :  { %s14194_s0 = inlined_call_operand.hbm [shape: bf16[512,768], index: 0, kind: input, shape index: {}]   ;;  %s14195_s1 = inlined_call_operand.hbm [shape: bf16[768,384], index: 1, kind: input, shape index: {}]   ;;  %s14196_s2 = inlined_call_operand.vmem [shape: f32[1,384], index: 2, kind: input, shape index: {}]   ;;  %s14197_s3 = inlined_call_operand.hbm [shape: bf16[384,512], index: 3, kind: input, shape index: {}]   ;;  %s14198_s4 = inlined_call_operand.vmem [shape: f32[1,512], index: 4, kind: input, shape index: {}]   ;;  %s14199_s5 = inlined_call_operand.vmem [shape: f32[1,256], index: 5, kind: input, shape index: {}]   ;;  %s14200_s6 = inlined_call_operand.<no memory space> [shape: f32[1,1], index: 6, kind: input, shape index: {}]   ;;  %s14201_s7 = inlined_call_operand.vmem [shape: f32[1,384], index: 7, kind: input, shape index: {}]   ;;  %s14202_s9 = inlined_call_operand.vmem [shape: f32[64,1], index: 9, kind: output, shape index: {0}]   ;;  %s14203_s10 = inlined_call_operand.vmem [shape: f32[64,8], index: 10, kind: output, shape index: {1}]   ;;  %s14204_s8 = inlined_call_operand.<no memory space> [shape: f32[1,1], index: 8, kind: input, shape index: {}]  }
   0x1   :  { %v16_v0 = vstv %s14200_s6  ;;  %v18_v1 = vstv %s14204_s8 }
   0x2   :  { %17 = vst [vmem:[#allocation2] sm:$0x1] %v16_v0  ;;  %19 = vst [vmem:[#allocation3] sm:$0x1] %v18_v1 }
   0x3   :  { %20 = vsyncpa [#allocation5], 0 }
   0x4   :  { %22 = vsyncpa [#allocation5 + $0x1], 0 }
   0x5   :  { %23 = vsyncpa [#allocation7], 0  ;;  %s9786_s17 = smov 0   ;;  %s9788_s18 = smov 0  }
   0x6   :  { %s9790_s19 = smov 0   ;;  %s9792_s20 = smov 0  }
   0x7 LB: > { %s7797_s6 = sadd.s32 4294967295, %s9713_s20   ;;  %p49_p0 = scmp.ne.s32.totalorder %s9705_s18, %s9701_s17  ;;  %s9713_s20 = sphi %s9792_s20, %s15190_s20   ;;  %s9709_s19 = sphi %s9790_s19, %s15189_s19   ;;  %s9705_s18 = sphi %s9788_s18, %s15188_s18   ;;  %s9701_s17 = sphi %s9786_s17, %s15187_s17  }
   0x8   : > { %p9808_p1 = scmp.eq.s32.totalorder %s7797_s6, 0  ;;  %p7799_p2 = scmp.ge.s32.totalorder %s9713_s20, 1 }
   0x9   : > { %p280_p3 = scmp.lt.s32.totalorder %s9713_s20, 3  ;;  %s9715_s23 = smov [#allocation6]  }
   0xa   : > { %s14422_s8 = scalar_select %p9808_p1, 1, 0 }
   0xb   : > { %p9816_p4 = por %p9808_p1, %p49_p0  ;;  %p9820_p5 = pnand %p7799_p2, %p280_p3 }
   0xc   : > { %s292_s24 = sshll.u32 %s9715_s23, 4  ;;  %s9716_s26 = smov [#allocation8]   ;;  %s293_s24 = int_to_ptr.vmem [resolvable:$true] %s292_s24 }
   0xd   : > { %s14423_s21 = scalar_select %p9816_p4, 1, 0 }
   0xe   : > { %s14424_s22 = scalar_select %p9820_p5, 1, 0 }
   0xf   : > { %p8566_p6 = pneg %p9820_p5  ;;  %s308_s27 = sshll.u32 %s9716_s26, 4  ;;  %s309_s27 = int_to_ptr.vmem [resolvable:$true] %s308_s27 }
  0x10   : > { %s9606_s28 = scalar_lea.vmem %s293_s24, 18432  ;;  %p9614_p12 = scmp.lt.s32.totalorder %s293_s24, %s293_s24 }
  0x11   : > { %p9828_p7 = pnand %p8566_p6, %p9808_p1  ;;  %p9607_p9 = scmp.ne.s32.totalorder %s293_s24, %s9606_s28 }
  0x12   : > { %p9615_p13 = scmp.lt.s32.totalorder %s9606_s28, %s9606_s28 }
  0x13   : > { %p9597_p8 = pneg %p9828_p7 }
  0x14   : > { %p9616_p0 = por %p9615_p13, %p9614_p12 }
  0x15   : > { %p9609_p10 = pnand %p9607_p9, %p9597_p8 }
  0x17   : > { %p9610_p11 = pneg %p9609_p10 }
  0x19   : > { %p9617_p2 = pnand %p9616_p0, %p9610_p11 }
  0x1b   : > { %9620 = shalt.err (!%p9617_p2)
}
  0x1c   : > { %s9717_s29 = smov 192   ;;  %s9718_s30 = smov 12  }
  0x1d   : > { %8569 = dma.hbm_to_vmem [thread:$0]  (!%p9828_p7), %s14195_s1, 18432, %s293_s24, [#allocation7], %s9717_s29, %s9717_s29, %s9718_s30  }
  0x1e   : > { %s9632_s13 = scalar_lea.vmem %s309_s27, 12288  ;;  %p9640_p10 = scmp.lt.s32.totalorder %s309_s27, %s309_s27 }
  0x1f   : > { %p9633_p3 = scmp.ne.s32.totalorder %s309_s27, %s9632_s13  ;;  %p9641_p1 = scmp.lt.s32.totalorder %s9632_s13, %s9632_s13 }
  0x21   : > { %p9635_p6 = pnand %p9633_p3, %p9597_p8  ;;  %p9642_p12 = por %p9641_p1, %p9640_p10 }
  0x23   : > { %p9636_p9 = pneg %p9635_p6 }
  0x25   : > { %p9643_p11 = pnand %p9642_p12, %p9636_p9 }
  0x27   : > { %9646 = shalt.err (!%p9643_p11)
}
  0x28   : > { %s9719_s14 = smov 256   ;;  %s9720_s15 = smov 16  }
  0x29   : > { %8572 = dma.hbm_to_vmem [thread:$0]  (!%p9828_p7), %s14197_s3, 12288, %s309_s27, [#allocation7], %s9719_s14, %s9719_s14, %s9720_s15  }
  0x2a   : > { %s9851_s23 = sadd.s32 1, %s9713_s20   ;;  %s36_s26 = sadd.s32 1, %s9709_s19 }
  0x2b   : > { %s33_s24 = ssub.s32 %s9713_s20, %s9851_s23  ;;  %p43_p8 = scmp.ne.s32.totalorder %s9709_s19, %s9705_s18 }
  0x2c   : > { %p34_p1 = scmp.eq.s32.totalorder %s33_s24, 0  ;;  %p44_p13 = scmp.eq.s32.totalorder %s9713_s20, 0 }
  0x2d   : > { %p8579_p2 = scmp.lt.s32.totalorder %s9713_s20, 2  ;;  %s337_s29 = sand.u32 1, %s9709_s19  }
  0x2e   : > { %s9860_s28 = scalar_select %p34_p1, %s9709_s19, %s36_s26  }
  0x2f   : > { %p45_p0 = por %p44_p13, %p43_p8  ;;  %s8554_s30 = smul.u32 12288, %s9713_s20 }
  0x30   : > { %s8553_s11 = smul.u32 768, %s337_s29  ;;  %s9876_s16 = scalar_lea.sflag [#allocation5], %s337_s29 }
  0x31   : > { %s9868_s13 = scalar_lea.hbm %s14194_s0, %s8554_s30  ;;  %p9870_p7 = pnand %p8579_p2, %p45_p0 }
  0x32   : > { %s341_s14 = scalar_lea.vmem [#allocation4], %s8553_s11  ;;  %s9647_s17 = scalar_lea.hbm %s9868_s13, 12288 }
  0x33   : > { %s349_s15 = sshll.u32 %s341_s14, 4  ;;  %p9648_p3 = scmp.ne.s32.totalorder %s9868_s13, %s9647_s17  ;;  %s9874_s15 = int_to_ptr.vmem [resolvable:$true] %s349_s15 }
  0x34   : > { %p9649_p6 = pneg %p9870_p7  ;;  %s9652_s30 = scalar_lea.hbm %s14194_s0, 24576 }
  0x35   : > { %p9653_p12 = scmp.lt.s32.totalorder %s9868_s13, %s14194_s0  ;;  %p9654_p11 = scmp.lt.s32.totalorder %s9652_s30, %s9647_s17 }
  0x36   : > { %p9650_p9 = pnand %p9649_p6, %p9648_p3 }
  0x37   : > { %p9655_p1 = por %p9654_p11, %p9653_p12 }
  0x38   : > { %p9651_p10 = pneg %p9650_p9 }
  0x3a   : > { %p9656_p8 = pnand %p9655_p1, %p9651_p10 }
  0x3c   : > { %9659 = shalt.err (!%p9656_p8)
}
  0x3d   : > { %s9660_s29 = scalar_lea.vmem %s9874_s15, 12288  ;;  %s9721_s11 = smov [#allocation4]  }
  0x3e   : > { %p9661_p13 = scmp.ne.s32.totalorder %s9874_s15, %s9660_s29  ;;  %s9665_s14 = sshll.u32 %s9721_s11, 4  ;;  %s9666_s14 = int_to_ptr.vmem [resolvable:$false] %s9665_s14 }
  0x3f   : > { %s9667_s24 = scalar_lea.vmem %s9666_s14, 24576  ;;  %p9668_p3 = scmp.lt.s32.totalorder %s9874_s15, %s9666_s14 }
  0x40   : > { %p9663_p0 = pnand %p9661_p13, %p9649_p6  ;;  %p9669_p9 = scmp.lt.s32.totalorder %s9667_s24, %s9660_s29 }
  0x42   : > { %p9664_p2 = pneg %p9663_p0  ;;  %p9670_p4 = por %p9669_p9, %p9668_p3 }
  0x44   : > { %p9671_p5 = pnand %p9670_p4, %p9664_p2 }
  0x46   : > { %9674 = shalt.err (!%p9671_p5)
}
  0x47   : > { %s9722_s17 = smov 384   ;;  %s9723_s26 = smov 24  }
  0x48   : > { %8576 = dma.hbm_to_vmem [thread:$0]  (!%p9870_p7), %s9868_s13, 12288, %s9874_s15, %s9876_s16, %s9722_s17, %s9722_s17, %s9723_s26  }
  0x49   : > { %p14427_p6 = scmp.ne.s32.totalorder %s14424_s22, 0 }
  0x4b   : > { %361 = sbr.rel (%p14427_p6) target bundleno = 2251 (0x8cb), region = 56 }
  0x50   : > { %s363_s30 = sand.u32 1, %s9705_s18   ;;  %p14428_p4 = scmp.ne.s32.totalorder %s14423_s21, 0 }
  0x51   : > { %s8555_s25 = smul.u32 768, %s363_s30  ;;  %s364_s12 = scalar_lea.sflag [#allocation5], %s363_s30 }
  0x53   : > { %s9900_s29 = scalar_lea.vmem [#allocation4], %s8555_s25 }
  0x54   : > { %9692 = dma.done.wait (%p14428_p4), %s364_s12, 12288  }
  0x55   : > { %9694 = vsyncadd (%p14428_p4), %s364_s12, 4294955008  ;;  %p14429_p5 = scmp.ne.s32.totalorder %s14422_s8, 0 }
  0x57   : > { %9696 = dma.done.wait (%p14429_p5), [#allocation7], 30720  }
  0x58   : > { %9698 = vsyncadd (%p14429_p5), [#allocation7], 4294936576  ;;  %v8625_v2 = vld [vmem:[#allocation6 + $0xac] ss:$12 sps:$4 sm:$0xff]   ;;  %v8629_v4 = vld [vmem:[#allocation6 + $0xa8] ss:$12 sps:$4 sm:$0xff]  }
  0x59   : > { %v8627_v3 = vld [vmem:[#allocation6 + $0x22c] ss:$12 sps:$4 sm:$0xff]   ;;  %1984 = vmatprep.subr.bf16.mxu0 %v8625_v2  ;;  %v8630_v5 = vld [vmem:[#allocation6 + $0x228] ss:$12 sps:$4 sm:$0xff]   ;;  %v8635_v8 = vld [vmem:[#allocation6 + $0x90] ss:$12 sps:$4 sm:$0xff]  }
  0x5a   : > { %2177 = vmatprep.subr.bf16.mxu1 %v8627_v3  ;;  %v8631_v6 = vld [vmem:[#allocation6 + $0x94] ss:$12 sps:$4 sm:$0xff]   ;;  %1985 = vmatpush1.bf16.msra.mxu0 %v8629_v4  ;;  %v8636_v9 = vld [vmem:[#allocation6 + $0x210] ss:$12 sps:$4 sm:$0xff]   ;;  %v8641_v12 = vld [vmem:[#allocation6 + $0x78] ss:$12 sps:$4 sm:$0xff]  }
  0x5b   : > { %2178 = vmatpush1.bf16.msra.mxu1 %v8630_v5  ;;  %v8633_v7 = vld [vmem:[#allocation6 + $0x214] ss:$12 sps:$4 sm:$0xff]   ;;  %1986 = vmatprep.subr.bf16.mxu0 %v8631_v6  ;;  %v8637_v10 = vld [vmem:[#allocation6 + $0x7c] ss:$12 sps:$4 sm:$0xff]   ;;  %v8642_v13 = vld [vmem:[#allocation6 + $0x1f8] ss:$12 sps:$4 sm:$0xff]  }
  0x5c   : > { %2179 = vmatprep.subr.bf16.mxu1 %v8633_v7  ;;  %v8639_v11 = vld [vmem:[#allocation6 + $0x1fc] ss:$12 sps:$4 sm:$0xff]   ;;  %v8643_v14 = vld [vmem:[#allocation6 + $0x64] ss:$12 sps:$4 sm:$0xff]   ;;  %v8647_v16 = vld [vmem:[#allocation6 + $0x60] ss:$12 sps:$4 sm:$0xff]  }
  0x5d   : > { %v8645_v15 = vld [vmem:[#allocation6 + $0x1e4] ss:$12 sps:$4 sm:$0xff]   ;;  %v8648_v17 = vld [vmem:[#allocation6 + $0x1e0] ss:$12 sps:$4 sm:$0xff]   ;;  %v8653_v20 = vld [vmem:[#allocation6 + $0x48] ss:$12 sps:$4 sm:$0xff]  }
  0x5e   : > { %1987 = vmatpush1.bf16.msra.mxu0 %v8635_v8  ;;  %v8649_v18 = vld [vmem:[#allocation6 + $0x4c] ss:$12 sps:$4 sm:$0xff]   ;;  %v8654_v21 = vld [vmem:[#allocation6 + $0x1c8] ss:$12 sps:$4 sm:$0xff]   ;;  %v8659_v24 = vld [vmem:[#allocation6 + $0x30] ss:$12 sps:$4 sm:$0xff]  }
  0x5f   : > { %2180 = vmatpush1.bf16.msra.mxu1 %v8636_v9  ;;  %1988 = vmatprep.subr.bf16.mxu0 %v8637_v10  ;;  %v8651_v19 = vld [vmem:[#allocation6 + $0x1cc] ss:$12 sps:$4 sm:$0xff]   ;;  %v8655_v22 = vld [vmem:[#allocation6 + $0x34] ss:$12 sps:$4 sm:$0xff]   ;;  %v8660_v25 = vld [vmem:[#allocation6 + $0x1b0] ss:$12 sps:$4 sm:$0xff]  }
  0x60   : > { %2181 = vmatprep.subr.bf16.mxu1 %v8639_v11  ;;  %v8657_v23 = vld [vmem:[#allocation6 + $0x1b4] ss:$12 sps:$4 sm:$0xff]   ;;  %v8661_v26 = vld [vmem:[#allocation6 + $0x1c] ss:$12 sps:$4 sm:$0xff]   ;;  %v8665_v28 = vld [vmem:[#allocation6 + $0x18] ss:$12 sps:$4 sm:$0xff]  }
  0x61   : > { %v8663_v27 = vld [vmem:[#allocation6 + $0x19c] ss:$12 sps:$4 sm:$0xff]   ;;  %v8666_v29 = vld [vmem:[#allocation6 + $0x198] ss:$12 sps:$4 sm:$0xff]   ;;  %v8671_v32 = vld [vmem:[#allocation6] ss:$12 sps:$4 sm:$0xff]  }
  0x62   : > { %1989 = vmatpush1.bf16.msra.mxu0 %v8641_v12  ;;  %v8667_v30 = vld [vmem:[#allocation6 + $0x4] ss:$12 sps:$4 sm:$0xff]   ;;  %v8672_v33 = vld [vmem:[#allocation6 + $0x180] ss:$12 sps:$4 sm:$0xff]   ;;  %v8677_v36 = vld [vmem:[#allocation6 + $0x168] ss:$12 sps:$4 sm:$0xff]  }
  0x63   : > { %2182 = vmatpush1.bf16.msra.mxu1 %v8642_v13  ;;  %1990 = vmatprep.subr.bf16.mxu0 %v8643_v14  ;;  %v8669_v31 = vld [vmem:[#allocation6 + $0x184] ss:$12 sps:$4 sm:$0xff]   ;;  %v8673_v34 = vld [vmem:[#allocation6 + $0x16c] ss:$12 sps:$4 sm:$0xff]   ;;  %v8678_v37 = vld [vmem:[#allocation6 + $0x2e8] ss:$12 sps:$4 sm:$0xff]  }
  0x64   : > { %2183 = vmatprep.subr.bf16.mxu1 %v8645_v15  ;;  %v8675_v35 = vld [vmem:[#allocation6 + $0x2ec] ss:$12 sps:$4 sm:$0xff]   ;;  %v8679_v38 = vld [vmem:[#allocation6 + $0x154] ss:$12 sps:$4 sm:$0xff]   ;;  %v8683_v40 = vld [vmem:[#allocation6 + $0x150] ss:$12 sps:$4 sm:$0xff]  }
  0x65   : > { %v8681_v39 = vld [vmem:[#allocation6 + $0x2d4] ss:$12 sps:$4 sm:$0xff]   ;;  %v8684_v41 = vld [vmem:[#allocation6 + $0x2d0] ss:$12 sps:$4 sm:$0xff]   ;;  %v8689_v44 = vld [vmem:[#allocation6 + $0x138] ss:$12 sps:$4 sm:$0xff]  }
  0x66   : > { %1991 = vmatpush1.bf16.msra.mxu0 %v8647_v16  ;;  %v8685_v42 = vld [vmem:[#allocation6 + $0x13c] ss:$12 sps:$4 sm:$0xff]   ;;  %v8690_v45 = vld [vmem:[#allocation6 + $0x2b8] ss:$12 sps:$4 sm:$0xff]   ;;  %v8695_v48 = vld [vmem:[#allocation6 + $0x120] ss:$12 sps:$4 sm:$0xff]  }
  0x67   : > { %2184 = vmatpush1.bf16.msra.mxu1 %v8648_v17  ;;  %1992 = vmatprep.subr.bf16.mxu0 %v8649_v18  ;;  %v8687_v43 = vld [vmem:[#allocation6 + $0x2bc] ss:$12 sps:$4 sm:$0xff]   ;;  %v8691_v46 = vld [vmem:[#allocation6 + $0x124] ss:$12 sps:$4 sm:$0xff]   ;;  %v8696_v49 = vld [vmem:[#allocation6 + $0x2a0] ss:$12 sps:$4 sm:$0xff]  }
  0x68   : > { %2185 = vmatprep.subr.bf16.mxu1 %v8651_v19  ;;  %v8693_v47 = vld [vmem:[#allocation6 + $0x2a4] ss:$12 sps:$4 sm:$0xff]   ;;  %v8697_v50 = vld [vmem:[#allocation6 + $0x10c] ss:$12 sps:$4 sm:$0xff]   ;;  %v8701_v54 = vld [vmem:[#allocation6 + $0x108] ss:$12 sps:$4 sm:$0xff]  }
  0x69   : > { %v8723_v51 = vld [vmem:[%s9900_s29 + $0x4] ss:$24 sps:$4 sm:$0xff]   ;;  %v8699_v52 = vld [vmem:[#allocation6 + $0x28c] ss:$12 sps:$4 sm:$0xff]   ;;  %v8702_v55 = vld [vmem:[#allocation6 + $0x288] ss:$12 sps:$4 sm:$0xff]  }
  0x6a   : > { %1993 = vmatpush1.bf16.msra.mxu0 %v8653_v20  ;;  %v8726_v53 = vld [vmem:[%s9900_s29 + $0xc] ss:$24 sps:$4 sm:$0xff]   ;;  %2016 = vmatprep.mubr.bf16.mxu0 %v8723_v51  ;;  %v8703_v56 = vld [vmem:[#allocation6 + $0xf4] ss:$12 sps:$4 sm:$0xff]   ;;  %v8707_v58 = vld [vmem:[#allocation6 + $0xf0] ss:$12 sps:$4 sm:$0xff]  }
  0x6b   : > { %2186 = vmatpush1.bf16.msra.mxu1 %v8654_v21  ;;  %1994 = vmatprep.subr.bf16.mxu0 %v8655_v22  ;;  %v8705_v57 = vld [vmem:[#allocation6 + $0x274] ss:$12 sps:$4 sm:$0xff]   ;;  %v8708_v59 = vld [vmem:[#allocation6 + $0x270] ss:$12 sps:$4 sm:$0xff]   ;;  %v8713_v62 = vld [vmem:[#allocation6 + $0xd8] ss:$12 sps:$4 sm:$0xff]  }
  0x6c   : > { %2187 = vmatprep.subr.bf16.mxu1 %v8657_v23  ;;  %2209 = vmatprep.mubr.bf16.mxu1 %v8726_v53  ;;  %v8709_v60 = vld [vmem:[#allocation6 + $0xdc] ss:$12 sps:$4 sm:$0xff]   ;;  %v8714_v63 = vld [vmem:[#allocation6 + $0x258] ss:$12 sps:$4 sm:$0xff]   ;;  %v8719_v2 = vld [vmem:[#allocation6 + $0xc0] ss:$12 sps:$4 sm:$0xff]  }
  0x6d   : > { %v8711_v61 = vld [vmem:[#allocation6 + $0x25c] ss:$12 sps:$4 sm:$0xff]   ;;  %v8715_v0 = vld [vmem:[#allocation6 + $0xc4] ss:$12 sps:$4 sm:$0xff]   ;;  %v8720_v3 = vld [vmem:[#allocation6 + $0x240] ss:$12 sps:$4 sm:$0xff]  }
  0x6e   : > { %1995 = vmatpush1.bf16.msra.mxu0 %v8659_v24  ;;  %v8717_v1 = vld [vmem:[#allocation6 + $0x244] ss:$12 sps:$4 sm:$0xff]   ;;  %v8729_v4 = vld [vmem:[#allocation6 + $0x3ac] ss:$12 sps:$4 sm:$0xff]   ;;  %v8724_v7 = vld [vmem:[%s9900_s29 + $0x8] ss:$24 sps:$4 sm:$0xff]  }
  0x6f   : > { %2188 = vmatpush1.bf16.msra.mxu1 %v8660_v25  ;;  %1996 = vmatprep.subr.bf16.mxu0 %v8661_v26  ;;  %v8730_v5 = vld [vmem:[#allocation6 + $0x170] ss:$12 sps:$4 sm:$0xff]   ;;  %v9913_v6 = vld [vmem:[%s9900_s29] ss:$24 sps:$4 sm:$0xff]   ;;  %v8727_v8 = vld [vmem:[#allocation6 + $0x3a8] ss:$12 sps:$4 sm:$0xff]  }
  0x70   : > { %2189 = vmatprep.subr.bf16.mxu1 %v8663_v27  ;;  %v8731_v9 = vld [vmem:[#allocation6 + $0xb0] ss:$12 sps:$4 sm:$0xff]   ;;  %v9917_v10 = vld [vmem:[%s9900_s29 + $0x34] ss:$24 sps:$4 sm:$0xff]   ;;  %v8750_v14 = vld [vmem:[#allocation6 + $0x158] ss:$12 sps:$4 sm:$0xff]  }
  0x71   : > { %v8734_v11 = vld [vmem:[%s9900_s29 + $0x3c] ss:$24 sps:$4 sm:$0xff]   ;;  %v8751_v16 = vld [vmem:[#allocation6 + $0x98] ss:$12 sps:$4 sm:$0xff]   ;;  %v8770_v17 = vld [vmem:[#allocation6 + $0x140] ss:$12 sps:$4 sm:$0xff]  }
  0x72   : > { %1997 = vmatpush1.bf16.msra.mxu0 %v8665_v28  ;;  %v8738_v12 = vld [vmem:[#allocation6 + $0x390] ss:$12 sps:$4 sm:$0xff]   ;;  %v8740_v13 = vld [vmem:[#allocation6 + $0x394] ss:$12 sps:$4 sm:$0xff]   ;;  %v8743_v21 = vld [vmem:[%s9900_s29 + $0x6c] ss:$24 sps:$4 sm:$0xff]  }
  0x73   : > { %2190 = vmatpush1.bf16.msra.mxu1 %v8666_v29  ;;  %1998 = vmatprep.subr.bf16.mxu0 %v8667_v30  ;;  %v8749_v15 = vld [vmem:[#allocation6 + $0x37c] ss:$12 sps:$4 sm:$0xff]   ;;  %v8737_v19 = vld [vmem:[%s9900_s29 + $0x38] ss:$24 sps:$4 sm:$0xff]   ;;  %v8771_v23 = vld [vmem:[#allocation6 + $0x80] ss:$12 sps:$4 sm:$0xff]  }
  0x74   : > { %2191 = vmatprep.subr.bf16.mxu1 %v8669_v31  ;;  %v9923_v18 = vld [vmem:[%s9900_s29 + $0x30] ss:$24 sps:$4 sm:$0xff]   ;;  %v9927_v20 = vld [vmem:[%s9900_s29 + $0x64] ss:$24 sps:$4 sm:$0xff]   ;;  %v8758_v25 = vld [vmem:[#allocation6 + $0x360] ss:$12 sps:$4 sm:$0xff]  }
  0x75   : > { %v8747_v22 = vld [vmem:[#allocation6 + $0x378] ss:$12 sps:$4 sm:$0xff]   ;;  %v8790_v28 = vld [vmem:[#allocation6 + $0x128] ss:$12 sps:$4 sm:$0xff]   ;;  %vm5448_vm0 = vcmask 1041409   ;;  %vm5450_vm1 = vcmask 1042434  }
  0x76   : > { %1999 = vmatpush1.bf16.msra.mxu0 %v8671_v32  ;;  %v8760_v24 = vld [vmem:[#allocation6 + $0x364] ss:$12 sps:$4 sm:$0xff]   ;;  %v8769_v26 = vld [vmem:[#allocation6 + $0x34c] ss:$12 sps:$4 sm:$0xff]   ;;  %v8791_v29 = vld [vmem:[#allocation6 + $0x68] ss:$12 sps:$4 sm:$0xff]  }
  0x77   : > { %2192 = vmatpush1.bf16.msra.mxu1 %v8672_v33  ;;  %2000 = vmatprep.subr.bf16.mxu0 %v8673_v34  ;;  %v9933_v27 = vld [vmem:[%s9900_s29 + $0x60] ss:$24 sps:$4 sm:$0xff]   ;;  %v9937_v31 = vld [vmem:[%s9900_s29 + $0x94] ss:$24 sps:$4 sm:$0xff]   ;;  %vm5452_vm2 = vcmask 1043459   ;;  %vm5454_vm3 = vcmask 1044484  }
  0x78   : > { %2193 = vmatprep.subr.bf16.mxu1 %v8675_v35  ;;  %v8746_v30 = vld [vmem:[%s9900_s29 + $0x68] ss:$24 sps:$4 sm:$0xff]   ;;  %v8754_v32 = vld [vmem:[%s9900_s29 + $0x9c] ss:$24 sps:$4 sm:$0xff]   ;;  %v8830_v53 = vld [vmem:[#allocation6 + $0xf8] ss:$12 sps:$4 sm:$0xff]  }
  0x79   : > { %v8767_v33 = vld [vmem:[#allocation6 + $0x348] ss:$12 sps:$4 sm:$0xff]   ;;  %vm5456_vm4 = vcmask 1045509   ;;  %vm5458_vm5 = vcmask 1046534   ;;  %vm5460_vm6 = vcmask 1047559   ;;  %vm5487_vm7 = vcmask 64512  }
  0x7a   : > { %2001 = vmatpush2.bf16.msra.mxu0 %v8677_v36  ;;  %v8780_v34 = vld [vmem:[#allocation6 + $0x334] ss:$12 sps:$4 sm:$0xff]   ;;  %v9943_v35 = vld [vmem:[%s9900_s29 + $0x90] ss:$24 sps:$4 sm:$0xff]   ;;  %s7809_s17 = sshll.u32 %s7797_s6, 2  ;;  %vm7508_vm8 = vcmask 7168  }
  0x7b   : > { %2194 = vmatpush2.bf16.msra.mxu1 %v8678_v37  ;;  %2002 = vmatprep.subr.bf16.mxu0 %v8679_v38  ;;  %v8757_v36 = vld [vmem:[%s9900_s29 + $0x98] ss:$24 sps:$4 sm:$0xff]   ;;  %v9947_v38 = vld [vmem:[%s9900_s29 + $0xc4] ss:$24 sps:$4 sm:$0xff]   ;;  %v8807_v51 = vld [vmem:[#allocation6 + $0x468] ss:$12 sps:$4 sm:$0xff]  }
  0x7c   : > { %2195 = vmatprep.subr.bf16.mxu1 %v8681_v39  ;;  %v8778_v37 = vld [vmem:[#allocation6 + $0x330] ss:$12 sps:$4 sm:$0xff]   ;;  %v8763_v39 = vld [vmem:[%s9900_s29 + $0xcc] ss:$24 sps:$4 sm:$0xff]   ;;  %p419_p7 = scmp.lt.s32.totalorder %s7809_s17, 7 }
  0x7e   : > { %2003 = vmatpush2.bf16.msra.mxu0 %v8683_v40  ;;  %v8789_v40 = vld [vmem:[#allocation6 + $0x31c] ss:$12 sps:$4 sm:$0xff]   ;;  %s15192_s17 = smov (!%p419_p7, %s7809_s17), 7 }
  0x7f   : > { %2196 = vmatpush2.bf16.msra.mxu1 %v8684_v41  ;;  %2004 = vmatprep.subr.bf16.mxu0 %v8685_v42  ;;  %v8810_v41 = vld [vmem:[#allocation6 + $0x110] ss:$12 sps:$4 sm:$0xff]   ;;  %s7810_s20 = sshll.u32 %s15192_s17, 3 }
  0x80   : > { %2197 = vmatprep.subr.bf16.mxu1 %v8687_v43  ;;  %v8811_v42 = vld [vmem:[#allocation6 + $0x50] ss:$12 sps:$4 sm:$0xff]   ;;  %v8787_v43 = vld [vmem:[#allocation6 + $0x318] ss:$12 sps:$4 sm:$0xff]   ;;  %s13461_s30 = scalar_lea.vmem %s14203_s10, %s7810_s20 }
  0x82   : > { %2005 = vmatpush2.bf16.msra.mxu0 %v8689_v44  ;;  %v8800_v44 = vld [vmem:[#allocation6 + $0x304] ss:$12 sps:$4 sm:$0xff]  }
  0x83   : > { %2198 = vmatpush2.bf16.msra.mxu1 %v8690_v45  ;;  %2006 = vmatprep.subr.bf16.mxu0 %v8691_v46  ;;  %v9953_v45 = vld [vmem:[%s9900_s29 + $0xc0] ss:$24 sps:$4 sm:$0xff]  }
  0x84   : > { %2199 = vmatprep.subr.bf16.mxu1 %v8693_v47  ;;  %v8766_v46 = vld [vmem:[%s9900_s29 + $0xc8] ss:$24 sps:$4 sm:$0xff]  }
  0x85   : > { %v8798_v47 = vld [vmem:[#allocation6 + $0x300] ss:$12 sps:$4 sm:$0xff]  }
  0x86   : > { %2007 = vmatpush2.bf16.msra.mxu0 %v8695_v48  ;;  %v9957_v48 = vld [vmem:[%s9900_s29 + $0xf4] ss:$24 sps:$4 sm:$0xff]  }
  0x87   : > { %2200 = vmatpush2.bf16.msra.mxu1 %v8696_v49  ;;  %2008 = vmatprep.subr.bf16.mxu0 %v8697_v50  ;;  %v8809_v49 = vld [vmem:[#allocation6 + $0x46c] ss:$12 sps:$4 sm:$0xff]   ;;  %v8774_v50 = vld [vmem:[%s9900_s29 + $0xfc] ss:$24 sps:$4 sm:$0xff]  }
  0x88   : > { %2201 = vmatprep.subr.bf16.mxu1 %v8699_v52  ;;  %v8820_v52 = vld [vmem:[#allocation6 + $0x454] ss:$12 sps:$4 sm:$0xff]  }
  0x8a   : > { %2009 = vmatpush2.bf16.msra.mxu0 %v8701_v54  ;;  %v8831_v54 = vld [vmem:[#allocation6 + $0x38] ss:$12 sps:$4 sm:$0xff]  }
  0x8b   : > { %2202 = vmatpush2.bf16.msra.mxu1 %v8702_v55  ;;  %2010 = vmatprep.subr.bf16.mxu0 %v8703_v56  ;;  %v8818_v55 = vld [vmem:[#allocation6 + $0x450] ss:$12 sps:$4 sm:$0xff]  }
  0x8c   : > { %2203 = vmatprep.subr.bf16.mxu1 %v8705_v57  ;;  %v9963_v56 = vld [vmem:[%s9900_s29 + $0xf0] ss:$24 sps:$4 sm:$0xff]  }
  0x8d   : > { %v8829_v57 = vld [vmem:[#allocation6 + $0x43c] ss:$12 sps:$4 sm:$0xff]  }
  0x8e   : > { %2011 = vmatpush2.bf16.msra.mxu0 %v8707_v58  ;;  %v8777_v58 = vld [vmem:[%s9900_s29 + $0xf8] ss:$24 sps:$4 sm:$0xff]  }
  0x8f   : > { %2204 = vmatpush2.bf16.msra.mxu1 %v8708_v59  ;;  %2012 = vmatprep.subr.bf16.mxu0 %v8709_v60  ;;  %v9967_v59 = vld [vmem:[%s9900_s29 + $0x124] ss:$24 sps:$4 sm:$0xff]  }
  0x90   : > { %2205 = vmatprep.subr.bf16.mxu1 %v8711_v61  ;;  %v8783_v60 = vld [vmem:[%s9900_s29 + $0x12c] ss:$24 sps:$4 sm:$0xff]  }
  0x91   : > { %v8827_v61 = vld [vmem:[#allocation6 + $0x438] ss:$12 sps:$4 sm:$0xff]  }
  0x92   : > { %2013 = vmatpush2.bf16.msra.mxu0 %v8713_v62  ;;  %v8840_v62 = vld [vmem:[#allocation6 + $0x424] ss:$12 sps:$4 sm:$0xff]  }
  0x93   : > { %2206 = vmatpush2.bf16.msra.mxu1 %v8714_v63  ;;  %2014 = vmatprep.subr.bf16.mxu0 %v8715_v0  ;;  %v8850_v63 = vld [vmem:[#allocation6 + $0xe0] ss:$12 sps:$4 sm:$0xff]  }
  0x94   : > { %2207 = vmatprep.subr.bf16.mxu1 %v8717_v1  ;;  %v8851_v0 = vld [vmem:[#allocation6 + $0x20] ss:$12 sps:$4 sm:$0xff]  }
  0x95   : > { %v8838_v1 = vld [vmem:[#allocation6 + $0x420] ss:$12 sps:$4 sm:$0xff]  }
  0x96   : > { %2015 = vmatpush2.bf16.msra.mxu0 %v8719_v2  ;;  %v9973_v2 = vld [vmem:[%s9900_s29 + $0x120] ss:$24 sps:$4 sm:$0xff]  }
  0x97   : > { %2208 = vmatpush2.bf16.msra.mxu1 %v8720_v3  ;;  %2370 = vmatprep.subr.bf16.mxu0 %v8729_v4  ;;  %v8849_v3 = vld [vmem:[#allocation6 + $0x40c] ss:$12 sps:$4 sm:$0xff]   ;;  %v8786_v4 = vld [vmem:[%s9900_s29 + $0x128] ss:$24 sps:$4 sm:$0xff]  }
  0x98   : > { %8217 = vmatprep.subr.bf16.mxu1 %v8730_v5  ;;  %v9977_v5 = vld [vmem:[%s9900_s29 + $0x154] ss:$24 sps:$4 sm:$0xff]  }
  0x99   : > { %2017 = vmatmul.mubr.bf16.vlgmr.msra.gmra.mxu0 %v9913_v6 }
  0x9a   : > { %2210 = vmatmul.mubr.bf16.vlgmr.msra.gmra.mxu1 %v8724_v7  ;;  %2371 = vmatpush1.bf16.msra.mxu0 %v8727_v8  ;;  %v8794_v7 = vld [vmem:[%s9900_s29 + $0x15c] ss:$24 sps:$4 sm:$0xff]  }
  0x9b   : > { %8218 = vmatpush3.bf16.msra.mxu1 %v8731_v9  ;;  %2026 = vmatprep.mubr.bf16.mxu0 %v9917_v10  ;;  %v8847_v8 = vld [vmem:[#allocation6 + $0x408] ss:$12 sps:$4 sm:$0xff]  }
  0x9c   : > { %2219 = vmatprep.mubr.bf16.mxu1 %v8734_v11  ;;  %2372 = vmatprep.subr.bf16.mxu0 %v8740_v13  ;;  %v8860_v9 = vld [vmem:[#allocation6 + $0x3f4] ss:$12 sps:$4 sm:$0xff]   ;;  %v8858_v11 = vld [vmem:[#allocation6 + $0x3f0] ss:$12 sps:$4 sm:$0xff]  }
  0x9d   : > { %8219 = vmatprep.subr.bf16.mxu1 %v8750_v14  ;;  %v9983_v13 = vld [vmem:[%s9900_s29 + $0x150] ss:$24 sps:$4 sm:$0xff]  }
  0x9e   : > { %2373 = vmatpush1.bf16.msra.mxu0 %v8738_v12  ;;  %v8869_v12 = vld [vmem:[#allocation6 + $0x3dc] ss:$12 sps:$4 sm:$0xff]  }
  0x9f   : > { %8220 = vmatpush3.bf16.msra.mxu1 %v8751_v16  ;;  %2374 = vmatprep.subr.bf16.mxu0 %v8749_v15  ;;  %v8870_v14 = vld [vmem:[#allocation6 + $0xc8] ss:$12 sps:$4 sm:$0xff]   ;;  %v8797_v16 = vld [vmem:[%s9900_s29 + $0x158] ss:$24 sps:$4 sm:$0xff]  }
  0xa0   : > { %8221 = vmatprep.subr.bf16.mxu1 %v8770_v17  ;;  %v8871_v15 = vld [vmem:[#allocation6 + $0x8] ss:$12 sps:$4 sm:$0xff]   ;;  %v9987_v17 = vld [vmem:[%s9900_s29 + $0x184] ss:$24 sps:$4 sm:$0xff]  }
  0xa1   : > { %2027 = vmatmul.mubr.bf16.gmra.mxu0 %v9923_v18 }
  0xa2   : > { %2220 = vmatmul.mubr.bf16.gmra.mxu1 %v8737_v19  ;;  %2036 = vmatprep.mubr.bf16.mxu0 %v9927_v20  ;;  %v8803_v19 = vld [vmem:[%s9900_s29 + $0x18c] ss:$24 sps:$4 sm:$0xff]  }
  0xa3   : > { %2229 = vmatprep.mubr.bf16.mxu1 %v8743_v21  ;;  %2375 = vmatpush1.bf16.msra.mxu0 %v8747_v22  ;;  %v8867_v21 = vld [vmem:[#allocation6 + $0x3d8] ss:$12 sps:$4 sm:$0xff]  }
  0xa4   : > { %8222 = vmatpush3.bf16.msra.mxu1 %v8771_v23  ;;  %2376 = vmatprep.subr.bf16.mxu0 %v8760_v24  ;;  %v8880_v22 = vld [vmem:[#allocation6 + $0x3c4] ss:$12 sps:$4 sm:$0xff]   ;;  %v8878_v23 = vld [vmem:[#allocation6 + $0x3c0] ss:$12 sps:$4 sm:$0xff]  }
  0xa5   : > { %8223 = vmatprep.subr.bf16.mxu1 %v8790_v28  ;;  %v9993_v24 = vld [vmem:[%s9900_s29 + $0x180] ss:$24 sps:$4 sm:$0xff]   ;;  %v8886_v28 = vld [vmem:[#allocation6 + $0x470] ss:$12 sps:$4 sm:$0xff]  }
  0xa7   : > { %2377 = vmatpush1.bf16.msra.mxu0 %v8758_v25  ;;  %v8806_v25 = vld [vmem:[%s9900_s29 + $0x188] ss:$24 sps:$4 sm:$0xff]  }
  0xa8   : > { %8224 = vmatpush3.bf16.msra.mxu1 %v8791_v29  ;;  %2378 = vmatprep.subr.bf16.mxu0 %v8769_v26  ;;  %v8884_v26 = vld [vmem:[#allocation6 + $0x2f0] ss:$12 sps:$4 sm:$0xff]   ;;  %v9997_v29 = vld [vmem:[%s9900_s29 + $0x1b4] ss:$24 sps:$4 sm:$0xff]  }
  0xa9   : > { %2037 = vmatmul.mubr.bf16.gmra.mxu0 %v9933_v27  ;;  %8225 = vmatprep.subr.bf16.mxu1 %v8810_v41  ;;  %v8834_v41 = vld [vmem:[%s9900_s29 + $0x21c] ss:$24 sps:$4 sm:$0xff]  }
  0xaa   : > { %2230 = vmatmul.mubr.bf16.gmra.mxu1 %v8746_v30  ;;  %2046 = vmatprep.mubr.bf16.mxu0 %v9937_v31  ;;  %v8814_v30 = vld [vmem:[%s9900_s29 + $0x1bc] ss:$24 sps:$4 sm:$0xff]  }
  0xab   : > { %2239 = vmatprep.mubr.bf16.mxu1 %v8754_v32  ;;  %2379 = vmatpush1.bf16.msra.mxu0 %v8767_v33  ;;  %v10003_v32 = vld [vmem:[%s9900_s29 + $0x1b0] ss:$24 sps:$4 sm:$0xff]  }
  0xac   : > { %2380 = vmatprep.subr.bf16.mxu0 %v8780_v34  ;;  %8226 = vmatpush3.bf16.msra.mxu1 %v8811_v42  ;;  %v8817_v33 = vld [vmem:[%s9900_s29 + $0x1b8] ss:$24 sps:$4 sm:$0xff]   ;;  %v10007_v34 = vld [vmem:[%s9900_s29 + $0x1e4] ss:$24 sps:$4 sm:$0xff]  }
  0xad   : > { %8227 = vmatprep.subr.bf16.mxu1 %v8830_v53  ;;  %v10023_v42 = vld [vmem:[%s9900_s29 + $0x210] ss:$24 sps:$4 sm:$0xff]  }
  0xae   : > { %v8857_v53 = vld [vmem:[%s9900_s29 + $0x278] ss:$24 sps:$4 sm:$0xff]  }
  0xaf   : > { %2381 = vmatpush1.bf16.msra.mxu0 %v8778_v37  ;;  %v10013_v37 = vld [vmem:[%s9900_s29 + $0x1e0] ss:$24 sps:$4 sm:$0xff]  }
  0xb0   : > { %2382 = vmatprep.subr.bf16.mxu0 %v8789_v40  ;;  %8228 = vmatpush3.bf16.msra.mxu1 %v8831_v54  ;;  %v10017_v40 = vld [vmem:[%s9900_s29 + $0x214] ss:$24 sps:$4 sm:$0xff]   ;;  %v10047_v54 = vld [vmem:[%s9900_s29 + $0x2a4] ss:$24 sps:$4 sm:$0xff]  }
  0xb1   : > { %2047 = vmatmul.mubr.bf16.gmra.mxu0 %v9943_v35  ;;  %8229 = vmatprep.subr.bf16.mxu1 %v8850_v63  ;;  %v8877_v63 = vld [vmem:[%s9900_s29 + $0x2d8] ss:$24 sps:$4 sm:$0xff]  }
  0xb2   : > { %2240 = vmatmul.mubr.bf16.gmra.mxu1 %v8757_v36  ;;  %2056 = vmatprep.mubr.bf16.mxu0 %v9947_v38  ;;  %v8823_v36 = vld [vmem:[%s9900_s29 + $0x1ec] ss:$24 sps:$4 sm:$0xff]  }
  0xb3   : > { %2249 = vmatprep.mubr.bf16.mxu1 %v8763_v39  ;;  %2383 = vmatpush1.bf16.msra.mxu0 %v8787_v43  ;;  %v8826_v39 = vld [vmem:[%s9900_s29 + $0x1e8] ss:$24 sps:$4 sm:$0xff]   ;;  %v8837_v43 = vld [vmem:[%s9900_s29 + $0x218] ss:$24 sps:$4 sm:$0xff]  }
  0xb4   : > { %2384 = vmatprep.subr.bf16.mxu0 %v8800_v44  ;;  %8230 = vmatpush3.bf16.msra.mxu1 %v8851_v0  ;;  %v10027_v44 = vld [vmem:[%s9900_s29 + $0x244] ss:$24 sps:$4 sm:$0xff]   ;;  %v10067_v0 = vld [vmem:[%s9900_s29 + $0x14] ss:$24 sps:$4 sm:$0xff]  }
  0xb5   : > { %8231 = vmatprep.subr.bf16.mxu1 %v8870_v14  ;;  %v8897_v14 = vld [vmem:[#allocation6 + $0x398] ss:$12 sps:$4 sm:$0xff]  }
  0xb7   : > { %2385 = vmatpush1.bf16.msra.mxu0 %v8798_v47  ;;  %v10033_v47 = vld [vmem:[%s9900_s29 + $0x240] ss:$24 sps:$4 sm:$0xff]  }
  0xb8   : > { %2386 = vmatprep.subr.bf16.mxu0 %v8809_v49  ;;  %8232 = vmatpush3.bf16.msra.mxu1 %v8871_v15  ;;  %v8846_v49 = vld [vmem:[%s9900_s29 + $0x248] ss:$24 sps:$4 sm:$0xff]  }
  0xb9   : > { %2057 = vmatmul.mubr.bf16.gmra.mxu0 %v9953_v45  ;;  %8441 = vmatprep.subr.bf16.mxu1 %v8886_v28  ;;  %v8904_v15 = vld [vmem:[#allocation6 + $0x2c0] ss:$12 sps:$4 sm:$0xff]   ;;  %v8924_v28 = vld [vmem:[#allocation6 + $0x290] ss:$12 sps:$4 sm:$0xff]  }
  0xba   : > { %2250 = vmatmul.mubr.bf16.gmra.mxu1 %v8766_v46  ;;  %2066 = vmatprep.mubr.bf16.mxu0 %v9957_v48  ;;  %v8843_v46 = vld [vmem:[%s9900_s29 + $0x24c] ss:$24 sps:$4 sm:$0xff]  }
  0xbb   : > { %2259 = vmatprep.mubr.bf16.mxu1 %v8774_v50  ;;  %2387 = vmatpush2.bf16.msra.mxu0 %v8807_v51  ;;  %v10037_v50 = vld [vmem:[%s9900_s29 + $0x274] ss:$24 sps:$4 sm:$0xff]  }
  0xbc   : > { %2388 = vmatprep.subr.bf16.mxu0 %v8820_v52  ;;  %v8854_v51 = vld [vmem:[%s9900_s29 + $0x27c] ss:$24 sps:$4 sm:$0xff]   ;;  %v10043_v52 = vld [vmem:[%s9900_s29 + $0x270] ss:$24 sps:$4 sm:$0xff]  }
  0xbf   : > { %2389 = vmatpush2.bf16.msra.mxu0 %v8818_v55  ;;  %v8863_v55 = vld [vmem:[%s9900_s29 + $0x2ac] ss:$24 sps:$4 sm:$0xff]  }
  0xc0   : > { %2390 = vmatprep.subr.bf16.mxu0 %v8829_v57  ;;  %v10053_v57 = vld [vmem:[%s9900_s29 + $0x2a0] ss:$24 sps:$4 sm:$0xff]  }
  0xc1   : > { %2067 = vmatmul.mubr.bf16.gmra.mxu0 %v9963_v56 }
  0xc2   : > { %2260 = vmatmul.mubr.bf16.gmra.mxu1 %v8777_v58  ;;  %2076 = vmatprep.mubr.bf16.mxu0 %v9967_v59  ;;  %v8866_v58 = vld [vmem:[%s9900_s29 + $0x2a8] ss:$24 sps:$4 sm:$0xff]  }
  0xc3   : > { %2269 = vmatprep.mubr.bf16.mxu1 %v8783_v60  ;;  %2391 = vmatpush2.bf16.msra.mxu0 %v8827_v61  ;;  %v10057_v60 = vld [vmem:[%s9900_s29 + $0x2d4] ss:$24 sps:$4 sm:$0xff]  }
  0xc4   : > { %2392 = vmatprep.subr.bf16.mxu0 %v8840_v62  ;;  %v8874_v61 = vld [vmem:[%s9900_s29 + $0x2dc] ss:$24 sps:$4 sm:$0xff]   ;;  %v10063_v62 = vld [vmem:[%s9900_s29 + $0x2d0] ss:$24 sps:$4 sm:$0xff]  }
  0xc7   : > { %2393 = vmatpush2.bf16.msra.mxu0 %v8838_v1  ;;  %v9561_v1 = vld [vmem:[%s9900_s29 + $0x4] ss:$24 sps:$4 sm:$0xff]  }
  0xc8   : > { %2394 = vmatprep.subr.bf16.mxu0 %v8849_v3  ;;  %v10073_v3 = vld [vmem:[%s9900_s29 + $0x10] ss:$24 sps:$4 sm:$0xff]  }
  0xc9   : > { %2077 = vmatmul.mubr.bf16.gmra.mxu0 %v9973_v2 }
  0xca   : > { %2270 = vmatmul.mubr.bf16.gmra.mxu1 %v8786_v4  ;;  %2086 = vmatprep.mubr.bf16.mxu0 %v9977_v5  ;;  %v8885_v4 = vld [vmem:[#allocation6 + $0x230] ss:$12 sps:$4 sm:$0xff]  }
  0xcb   : > { %2279 = vmatprep.mubr.bf16.mxu1 %v8794_v7  ;;  %2395 = vmatpush2.bf16.msra.mxu0 %v8847_v8  ;;  %v8887_v7 = vld [vmem:[#allocation6 + $0x3b0] ss:$12 sps:$4 sm:$0xff]  }
  0xcc   : > { %2396 = vmatprep.subr.bf16.mxu0 %v8860_v9  ;;  %v10076_v8 = vld [vmem:[%s9900_s29 + $0x44] ss:$24 sps:$4 sm:$0xff]  }
  0xcd   : > { %v8894_v9 = vld [vmem:[#allocation6 + $0x2d8] ss:$12 sps:$4 sm:$0xff]  }
  0xcf   : > { %2397 = vmatpush2.bf16.msra.mxu0 %v8858_v11  ;;  %v8896_v11 = vld [vmem:[#allocation6 + $0x458] ss:$12 sps:$4 sm:$0xff]  }
  0xd0   : > { %2398 = vmatprep.subr.bf16.mxu0 %v8869_v12  ;;  %v8895_v12 = vld [vmem:[#allocation6 + $0x218] ss:$12 sps:$4 sm:$0xff]  }
  0xd1   : > { %2087 = vmatmul.mubr.bf16.gmra.mxu0 %v9983_v13 }
  0xd2   : > { %2280 = vmatmul.mubr.bf16.gmra.mxu1 %v8797_v16  ;;  %2096 = vmatprep.mubr.bf16.mxu0 %v9987_v17  ;;  %v8906_v16 = vld [vmem:[#allocation6 + $0x440] ss:$12 sps:$4 sm:$0xff]  }
  0xd3   : > { %2289 = vmatprep.mubr.bf16.mxu1 %v8803_v19  ;;  %2399 = vmatpush2.bf16.msra.mxu0 %v8867_v21  ;;  %v10083_v19 = vld [vmem:[%s9900_s29 + $0x40] ss:$24 sps:$4 sm:$0xff]   ;;  %v10086_v21 = vld [vmem:[%s9900_s29 + $0x74] ss:$24 sps:$4 sm:$0xff]  }
  0xd4   : > { %2400 = vmatprep.subr.bf16.mxu0 %v8880_v22  ;;  %v8905_v22 = vld [vmem:[#allocation6 + $0x200] ss:$12 sps:$4 sm:$0xff]  }
  0xd7   : > { %2401 = vmatpush2.bf16.msra.mxu0 %v8878_v23  ;;  %v8907_v23 = vld [vmem:[#allocation6 + $0x380] ss:$12 sps:$4 sm:$0xff]  }
  0xd8   : > { %8329 = vmatprep.subr.bf16.mxu0 %v8884_v26  ;;  %v8917_v26 = vld [vmem:[#allocation6 + $0x368] ss:$12 sps:$4 sm:$0xff]  }
  0xd9   : > { %2097 = vmatmul.mubr.bf16.gmra.mxu0 %v9993_v24 }
  0xda   : > { %2290 = vmatmul.mubr.bf16.gmra.mxu1 %v8806_v25  ;;  %2106 = vmatprep.mubr.bf16.mxu0 %v9997_v29  ;;  %v8916_v25 = vld [vmem:[#allocation6 + $0x428] ss:$12 sps:$4 sm:$0xff]  }
  0xdb   : > { %2299 = vmatprep.mubr.bf16.mxu1 %v8814_v30  ;;  %v8926_v30 = vld [vmem:[#allocation6 + $0x410] ss:$12 sps:$4 sm:$0xff]  }
  0xe1   : > { %2107 = vmatmul.mubr.bf16.gmra.mxu0 %v10003_v32 }
  0xe2   : > { %2300 = vmatmul.mubr.bf16.gmra.mxu1 %v8817_v33  ;;  %2116 = vmatprep.mubr.bf16.mxu0 %v10007_v34  ;;  %v10093_v33 = vld [vmem:[%s9900_s29 + $0x70] ss:$24 sps:$4 sm:$0xff]  }
  0xe3   : > { %2309 = vmatprep.mubr.bf16.mxu1 %v8823_v36  ;;  %v10096_v36 = vld [vmem:[%s9900_s29 + $0xa4] ss:$24 sps:$4 sm:$0xff]  }
  0xe9   : > { %2117 = vmatmul.mubr.bf16.gmra.mxu0 %v10013_v37 }
  0xea   : > { %2310 = vmatmul.mubr.bf16.gmra.mxu1 %v8826_v39  ;;  %2126 = vmatprep.mubr.bf16.mxu0 %v10017_v40  ;;  %v8925_v39 = vld [vmem:[#allocation6 + $0x1d0] ss:$12 sps:$4 sm:$0xff]  }
  0xeb   : > { %2319 = vmatprep.mubr.bf16.mxu1 %v8834_v41  ;;  %v8934_v41 = vld [vmem:[#allocation6 + $0x278] ss:$12 sps:$4 sm:$0xff]  }
  0xf1   : > { %2127 = vmatmul.mubr.bf16.gmra.mxu0 %v10023_v42 }
  0xf2   : > { %2320 = vmatmul.mubr.bf16.gmra.mxu1 %v8837_v43  ;;  %2136 = vmatprep.mubr.bf16.mxu0 %v10027_v44  ;;  %v8935_v43 = vld [vmem:[#allocation6 + $0x1b8] ss:$12 sps:$4 sm:$0xff]  }
  0xf3   : > { %2329 = vmatprep.mubr.bf16.mxu1 %v8843_v46  ;;  %v8937_v46 = vld [vmem:[#allocation6 + $0x338] ss:$12 sps:$4 sm:$0xff]  }
  0xf9   : > { %2137 = vmatmul.mubr.bf16.gmra.mxu0 %v10033_v47 }
  0xfa   : > { %2330 = vmatmul.mubr.bf16.gmra.mxu1 %v8846_v49  ;;  %2146 = vmatprep.mubr.bf16.mxu0 %v10037_v50  ;;  %v8944_v49 = vld [vmem:[#allocation6 + $0x260] ss:$12 sps:$4 sm:$0xff]  }
  0xfb   : > { %2339 = vmatprep.mubr.bf16.mxu1 %v8854_v51  ;;  %v8946_v51 = vld [vmem:[#allocation6 + $0x3e0] ss:$12 sps:$4 sm:$0xff]  }
 0x101   : > { %2147 = vmatmul.mubr.bf16.gmra.mxu0 %v10043_v52 }
 0x102   : > { %2340 = vmatmul.mubr.bf16.gmra.mxu1 %v8857_v53  ;;  %2156 = vmatprep.mubr.bf16.mxu0 %v10047_v54  ;;  %v10103_v53 = vld [vmem:[%s9900_s29 + $0xa0] ss:$24 sps:$4 sm:$0xff]  }
 0x103   : > { %2349 = vmatprep.mubr.bf16.mxu1 %v8863_v55  ;;  %v10106_v55 = vld [vmem:[%s9900_s29 + $0xd4] ss:$24 sps:$4 sm:$0xff]  }
 0x109   : > { %2157 = vmatmul.mubr.bf16.gmra.mxu0 %v10053_v57 }
 0x10a   : > { %2350 = vmatmul.mubr.bf16.gmra.mxu1 %v8866_v58  ;;  %2166 = vmatprep.mubr.bf16.mxu0 %v10057_v60  ;;  %v8945_v58 = vld [vmem:[#allocation6 + $0x1a0] ss:$12 sps:$4 sm:$0xff]  }
 0x10b   : > { %2359 = vmatprep.mubr.bf16.mxu1 %v8874_v61  ;;  %v8956_v61 = vld [vmem:[#allocation6 + $0x3c8] ss:$12 sps:$4 sm:$0xff]  }
 0x111   : > { %2167 = vmatmul.mubr.bf16.gmra.mxu0 %v10063_v62 }
 0x112   : > { %2360 = vmatmul.mubr.bf16.gmra.mxu1 %v8877_v63  ;;  %2402 = vmatprep.mubr.bf16.mxu0 %v10067_v0  ;;  %v8955_v63 = vld [vmem:[#allocation6 + $0x188] ss:$12 sps:$4 sm:$0xff]  }
 0x113   : > { %2595 = vmatprep.mubr.bf16.mxu1 %v9561_v1  ;;  %v8957_v1 = vld [vmem:[#allocation6 + $0x308] ss:$12 sps:$4 sm:$0xff]  }
 0x119   : > { %2403 = vmatmul.mubr.bf16.vlgmr.msra.gmra.mxu0 %v10073_v3 }
 0x11a   : > { %2596 = vmatmul.mubr.bf16.vlgmr.msra.gmra.mxu1 %v9913_v6  ;;  %8330 = vmatpush3.bf16.msra.mxu0 %v8885_v4  ;;  %v8914_v6 = vld [vmem:[#allocation6 + $0x2a8] ss:$12 sps:$4 sm:$0xff]  }
 0x11b   : > { %8442 = vmatpush3.bf16.msra.mxu1 %v8887_v7  ;;  %2412 = vmatprep.mubr.bf16.mxu0 %v10076_v8  ;;  %v10113_v4 = vld [vmem:[%s9900_s29 + $0xd0] ss:$24 sps:$4 sm:$0xff]   ;;  %v10116_v7 = vld [vmem:[%s9900_s29 + $0x104] ss:$24 sps:$4 sm:$0xff]  }
 0x11c   : > { %2603 = vmatprep.mubr.bf16.mxu1 %v9917_v10  ;;  %8331 = vmatprep.subr.bf16.mxu0 %v8894_v9  ;;  %v8915_v10 = vld [vmem:[#allocation6 + $0x1e8] ss:$12 sps:$4 sm:$0xff]  }
 0x11d   : > { %8443 = vmatprep.subr.bf16.mxu1 %v8896_v11  ;;  %v10133_v9 = vld [vmem:[%s9900_s29 + $0x130] ss:$24 sps:$4 sm:$0xff]   ;;  %v10146_v11 = vld [vmem:[%s9900_s29 + $0x194] ss:$24 sps:$4 sm:$0xff]  }
 0x11e   : > { %8332 = vmatpush3.bf16.msra.mxu0 %v8895_v12 }
 0x11f   : > { %8444 = vmatpush3.bf16.msra.mxu1 %v8897_v14  ;;  %8333 = vmatprep.subr.bf16.mxu0 %v8904_v15  ;;  %v10165_v14 = vld [vmem:[%s9900_s29 + $0x190] ss:$24 sps:$4 sm:$0xff]  }
 0x120   : > { %8445 = vmatprep.subr.bf16.mxu1 %v8906_v16  ;;  %v8963_v16 = vld [vmem:[#allocation8 + $0xe4] ss:$16 sps:$4 sm:$0xff]  }
 0x121   : > { %2413 = vmatmul.mubr.bf16.gmra.mxu0 %v10083_v19 }
 0x122   : > { %2604 = vmatmul.mubr.bf16.gmra.mxu1 %v9923_v18  ;;  %2422 = vmatprep.mubr.bf16.mxu0 %v10086_v21  ;;  %v8927_v18 = vld [vmem:[#allocation6 + $0x350] ss:$12 sps:$4 sm:$0xff]  }
 0x123   : > { %2611 = vmatprep.mubr.bf16.mxu1 %v9927_v20  ;;  %8334 = vmatpush3.bf16.msra.mxu0 %v8905_v22  ;;  %v8936_v20 = vld [vmem:[#allocation6 + $0x3f8] ss:$12 sps:$4 sm:$0xff]  }
 0x124   : > { %8446 = vmatpush3.bf16.msra.mxu1 %v8907_v23  ;;  %8335 = vmatprep.subr.bf16.mxu0 %v8914_v6 }
 0x125   : > { %8447 = vmatprep.subr.bf16.mxu1 %v8916_v25 }
 0x127   : > { %8336 = vmatpush3.bf16.msra.mxu0 %v8915_v10 }
 0x128   : > { %8448 = vmatpush3.bf16.msra.mxu1 %v8917_v26  ;;  %8337 = vmatprep.subr.bf16.mxu0 %v8924_v28 }
 0x129   : > { %8449 = vmatprep.subr.bf16.mxu1 %v8926_v30  ;;  %2423 = vmatmul.mubr.bf16.gmra.mxu0 %v10093_v33 }
 0x12a   : > { %2612 = vmatmul.mubr.bf16.gmra.mxu1 %v9933_v27  ;;  %2432 = vmatprep.mubr.bf16.mxu0 %v10096_v36  ;;  %v8947_v27 = vld [vmem:[#allocation6 + $0x320] ss:$12 sps:$4 sm:$0xff]  }
 0x12b   : > { %2619 = vmatprep.mubr.bf16.mxu1 %v9937_v31  ;;  %8338 = vmatpush3.bf16.msra.mxu0 %v8925_v39  ;;  %v8954_v31 = vld [vmem:[#allocation6 + $0x248] ss:$12 sps:$4 sm:$0xff]  }
 0x12c   : > { %8450 = vmatpush3.bf16.msra.mxu1 %v8927_v18  ;;  %8339 = vmatprep.subr.bf16.mxu0 %v8934_v41  ;;  %v10185_v18 = vld [vmem:[%s9900_s29 + $0x1c0] ss:$24 sps:$4 sm:$0xff]  }
 0x12d   : > { %8451 = vmatprep.subr.bf16.mxu1 %v8936_v20  ;;  %v10191_v20 = vld [vmem:[%s9900_s29 + $0x1f4] ss:$24 sps:$4 sm:$0xff]  }
 0x12f   : > { %8340 = vmatpush3.bf16.msra.mxu0 %v8935_v43 }
 0x130   : > { %8452 = vmatpush3.bf16.msra.mxu1 %v8937_v46  ;;  %8341 = vmatprep.subr.bf16.mxu0 %v8944_v49 }
 0x131   : > { %8453 = vmatprep.subr.bf16.mxu1 %v8946_v51  ;;  %2433 = vmatmul.mubr.bf16.gmra.mxu0 %v10103_v53 }
 0x132   : > { %2620 = vmatmul.mubr.bf16.gmra.mxu1 %v9943_v35  ;;  %2442 = vmatprep.mubr.bf16.mxu0 %v10106_v55  ;;  %v10123_v35 = vld [vmem:[%s9900_s29 + $0x100] ss:$24 sps:$4 sm:$0xff]  }
 0x133   : > { %2627 = vmatprep.mubr.bf16.mxu1 %v9947_v38  ;;  %8342 = vmatpush3.bf16.msra.mxu0 %v8945_v58  ;;  %v10126_v38 = vld [vmem:[%s9900_s29 + $0x134] ss:$24 sps:$4 sm:$0xff]  }
 0x134   : > { %8454 = vmatpush3.bf16.msra.mxu1 %v8947_v27  ;;  %8343 = vmatprep.subr.bf16.mxu0 %v8954_v31 }
 0x135   : > { %8455 = vmatprep.subr.bf16.mxu1 %v8956_v61 }
 0x137   : > { %8344 = vmatpush3.bf16.msra.mxu0 %v8955_v63 }
 0x138   : > { %8456 = vmatpush3.bf16.msra.mxu1 %v8957_v1  ;;  %3788 = vmatprep.subr.bf16.mxu0 %v8963_v16 }
 0x139   : > { %2443 = vmatmul.mubr.bf16.gmra.mxu0 %v10113_v4 }
 0x13a   : > { %2628 = vmatmul.mubr.bf16.gmra.mxu1 %v9953_v45  ;;  %2452 = vmatprep.mubr.bf16.mxu0 %v10116_v7  ;;  %v10136_v45 = vld [vmem:[%s9900_s29 + $0x164] ss:$24 sps:$4 sm:$0xff]  }
 0x13b   : > { %2635 = vmatprep.mubr.bf16.mxu1 %v9957_v48  ;;  %v14209_v48 = vlaneseq }
 0x141   : > { %2453 = vmatmul.mubr.bf16.gmra.mxu0 %v10123_v35 }
 0x142   : > { %2636 = vmatmul.mubr.bf16.gmra.mxu1 %v9963_v56  ;;  %2462 = vmatprep.mubr.bf16.mxu0 %v10126_v38  ;;  %v10143_v56 = vld [vmem:[%s9900_s29 + $0x160] ss:$24 sps:$4 sm:$0xff]  }
 0x143   : > { %2643 = vmatprep.mubr.bf16.mxu1 %v9967_v59  ;;  %v10149_v59 = vshrl.u32 %v14209_v48, 7 }
 0x145   : > { %14430 = vst [vmem:[#allocation11_spill] sm:$0xff] %v10149_v59  ;;  %v10162_v12 = vsub.s32 1, %v10149_v59 }
 0x147   : > { %14432 = vst [vmem:[#allocation13_spill] sm:$0xff] %v10162_v12 }
 0x149   : > { %2463 = vmatmul.mubr.bf16.gmra.mxu0 %v10133_v9 }
 0x14a   : > { %2644 = vmatmul.mubr.bf16.gmra.mxu1 %v9973_v2  ;;  %2472 = vmatprep.mubr.bf16.mxu0 %v10136_v45  ;;  %v10156_v2 = vsub.s32 0, %v10149_v59  ;;  %v10273_v59 = vld [vmem:[%s9900_s29 + $0x280] ss:$24 sps:$4 sm:$0xff]  }
 0x14b   : > { %2651 = vmatprep.mubr.bf16.mxu1 %v9977_v5  ;;  %v719_v5 = vld [vmem:[%s14196_s2] sm:$0x7] }
 0x14c   : > { %14431 = vst [vmem:[#allocation12_spill] sm:$0xff] %v10156_v2  ;;  %v10168_v15 = vrot.slane %v719_v5, %v10156_v2 }
 0x151   : > { %2473 = vmatmul.mubr.bf16.gmra.mxu0 %v10143_v56 }
 0x152   : > { %2652 = vmatmul.mubr.bf16.gmra.mxu1 %v9983_v13  ;;  %2482 = vmatprep.mubr.bf16.mxu0 %v10146_v11  ;;  %v10171_v13 = vld [vmem:[%s9900_s29 + $0x1c4] ss:$24 sps:$4 sm:$0xff]  }
 0x153   : > { %2659 = vmatprep.mubr.bf16.mxu1 %v9987_v17  ;;  %v10174_v17 = vrot.slane %v719_v5, %v10162_v12 }
 0x159   : > { %v2018_v22 = vpop.f32.mrf.mxu0  ;;  %2483 = vmatmul.mubr.bf16.gmra.mxu0 %v10165_v14 }
 0x15a   : > { %v2211_v23 = vpop.f32.mrf.mxu1  ;;  %2660 = vmatmul.mubr.bf16.gmra.mxu1 %v9993_v24  ;;  %v2019_v6 = vadd.f32 %v2018_v22, %v10168_v15  ;;  %2492 = vmatprep.mubr.bf16.mxu0 %v10171_v13 }
 0x15b   : > { %2667 = vmatprep.mubr.bf16.mxu1 %v9997_v29  ;;  %v2020_v25 = vpop.f32.mrf.mxu0 }
 0x15c   : > { %v2213_v10 = vpop.f32.mrf.mxu1  ;;  %v10181_v26 = vadd.f32 %v2211_v23, %v2019_v6  ;;  %v2021_v28 = vadd.f32 %v2020_v25, %v10174_v17  ;;  %v10207_v23 = vld [vmem:[%s9900_s29 + $0x1f0] ss:$24 sps:$4 sm:$0xff]   ;;  %v10213_v25 = vld [vmem:[%s9900_s29 + $0x224] ss:$24 sps:$4 sm:$0xff]  }
 0x15d   : > { %v2022_v30 = vpop.f32.mrf.mxu0 }
 0x15e   : > { %v2215_v39 = vpop.f32.mrf.mxu1  ;;  %v10187_v41 = vadd.f32 %v2213_v10, %v2021_v28  ;;  %v2023_v24 = vadd.f32 %v2022_v30, %v10168_v15 }
 0x15f   : > { %v2024_v43 = vpop.f32.mrf.mxu0 }
 0x160   : > { %v2217_v46 = vpop.f32.mrf.mxu1  ;;  %v10193_v29 = vadd.f32 %v2215_v39, %v2023_v24  ;;  %v2025_v49 = vadd.f32 %v2024_v43, %v10174_v17 }
 0x161   : > { %v2028_v51 = vpop.f32.mrf.mxu0  ;;  %2493 = vmatmul.mubr.bf16.gmra.mxu0 %v10185_v18 }
 0x162   : > { %v2221_v58 = vpop.f32.mrf.mxu1  ;;  %2668 = vmatmul.mubr.bf16.gmra.mxu1 %v10003_v32  ;;  %v10198_v27 = vadd.f32 %v2217_v46, %v2025_v49  ;;  %v2029_v31 = vadd.f32 %v2028_v51, %v10168_v15  ;;  %2502 = vmatprep.mubr.bf16.mxu0 %v10191_v20 }
 0x163   : > { %2675 = vmatprep.mubr.bf16.mxu1 %v10007_v34  ;;  %v2030_v61 = vpop.f32.mrf.mxu0 }
 0x164   : > { %v2223_v63 = vpop.f32.mrf.mxu1  ;;  %v10203_v1 = vadd.f32 %v2221_v58, %v2029_v31  ;;  %v2031_v5 = vadd.f32 %v2030_v61, %v10174_v17  ;;  %v8978_v61 = vld [vmem:[#allocation8 + $0x2e4] ss:$16 sps:$4 sm:$0xff]  }
 0x165   : > { %v2032_v16 = vpop.f32.mrf.mxu0  ;;  %3981 = vmatprep.subr.bf16.mxu1 %v8978_v61 }
 0x166   : > { %v2225_v22 = vpop.f32.mrf.mxu1  ;;  %v10209_v6 = vadd.f32 %v2223_v63, %v2031_v5  ;;  %v2033_v32 = vadd.f32 %v2032_v16, %v10168_v15  ;;  %v10229_v16 = vld [vmem:[%s9900_s29 + $0x220] ss:$24 sps:$4 sm:$0xff]  }
 0x167   : > { %v2034_v10 = vpop.f32.mrf.mxu0 }
 0x168   : > { %v2227_v28 = vpop.f32.mrf.mxu1  ;;  %v10215_v30 = vadd.f32 %v2225_v22, %v2033_v32  ;;  %v2035_v34 = vadd.f32 %v2034_v10, %v10174_v17  ;;  %v10235_v32 = vld [vmem:[%s9900_s29 + $0x254] ss:$24 sps:$4 sm:$0xff]  }
 0x169   : > { %v2038_v39 = vpop.f32.mrf.mxu0  ;;  %2503 = vmatmul.mubr.bf16.gmra.mxu0 %v10207_v23 }
 0x16a   : > { %v2231_v24 = vpop.f32.mrf.mxu1  ;;  %2676 = vmatmul.mubr.bf16.gmra.mxu1 %v10013_v37  ;;  %v10220_v43 = vadd.f32 %v2227_v28, %v2035_v34  ;;  %v2039_v46 = vadd.f32 %v2038_v39, %v10168_v15  ;;  %2512 = vmatprep.mubr.bf16.mxu0 %v10213_v25 }
 0x16b   : > { %2683 = vmatprep.mubr.bf16.mxu1 %v10017_v40  ;;  %v2040_v49 = vpop.f32.mrf.mxu0 }
 0x16c   : > { %v2233_v51 = vpop.f32.mrf.mxu1  ;;  %v10225_v58 = vadd.f32 %v2231_v24, %v2039_v46  ;;  %v2041_v31 = vadd.f32 %v2040_v49, %v10174_v17 }
 0x16d   : > { %v2042_v63 = vpop.f32.mrf.mxu0 }
 0x16e   : > { %v2235_v5 = vpop.f32.mrf.mxu1  ;;  %v10231_v37 = vadd.f32 %v2233_v51, %v2041_v31  ;;  %v2043_v22 = vadd.f32 %v2042_v63, %v10168_v15 }
 0x16f   : > { %v2044_v10 = vpop.f32.mrf.mxu0 }
 0x170   : > { %v2237_v40 = vpop.f32.mrf.mxu1  ;;  %v10237_v28 = vadd.f32 %v2235_v5, %v2043_v22  ;;  %v2045_v34 = vadd.f32 %v2044_v10, %v10174_v17  ;;  %v10251_v10 = vld [vmem:[%s9900_s29 + $0x250] ss:$24 sps:$4 sm:$0xff]  }
 0x171   : > { %v2048_v39 = vpop.f32.mrf.mxu0  ;;  %2513 = vmatmul.mubr.bf16.gmra.mxu0 %v10229_v16 }
 0x172   : > { %v2241_v24 = vpop.f32.mrf.mxu1  ;;  %2684 = vmatmul.mubr.bf16.gmra.mxu1 %v10023_v42  ;;  %v10242_v46 = vadd.f32 %v2237_v40, %v2045_v34  ;;  %v2049_v49 = vadd.f32 %v2048_v39, %v10168_v15  ;;  %2522 = vmatprep.mubr.bf16.mxu0 %v10235_v32  ;;  %v10257_v40 = vld [vmem:[%s9900_s29 + $0x284] ss:$24 sps:$4 sm:$0xff]  }
 0x173   : > { %2691 = vmatprep.mubr.bf16.mxu1 %v10027_v44  ;;  %v2050_v51 = vpop.f32.mrf.mxu0 }
 0x174   : > { %v2243_v31 = vpop.f32.mrf.mxu1  ;;  %v10247_v61 = vadd.f32 %v2241_v24, %v2049_v49  ;;  %v2051_v63 = vadd.f32 %v2050_v51, %v10174_v17 }
 0x175   : > { %v2052_v5 = vpop.f32.mrf.mxu0 }
 0x176   : > { %14433 = vst [vmem:[#allocation14_spill] sm:$0xff] %v10247_v61  ;;  %v2245_v22 = vpop.f32.mrf.mxu1  ;;  %v10253_v48 = vadd.f32 %v2243_v31, %v2051_v63  ;;  %v2053_v42 = vadd.f32 %v2052_v5, %v10168_v15 }
 0x177   : > { %v2054_v34 = vpop.f32.mrf.mxu0 }
 0x178   : > { %v2247_v39 = vpop.f32.mrf.mxu1  ;;  %v10259_v12 = vadd.f32 %v2245_v22, %v2053_v42  ;;  %v2055_v44 = vadd.f32 %v2054_v34, %v10174_v17 }
 0x179   : > { %v2058_v24 = vpop.f32.mrf.mxu0  ;;  %2523 = vmatmul.mubr.bf16.gmra.mxu0 %v10251_v10 }
 0x17a   : > { %14434 = vst [vmem:[#allocation15_spill] sm:$0xff] %v10259_v12  ;;  %v2251_v49 = vpop.f32.mrf.mxu1  ;;  %2692 = vmatmul.mubr.bf16.gmra.mxu1 %v10033_v47  ;;  %v10264_v51 = vadd.f32 %v2247_v39, %v2055_v44  ;;  %v2059_v31 = vadd.f32 %v2058_v24, %v10168_v15  ;;  %2532 = vmatprep.mubr.bf16.mxu0 %v10257_v40  ;;  %v10279_v39 = vld [vmem:[%s9900_s29 + $0x2b4] ss:$24 sps:$4 sm:$0xff]  }
 0x17b   : > { %2699 = vmatprep.mubr.bf16.mxu1 %v10037_v50  ;;  %v2060_v63 = vpop.f32.mrf.mxu0 }
 0x17c   : > { %v2253_v5 = vpop.f32.mrf.mxu1  ;;  %v10269_v22 = vadd.f32 %v2251_v49, %v2059_v31  ;;  %v2061_v42 = vadd.f32 %v2060_v63, %v10174_v17 }
 0x17d   : > { %v2062_v34 = vpop.f32.mrf.mxu0 }
 0x17e   : > { %14435 = vst [vmem:[#allocation16_spill] sm:$0xff] %v10269_v22  ;;  %v2255_v2 = vpop.f32.mrf.mxu1  ;;  %v10275_v61 = vadd.f32 %v2253_v5, %v2061_v42  ;;  %v2063_v47 = vadd.f32 %v2062_v34, %v10168_v15 }
 0x17f   : > { %v2064_v44 = vpop.f32.mrf.mxu0 }
 0x180   : > { %14436 = vst [vmem:[#allocation17_spill] sm:$0xff] %v10275_v61  ;;  %v2257_v24 = vpop.f32.mrf.mxu1  ;;  %v10281_v12 = vadd.f32 %v2255_v2, %v2063_v47  ;;  %v2065_v50 = vadd.f32 %v2064_v44, %v10174_v17 }
 0x181   : > { %v2068_v49 = vpop.f32.mrf.mxu0  ;;  %2533 = vmatmul.mubr.bf16.gmra.mxu0 %v10273_v59 }
 0x182   : > { %14437 = vst [vmem:[#allocation18_spill] sm:$0xff] %v10281_v12  ;;  %v2261_v31 = vpop.f32.mrf.mxu1  ;;  %2700 = vmatmul.mubr.bf16.gmra.mxu1 %v10043_v52  ;;  %v10286_v63 = vadd.f32 %v2257_v24, %v2065_v50  ;;  %v2069_v5 = vadd.f32 %v2068_v49, %v10168_v15  ;;  %2542 = vmatprep.mubr.bf16.mxu0 %v10279_v39  ;;  %v10295_v12 = vld [vmem:[%s9900_s29 + $0x2b0] ss:$24 sps:$4 sm:$0xff]   ;;  %v10301_v24 = vld [vmem:[%s9900_s29 + $0x2e4] ss:$24 sps:$4 sm:$0xff]  }
 0x183   : > { %2707 = vmatprep.mubr.bf16.mxu1 %v10047_v54  ;;  %v2070_v2 = vpop.f32.mrf.mxu0 }
 0x184   : > { %14438 = vst [vmem:[#allocation19_spill] sm:$0xff] %v10286_v63  ;;  %v2263_v42 = vpop.f32.mrf.mxu1  ;;  %v10291_v34 = vadd.f32 %v2261_v31, %v2069_v5  ;;  %v2071_v47 = vadd.f32 %v2070_v2, %v10174_v17 }
 0x185   : > { %v2072_v44 = vpop.f32.mrf.mxu0 }
 0x186   : > { %14439 = vst [vmem:[#allocation20_spill] sm:$0xff] %v10291_v34  ;;  %v2265_v22 = vpop.f32.mrf.mxu1  ;;  %v10297_v61 = vadd.f32 %v2263_v42, %v2071_v47  ;;  %v2073_v52 = vadd.f32 %v2072_v44, %v10168_v15 }
 0x187   : > { %v2074_v50 = vpop.f32.mrf.mxu0 }
 0x188   : > { %14440 = vst [vmem:[#allocation21_spill] sm:$0xff] %v10297_v61  ;;  %v2267_v49 = vpop.f32.mrf.mxu1  ;;  %v10303_v63 = vadd.f32 %v2265_v22, %v2073_v52  ;;  %v2075_v54 = vadd.f32 %v2074_v50, %v10174_v17 }
 0x189   : > { %v2078_v31 = vpop.f32.mrf.mxu0  ;;  %2543 = vmatmul.mubr.bf16.gmra.mxu0 %v10295_v12 }
 0x18a   : > { %14441 = vst [vmem:[#allocation22_spill] sm:$0xff] %v10303_v63  ;;  %v2271_v5 = vpop.f32.mrf.mxu1  ;;  %2708 = vmatmul.mubr.bf16.gmra.mxu1 %v10053_v57  ;;  %v10308_v2 = vadd.f32 %v2267_v49, %v2075_v54  ;;  %v2079_v42 = vadd.f32 %v2078_v31, %v10168_v15  ;;  %2552 = vmatprep.mubr.bf16.mxu0 %v10301_v24  ;;  %v10317_v63 = vld [vmem:[%s9900_s29 + $0x2e0] ss:$24 sps:$4 sm:$0xff]  }
 0x18b   : > { %2715 = vmatprep.mubr.bf16.mxu1 %v10057_v60  ;;  %v2080_v47 = vpop.f32.mrf.mxu0 }
 0x18c   : > { %14442 = vst [vmem:[#allocation23_spill] sm:$0xff] %v10308_v2  ;;  %v2273_v22 = vpop.f32.mrf.mxu1  ;;  %v10313_v44 = vadd.f32 %v2271_v5, %v2079_v42  ;;  %v2081_v52 = vadd.f32 %v2080_v47, %v10174_v17 }
 0x18d   : > { %v2082_v50 = vpop.f32.mrf.mxu0 }
 0x18e   : > { %14443 = vst [vmem:[#allocation24_spill] sm:$0xff] %v10313_v44  ;;  %v2275_v34 = vpop.f32.mrf.mxu1  ;;  %v10319_v57 = vadd.f32 %v2273_v22, %v2081_v52  ;;  %v2083_v49 = vadd.f32 %v2082_v50, %v10168_v15  ;;  %v9562_v22 = vld [vmem:[%s9900_s29 + $0xc] ss:$24 sps:$4 sm:$0xff]  }
 0x18f   : > { %v2084_v54 = vpop.f32.mrf.mxu0 }
 0x190   : > { %14444 = vst [vmem:[#allocation25_spill] sm:$0xff] %v10319_v57  ;;  %v2277_v31 = vpop.f32.mrf.mxu1  ;;  %v10322_v61 = vadd.f32 %v2275_v34, %v2083_v49  ;;  %v2085_v60 = vadd.f32 %v2084_v54, %v10174_v17 }
 0x191   : > { %v2088_v2 = vpop.f32.mrf.mxu0  ;;  %2553 = vmatmul.mubr.bf16.gmra.mxu0 %v10317_v63 }
 0x192   : > { %14445 = vst [vmem:[#allocation26_spill] sm:$0xff] %v10322_v61  ;;  %v2281_v5 = vpop.f32.mrf.mxu1  ;;  %2716 = vmatmul.mubr.bf16.gmra.mxu1 %v10063_v62  ;;  %v10327_v42 = vadd.f32 %v2277_v31, %v2085_v60  ;;  %v2089_v47 = vadd.f32 %v2088_v2, %v10168_v15  ;;  %2756 = vmatprep.mubr.bf16.mxu0 %v9562_v22  ;;  %v8961_v60 = vld [vmem:[#allocation8 + $0xe0] ss:$16 sps:$4 sm:$0xff]  }
 0x193   : > { %2917 = vmatprep.mubr.bf16.mxu1 %v10067_v0  ;;  %v2090_v52 = vpop.f32.mrf.mxu0  ;;  %v8976_v22 = vld [vmem:[#allocation8 + $0x2e0] ss:$16 sps:$4 sm:$0xff]  }
 0x194   : > { %14446 = vst [vmem:[#allocation27_spill] sm:$0xff] %v10327_v42  ;;  %v2283_v50 = vpop.f32.mrf.mxu1  ;;  %v10332_v34 = vadd.f32 %v2281_v5, %v2089_v47  ;;  %v2091_v49 = vadd.f32 %v2090_v52, %v10174_v17  ;;  %v8966_v5 = vld [vmem:[#allocation8 + $0xc4] ss:$16 sps:$4 sm:$0xff]   ;;  %v9563_v52 = vld [vmem:[%s9900_s29 + $0x8] ss:$24 sps:$4 sm:$0xff]  }
 0x195   : > { %v2092_v54 = vpop.f32.mrf.mxu0  ;;  %v8993_v47 = vld [vmem:[#allocation8 + $0x2c4] ss:$16 sps:$4 sm:$0xff]  }
 0x196   : > { %14447 = vst [vmem:[#allocation28_spill] sm:$0xff] %v10332_v34  ;;  %v2285_v44 = vpop.f32.mrf.mxu1  ;;  %v10335_v61 = vadd.f32 %v2283_v50, %v2091_v49  ;;  %v2093_v62 = vadd.f32 %v2092_v54, %v10168_v15  ;;  %v9564_v54 = vld [vmem:[%s9900_s29 + $0x3c] ss:$24 sps:$4 sm:$0xff]  }
 0x197   : > { %v2094_v31 = vpop.f32.mrf.mxu0 }
 0x198   : > { %14448 = vst [vmem:[#allocation29_spill] sm:$0xff] %v10335_v61  ;;  %v2287_v2 = vpop.f32.mrf.mxu1  ;;  %v10338_v57 = vadd.f32 %v2285_v44, %v2093_v62  ;;  %v2095_v0 = vadd.f32 %v2094_v31, %v10174_v17  ;;  %v8964_v31 = vld [vmem:[#allocation8 + $0xc0] ss:$16 sps:$4 sm:$0xff]  }
 0x199   : > { %v2098_v34 = vpop.f32.mrf.mxu0  ;;  %2757 = vmatmul.mubr.bf16.vlgmr.msra.gmra.mxu0 %v9563_v52 }
 0x19a   : > { %14449 = vst [vmem:[#allocation30_spill] sm:$0xff] %v10338_v57  ;;  %v2291_v42 = vpop.f32.mrf.mxu1  ;;  %2918 = vmatmul.mubr.bf16.vlgmr.msra.gmra.mxu1 %v10073_v3  ;;  %v10343_v50 = vadd.f32 %v2287_v2, %v2095_v0  ;;  %v2099_v49 = vadd.f32 %v2098_v34, %v10168_v15  ;;  %2764 = vmatprep.mubr.bf16.mxu0 %v9564_v54  ;;  %v8991_v57 = vld [vmem:[#allocation8 + $0x2c0] ss:$16 sps:$4 sm:$0xff]   ;;  %v8969_v3 = vld [vmem:[#allocation8 + $0xa4] ss:$16 sps:$4 sm:$0xff]  }
 0x19b   : > { %2925 = vmatprep.mubr.bf16.mxu1 %v10076_v8  ;;  %v2100_v44 = vpop.f32.mrf.mxu0  ;;  %3789 = vmatpush1.bf16.msra.mxu0 %v8961_v60  ;;  %v9008_v2 = vld [vmem:[#allocation8 + $0x2a4] ss:$16 sps:$4 sm:$0xff]  }
 0x19c   : > { %14450 = vst [vmem:[#allocation31_spill] sm:$0xff] %v10343_v50  ;;  %v2293_v62 = vpop.f32.mrf.mxu1  ;;  %3982 = vmatpush1.bf16.msra.mxu1 %v8976_v22  ;;  %v10348_v61 = vadd.f32 %v2291_v42, %v2099_v49  ;;  %v2101_v52 = vadd.f32 %v2100_v44, %v10174_v17  ;;  %3790 = vmatprep.subr.bf16.mxu0 %v8966_v5  ;;  %v8967_v22 = vld [vmem:[#allocation8 + $0xa0] ss:$16 sps:$4 sm:$0xff]   ;;  %v9020_v44 = vld [vmem:[#allocation8 + $0x284] ss:$16 sps:$4 sm:$0xff]  }
 0x19d   : > { %3983 = vmatprep.subr.bf16.mxu1 %v8993_v47  ;;  %v2102_v0 = vpop.f32.mrf.mxu0  ;;  %v9006_v42 = vld [vmem:[#allocation8 + $0x2a0] ss:$16 sps:$4 sm:$0xff]   ;;  %v8972_v47 = vld [vmem:[#allocation8 + $0x84] ss:$16 sps:$4 sm:$0xff]  }
 0x19e   : > { %14451 = vst [vmem:[#allocation32_spill] sm:$0xff] %v10348_v61  ;;  %v2295_v34 = vpop.f32.mrf.mxu1  ;;  %v10351_v50 = vadd.f32 %v2293_v62, %v2101_v52  ;;  %v2103_v8 = vadd.f32 %v2102_v0, %v10168_v15  ;;  %v9565_v61 = vld [vmem:[%s9900_s29 + $0x38] ss:$24 sps:$4 sm:$0xff]  }
 0x19f   : > { %v2104_v54 = vpop.f32.mrf.mxu0  ;;  %3791 = vmatpush1.bf16.msra.mxu0 %v8964_v31 }
 0x1a0   : > { %v2297_v60 = vpop.f32.mrf.mxu1  ;;  %3984 = vmatpush1.bf16.msra.mxu1 %v8991_v57  ;;  %v10354_v49 = vadd.f32 %v2295_v34, %v2103_v8  ;;  %v2105_v5 = vadd.f32 %v2104_v54, %v10174_v17  ;;  %3792 = vmatprep.subr.bf16.mxu0 %v8969_v3  ;;  %v9566_v57 = vld [vmem:[%s9900_s29 + $0x6c] ss:$24 sps:$4 sm:$0xff]   ;;  %v8970_v3 = vld [vmem:[#allocation8 + $0x80] ss:$16 sps:$4 sm:$0xff]  }
 0x1a1   : > { %3985 = vmatprep.subr.bf16.mxu1 %v9008_v2  ;;  %v2108_v62 = vpop.f32.mrf.mxu0  ;;  %2765 = vmatmul.mubr.bf16.gmra.mxu0 %v9565_v61  ;;  %v9018_v2 = vld [vmem:[#allocation8 + $0x280] ss:$16 sps:$4 sm:$0xff]  }
 0x1a2   : > { %v2301_v52 = vpop.f32.mrf.mxu1  ;;  %2926 = vmatmul.mubr.bf16.gmra.mxu1 %v10083_v19  ;;  %v10359_v0 = vadd.f32 %v2297_v60, %v2105_v5  ;;  %v2109_v31 = vadd.f32 %v2108_v62, %v10168_v15  ;;  %2772 = vmatprep.mubr.bf16.mxu0 %v9566_v57  ;;  %v8975_v19 = vld [vmem:[#allocation8 + $0x64] ss:$16 sps:$4 sm:$0xff]  }
 0x1a3   : > { %2933 = vmatprep.mubr.bf16.mxu1 %v10086_v21  ;;  %v2110_v34 = vpop.f32.mrf.mxu0  ;;  %3793 = vmatpush1.bf16.msra.mxu0 %v8967_v22 }
 0x1a4   : > { %v2303_v8 = vpop.f32.mrf.mxu1  ;;  %3986 = vmatpush1.bf16.msra.mxu1 %v9006_v42  ;;  %v10364_v54 = vadd.f32 %v2301_v52, %v2109_v31  ;;  %v2111_v61 = vadd.f32 %v2110_v34, %v10174_v17  ;;  %3794 = vmatprep.subr.bf16.mxu0 %v8972_v47  ;;  %v8973_v42 = vld [vmem:[#allocation8 + $0x60] ss:$16 sps:$4 sm:$0xff]   ;;  %v8981_v47 = vld [vmem:[#allocation8 + $0x44] ss:$16 sps:$4 sm:$0xff]  }
 0x1a5   : > { %3987 = vmatprep.subr.bf16.mxu1 %v9020_v44  ;;  %v2112_v60 = vpop.f32.mrf.mxu0 }
 0x1a6   : > { %14452 = vst [vmem:[#allocation33_spill] sm:$0xff] %v10364_v54  ;;  %v2305_v5 = vpop.f32.mrf.mxu1  ;;  %v10367_v62 = vadd.f32 %v2303_v8, %v2111_v61  ;;  %v2113_v21 = vadd.f32 %v2112_v60, %v10168_v15  ;;  %v9567_v54 = vld [vmem:[%s9900_s29 + $0x68] ss:$24 sps:$4 sm:$0xff]   ;;  %v9568_v60 = vld [vmem:[%s9900_s29 + $0x9c] ss:$24 sps:$4 sm:$0xff]  }
 0x1a7   : > { %v2114_v57 = vpop.f32.mrf.mxu0  ;;  %3795 = vmatpush1.bf16.msra.mxu0 %v8970_v3 }
 0x1a8   : > { %14453 = vst [vmem:[#allocation34_spill] sm:$0xff] %v10367_v62  ;;  %v2307_v22 = vpop.f32.mrf.mxu1  ;;  %3988 = vmatpush1.bf16.msra.mxu1 %v9018_v2  ;;  %v10370_v52 = vadd.f32 %v2305_v5, %v2113_v21  ;;  %v2115_v31 = vadd.f32 %v2114_v57, %v10174_v17  ;;  %3796 = vmatprep.subr.bf16.mxu0 %v8975_v19  ;;  %v8979_v5 = vld [vmem:[#allocation8 + $0x40] ss:$16 sps:$4 sm:$0xff]  }
 0x1a9   : > { %v2118_v44 = vpop.f32.mrf.mxu0  ;;  %2773 = vmatmul.mubr.bf16.gmra.mxu0 %v9567_v54  ;;  %v8984_v54 = vld [vmem:[#allocation8 + $0x24] ss:$16 sps:$4 sm:$0xff]   ;;  %v9021_v57 = vld [vmem:[#allocation8 + $0x260] ss:$16 sps:$4 sm:$0xff]  }
 0x1aa   : > { %14454 = vst [vmem:[#allocation35_spill] sm:$0xff] %v10370_v52  ;;  %v2311_v34 = vpop.f32.mrf.mxu1  ;;  %2934 = vmatmul.mubr.bf16.gmra.mxu1 %v10093_v33  ;;  %v10375_v8 = vadd.f32 %v2307_v22, %v2115_v31  ;;  %v2119_v61 = vadd.f32 %v2118_v44, %v10168_v15  ;;  %2780 = vmatprep.mubr.bf16.mxu0 %v9568_v60  ;;  %v9023_v33 = vld [vmem:[#allocation8 + $0x264] ss:$16 sps:$4 sm:$0xff]   ;;  %v9569_v62 = vld [vmem:[%s9900_s29 + $0x98] ss:$24 sps:$4 sm:$0xff]  }
 0x1ab   : > { %2941 = vmatprep.mubr.bf16.mxu1 %v10096_v36  ;;  %v2120_v3 = vpop.f32.mrf.mxu0  ;;  %3797 = vmatpush1.bf16.msra.mxu0 %v8973_v42 }
 0x1ac   : > { %v2313_v2 = vpop.f32.mrf.mxu1  ;;  %v10380_v19 = vadd.f32 %v2311_v34, %v2119_v61  ;;  %v2121_v21 = vadd.f32 %v2120_v3, %v10174_v17  ;;  %3798 = vmatprep.subr.bf16.mxu0 %v8981_v47  ;;  %3989 = vmatprep.subr.bf16.mxu1 %v9023_v33  ;;  %v8982_v34 = vld [vmem:[#allocation8 + $0x20] ss:$16 sps:$4 sm:$0xff]   ;;  %v8987_v3 = vld [vmem:[#allocation8 + $0x4] ss:$16 sps:$4 sm:$0xff]  }
 0x1ad   : > { %v2122_v22 = vpop.f32.mrf.mxu0  ;;  %3990 = vmatpush1.bf16.msra.mxu1 %v9021_v57  ;;  %v9570_v33 = vld [vmem:[%s9900_s29 + $0xcc] ss:$24 sps:$4 sm:$0xff]  }
 0x1ae   : > { %14455 = vst [vmem:[#allocation36_spill] sm:$0xff] %v10380_v19  ;;  %v2315_v31 = vpop.f32.mrf.mxu1  ;;  %v10383_v44 = vadd.f32 %v2313_v2, %v2121_v21  ;;  %v2123_v60 = vadd.f32 %v2122_v22, %v10168_v15  ;;  %v8985_v22 = vld [vmem:[#allocation8] ss:$16 sps:$4 sm:$0xff]  }
 0x1af   : > { %v2124_v36 = vpop.f32.mrf.mxu0  ;;  %3799 = vmatpush1.bf16.msra.mxu0 %v8979_v5 }
 0x1b0   : > { %v2317_v42 = vpop.f32.mrf.mxu1  ;;  %v10386_v61 = vadd.f32 %v2315_v31, %v2123_v60  ;;  %v2125_v47 = vadd.f32 %v2124_v36, %v10174_v17  ;;  %3800 = vmatprep.subr.bf16.mxu0 %v8984_v54 }
 0x1b1   : > { %v2128_v19 = vpop.f32.mrf.mxu0  ;;  %2781 = vmatmul.mubr.bf16.gmra.mxu0 %v9569_v62  ;;  %v8990_v62 = vld [vmem:[#allocation8 + $0x1e4] ss:$16 sps:$4 sm:$0xff]  }
 0x1b2   : > { %v2321_v52 = vpop.f32.mrf.mxu1  ;;  %2942 = vmatmul.mubr.bf16.gmra.mxu1 %v10103_v53  ;;  %v10391_v2 = vadd.f32 %v2317_v42, %v2125_v47  ;;  %v2129_v21 = vadd.f32 %v2128_v19, %v10168_v15  ;;  %2788 = vmatprep.mubr.bf16.mxu0 %v9570_v33  ;;  %v8988_v47 = vld [vmem:[#allocation8 + $0x1e0] ss:$16 sps:$4 sm:$0xff]  }
 0x1b3   : > { %2949 = vmatprep.mubr.bf16.mxu1 %v10106_v55  ;;  %v2130_v5 = vpop.f32.mrf.mxu0  ;;  %3801 = vmatpush1.bf16.msra.mxu0 %v8982_v34 }
 0x1b4   : > { %v2323_v57 = vpop.f32.mrf.mxu1  ;;  %v10396_v54 = vadd.f32 %v2321_v52, %v2129_v21  ;;  %v2131_v31 = vadd.f32 %v2130_v5, %v10174_v17  ;;  %3802 = vmatprep.subr.bf16.mxu0 %v8987_v3  ;;  %v8996_v21 = vld [vmem:[#allocation8 + $0x1c4] ss:$16 sps:$4 sm:$0xff]   ;;  %v9571_v5 = vld [vmem:[%s9900_s29 + $0xc8] ss:$24 sps:$4 sm:$0xff]  }
 0x1b5   : > { %v2132_v53 = vpop.f32.mrf.mxu0 }
 0x1b6   : > { %14456 = vst [vmem:[#allocation37_spill] sm:$0xff] %v10396_v54  ;;  %v2325_v60 = vpop.f32.mrf.mxu1  ;;  %v10399_v36 = vadd.f32 %v2323_v57, %v2131_v31  ;;  %v2133_v19 = vadd.f32 %v2132_v53, %v10168_v15  ;;  %v9572_v53 = vld [vmem:[%s9900_s29 + $0xfc] ss:$24 sps:$4 sm:$0xff]   ;;  %v9024_v54 = vld [vmem:[#allocation8 + $0x240] ss:$16 sps:$4 sm:$0xff]  }
 0x1b7   : > { %v2134_v42 = vpop.f32.mrf.mxu0  ;;  %3803 = vmatpush1.bf16.msra.mxu0 %v8985_v22 }
 0x1b8   : > { %14457 = vst [vmem:[#allocation38_spill] sm:$0xff] %v10399_v36  ;;  %v2327_v55 = vpop.f32.mrf.mxu1  ;;  %v10402_v34 = vadd.f32 %v2325_v60, %v2133_v19  ;;  %v2135_v52 = vadd.f32 %v2134_v42, %v10174_v17  ;;  %3804 = vmatprep.subr.bf16.mxu0 %v8990_v62  ;;  %v8994_v19 = vld [vmem:[#allocation8 + $0x1c0] ss:$16 sps:$4 sm:$0xff]  }
 0x1b9   : > { %v2138_v3 = vpop.f32.mrf.mxu0  ;;  %2789 = vmatmul.mubr.bf16.gmra.mxu0 %v9571_v5  ;;  %v8999_v5 = vld [vmem:[#allocation8 + $0x1a4] ss:$16 sps:$4 sm:$0xff]   ;;  %v9573_v36 = vld [vmem:[%s9900_s29 + $0xf8] ss:$24 sps:$4 sm:$0xff]  }
 0x1ba   : > { %14458 = vst [vmem:[#allocation39_spill] sm:$0xff] %v10402_v34  ;;  %v2331_v33 = vpop.f32.mrf.mxu1  ;;  %2950 = vmatmul.mubr.bf16.gmra.mxu1 %v10113_v4  ;;  %v10407_v57 = vadd.f32 %v2327_v55, %v2135_v52  ;;  %v2139_v31 = vadd.f32 %v2138_v3, %v10168_v15  ;;  %2796 = vmatprep.mubr.bf16.mxu0 %v9572_v53  ;;  %v9026_v4 = vld [vmem:[#allocation8 + $0x244] ss:$16 sps:$4 sm:$0xff]  }
 0x1bb   : > { %2957 = vmatprep.mubr.bf16.mxu1 %v10116_v7  ;;  %v2140_v22 = vpop.f32.mrf.mxu0  ;;  %3805 = vmatpush2.bf16.msra.mxu0 %v8988_v47 }
 0x1bc   : > { %v2333_v60 = vpop.f32.mrf.mxu1  ;;  %v10412_v62 = vadd.f32 %v2331_v33, %v2139_v31  ;;  %v2141_v42 = vadd.f32 %v2140_v22, %v10174_v17  ;;  %3806 = vmatprep.subr.bf16.mxu0 %v8996_v21  ;;  %3991 = vmatprep.subr.bf16.mxu1 %v9026_v4  ;;  %v8997_v33 = vld [vmem:[#allocation8 + $0x1a0] ss:$16 sps:$4 sm:$0xff]   ;;  %v9002_v22 = vld [vmem:[#allocation8 + $0x184] ss:$16 sps:$4 sm:$0xff]  }
 0x1bd   : > { %v2142_v55 = vpop.f32.mrf.mxu0  ;;  %3992 = vmatpush1.bf16.msra.mxu1 %v9024_v54  ;;  %v9574_v4 = vld [vmem:[%s9900_s29 + $0x12c] ss:$24 sps:$4 sm:$0xff]  }
 0x1be   : > { %14459 = vst [vmem:[#allocation40_spill] sm:$0xff] %v10412_v62  ;;  %v2335_v52 = vpop.f32.mrf.mxu1  ;;  %v10415_v3 = vadd.f32 %v2333_v60, %v2141_v42  ;;  %v2143_v53 = vadd.f32 %v2142_v55, %v10168_v15  ;;  %v9000_v55 = vld [vmem:[#allocation8 + $0x180] ss:$16 sps:$4 sm:$0xff]  }
 0x1bf   : > { %v2144_v7 = vpop.f32.mrf.mxu0  ;;  %3807 = vmatpush2.bf16.msra.mxu0 %v8994_v19 }
 0x1c0   : > { %v2337_v47 = vpop.f32.mrf.mxu1  ;;  %v10418_v31 = vadd.f32 %v2335_v52, %v2143_v53  ;;  %v2145_v21 = vadd.f32 %v2144_v7, %v10174_v17  ;;  %3808 = vmatprep.subr.bf16.mxu0 %v8999_v5 }
 0x1c1   : > { %v2148_v62 = vpop.f32.mrf.mxu0  ;;  %2797 = vmatmul.mubr.bf16.gmra.mxu0 %v9573_v36  ;;  %v9005_v36 = vld [vmem:[#allocation8 + $0x164] ss:$16 sps:$4 sm:$0xff]  }
 0x1c2   : > { %14460 = vst [vmem:[#allocation41_spill] sm:$0xff] %v10418_v31  ;;  %v2341_v34 = vpop.f32.mrf.mxu1  ;;  %2958 = vmatmul.mubr.bf16.gmra.mxu1 %v10123_v35  ;;  %v10423_v60 = vadd.f32 %v2337_v47, %v2145_v21  ;;  %v2149_v42 = vadd.f32 %v2148_v62, %v10168_v15  ;;  %2804 = vmatprep.mubr.bf16.mxu0 %v9574_v4  ;;  %v9003_v21 = vld [vmem:[#allocation8 + $0x160] ss:$16 sps:$4 sm:$0xff]  }
 0x1c3   : > { %2965 = vmatprep.mubr.bf16.mxu1 %v10126_v38  ;;  %v2150_v54 = vpop.f32.mrf.mxu0  ;;  %3809 = vmatpush2.bf16.msra.mxu0 %v8997_v33  ;;  %v9587_v31 = vld [vmem:[%s9900_s29 + $0x248] ss:$24 sps:$4 sm:$0xff]  }
 0x1c4   : > { %v2343_v19 = vpop.f32.mrf.mxu1  ;;  %v10428_v5 = vadd.f32 %v2341_v34, %v2149_v42  ;;  %v2151_v52 = vadd.f32 %v2150_v54, %v10174_v17  ;;  %3810 = vmatprep.subr.bf16.mxu0 %v9002_v22  ;;  %v9011_v42 = vld [vmem:[#allocation8 + $0x144] ss:$16 sps:$4 sm:$0xff]   ;;  %v9575_v54 = vld [vmem:[%s9900_s29 + $0x128] ss:$24 sps:$4 sm:$0xff]  }
 0x1c5   : > { %v2152_v35 = vpop.f32.mrf.mxu0 }
 0x1c6   : > { %14461 = vst [vmem:[#allocation42_spill] sm:$0xff] %v10428_v5  ;;  %v2345_v53 = vpop.f32.mrf.mxu1  ;;  %v10431_v7 = vadd.f32 %v2343_v19, %v2151_v52  ;;  %v2153_v62 = vadd.f32 %v2152_v35, %v10168_v15  ;;  %v9576_v35 = vld [vmem:[%s9900_s29 + $0x15c] ss:$24 sps:$4 sm:$0xff]   ;;  %v9027_v5 = vld [vmem:[#allocation8 + $0x220] ss:$16 sps:$4 sm:$0xff]  }
 0x1c7   : > { %v2154_v47 = vpop.f32.mrf.mxu0  ;;  %3811 = vmatpush2.bf16.msra.mxu0 %v9000_v55 }
 0x1c8   : > { %14462 = vst [vmem:[#allocation43_spill] sm:$0xff] %v10431_v7  ;;  %v2347_v38 = vpop.f32.mrf.mxu1  ;;  %v10434_v33 = vadd.f32 %v2345_v53, %v2153_v62  ;;  %v2155_v34 = vadd.f32 %v2154_v47, %v10174_v17  ;;  %3812 = vmatprep.subr.bf16.mxu0 %v9005_v36  ;;  %v9009_v62 = vld [vmem:[#allocation8 + $0x140] ss:$16 sps:$4 sm:$0xff]  }
 0x1c9   : > { %v2158_v22 = vpop.f32.mrf.mxu0  ;;  %2805 = vmatmul.mubr.bf16.gmra.mxu0 %v9575_v54  ;;  %v9014_v54 = vld [vmem:[#allocation8 + $0x124] ss:$16 sps:$4 sm:$0xff]   ;;  %v9577_v7 = vld [vmem:[%s9900_s29 + $0x158] ss:$24 sps:$4 sm:$0xff]  }
 0x1ca   : > { %14463 = vst [vmem:[#allocation44_spill] sm:$0xff] %v10434_v33  ;;  %v2351_v4 = vpop.f32.mrf.mxu1  ;;  %2966 = vmatmul.mubr.bf16.gmra.mxu1 %v10133_v9  ;;  %v10439_v19 = vadd.f32 %v2347_v38, %v2155_v34  ;;  %v2159_v52 = vadd.f32 %v2158_v22, %v10168_v15  ;;  %2812 = vmatprep.mubr.bf16.mxu0 %v9576_v35  ;;  %v9029_v9 = vld [vmem:[#allocation8 + $0x224] ss:$16 sps:$4 sm:$0xff]  }
 0x1cb   : > { %2973 = vmatprep.mubr.bf16.mxu1 %v10136_v45  ;;  %v2160_v55 = vpop.f32.mrf.mxu0  ;;  %3813 = vmatpush2.bf16.msra.mxu0 %v9003_v21 }
 0x1cc   : > { %14464 = vst [vmem:[#allocation45_spill] sm:$0xff] %v10439_v19  ;;  %v2353_v53 = vpop.f32.mrf.mxu1  ;;  %v10444_v36 = vadd.f32 %v2351_v4, %v2159_v52  ;;  %v2161_v47 = vadd.f32 %v2160_v55, %v10174_v17  ;;  %3814 = vmatprep.subr.bf16.mxu0 %v9011_v42  ;;  %3993 = vmatprep.subr.bf16.mxu1 %v9029_v9  ;;  %v9012_v4 = vld [vmem:[#allocation8 + $0x120] ss:$16 sps:$4 sm:$0xff]   ;;  %v9017_v55 = vld [vmem:[#allocation8 + $0x104] ss:$16 sps:$4 sm:$0xff]  }
 0x1cd   : > { %v2162_v38 = vpop.f32.mrf.mxu0  ;;  %3994 = vmatpush1.bf16.msra.mxu1 %v9027_v5  ;;  %v9578_v9 = vld [vmem:[%s9900_s29 + $0x18c] ss:$24 sps:$4 sm:$0xff]  }
 0x1ce   : > { %14465 = vst [vmem:[#allocation46_spill] sm:$0xff] %v10444_v36  ;;  %v2355_v34 = vpop.f32.mrf.mxu1  ;;  %v10447_v22 = vadd.f32 %v2353_v53, %v2161_v47  ;;  %v2163_v35 = vadd.f32 %v2162_v38, %v10168_v15  ;;  %v9015_v38 = vld [vmem:[#allocation8 + $0x100] ss:$16 sps:$4 sm:$0xff]  }
 0x1cf   : > { %v2164_v45 = vpop.f32.mrf.mxu0  ;;  %3815 = vmatpush2.bf16.msra.mxu0 %v9009_v62 }
 0x1d0   : > { %14466 = vst [vmem:[#allocation47_spill] sm:$0xff] %v10447_v22  ;;  %v2357_v21 = vpop.f32.mrf.mxu1  ;;  %v10450_v52 = vadd.f32 %v2355_v34, %v2163_v35  ;;  %v2165_v42 = vadd.f32 %v2164_v45, %v10174_v17  ;;  %3816 = vmatprep.subr.bf16.mxu0 %v9014_v54 }
 0x1d1   : > { %v2168_v36 = vpop.f32.mrf.mxu0  ;;  %2813 = vmatmul.mubr.bf16.gmra.mxu0 %v9577_v7 }
 0x1d2   : > { %14467 = vst [vmem:[#allocation48_spill] sm:$0xff] %v10450_v52  ;;  %v2361_v33 = vpop.f32.mrf.mxu1  ;;  %2974 = vmatmul.mubr.bf16.gmra.mxu1 %v10143_v56  ;;  %v10455_v53 = vadd.f32 %v2357_v21, %v2165_v42  ;;  %v2169_v47 = vadd.f32 %v2168_v36, %v10168_v15  ;;  %2820 = vmatprep.mubr.bf16.mxu0 %v9578_v9  ;;  %v9579_v9 = vld [vmem:[%s9900_s29 + $0x188] ss:$24 sps:$4 sm:$0xff]   ;;  %v9585_v52 = vld [vmem:[%s9900_s29 + $0x218] ss:$24 sps:$4 sm:$0xff]  }
 0x1d3   : > { %2981 = vmatprep.mubr.bf16.mxu1 %v10146_v11  ;;  %v2170_v5 = vpop.f32.mrf.mxu0  ;;  %3817 = vmatpush2.bf16.msra.mxu0 %v9012_v4  ;;  %v9032_v11 = vld [vmem:[#allocation8 + $0xec] ss:$16 sps:$4 sm:$0xff]  }
 0x1d4   : > { %14468 = vst [vmem:[#allocation49_spill] sm:$0xff] %v10455_v53  ;;  %v2363_v62 = vpop.f32.mrf.mxu1  ;;  %v10460_v54 = vadd.f32 %v2361_v33, %v2169_v47  ;;  %v2171_v34 = vadd.f32 %v2170_v5, %v10174_v17  ;;  %3818 = vmatprep.subr.bf16.mxu0 %v9017_v55  ;;  %v9580_v5 = vld [vmem:[%s9900_s29 + $0x1bc] ss:$24 sps:$4 sm:$0xff]  }
 0x1d5   : > { %v2172_v7 = vpop.f32.mrf.mxu0 }
 0x1d6   : > { %14469 = vst [vmem:[#allocation50_spill] sm:$0xff] %v10460_v54  ;;  %v2365_v56 = vpop.f32.mrf.mxu1  ;;  %v10463_v35 = vadd.f32 %v2363_v62, %v2171_v34  ;;  %v2173_v36 = vadd.f32 %v2172_v7, %v10168_v15  ;;  %v9033_v15 = vld [vmem:[#allocation8 + $0x200] ss:$16 sps:$4 sm:$0xff]   ;;  %v9035_v62 = vld [vmem:[#allocation8 + $0x204] ss:$16 sps:$4 sm:$0xff]  }
 0x1d7   : > { %v2174_v45 = vpop.f32.mrf.mxu0  ;;  %3819 = vmatpush2.bf16.msra.mxu0 %v9015_v38  ;;  %3995 = vmatprep.subr.bf16.mxu1 %v9035_v62  ;;  %v9583_v54 = vld [vmem:[%s9900_s29 + $0x1e8] ss:$24 sps:$4 sm:$0xff]  }
 0x1d8   : > { %14470 = vst [vmem:[#allocation51_spill] sm:$0xff] %v10463_v35  ;;  %v2367_v21 = vpop.f32.mrf.mxu1  ;;  %v10466_v42 = vadd.f32 %v2365_v56, %v2173_v36  ;;  %v2175_v4 = vadd.f32 %v2174_v45, %v10174_v17  ;;  %4174 = vmatprep.subr.bf16.mxu0 %v9032_v11  ;;  %3996 = vmatpush1.bf16.msra.mxu1 %v9033_v15  ;;  %v9582_v11 = vld [vmem:[%s9900_s29 + $0x1ec] ss:$24 sps:$4 sm:$0xff]  }
 0x1d9   : > { %v10469_v33 = vpop.f32.mrf.mxu0  ;;  %2821 = vmatmul.mubr.bf16.gmra.mxu0 %v9579_v9 }
 0x1da   : > { %14471 = vst [vmem:[#allocation52_spill] sm:$0xff] %v10466_v42  ;;  %v8233_v47 = vpop.f32.mrf.mxu1  ;;  %2982 = vmatmul.mubr.bf16.gmra.mxu1 %v10165_v14  ;;  %v10473_v55 = vadd.f32 %v2367_v21, %v2175_v4  ;;  %2828 = vmatprep.mubr.bf16.mxu0 %v9580_v5  ;;  %v9581_v4 = vld [vmem:[%s9900_s29 + $0x1b8] ss:$24 sps:$4 sm:$0xff]  }
 0x1db   : > { %2989 = vmatprep.mubr.bf16.mxu1 %v10171_v13  ;;  %v10477_v38 = vpop.f32.mrf.mxu0 }
 0x1dc   : > { %14472 = vst [vmem:[#allocation53_spill] sm:$0xff] %v10473_v55  ;;  %v8234_v17 = vpop.f32.mrf.mxu1 }
 0x1dd   : > { %v10479_v34 = vadd.f32 %v8234_v17, %v8233_v47  ;;  %v10481_v7 = vpop.f32.mrf.mxu0 }
 0x1de   : > { %v8236_v14 = vpop.f32.mrf.mxu1 }
 0x1df   : > { %v10483_v56 = vpop.f32.mrf.mxu0 }
 0x1e0   : > { %v8237_v36 = vpop.f32.mrf.mxu1 }
 0x1e1   : > { %v10485_v45 = vadd.f32 %v8237_v36, %v8236_v14  ;;  %v10487_v13 = vpop.f32.mrf.mxu0  ;;  %2829 = vmatmul.mubr.bf16.gmra.mxu0 %v9581_v4 }
 0x1e2   : > { %v8239_v21 = vpop.f32.mrf.mxu1  ;;  %2990 = vmatmul.mubr.bf16.gmra.mxu1 %v10185_v18  ;;  %2836 = vmatprep.mubr.bf16.mxu0 %v9582_v11 }
 0x1e3   : > { %2997 = vmatprep.mubr.bf16.mxu1 %v10191_v20  ;;  %v10493_v47 = vpop.f32.mrf.mxu0  ;;  %v9584_v20 = vld [vmem:[%s9900_s29 + $0x21c] ss:$24 sps:$4 sm:$0xff]  }
 0x1e4   : > { %v8240_v9 = vpop.f32.mrf.mxu1 }
 0x1e5   : > { %v10495_v5 = vadd.f32 %v8240_v9, %v8239_v21  ;;  %v10497_v15 = vpop.f32.mrf.mxu0  ;;  %v14216_v9 = vmov 0  }
 0x1e6   : > { %v8242_v62 = vpop.f32.mrf.mxu1  ;;  %8623 = vset.pattern.permute.xlu1 %v14216_v9  ;;  %8624 = vset.pattern.permute.xlu0 %v14216_v9  ;;  %v9586_v9 = vld [vmem:[%s9900_s29 + $0x24c] ss:$24 sps:$4 sm:$0xff]  }
 0x1e7   : > { %v10499_v17 = vpop.f32.mrf.mxu0 }
 0x1e8   : > { %v8243_v14 = vpop.f32.mrf.mxu1 }
 0x1e9   : > { %v10501_v36 = vadd.f32 %v8243_v14, %v8242_v62  ;;  %v10503_v4 = vpop.f32.mrf.mxu0  ;;  %2837 = vmatmul.mubr.bf16.gmra.mxu0 %v9583_v54 }
 0x1ea   : > { %v8245_v18 = vpop.f32.mrf.mxu1  ;;  %2998 = vmatmul.mubr.bf16.gmra.mxu1 %v10207_v23  ;;  %2844 = vmatprep.mubr.bf16.mxu0 %v9584_v20 }
 0x1eb   : > { %3005 = vmatprep.mubr.bf16.mxu1 %v10213_v25  ;;  %v10509_v21 = vpop.f32.mrf.mxu0  ;;  %v9050_v25 = vld [vmem:[#allocation8 + $0x2ec] ss:$16 sps:$4 sm:$0xff]  }
 0x1ec   : > { %v8246_v11 = vpop.f32.mrf.mxu1  ;;  %4367 = vmatprep.subr.bf16.mxu1 %v9050_v25 }
 0x1ed   : > { %v10513_v62 = vadd.f32 %v8246_v11, %v8245_v18  ;;  %v10515_v14 = vpop.f32.mrf.mxu0 }
 0x1ee   : > { %v8248_v54 = vpop.f32.mrf.mxu1 }
 0x1ef   : > { %14473 = vst [vmem:[#allocation54_spill] sm:$0xff] %v10513_v62  ;;  %v10517_v23 = vpop.f32.mrf.mxu0 }
 0x1f0   : > { %v8249_v20 = vpop.f32.mrf.mxu1 }
 0x1f1   : > { %v10519_v42 = vadd.f32 %v8249_v20, %v8248_v54  ;;  %v10521_v35 = vpop.f32.mrf.mxu0  ;;  %2845 = vmatmul.mubr.bf16.gmra.mxu0 %v9585_v52 }
 0x1f2   : > { %v8251_v55 = vpop.f32.mrf.mxu1  ;;  %3006 = vmatmul.mubr.bf16.gmra.mxu1 %v10229_v16  ;;  %2852 = vmatprep.mubr.bf16.mxu0 %v9586_v9 }
 0x1f3   : > { %14474 = vst [vmem:[#allocation55_spill] sm:$0xff] %v10519_v42  ;;  %3013 = vmatprep.mubr.bf16.mxu1 %v10235_v32  ;;  %v10527_v18 = vpop.f32.mrf.mxu0  ;;  %v9588_v32 = vld [vmem:[%s9900_s29 + $0x27c] ss:$24 sps:$4 sm:$0xff]   ;;  %v9589_v42 = vld [vmem:[%s9900_s29 + $0x278] ss:$24 sps:$4 sm:$0xff]  }
 0x1f4   : > { %v8252_v11 = vpop.f32.mrf.mxu1 }
 0x1f5   : > { %v10529_v54 = vadd.f32 %v8252_v11, %v8251_v55  ;;  %v10531_v20 = vpop.f32.mrf.mxu0 }
 0x1f6   : > { %v8254_v22 = vpop.f32.mrf.mxu1 }
 0x1f7   : > { %14475 = vst [vmem:[#allocation56_spill] sm:$0xff] %v10529_v54  ;;  %v10533_v53 = vpop.f32.mrf.mxu0 }
 0x1f8   : > { %v8255_v52 = vpop.f32.mrf.mxu1 }
 0x1f9   : > { %v10535_v19 = vadd.f32 %v8255_v52, %v8254_v22  ;;  %v10537_v16 = vpop.f32.mrf.mxu0  ;;  %2853 = vmatmul.mubr.bf16.gmra.mxu0 %v9587_v31 }
 0x1fa   : > { %v8257_v9 = vpop.f32.mrf.mxu1  ;;  %3014 = vmatmul.mubr.bf16.gmra.mxu1 %v10251_v10  ;;  %2860 = vmatprep.mubr.bf16.mxu0 %v9588_v32 }
 0x1fb   : > { %14476 = vst [vmem:[#allocation57_spill] sm:$0xff] %v10535_v19  ;;  %3021 = vmatprep.mubr.bf16.mxu1 %v10257_v40  ;;  %v10543_v55 = vpop.f32.mrf.mxu0  ;;  %v9590_v40 = vld [vmem:[%s9900_s29 + $0x2ac] ss:$24 sps:$4 sm:$0xff]  }
 0x1fc   : > { %v8258_v25 = vpop.f32.mrf.mxu1 }
 0x1fd   : > { %v10545_v11 = vadd.f32 %v8258_v25, %v8257_v9  ;;  %v10547_v22 = vpop.f32.mrf.mxu0 }
 0x1fe   : > { %v10549_v52 = vpop.f32.mrf.mxu1 }
 0x1ff   : > { %14477 = vst [vmem:[#allocation58_spill] sm:$0xff] %v10545_v11  ;;  %14478 = vst [vmem:[#allocation59_spill] sm:$0xff] %v10549_v52  ;;  %v10551_v19 = vpop.f32.mrf.mxu0 }
 0x200   : > { %v10553_v54 = vpop.f32.mrf.mxu1 }
 0x201   : > { %14479 = vst [vmem:[#allocation60_spill] sm:$0xff] %v10553_v54  ;;  %v10555_v31 = vpop.f32.mrf.mxu0  ;;  %2861 = vmatmul.mubr.bf16.gmra.mxu0 %v9589_v42 }
 0x202   : > { %v8263_v10 = vpop.f32.mrf.mxu1  ;;  %3022 = vmatmul.mubr.bf16.gmra.mxu1 %v10273_v59  ;;  %2868 = vmatprep.mubr.bf16.mxu0 %v9590_v40  ;;  %v10575_v59 = vadd.f32 %v10483_v56, %v10198_v27  ;;  %v9591_v40 = vld [vmem:[%s9900_s29 + $0x2a8] ss:$24 sps:$4 sm:$0xff]  }
 0x203   : > { %3029 = vmatprep.mubr.bf16.mxu1 %v10279_v39  ;;  %v10561_v9 = vpop.f32.mrf.mxu0 }
 0x204   : > { %v8264_v32 = vpop.f32.mrf.mxu1  ;;  %14483 = vst [vmem:[#allocation64_spill] sm:$0xff] %v10575_v59  ;;  %v14219_v56 = vmax.f32 %v10575_v59, 0.0 }
 0x205   : > { %v10563_v25 = vadd.f32 %v8264_v32, %v8263_v10  ;;  %v10565_v11 = vpop.f32.mrf.mxu0  ;;  %v10583_v10 = vadd.f32 %v10477_v38, %v10187_v41  ;;  %v9592_v32 = vld [vmem:[%s9900_s29 + $0x2dc] ss:$24 sps:$4 sm:$0xff]   ;;  %v10599_v41 = vadd.f32 %v10481_v7, %v10193_v29 }
 0x206   : > { %v10567_v54 = vpop.f32.mrf.mxu1 }
 0x207   : > { %14480 = vst [vmem:[#allocation61_spill] sm:$0xff] %v10563_v25  ;;  %14481 = vst [vmem:[#allocation62_spill] sm:$0xff] %v10567_v54  ;;  %v10569_v52 = vpop.f32.mrf.mxu0 }
 0x208   : > { %v10571_v62 = vpop.f32.mrf.mxu1  ;;  %14484 = vst [vmem:[#allocation65_spill] sm:$0xff] %v10583_v10  ;;  %14486 = vst [vmem:[#allocation67_spill] sm:$0xff] %v10599_v41 }
 0x209   : > { %14482 = vst [vmem:[#allocation63_spill] sm:$0xff] %v10571_v62  ;;  %v10577_v42 = vpop.f32.mrf.mxu0  ;;  %2869 = vmatmul.mubr.bf16.gmra.mxu0 %v9591_v40 }
 0x20a   : > { %v8269_v39 = vpop.f32.mrf.mxu1  ;;  %3030 = vmatmul.mubr.bf16.gmra.mxu1 %v10295_v12  ;;  %2876 = vmatprep.mubr.bf16.mxu0 %v9592_v32  ;;  %v14218_v12 = vmax.f32 %v10583_v10, 0.0  ;;  %v10607_v32 = vadd.f32 %v10499_v17, %v10220_v43  ;;  %v10625_v43 = vadd.f32 %v10493_v47, %v10209_v6  ;;  %v14491_v17 = vmov 0   ;;  %v9030_v47 = vld [vmem:[#allocation8 + $0xe8] ss:$16 sps:$4 sm:$0xff]  }
 0x20b   : > { %3037 = vmatprep.mubr.bf16.mxu1 %v10301_v24  ;;  %v10587_v25 = vpop.f32.mrf.mxu0 }
 0x20c   : > { %v8270_v27 = vpop.f32.mrf.mxu1  ;;  %14487 = vst [vmem:[#allocation68_spill] sm:$0xff] %v10607_v32  ;;  %14490 = vst [vmem:[#allocation71_spill] sm:$0xff] %v10625_v43  ;;  %v14227_v6 = vmax.f32 %v10625_v43, 0.0 }
 0x20d   : > { %v10590_v62 = vadd.f32 %v8270_v27, %v8269_v39  ;;  %v10592_v54 = vpop.f32.mrf.mxu0  ;;  %v10613_v39 = vpack.c.bf16 %v14219_v56, %v14218_v12  ;;  %v10617_v27 = vadd.f32 %v10469_v33, %v10181_v26  ;;  %v14226_v12 = vmax.f32 %v10599_v41, 0.0 }
 0x20e   : > { %v10594_v40 = vpop.f32.mrf.mxu1  ;;  %v10649_v33 = vadd.f32 %v10497_v15, %v10215_v30 }
 0x20f   : > { %14485 = vst [vmem:[#allocation66_spill] sm:$0xff] %v10594_v40  ;;  %v10601_v38 = vpop.f32.mrf.mxu0  ;;  %14488 = vst [vmem:[#allocation69_spill] sm:$0xff] %v10613_v39  ;;  %v9593_v40 = vld [vmem:[%s9900_s29 + $0x2d8] ss:$24 sps:$4 sm:$0xff]   ;;  %s422_s29 = scalar_lea.vmem %s14202_s9, %s7810_s20 }
 0x210   : > { %v10603_v24 = vpop.f32.mrf.mxu1  ;;  %14489 = vst [vmem:[#allocation70_spill] sm:$0xff] %v10617_v27  ;;  %14495 = vst [vmem:[#allocation75_spill] sm:$0xff] %v10649_v33 }
 0x211   : > { %v10619_v29 = vpop.f32.mrf.mxu0  ;;  %2877 = vmatmul.mubr.bf16.gmra.mxu0 %v9593_v40  ;;  %v14225_v40 = vmax.f32 %v10617_v27, 0.0  ;;  %v14497_v27 = vmax.f32 %v10607_v32, 0.0 }
 0x212   : > { %v8275_v7 = vpop.f32.mrf.mxu1  ;;  %3038 = vmatmul.mubr.bf16.gmra.mxu1 %v10317_v63  ;;  %3820 = vmatprep.mubr.bf16.mxu0 %v10613_v39 }
 0x213   : > { %4013 = vmatprep.mubr.bf16.mxu1 %v14491_v17  ;;  %v10630_v56 = vpop.f32.mrf.mxu0  ;;  %v10645_v39 = vpack.c.bf16 %v14226_v12, %v14225_v40  ;;  %v10663_v41 = vpack.c.bf16 %v14497_v27, %v14227_v6  ;;  %v10667_v40 = vadd.f32 %v10487_v13, %v10203_v1  ;;  %v10674_v12 = vadd.f32 %v10509_v21, %v10231_v37  ;;  %v9041_v1 = vld [vmem:[#allocation8 + $0xac] ss:$16 sps:$4 sm:$0xff]  }
 0x214   : > { %v8276_v26 = vpop.f32.mrf.mxu1 }
 0x215   : > { %v10633_v10 = vadd.f32 %v8276_v26, %v8275_v7  ;;  %v10636_v63 = vpop.f32.mrf.mxu0  ;;  %14494 = vst [vmem:[#allocation74_spill] sm:$0xff] %v10645_v39  ;;  %14498 = vst [vmem:[#allocation77_spill] sm:$0xff] %v10667_v40  ;;  %v14233_v43 = vmax.f32 %v10667_v40, 0.0  ;;  %v14234_v21 = vmax.f32 %v10674_v12, 0.0 }
 0x216   : > { %v10638_v59 = vpop.f32.mrf.mxu1  ;;  %14499 = vst [vmem:[#allocation78_spill] sm:$0xff] %v10674_v12 }
 0x217   : > { %14492 = vst [vmem:[#allocation72_spill] sm:$0xff] %v10633_v10  ;;  %14493 = vst [vmem:[#allocation73_spill] sm:$0xff] %v10638_v59  ;;  %v10651_v7 = vpop.f32.mrf.mxu0  ;;  %v9038_v10 = vld [vmem:[#allocation8 + $0xcc] ss:$16 sps:$4 sm:$0xff]   ;;  %v10657_v59 = vadd.f32 %v10517_v23, %v10242_v46  ;;  %v9036_v46 = vld [vmem:[#allocation8 + $0xc8] ss:$16 sps:$4 sm:$0xff]  }
 0x218   : > { %v10653_v26 = vpop.f32.mrf.mxu1  ;;  %v14232_v23 = vmax.f32 %v10649_v33, 0.0 }
 0x219   : > { %14496 = vst [vmem:[#allocation76_spill] sm:$0xff] %v10657_v59  ;;  %v10669_v30 = vpop.f32.mrf.mxu0  ;;  %3821 = vmatmul.mubr.bf16.vlgmr.msra.gmra.mxu0 %v10645_v39  ;;  %v14503_v33 = vmax.f32 %v10657_v59, 0.0 }
 0x21a   : > { %v8281_v15 = vpop.f32.mrf.mxu1  ;;  %3830 = vmatprep.mubr.bf16.mxu0 %v10663_v41  ;;  %4175 = vmatpush1.bf16.msra.mxu0 %v9030_v47  ;;  %v9039_v47 = vld [vmem:[#allocation8 + $0xa8] ss:$16 sps:$4 sm:$0xff]  }
 0x21b   : > { %v10678_v27 = vpop.f32.mrf.mxu0  ;;  %4176 = vmatprep.subr.bf16.mxu0 %v9038_v10  ;;  %v10693_v10 = vpack.c.bf16 %v14232_v23, %v14233_v43  ;;  %v10711_v23 = vpack.c.bf16 %v14503_v33, %v14234_v21 }
 0x21c   : > { %v8282_v6 = vpop.f32.mrf.mxu1 }
 0x21d   : > { %v10681_v32 = vadd.f32 %v8282_v6, %v8281_v15  ;;  %v10684_v39 = vpop.f32.mrf.mxu0  ;;  %v10697_v6 = vadd.f32 %v10515_v14, %v10237_v28  ;;  %14504 = vst [vmem:[#allocation82_spill] sm:$0xff] %v10711_v23  ;;  %v10715_v28 = vadd.f32 %v10503_v4, %v10225_v58  ;;  %v9047_v58 = vld [vmem:[#allocation8 + $0x6c] ss:$16 sps:$4 sm:$0xff]  }
 0x21e   : > { %v10686_v37 = vpop.f32.mrf.mxu1  ;;  %4177 = vmatpush1.bf16.msra.mxu0 %v9036_v46  ;;  %v10705_v46 = vadd.f32 %v10533_v53, %v10264_v51  ;;  %v9042_v51 = vld [vmem:[#allocation8 + $0x88] ss:$16 sps:$4 sm:$0xff]  }
 0x21f   : > { %14500 = vst [vmem:[#allocation79_spill] sm:$0xff] %v10686_v37  ;;  %14501 = vst [vmem:[#allocation80_spill] sm:$0xff] %v10697_v6  ;;  %v10699_v15 = vpop.f32.mrf.mxu0  ;;  %4178 = vmatprep.subr.bf16.mxu0 %v9041_v1  ;;  %v9044_v37 = vld [vmem:[#allocation8 + $0x8c] ss:$16 sps:$4 sm:$0xff]   ;;  %v10722_v1 = vadd.f32 %v10527_v18, %v10253_v48  ;;  %v14240_v53 = vmax.f32 %v10697_v6, 0.0  ;;  %v14241_v12 = vmax.f32 %v10715_v28, 0.0 }
 0x220   : > { %v10701_v13 = vpop.f32.mrf.mxu1  ;;  %14502 = vst [vmem:[#allocation81_spill] sm:$0xff] %v10705_v46  ;;  %14505 = vst [vmem:[#allocation83_spill] sm:$0xff] %v10715_v28  ;;  %v14515_v6 = vmax.f32 %v10705_v46, 0.0 }
 0x221   : > { %v10717_v14 = vpop.f32.mrf.mxu0  ;;  %3831 = vmatmul.mubr.bf16.gmra.mxu0 %v10693_v10  ;;  %14506 = vst [vmem:[#allocation84_spill] sm:$0xff] %v10722_v1  ;;  %v14243_v18 = vmax.f32 %v10722_v1, 0.0 }
 0x222   : > { %v8287_v43 = vpop.f32.mrf.mxu1  ;;  %3840 = vmatprep.mubr.bf16.mxu0 %v10711_v23  ;;  %4179 = vmatpush1.bf16.msra.mxu0 %v9039_v47  ;;  %v9045_v47 = vld [vmem:[#allocation8 + $0x68] ss:$16 sps:$4 sm:$0xff]   ;;  %v14510_v23 = vld [vmem:[#allocation15_spill] sm:$0xff] }
 0x223   : > { %v10726_v33 = vpop.f32.mrf.mxu0  ;;  %4180 = vmatprep.subr.bf16.mxu0 %v9044_v37  ;;  %v10741_v37 = vpack.c.bf16 %v14240_v53, %v14241_v12  ;;  %v10759_v53 = vpack.c.bf16 %v14515_v6, %v14243_v18  ;;  %v14517_v12 = vld [vmem:[#allocation14_spill] sm:$0xff] }
 0x224   : > { %v8288_v21 = vpop.f32.mrf.mxu1 }
 0x225   : > { %v10729_v59 = vadd.f32 %v8288_v21, %v8287_v43  ;;  %v10732_v40 = vpop.f32.mrf.mxu0  ;;  %14509 = vst [vmem:[#allocation87_spill] sm:$0xff] %v10741_v37  ;;  %v10745_v43 = vadd.f32 %v10531_v20, %v14510_v23  ;;  %14516 = vst [vmem:[#allocation89_spill] sm:$0xff] %v10759_v53  ;;  %v10763_v20 = vadd.f32 %v10521_v35, %v14517_v12  ;;  %v9056_v35 = vld [vmem:[#allocation8 + $0x2c] ss:$16 sps:$4 sm:$0xff]  }
 0x226   : > { %v10734_v48 = vpop.f32.mrf.mxu1  ;;  %4181 = vmatpush1.bf16.msra.mxu0 %v9042_v51 }
 0x227   : > { %14507 = vst [vmem:[#allocation85_spill] sm:$0xff] %v10729_v59  ;;  %14508 = vst [vmem:[#allocation86_spill] sm:$0xff] %v10734_v48  ;;  %v10747_v21 = vpop.f32.mrf.mxu0  ;;  %4182 = vmatprep.subr.bf16.mxu0 %v9047_v58  ;;  %v9053_v48 = vld [vmem:[#allocation8 + $0x4c] ss:$16 sps:$4 sm:$0xff]   ;;  %v14513_v59 = vld [vmem:[#allocation19_spill] sm:$0xff]  ;;  %v14250_v1 = vmax.f32 %v10763_v20, 0.0 }
 0x228   : > { %14511 = vst [vmem:[#allocation15_spill] sm:$0xff] %v10745_v43  ;;  %v10749_v4 = vpop.f32.mrf.mxu1  ;;  %v10753_v51 = vadd.f32 %v10551_v19, %v14513_v59  ;;  %14518 = vst [vmem:[#allocation14_spill] sm:$0xff] %v10763_v20  ;;  %v14519_v58 = vld [vmem:[#allocation17_spill] sm:$0xff]  ;;  %v9051_v19 = vld [vmem:[#allocation8 + $0x48] ss:$16 sps:$4 sm:$0xff]   ;;  %v14249_v59 = vmax.f32 %v10745_v43, 0.0 }
 0x229   : > { %14512 = vst [vmem:[#allocation88_spill] sm:$0xff] %v10749_v4  ;;  %v10765_v23 = vpop.f32.mrf.mxu0  ;;  %3841 = vmatmul.mubr.bf16.gmra.mxu0 %v10741_v37  ;;  %v10770_v4 = vadd.f32 %v10543_v55, %v14519_v58  ;;  %v9054_v58 = vld [vmem:[#allocation8 + $0x28] ss:$16 sps:$4 sm:$0xff]  }
 0x22a   : > { %14514 = vst [vmem:[#allocation19_spill] sm:$0xff] %v10753_v51  ;;  %v8293_v28 = vpop.f32.mrf.mxu1  ;;  %3850 = vmatprep.mubr.bf16.mxu0 %v10759_v53  ;;  %4183 = vmatpush1.bf16.msra.mxu0 %v9045_v47  ;;  %v14524_v53 = vld [vmem:[#allocation18_spill] sm:$0xff]  ;;  %v14529_v43 = vmax.f32 %v10753_v51, 0.0 }
 0x22b   : > { %14520 = vst [vmem:[#allocation17_spill] sm:$0xff] %v10770_v4  ;;  %v10774_v6 = vpop.f32.mrf.mxu0  ;;  %4184 = vmatprep.subr.bf16.mxu0 %v9053_v48  ;;  %v14252_v47 = vmax.f32 %v10770_v4, 0.0  ;;  %v10789_v48 = vpack.c.bf16 %v14249_v59, %v14250_v1  ;;  %v14531_v1 = vld [vmem:[#allocation16_spill] sm:$0xff] }
 0x22c   : > { %v8294_v18 = vpop.f32.mrf.mxu1 }
 0x22d   : > { %v10777_v46 = vadd.f32 %v8294_v18, %v8293_v28  ;;  %v10780_v37 = vpop.f32.mrf.mxu0  ;;  %14523 = vst [vmem:[#allocation92_spill] sm:$0xff] %v10789_v48  ;;  %v10793_v28 = vadd.f32 %v10547_v22, %v14524_v53  ;;  %v10807_v59 = vpack.c.bf16 %v14529_v43, %v14252_v47  ;;  %v10811_v22 = vadd.f32 %v10537_v16, %v14531_v1  ;;  %v9062_v16 = vld [vmem:[#allocation8 + $0x1ec] ss:$16 sps:$4 sm:$0xff]  }
 0x22e   : > { %v10782_v55 = vpop.f32.mrf.mxu1  ;;  %4185 = vmatpush1.bf16.msra.mxu0 %v9051_v19 }
 0x22f   : > { %14521 = vst [vmem:[#allocation90_spill] sm:$0xff] %v10777_v46  ;;  %14522 = vst [vmem:[#allocation91_spill] sm:$0xff] %v10782_v55  ;;  %v10795_v18 = vpop.f32.mrf.mxu0  ;;  %4186 = vmatprep.subr.bf16.mxu0 %v9056_v35  ;;  %v9059_v55 = vld [vmem:[#allocation8 + $0xc] ss:$16 sps:$4 sm:$0xff]   ;;  %v14527_v46 = vld [vmem:[#allocation23_spill] sm:$0xff]  ;;  %v14258_v51 = vmax.f32 %v10811_v22, 0.0 }
 0x230   : > { %14525 = vst [vmem:[#allocation18_spill] sm:$0xff] %v10793_v28  ;;  %v10797_v12 = vpop.f32.mrf.mxu1  ;;  %v10801_v19 = vadd.f32 %v10569_v52, %v14527_v46  ;;  %14530 = vst [vmem:[#allocation94_spill] sm:$0xff] %v10807_v59  ;;  %v14533_v35 = vld [vmem:[#allocation21_spill] sm:$0xff]  ;;  %v9057_v52 = vld [vmem:[#allocation8 + $0x8] ss:$16 sps:$4 sm:$0xff]   ;;  %v14259_v46 = vmax.f32 %v10793_v28, 0.0 }
 0x231   : > { %14526 = vst [vmem:[#allocation93_spill] sm:$0xff] %v10797_v12  ;;  %14532 = vst [vmem:[#allocation16_spill] sm:$0xff] %v10811_v22  ;;  %v10813_v53 = vpop.f32.mrf.mxu0  ;;  %3851 = vmatmul.mubr.bf16.gmra.mxu0 %v10789_v48  ;;  %v10818_v12 = vadd.f32 %v10561_v9, %v14533_v35  ;;  %v9060_v35 = vld [vmem:[#allocation8 + $0x1e8] ss:$16 sps:$4 sm:$0xff]  }
 0x232   : > { %14528 = vst [vmem:[#allocation23_spill] sm:$0xff] %v10801_v19  ;;  %v8299_v20 = vpop.f32.mrf.mxu1  ;;  %3860 = vmatprep.mubr.bf16.mxu0 %v10807_v59  ;;  %4187 = vmatpush1.bf16.msra.mxu0 %v9054_v58  ;;  %v14538_v59 = vld [vmem:[#allocation22_spill] sm:$0xff]  ;;  %v14543_v22 = vmax.f32 %v10801_v19, 0.0 }
 0x233   : > { %14534 = vst [vmem:[#allocation21_spill] sm:$0xff] %v10818_v12  ;;  %v10822_v43 = vpop.f32.mrf.mxu0  ;;  %4188 = vmatprep.subr.bf16.mxu0 %v9059_v55  ;;  %v14261_v58 = vmax.f32 %v10818_v12, 0.0  ;;  %v10837_v55 = vpack.c.bf16 %v14259_v46, %v14258_v51  ;;  %v14545_v46 = vld [vmem:[#allocation20_spill] sm:$0xff] }
 0x234   : > { %v8300_v47 = vpop.f32.mrf.mxu1 }
 0x235   : > { %v10825_v4 = vadd.f32 %v8300_v47, %v8299_v20  ;;  %v10828_v48 = vpop.f32.mrf.mxu0  ;;  %14537 = vst [vmem:[#allocation97_spill] sm:$0xff] %v10837_v55  ;;  %v10841_v20 = vadd.f32 %v10565_v11, %v14538_v59  ;;  %v10855_v51 = vpack.c.bf16 %v14543_v22, %v14261_v58  ;;  %v10859_v11 = vadd.f32 %v10555_v31, %v14545_v46  ;;  %v9071_v31 = vld [vmem:[#allocation8 + $0x1ac] ss:$16 sps:$4 sm:$0xff]  }
 0x236   : > { %v10830_v9 = vpop.f32.mrf.mxu1  ;;  %4189 = vmatpush1.bf16.msra.mxu0 %v9057_v52 }
 0x237   : > { %14535 = vst [vmem:[#allocation95_spill] sm:$0xff] %v10825_v4  ;;  %14536 = vst [vmem:[#allocation96_spill] sm:$0xff] %v10830_v9  ;;  %v10843_v47 = vpop.f32.mrf.mxu0  ;;  %4190 = vmatprep.subr.bf16.mxu0 %v9062_v16  ;;  %v9068_v9 = vld [vmem:[#allocation8 + $0x1cc] ss:$16 sps:$4 sm:$0xff]   ;;  %v14541_v4 = vld [vmem:[#allocation27_spill] sm:$0xff]  ;;  %v14268_v12 = vmax.f32 %v10859_v11, 0.0 }
 0x238   : > { %14539 = vst [vmem:[#allocation22_spill] sm:$0xff] %v10841_v20  ;;  %v10845_v1 = vpop.f32.mrf.mxu1  ;;  %v10849_v52 = vadd.f32 %v10601_v38, %v14541_v4  ;;  %14544 = vst [vmem:[#allocation99_spill] sm:$0xff] %v10855_v51  ;;  %v14547_v16 = vld [vmem:[#allocation25_spill] sm:$0xff]  ;;  %v9066_v38 = vld [vmem:[#allocation8 + $0x1c8] ss:$16 sps:$4 sm:$0xff]   ;;  %v14267_v4 = vmax.f32 %v10841_v20, 0.0 }
 0x239   : > { %14540 = vst [vmem:[#allocation98_spill] sm:$0xff] %v10845_v1  ;;  %14546 = vst [vmem:[#allocation20_spill] sm:$0xff] %v10859_v11  ;;  %v10861_v59 = vpop.f32.mrf.mxu0  ;;  %3861 = vmatmul.mubr.bf16.gmra.mxu0 %v10837_v55  ;;  %v10866_v1 = vadd.f32 %v10587_v25, %v14547_v16  ;;  %v9069_v16 = vld [vmem:[#allocation8 + $0x1a8] ss:$16 sps:$4 sm:$0xff]  }
 0x23a   : > { %14542 = vst [vmem:[#allocation27_spill] sm:$0xff] %v10849_v52  ;;  %v8305_v28 = vpop.f32.mrf.mxu1  ;;  %3870 = vmatprep.mubr.bf16.mxu0 %v10855_v51  ;;  %4191 = vmatpush2.bf16.msra.mxu0 %v9060_v35  ;;  %v14552_v51 = vld [vmem:[#allocation26_spill] sm:$0xff]  ;;  %v14557_v20 = vmax.f32 %v10849_v52, 0.0 }
 0x23b   : > { %14548 = vst [vmem:[#allocation25_spill] sm:$0xff] %v10866_v1  ;;  %v10870_v22 = vpop.f32.mrf.mxu0  ;;  %4192 = vmatprep.subr.bf16.mxu0 %v9068_v9  ;;  %v14270_v35 = vmax.f32 %v10866_v1, 0.0  ;;  %v10885_v9 = vpack.c.bf16 %v14267_v4, %v14268_v12  ;;  %v14559_v12 = vld [vmem:[#allocation24_spill] sm:$0xff] }
 0x23c   : > { %v8306_v58 = vpop.f32.mrf.mxu1 }
 0x23d   : > { %v10873_v19 = vadd.f32 %v8306_v58, %v8305_v28  ;;  %v10876_v55 = vpop.f32.mrf.mxu0  ;;  %14551 = vst [vmem:[#allocation102_spill] sm:$0xff] %v10885_v9  ;;  %v10889_v28 = vadd.f32 %v10592_v54, %v14552_v51  ;;  %v10903_v4 = vpack.c.bf16 %v14557_v20, %v14270_v35  ;;  %v10907_v54 = vadd.f32 %v10577_v42, %v14559_v12  ;;  %v9077_v42 = vld [vmem:[#allocation8 + $0x16c] ss:$16 sps:$4 sm:$0xff]  }
 0x23e   : > { %v10878_v25 = vpop.f32.mrf.mxu1  ;;  %4193 = vmatpush2.bf16.msra.mxu0 %v9066_v38 }
 0x23f   : > { %14549 = vst [vmem:[#allocation100_spill] sm:$0xff] %v10873_v19  ;;  %14550 = vst [vmem:[#allocation101_spill] sm:$0xff] %v10878_v25  ;;  %v10891_v58 = vpop.f32.mrf.mxu0  ;;  %4194 = vmatprep.subr.bf16.mxu0 %v9071_v31  ;;  %v9074_v25 = vld [vmem:[#allocation8 + $0x18c] ss:$16 sps:$4 sm:$0xff]   ;;  %v14555_v19 = vld [vmem:[#allocation31_spill] sm:$0xff]  ;;  %v14276_v52 = vmax.f32 %v10907_v54, 0.0 }
 0x240   : > { %14553 = vst [vmem:[#allocation26_spill] sm:$0xff] %v10889_v28  ;;  %v10893_v46 = vpop.f32.mrf.mxu1  ;;  %v10897_v38 = vadd.f32 %v10651_v7, %v14555_v19  ;;  %14558 = vst [vmem:[#allocation104_spill] sm:$0xff] %v10903_v4  ;;  %v14561_v31 = vld [vmem:[#allocation29_spill] sm:$0xff]  ;;  %v9072_v7 = vld [vmem:[#allocation8 + $0x188] ss:$16 sps:$4 sm:$0xff]   ;;  %v14277_v19 = vmax.f32 %v10889_v28, 0.0 }
 0x241   : > { %14554 = vst [vmem:[#allocation103_spill] sm:$0xff] %v10893_v46  ;;  %14560 = vst [vmem:[#allocation24_spill] sm:$0xff] %v10907_v54  ;;  %v10909_v51 = vpop.f32.mrf.mxu0  ;;  %3871 = vmatmul.mubr.bf16.gmra.mxu0 %v10885_v9  ;;  %v10914_v46 = vadd.f32 %v10630_v56, %v14561_v31  ;;  %v9075_v31 = vld [vmem:[#allocation8 + $0x168] ss:$16 sps:$4 sm:$0xff]  }
 0x242   : > { %14556 = vst [vmem:[#allocation31_spill] sm:$0xff] %v10897_v38  ;;  %v8311_v11 = vpop.f32.mrf.mxu1  ;;  %3880 = vmatprep.mubr.bf16.mxu0 %v10903_v4  ;;  %4195 = vmatpush2.bf16.msra.mxu0 %v9069_v16  ;;  %v14565_v4 = vld [vmem:[#allocation30_spill] sm:$0xff]  ;;  %v14568_v54 = vmax.f32 %v10897_v38, 0.0 }
 0x243   : > { %14562 = vst [vmem:[#allocation29_spill] sm:$0xff] %v10914_v46  ;;  %v10918_v20 = vpop.f32.mrf.mxu0  ;;  %4196 = vmatprep.subr.bf16.mxu0 %v9074_v25  ;;  %v14279_v16 = vmax.f32 %v10914_v46, 0.0  ;;  %v10933_v25 = vpack.c.bf16 %v14277_v19, %v14276_v52  ;;  %v14569_v19 = vld [vmem:[#allocation28_spill] sm:$0xff] }
 0x244   : > { %v8312_v35 = vpop.f32.mrf.mxu1 }
 0x245   : > { %v10921_v1 = vadd.f32 %v8312_v35, %v8311_v11  ;;  %v10924_v9 = vpop.f32.mrf.mxu0  ;;  %14564 = vst [vmem:[#allocation106_spill] sm:$0xff] %v10933_v25  ;;  %v10937_v11 = vadd.f32 %v10636_v63, %v14565_v4  ;;  %v10951_v52 = vpack.c.bf16 %v14568_v54, %v14279_v16  ;;  %v10955_v63 = vadd.f32 %v10619_v29, %v14569_v19  ;;  %v9086_v29 = vld [vmem:[#allocation8 + $0x12c] ss:$16 sps:$4 sm:$0xff]  }
 0x246   : > { %v10926_v56 = vpop.f32.mrf.mxu1  ;;  %4197 = vmatpush2.bf16.msra.mxu0 %v9072_v7  ;;  %v10945_v7 = vadd.f32 %v10699_v15, %v10359_v0  ;;  %v9081_v0 = vld [vmem:[#allocation8 + $0x148] ss:$16 sps:$4 sm:$0xff]  }
 0x247   : > { %14563 = vst [vmem:[#allocation105_spill] sm:$0xff] %v10926_v56  ;;  %14566 = vst [vmem:[#allocation30_spill] sm:$0xff] %v10937_v11  ;;  %v10939_v35 = vpop.f32.mrf.mxu0  ;;  %4198 = vmatprep.subr.bf16.mxu0 %v9077_v42  ;;  %v9083_v56 = vld [vmem:[#allocation8 + $0x14c] ss:$16 sps:$4 sm:$0xff]   ;;  %v10962_v42 = vadd.f32 %v10678_v27, %v10351_v50  ;;  %v14285_v15 = vmax.f32 %v10937_v11, 0.0  ;;  %v14284_v38 = vmax.f32 %v10955_v63, 0.0 }
 0x248   : > { %v10941_v12 = vpop.f32.mrf.mxu1  ;;  %14567 = vst [vmem:[#allocation107_spill] sm:$0xff] %v10945_v7  ;;  %14570 = vst [vmem:[#allocation28_spill] sm:$0xff] %v10955_v63  ;;  %v14576_v63 = vmax.f32 %v10945_v7, 0.0 }
 0x249   : > { %v10957_v4 = vpop.f32.mrf.mxu0  ;;  %3881 = vmatmul.mubr.bf16.gmra.mxu0 %v10933_v25  ;;  %14571 = vst [vmem:[#allocation108_spill] sm:$0xff] %v10962_v42  ;;  %v14287_v27 = vmax.f32 %v10962_v42, 0.0 }
 0x24a   : > { %v8317_v28 = vpop.f32.mrf.mxu1  ;;  %3890 = vmatprep.mubr.bf16.mxu0 %v10951_v52  ;;  %4199 = vmatpush2.bf16.msra.mxu0 %v9075_v31  ;;  %v9084_v31 = vld [vmem:[#allocation8 + $0x128] ss:$16 sps:$4 sm:$0xff]  }
 0x24b   : > { %v10966_v54 = vpop.f32.mrf.mxu0  ;;  %4200 = vmatprep.subr.bf16.mxu0 %v9083_v56  ;;  %v10981_v56 = vpack.c.bf16 %v14285_v15, %v14284_v38  ;;  %v10999_v38 = vpack.c.bf16 %v14576_v63, %v14287_v27  ;;  %v14578_v15 = vld [vmem:[#allocation32_spill] sm:$0xff] }
 0x24c   : > { %v8318_v16 = vpop.f32.mrf.mxu1 }
 0x24d   : > { %v10969_v46 = vadd.f32 %v8318_v16, %v8317_v28  ;;  %v10972_v25 = vpop.f32.mrf.mxu0  ;;  %v10985_v28 = vadd.f32 %v10684_v39, %v10354_v49  ;;  %14577 = vst [vmem:[#allocation113_spill] sm:$0xff] %v10999_v38  ;;  %v11003_v49 = vadd.f32 %v10669_v30, %v14578_v15  ;;  %v14582_v30 = vld [vmem:[#allocation11_spill] sm:$0xff] }
 0x24e   : > { %v10974_v50 = vpop.f32.mrf.mxu1  ;;  %4201 = vmatpush2.bf16.msra.mxu0 %v9081_v0  ;;  %v10993_v0 = vadd.f32 %v10747_v21, %v10375_v8  ;;  %v9087_v8 = vld [vmem:[#allocation8 + $0x108] ss:$16 sps:$4 sm:$0xff]   ;;  %v11017_v15 = vsub.s32 2, %v14582_v30  ;;  %v14586_v30 = vld [vmem:[#allocation35_spill] sm:$0xff] }
 0x24f   : > { %14572 = vst [vmem:[#allocation109_spill] sm:$0xff] %v10974_v50  ;;  %14573 = vst [vmem:[#allocation110_spill] sm:$0xff] %v10985_v28  ;;  %v10987_v16 = vpop.f32.mrf.mxu0  ;;  %4202 = vmatprep.subr.bf16.mxu0 %v9086_v29  ;;  %v9089_v50 = vld [vmem:[#allocation8 + $0x10c] ss:$16 sps:$4 sm:$0xff]   ;;  %v14292_v21 = vmax.f32 %v10985_v28, 0.0  ;;  %v11036_v42 = vadd.f32 %v10732_v40, %v14586_v30 }
 0x250   : > { %v10989_v19 = vpop.f32.mrf.mxu1  ;;  %14575 = vst [vmem:[#allocation112_spill] sm:$0xff] %v10993_v0  ;;  %14579 = vst [vmem:[#allocation32_spill] sm:$0xff] %v11003_v49  ;;  %v14580_v29 = vld [vmem:[#allocation34_spill] sm:$0xff]  ;;  %v14591_v40 = vmax.f32 %v10993_v0, 0.0 }
 0x251   : > { %14574 = vst [vmem:[#allocation111_spill] sm:$0xff] %v10989_v19  ;;  %v11005_v39 = vpop.f32.mrf.mxu0  ;;  %3891 = vmatmul.mubr.bf16.gmra.mxu0 %v10981_v56  ;;  %v11010_v19 = vadd.f32 %v10726_v33, %v14580_v29  ;;  %14583 = vst [vmem:[#allocation114_spill] sm:$0xff] %v11017_v15  ;;  %v14291_v33 = vmax.f32 %v11003_v49, 0.0 }
 0x252   : > { %v8323_v11 = vpop.f32.mrf.mxu1  ;;  %3900 = vmatprep.mubr.bf16.mxu0 %v10999_v38  ;;  %4203 = vmatpush2.bf16.msra.mxu0 %v9084_v31  ;;  %14587 = vst [vmem:[#allocation35_spill] sm:$0xff] %v11036_v42  ;;  %v11050_v31 = vadd.f32 %v10795_v18, %v10391_v2  ;;  %v14303_v2 = vmax.f32 %v11036_v42, 0.0  ;;  %v14601_v42 = vld [vmem:[#allocation38_spill] sm:$0xff] }
 0x253   : > { %14581 = vst [vmem:[#allocation34_spill] sm:$0xff] %v11010_v19  ;;  %v11014_v63 = vpop.f32.mrf.mxu0  ;;  %4204 = vmatprep.subr.bf16.mxu0 %v9089_v50  ;;  %v11032_v50 = vpack.c.bf16 %v14292_v21, %v14291_v33  ;;  %v14590_v33 = vmax.f32 %v11010_v19, 0.0  ;;  %v14593_v21 = vld [vmem:[#allocation33_spill] sm:$0xff] }
 0x254   : > { %v8324_v27 = vpop.f32.mrf.mxu1  ;;  %14589 = vst [vmem:[#allocation118_spill] sm:$0xff] %v11050_v31  ;;  %v11060_v49 = vadd.f32 %v10717_v14, %v14593_v21  ;;  %v11088_v14 = vadd.f32 %v10843_v47, %v10407_v57  ;;  %v11103_v57 = vadd.f32 %v10822_v43, %v14601_v42 }
 0x255   : > { %v11020_v7 = vadd.f32 %v8324_v27, %v8323_v11  ;;  %v11023_v29 = vpop.f32.mrf.mxu0  ;;  %14585 = vst [vmem:[#allocation116_spill] sm:$0xff] %v11032_v50  ;;  %v11056_v30 = vpack.c.bf16 %v14591_v40, %v14590_v33 }
 0x256   : > { %v11025_v38 = vpop.f32.mrf.mxu1  ;;  %4205 = vmatpush2.bf16.msra.mxu0 %v9087_v8  ;;  %14594 = vst [vmem:[#allocation33_spill] sm:$0xff] %v11060_v49  ;;  %v14302_v40 = vmax.f32 %v11060_v49, 0.0  ;;  %14597 = vst [vmem:[#allocation122_spill] sm:$0xff] %v11088_v14 }
 0x257   : > { %14584 = vst [vmem:[#allocation115_spill] sm:$0xff] %v11025_v38  ;;  %v11038_v11 = vpop.f32.mrf.mxu0  ;;  %v9594_v38 = vld [vmem:[%s14196_s2] sm:$0x7]  ;;  %14592 = vst [vmem:[#allocation119_spill] sm:$0xff] %v11056_v30 }
 0x258   : > { %v11040_v27 = vpop.f32.mrf.mxu1  ;;  %v11046_v8 = vrot.slane %v9594_v38, %v11017_v15  ;;  %v11065_v38 = vadd.f32 %v10774_v6, %v10383_v44  ;;  %14602 = vst [vmem:[#allocation38_spill] sm:$0xff] %v11103_v57 }
 0x259   : > { %14588 = vst [vmem:[#allocation117_spill] sm:$0xff] %v11040_v27  ;;  %v8345_v28 = vpop.f32.mrf.mxu0  ;;  %3901 = vmatmul.mubr.bf16.gmra.mxu0 %v11032_v50 }
 0x25a   : > { %v8457_v27 = vpop.f32.mrf.mxu1  ;;  %14595 = vst [vmem:[#allocation120_spill] sm:$0xff] %v11065_v38  ;;  %3910 = vmatprep.mubr.bf16.mxu0 %v11056_v30  ;;  %v2598_v33 = vadd.f32 %v10479_v34, %v11046_v8  ;;  %v14305_v50 = vmax.f32 %v11065_v38, 0.0  ;;  %v2601_v6 = vadd.f32 %v10485_v45, %v11046_v8  ;;  %v11080_v30 = vpack.c.bf16 %v14303_v2, %v14302_v40  ;;  %v14599_v40 = vld [vmem:[#allocation36_spill] sm:$0xff] }
 0x25b   : > { %v8346_v18 = vpop.f32.mrf.mxu0  ;;  %v11084_v34 = vadd.f32 %v10780_v37, %v10386_v61  ;;  %v14598_v45 = vmax.f32 %v11050_v31, 0.0  ;;  %v11098_v2 = vadd.f32 %v10765_v23, %v14599_v40  ;;  %v2606_v23 = vadd.f32 %v10495_v5, %v11046_v8 }
 0x25c   : > { %v8458_v19 = vpop.f32.mrf.mxu1  ;;  %v8347_v21 = vadd.f32 %v8346_v18, %v8345_v28 }
 0x25d   : > { %v8348_v0 = vpop.f32.mrf.mxu0  ;;  %14596 = vst [vmem:[#allocation121_spill] sm:$0xff] %v11084_v34  ;;  %v11094_v49 = vpack.c.bf16 %v14598_v45, %v14305_v50  ;;  %14600 = vst [vmem:[#allocation36_spill] sm:$0xff] %v11098_v2  ;;  %v14308_v43 = vmax.f32 %v11098_v2, 0.0 }
 0x25e   : > { %v8460_v15 = vpop.f32.mrf.mxu1  ;;  %v2759_v44 = vadd.f32 %v8347_v21, %v2598_v33  ;;  %v8459_v33 = vadd.f32 %v8458_v19, %v8457_v27  ;;  %v14307_v27 = vmax.f32 %v11084_v34, 0.0  ;;  %v11152_v34 = vadd.f32 %v10870_v22, %v10415_v3  ;;  %v9063_v3 = vld [vmem:[#allocation8 + $0x2c8] ss:$16 sps:$4 sm:$0xff]  }
 0x25f   : > { %v8349_v28 = vpop.f32.mrf.mxu0  ;;  %v14613_v22 = vld [vmem:[#allocation54_spill] sm:$0xff] }
 0x260   : > { %v8461_v18 = vpop.f32.mrf.mxu1  ;;  %v8350_v21 = vadd.f32 %v8349_v28, %v8348_v0  ;;  %v11105_v47 = vadd.f32 %v8459_v33, %v2759_v44  ;;  %v11124_v5 = vpack.c.bf16 %v14307_v27, %v14308_v43  ;;  %v9065_v43 = vld [vmem:[#allocation8 + $0x2cc] ss:$16 sps:$4 sm:$0xff]   ;;  %14611 = vst [vmem:[#allocation126_spill] sm:$0xff] %v11152_v34 }
 0x261   : > { %v8351_v61 = vpop.f32.mrf.mxu0  ;;  %3911 = vmatmul.mubr.bf16.gmra.mxu0 %v11080_v30  ;;  %v8462_v0 = vadd.f32 %v8461_v18, %v8460_v15  ;;  %v14312_v15 = vmax.f32 %v11103_v57, 0.0 }
 0x262   : > { %v8463_v37 = vpop.f32.mrf.mxu1  ;;  %14603 = vst [vmem:[#allocation123_spill] sm:$0xff] %v11105_v47  ;;  %v2762_v19 = vadd.f32 %v8350_v21, %v2601_v6  ;;  %3920 = vmatprep.mubr.bf16.mxu0 %v11094_v49  ;;  %v14311_v6 = vmax.f32 %v11105_v47, 0.0  ;;  %v2609_v21 = vadd.f32 %v10501_v36, %v11046_v8 }
 0x263   : > { %v8352_v28 = vpop.f32.mrf.mxu0 }
 0x264   : > { %v8464_v45 = vpop.f32.mrf.mxu1  ;;  %v11112_v50 = vadd.f32 %v8462_v0, %v2762_v19  ;;  %v8353_v31 = vadd.f32 %v8352_v28, %v8351_v61  ;;  %v14605_v61 = vld [vmem:[#allocation39_spill] sm:$0xff]  ;;  %v11132_v0 = vadd.f32 %v10891_v58, %v10423_v60  ;;  %v14609_v60 = vld [vmem:[#allocation37_spill] sm:$0xff] }
 0x265   : > { %v8354_v42 = vpop.f32.mrf.mxu0  ;;  %v11128_v19 = vadd.f32 %v10828_v48, %v14605_v61  ;;  %v14608_v48 = vmax.f32 %v11088_v14, 0.0  ;;  %v11148_v58 = vadd.f32 %v10813_v53, %v14609_v60  ;;  %v14615_v14 = vld [vmem:[#allocation55_spill] sm:$0xff] }
 0x266   : > { %14604 = vst [vmem:[#allocation124_spill] sm:$0xff] %v11112_v50  ;;  %v8466_v44 = vpop.f32.mrf.mxu1  ;;  %v14313_v18 = vmax.f32 %v11112_v50, 0.0  ;;  %v2767_v33 = vadd.f32 %v8353_v31, %v2606_v23  ;;  %14607 = vst [vmem:[#allocation125_spill] sm:$0xff] %v11132_v0  ;;  %v9048_v31 = vld [vmem:[#allocation8 + $0x2e8] ss:$16 sps:$4 sm:$0xff]   ;;  %v8465_v23 = vadd.f32 %v8464_v45, %v8463_v37  ;;  %v2617_v57 = vadd.f32 %v14615_v14, %v11046_v8 }
 0x267   : > { %14606 = vst [vmem:[#allocation39_spill] sm:$0xff] %v11128_v19  ;;  %v8355_v28 = vpop.f32.mrf.mxu0  ;;  %v11144_v61 = vpack.c.bf16 %v14608_v48, %v14312_v15  ;;  %14610 = vst [vmem:[#allocation37_spill] sm:$0xff] %v11148_v58  ;;  %v9078_v14 = vld [vmem:[#allocation8 + $0x2a8] ss:$16 sps:$4 sm:$0xff]  }
 0x268   : > { %v8467_v40 = vpop.f32.mrf.mxu1  ;;  %v11138_v36 = vpack.c.bf16 %v14313_v18, %v14311_v6  ;;  %v8356_v27 = vadd.f32 %v8355_v28, %v8354_v42  ;;  %v11155_v37 = vadd.f32 %v8465_v23, %v2767_v33  ;;  %v2614_v33 = vadd.f32 %v14613_v22, %v11046_v8 }
 0x269   : > { %v8357_v38 = vpop.f32.mrf.mxu0  ;;  %3921 = vmatmul.mubr.bf16.gmra.mxu0 %v11124_v5  ;;  %v8468_v42 = vadd.f32 %v8467_v40, %v8466_v44  ;;  %v9080_v40 = vld [vmem:[#allocation8 + $0x2ac] ss:$16 sps:$4 sm:$0xff]   ;;  %v14316_v44 = vmax.f32 %v11148_v58, 0.0 }
 0x26a   : > { %v8469_v6 = vpop.f32.mrf.mxu1  ;;  %14612 = vst [vmem:[#allocation127_spill] sm:$0xff] %v11155_v37  ;;  %v2770_v45 = vadd.f32 %v8356_v27, %v2609_v21  ;;  %3930 = vmatprep.mubr.bf16.mxu0 %v11144_v61  ;;  %4014 = vmatmul.mubr.bf16.vlgmr.msra.gmra.mxu1 %v11138_v36  ;;  %v14320_v21 = vmax.f32 %v11152_v34, 0.0  ;;  %v9092_v34 = vld [vmem:[#allocation8 + $0x28c] ss:$16 sps:$4 sm:$0xff]  }
 0x26b   : > { %v8358_v48 = vpop.f32.mrf.mxu0  ;;  %4368 = vmatpush1.bf16.msra.mxu1 %v9048_v31  ;;  %4023 = vmatprep.mubr.bf16.mxu1 %v14491_v17  ;;  %v14619_v31 = vmax.f32 %v11132_v0, 0.0  ;;  %v14624_v58 = vld [vmem:[#allocation40_spill] sm:$0xff] }
 0x26c   : > { %v8470_v60 = vpop.f32.mrf.mxu1  ;;  %v11164_v23 = vadd.f32 %v8468_v42, %v2770_v45  ;;  %v8359_v27 = vadd.f32 %v8358_v48, %v8357_v38  ;;  %4369 = vmatprep.subr.bf16.mxu1 %v9065_v43  ;;  %v14616_v38 = vmax.f32 %v11128_v19, 0.0  ;;  %v14617_v45 = vld [vmem:[#allocation41_spill] sm:$0xff] }
 0x26d   : > { %v8360_v15 = vpop.f32.mrf.mxu0  ;;  %v11180_v42 = vadd.f32 %v10876_v55, %v14617_v45  ;;  %v8471_v45 = vadd.f32 %v8470_v60, %v8469_v6 }
 0x26e   : > { %14614 = vst [vmem:[#allocation54_spill] sm:$0xff] %v11164_v23  ;;  %v8472_v18 = vpop.f32.mrf.mxu1  ;;  %v2775_v28 = vadd.f32 %v8359_v27, %v2614_v33  ;;  %v11176_v43 = vpack.c.bf16 %v14616_v38, %v14316_v44  ;;  %v11186_v33 = vpack.c.bf16 %v14619_v31, %v14320_v21  ;;  %v14620_v27 = vld [vmem:[#allocation45_spill] sm:$0xff]  ;;  %v14622_v38 = vmax.f32 %v11155_v37, 0.0 }
 0x26f   : > { %14618 = vst [vmem:[#allocation55_spill] sm:$0xff] %v11180_v42  ;;  %v8361_v48 = vpop.f32.mrf.mxu0  ;;  %4370 = vmatpush1.bf16.msra.mxu1 %v9063_v3  ;;  %v11190_v53 = vadd.f32 %v10939_v35, %v14620_v27  ;;  %v14623_v44 = vmax.f32 %v11164_v23, 0.0  ;;  %v11200_v31 = vadd.f32 %v10861_v59, %v14624_v58  ;;  %v14626_v3 = vld [vmem:[#allocation43_spill] sm:$0xff]  ;;  %v14629_v58 = vld [vmem:[#allocation56_spill] sm:$0xff] }
 0x270   : > { %v8473_v22 = vpop.f32.mrf.mxu1  ;;  %v8362_v19 = vadd.f32 %v8361_v48, %v8360_v15  ;;  %4371 = vmatprep.subr.bf16.mxu1 %v9080_v40  ;;  %v11204_v21 = vadd.f32 %v10918_v20, %v14626_v3  ;;  %v11207_v0 = vadd.f32 %v8471_v45, %v2775_v28  ;;  %v9090_v20 = vld [vmem:[#allocation8 + $0x288] ss:$16 sps:$4 sm:$0xff]   ;;  %v2622_v60 = vadd.f32 %v14629_v58, %v11046_v8  ;;  %v14631_v58 = vld [vmem:[#allocation57_spill] sm:$0xff] }
 0x271   : > { %14621 = vst [vmem:[#allocation41_spill] sm:$0xff] %v11190_v53  ;;  %v11196_v55 = vpack.c.bf16 %v14623_v44, %v14622_v38  ;;  %14625 = vst [vmem:[#allocation45_spill] sm:$0xff] %v11200_v31  ;;  %v8363_v35 = vpop.f32.mrf.mxu0  ;;  %3931 = vmatmul.mubr.bf16.gmra.mxu0 %v11176_v43  ;;  %v8474_v38 = vadd.f32 %v8473_v22, %v8472_v18  ;;  %v9095_v18 = vld [vmem:[#allocation8 + $0x26c] ss:$16 sps:$4 sm:$0xff]   ;;  %v2625_v2 = vadd.f32 %v14631_v58, %v11046_v8 }
 0x272   : > { %14627 = vst [vmem:[#allocation40_spill] sm:$0xff] %v11204_v21  ;;  %v8475_v27 = vpop.f32.mrf.mxu1  ;;  %14628 = vst [vmem:[#allocation43_spill] sm:$0xff] %v11207_v0  ;;  %v2778_v44 = vadd.f32 %v8362_v19, %v2617_v57  ;;  %3940 = vmatprep.mubr.bf16.mxu0 %v11186_v33  ;;  %v14323_v19 = vmax.f32 %v11200_v31, 0.0  ;;  %v14327_v3 = vmax.f32 %v11207_v0, 0.0  ;;  %v14638_v31 = vmax.f32 %v11204_v21, 0.0 }
 0x273   : > { %4024 = vmatmul.mubr.bf16.gmra.mxu1 %v11196_v55  ;;  %v8364_v59 = vpop.f32.mrf.mxu0 }
 0x274   : > { %v8476_v6 = vpop.f32.mrf.mxu1  ;;  %4033 = vmatprep.mubr.bf16.mxu1 %v14491_v17  ;;  %4372 = vmatpush1.bf16.msra.mxu1 %v9078_v14  ;;  %v11216_v40 = vadd.f32 %v8474_v38, %v2778_v44  ;;  %v8365_v57 = vadd.f32 %v8364_v59, %v8363_v35  ;;  %v14632_v35 = vmax.f32 %v11180_v42, 0.0  ;;  %v14633_v44 = vld [vmem:[#allocation44_spill] sm:$0xff]  ;;  %v14635_v59 = vld [vmem:[#allocation49_spill] sm:$0xff]  ;;  %v14642_v42 = vld [vmem:[#allocation47_spill] sm:$0xff] }
 0x275   : > { %4373 = vmatprep.subr.bf16.mxu1 %v9092_v34  ;;  %v8366_v48 = vpop.f32.mrf.mxu0  ;;  %v11232_v38 = vadd.f32 %v10924_v9, %v14633_v44  ;;  %v11236_v28 = vadd.f32 %v10987_v16, %v14635_v59  ;;  %v14639_v9 = vmax.f32 %v11190_v53, 0.0  ;;  %v9098_v16 = vld [vmem:[#allocation8 + $0x24c] ss:$16 sps:$4 sm:$0xff]   ;;  %v11256_v23 = vadd.f32 %v10966_v54, %v14642_v42 }
 0x276   : > { %14630 = vst [vmem:[#allocation56_spill] sm:$0xff] %v11216_v40  ;;  %v8478_v22 = vpop.f32.mrf.mxu1  ;;  %v2783_v15 = vadd.f32 %v8365_v57, %v2622_v60  ;;  %v11228_v34 = vpack.c.bf16 %v14632_v35, %v14323_v19  ;;  %v9093_v60 = vld [vmem:[#allocation8 + $0x268] ss:$16 sps:$4 sm:$0xff]   ;;  %v14637_v57 = vmax.f32 %v11216_v40, 0.0  ;;  %v8477_v35 = vadd.f32 %v8476_v6, %v8475_v27 }
 0x277   : > { %14634 = vst [vmem:[#allocation57_spill] sm:$0xff] %v11232_v38  ;;  %14636 = vst [vmem:[#allocation44_spill] sm:$0xff] %v11236_v28  ;;  %v8367_v45 = vpop.f32.mrf.mxu0  ;;  %v11248_v44 = vpack.c.bf16 %v14639_v9, %v14638_v31  ;;  %v14640_v59 = vld [vmem:[#allocation42_spill] sm:$0xff]  ;;  %v14645_v31 = vld [vmem:[#allocation59_spill] sm:$0xff] }
 0x278   : > { %v8479_v14 = vpop.f32.mrf.mxu1  ;;  %4374 = vmatpush1.bf16.msra.mxu1 %v9090_v20  ;;  %v11242_v58 = vpack.c.bf16 %v14637_v57, %v14327_v3  ;;  %v8368_v19 = vadd.f32 %v8367_v45, %v8366_v48  ;;  %v11252_v20 = vadd.f32 %v10909_v51, %v14640_v59  ;;  %14643 = vst [vmem:[#allocation42_spill] sm:$0xff] %v11256_v23  ;;  %v14652_v45 = vmax.f32 %v11236_v28, 0.0 }
 0x279   : > { %4375 = vmatprep.subr.bf16.mxu1 %v9095_v18  ;;  %v8369_v57 = vpop.f32.mrf.mxu0  ;;  %3941 = vmatmul.mubr.bf16.gmra.mxu0 %v11228_v34  ;;  %v11259_v27 = vadd.f32 %v8477_v35, %v2783_v15  ;;  %v8480_v48 = vadd.f32 %v8479_v14, %v8478_v22  ;;  %v14646_v18 = vld [vmem:[#allocation60_spill] sm:$0xff] }
 0x27a   : > { %14641 = vst [vmem:[#allocation49_spill] sm:$0xff] %v11252_v20  ;;  %v8481_v3 = vpop.f32.mrf.mxu1  ;;  %v2786_v6 = vadd.f32 %v8368_v19, %v2625_v2  ;;  %3950 = vmatprep.mubr.bf16.mxu0 %v11248_v44  ;;  %v8262_v51 = vadd.f32 %v14646_v18, %v14645_v31  ;;  %v9096_v15 = vld [vmem:[#allocation8 + $0x248] ss:$16 sps:$4 sm:$0xff]   ;;  %v9101_v35 = vld [vmem:[#allocation8 + $0x22c] ss:$16 sps:$4 sm:$0xff]   ;;  %v14330_v59 = vmax.f32 %v11252_v20, 0.0 }
 0x27b   : > { %14644 = vst [vmem:[#allocation47_spill] sm:$0xff] %v11259_v27  ;;  %4034 = vmatmul.mubr.bf16.gmra.mxu1 %v11242_v58  ;;  %v8370_v42 = vpop.f32.mrf.mxu0  ;;  %v14647_v2 = vld [vmem:[#allocation58_spill] sm:$0xff]  ;;  %v14334_v31 = vmax.f32 %v11256_v23, 0.0 }
 0x27c   : > { %v8482_v9 = vpop.f32.mrf.mxu1  ;;  %4043 = vmatprep.mubr.bf16.mxu1 %v14491_v17  ;;  %4376 = vmatpush1.bf16.msra.mxu1 %v9093_v60  ;;  %v2630_v19 = vadd.f32 %v14647_v2, %v11046_v8  ;;  %v11270_v22 = vadd.f32 %v8480_v48, %v2786_v6  ;;  %v8371_v14 = vadd.f32 %v8370_v42, %v8369_v57  ;;  %v14649_v6 = vmax.f32 %v11232_v38, 0.0  ;;  %v9104_v23 = vld [vmem:[#allocation8 + $0x20c] ss:$16 sps:$4 sm:$0xff]  }
 0x27d   : > { %4377 = vmatprep.subr.bf16.mxu1 %v9098_v16  ;;  %v8372_v18 = vpop.f32.mrf.mxu0  ;;  %v2633_v21 = vadd.f32 %v8262_v51, %v11046_v8  ;;  %v14650_v16 = vld [vmem:[#allocation48_spill] sm:$0xff]  ;;  %v11291_v53 = vpack.c.bf16 %v14652_v45, %v14334_v31  ;;  %v14657_v20 = vld [vmem:[#allocation46_spill] sm:$0xff] }
 0x27e   : > { %14648 = vst [vmem:[#allocation59_spill] sm:$0xff] %v11270_v22  ;;  %v8484_v54 = vpop.f32.mrf.mxu1  ;;  %v2791_v60 = vadd.f32 %v8371_v14, %v2630_v19  ;;  %v11281_v57 = vpack.c.bf16 %v14649_v6, %v14330_v59  ;;  %v11285_v48 = vadd.f32 %v10972_v25, %v14650_v16  ;;  %v9099_v51 = vld [vmem:[#allocation8 + $0x228] ss:$16 sps:$4 sm:$0xff]   ;;  %v14653_v19 = vld [vmem:[#allocation53_spill] sm:$0xff]  ;;  %v14655_v6 = vmax.f32 %v11259_v27, 0.0 }
 0x27f   : > { %v8373_v42 = vpop.f32.mrf.mxu0  ;;  %v11295_v14 = vadd.f32 %v11038_v11, %v14653_v19  ;;  %v14656_v59 = vmax.f32 %v11270_v22, 0.0  ;;  %v8483_v16 = vadd.f32 %v8482_v9, %v8481_v3  ;;  %v11305_v45 = vadd.f32 %v10957_v4, %v14657_v20  ;;  %v14662_v3 = vld [vmem:[#allocation62_spill] sm:$0xff]  ;;  %v14663_v9 = vld [vmem:[#allocation63_spill] sm:$0xff] }
 0x280   : > { %14651 = vst [vmem:[#allocation60_spill] sm:$0xff] %v11285_v48  ;;  %v8485_v2 = vpop.f32.mrf.mxu1  ;;  %4378 = vmatpush1.bf16.msra.mxu1 %v9096_v15  ;;  %v8374_v38 = vadd.f32 %v8373_v42, %v8372_v18  ;;  %v14659_v15 = vld [vmem:[#allocation51_spill] sm:$0xff]  ;;  %v8268_v4 = vadd.f32 %v14663_v9, %v14662_v3  ;;  %v9102_v18 = vld [vmem:[#allocation8 + $0x208] ss:$16 sps:$4 sm:$0xff]  }
 0x281   : > { %14654 = vst [vmem:[#allocation58_spill] sm:$0xff] %v11295_v14  ;;  %v11301_v25 = vpack.c.bf16 %v14656_v59, %v14655_v6  ;;  %4379 = vmatprep.subr.bf16.mxu1 %v9101_v35  ;;  %14658 = vst [vmem:[#allocation48_spill] sm:$0xff] %v11305_v45  ;;  %v11309_v31 = vadd.f32 %v11014_v63, %v14659_v15  ;;  %v8375_v11 = vpop.f32.mrf.mxu0  ;;  %3951 = vmatmul.mubr.bf16.gmra.mxu0 %v11281_v57 }
 0x282   : > { %v8487_v19 = vpop.f32.mrf.mxu1  ;;  %v11312_v28 = vadd.f32 %v8483_v16, %v2791_v60  ;;  %v2794_v59 = vadd.f32 %v8374_v38, %v2633_v21  ;;  %v8486_v6 = vadd.f32 %v8485_v2, %v8484_v54  ;;  %3960 = vmatprep.mubr.bf16.mxu0 %v11291_v53  ;;  %v14664_v60 = vld [vmem:[#allocation61_spill] sm:$0xff]  ;;  %v14341_v21 = vmax.f32 %v11295_v14, 0.0 }
 0x283   : > { %14660 = vst [vmem:[#allocation53_spill] sm:$0xff] %v11309_v31  ;;  %4044 = vmatmul.mubr.bf16.gmra.mxu1 %v11301_v25  ;;  %v8376_v35 = vpop.f32.mrf.mxu0  ;;  %v2638_v42 = vadd.f32 %v14664_v60, %v11046_v8  ;;  %v14337_v2 = vmax.f32 %v11305_v45, 0.0  ;;  %v14342_v3 = vmax.f32 %v11309_v31, 0.0  ;;  %v2641_v22 = vadd.f32 %v8268_v4, %v11046_v8 }
 0x284   : > { %14661 = vst [vmem:[#allocation46_spill] sm:$0xff] %v11312_v28  ;;  %v8488_v63 = vpop.f32.mrf.mxu1  ;;  %4053 = vmatprep.mubr.bf16.mxu1 %v14491_v17  ;;  %4380 = vmatpush1.bf16.msra.mxu1 %v9099_v51  ;;  %v11323_v38 = vadd.f32 %v8486_v6, %v2794_v59  ;;  %v8377_v54 = vadd.f32 %v8376_v35, %v8375_v11  ;;  %v14339_v9 = vmax.f32 %v11312_v28, 0.0  ;;  %v14666_v59 = vmax.f32 %v11285_v48, 0.0 }
 0x285   : > { %4381 = vmatprep.subr.bf16.mxu1 %v9104_v23  ;;  %v8378_v16 = vpop.f32.mrf.mxu0  ;;  %v14667_v23 = vld [vmem:[#allocation52_spill] sm:$0xff]  ;;  %v8489_v4 = vadd.f32 %v8488_v63, %v8487_v19 }
 0x286   : > { %14665 = vst [vmem:[#allocation51_spill] sm:$0xff] %v11323_v38  ;;  %v8490_v15 = vpop.f32.mrf.mxu1  ;;  %v14340_v51 = vmax.f32 %v11323_v38, 0.0  ;;  %v2799_v20 = vadd.f32 %v8377_v54, %v2638_v42  ;;  %v11334_v6 = vpack.c.bf16 %v14666_v59, %v14337_v2  ;;  %v11338_v11 = vadd.f32 %v11023_v29, %v14667_v23  ;;  %v14669_v2 = vld [vmem:[#allocation50_spill] sm:$0xff] }
 0x287   : > { %v8379_v35 = vpop.f32.mrf.mxu0  ;;  %v11350_v59 = vpack.c.bf16 %v14341_v21, %v14342_v3  ;;  %v11354_v29 = vadd.f32 %v11005_v39, %v14669_v2  ;;  %v2646_v39 = vadd.f32 %v10590_v62, %v11046_v8  ;;  %v14672_v2 = vld [vmem:[#allocation66_spill] sm:$0xff] }
 0x288   : > { %14668 = vst [vmem:[#allocation62_spill] sm:$0xff] %v11338_v11  ;;  %v8491_v60 = vpop.f32.mrf.mxu1  ;;  %4382 = vmatpush1.bf16.msra.mxu1 %v9102_v18  ;;  %v11344_v42 = vpack.c.bf16 %v14340_v51, %v14339_v9  ;;  %v8380_v54 = vadd.f32 %v8379_v35, %v8378_v16  ;;  %v11357_v45 = vadd.f32 %v8489_v4, %v2799_v20  ;;  %v14344_v19 = vmax.f32 %v11338_v11, 0.0  ;;  %v14675_v11 = vld [vmem:[#allocation69_spill] sm:$0xff] }
 0x289   : > { %14670 = vst [vmem:[#allocation63_spill] sm:$0xff] %v11354_v29  ;;  %v8381_v23 = vpop.f32.mrf.mxu0  ;;  %3961 = vmatmul.mubr.bf16.gmra.mxu0 %v11334_v6  ;;  %v8492_v51 = vadd.f32 %v8491_v60, %v8490_v15  ;;  %v8274_v35 = vadd.f32 %v10603_v24, %v14672_v2  ;;  %v14345_v15 = vmax.f32 %v11354_v29, 0.0 }
 0x28a   : > { %v8493_v18 = vpop.f32.mrf.mxu1  ;;  %14671 = vst [vmem:[#allocation61_spill] sm:$0xff] %v11357_v45  ;;  %v2802_v9 = vadd.f32 %v8380_v54, %v2641_v22  ;;  %3970 = vmatprep.mubr.bf16.mxu0 %v11350_v59  ;;  %v14349_v54 = vmax.f32 %v11357_v45, 0.0 }
 0x28b   : > { %4054 = vmatmul.mubr.bf16.gmra.mxu1 %v11344_v42  ;;  %v8382_v63 = vpop.f32.mrf.mxu0  ;;  %v11376_v62 = vpack.c.bf16 %v14344_v19, %v14345_v15 }
 0x28c   : > { %v8494_v16 = vpop.f32.mrf.mxu1  ;;  %4063 = vmatprep.mubr.bf16.mxu1 %v14491_v17  ;;  %v11367_v20 = vadd.f32 %v8492_v51, %v2802_v9  ;;  %v8383_v22 = vadd.f32 %v8382_v63, %v8381_v23  ;;  %v2649_v9 = vadd.f32 %v8274_v35, %v11046_v8 }
 0x28d   : > { %v8384_v60 = vpop.f32.mrf.mxu0  ;;  %v8495_v23 = vadd.f32 %v8494_v16, %v8493_v18 }
 0x28e   : > { %14673 = vst [vmem:[#allocation52_spill] sm:$0xff] %v11367_v20  ;;  %v8496_v4 = vpop.f32.mrf.mxu1  ;;  %v14348_v21 = vmax.f32 %v11367_v20, 0.0  ;;  %v2807_v3 = vadd.f32 %v8383_v22, %v2646_v39 }
 0x28f   : > { %v8385_v14 = vpop.f32.mrf.mxu0 }
 0x290   : > { %v8497_v24 = vpop.f32.mrf.mxu1  ;;  %v11383_v51 = vpack.c.bf16 %v14348_v21, %v14349_v54  ;;  %v8386_v63 = vadd.f32 %v8385_v14, %v8384_v60  ;;  %v11386_v22 = vadd.f32 %v8495_v23, %v2807_v3  ;;  %v14676_v21 = vld [vmem:[#allocation72_spill] sm:$0xff]  ;;  %v14677_v14 = vld [vmem:[#allocation73_spill] sm:$0xff] }
 0x291   : > { %v8387_v2 = vpop.f32.mrf.mxu0  ;;  %3971 = vmatmul.mubr.bf16.gmra.mxu0 %v11376_v62  ;;  %v8498_v15 = vadd.f32 %v8497_v24, %v8496_v4  ;;  %v2654_v18 = vadd.f32 %v14676_v21, %v11046_v8  ;;  %v8280_v16 = vadd.f32 %v10653_v26, %v14677_v14 }
 0x292   : > { %v8499_v39 = vpop.f32.mrf.mxu1  ;;  %14674 = vst [vmem:[#allocation50_spill] sm:$0xff] %v11386_v22  ;;  %v2810_v19 = vadd.f32 %v8386_v63, %v2649_v9  ;;  %4206 = vmatprep.mubr.bf16.mxu0 %v14675_v11  ;;  %v14352_v4 = vmax.f32 %v11386_v22, 0.0 }
 0x293   : > { %4064 = vmatmul.mubr.bf16.gmra.mxu1 %v11383_v51  ;;  %v8388_v35 = vpop.f32.mrf.mxu0  ;;  %v2657_v29 = vadd.f32 %v8280_v16, %v11046_v8 }
 0x294   : > { %v8500_v31 = vpop.f32.mrf.mxu1  ;;  %4073 = vmatprep.mubr.bf16.mxu1 %v14491_v17  ;;  %v11395_v60 = vadd.f32 %v8498_v15, %v2810_v19  ;;  %v8389_v3 = vadd.f32 %v8388_v35, %v8387_v2  ;;  %v14679_v35 = vld [vmem:[#allocation74_spill] sm:$0xff] }
 0x295   : > { %v8390_v23 = vpop.f32.mrf.mxu0  ;;  %v8501_v26 = vadd.f32 %v8500_v31, %v8499_v39  ;;  %v2662_v31 = vadd.f32 %v10681_v32, %v11046_v8  ;;  %v14681_v39 = vld [vmem:[#allocation79_spill] sm:$0xff] }
 0x296   : > { %14678 = vst [vmem:[#allocation66_spill] sm:$0xff] %v11395_v60  ;;  %v8502_v9 = vpop.f32.mrf.mxu1  ;;  %v14353_v24 = vmax.f32 %v11395_v60, 0.0  ;;  %v2815_v11 = vadd.f32 %v8389_v3, %v2654_v18 }
 0x297   : > { %v8391_v63 = vpop.f32.mrf.mxu0 }
 0x298   : > { %v8503_v54 = vpop.f32.mrf.mxu1  ;;  %v11404_v21 = vpack.c.bf16 %v14353_v24, %v14352_v4  ;;  %v8392_v19 = vadd.f32 %v8391_v63, %v8390_v23  ;;  %v11407_v14 = vadd.f32 %v8501_v26, %v2815_v11  ;;  %v8286_v23 = vadd.f32 %v10701_v13, %v14681_v39 }
 0x299   : > { %v8393_v15 = vpop.f32.mrf.mxu0  ;;  %4207 = vmatmul.mubr.bf16.vlgmr.msra.gmra.mxu0 %v14679_v35  ;;  %v8504_v18 = vadd.f32 %v8503_v54, %v8502_v9 }
 0x29a   : > { %v8505_v2 = vpop.f32.mrf.mxu1  ;;  %14680 = vst [vmem:[#allocation69_spill] sm:$0xff] %v11407_v14  ;;  %v2818_v48 = vadd.f32 %v8392_v19, %v2657_v29  ;;  %4216 = vmatprep.mubr.bf16.mxu0 %v10663_v41  ;;  %v14354_v54 = vmax.f32 %v11407_v14, 0.0  ;;  %v2665_v4 = vadd.f32 %v8286_v23, %v11046_v8 }
 0x29b   : > { %4074 = vmatmul.mubr.bf16.gmra.mxu1 %v11404_v21  ;;  %v8394_v16 = vpop.f32.mrf.mxu0 }
 0x29c   : > { %v8506_v3 = vpop.f32.mrf.mxu1  ;;  %4083 = vmatprep.mubr.bf16.mxu1 %v14491_v17  ;;  %v11416_v63 = vadd.f32 %v8504_v18, %v2818_v48  ;;  %v8395_v11 = vadd.f32 %v8394_v16, %v8393_v15 }
 0x29d   : > { %v8396_v26 = vpop.f32.mrf.mxu0  ;;  %v8507_v13 = vadd.f32 %v8506_v3, %v8505_v2  ;;  %v14686_v3 = vld [vmem:[#allocation86_spill] sm:$0xff] }
 0x29e   : > { %14682 = vst [vmem:[#allocation72_spill] sm:$0xff] %v11416_v63  ;;  %v8508_v29 = vpop.f32.mrf.mxu1  ;;  %v14355_v9 = vmax.f32 %v11416_v63, 0.0  ;;  %v2823_v41 = vadd.f32 %v8395_v11, %v2662_v31  ;;  %v14684_v11 = vld [vmem:[#allocation82_spill] sm:$0xff] }
 0x29f   : > { %v8397_v19 = vpop.f32.mrf.mxu0 }
 0x2a0   : > { %v8509_v35 = vpop.f32.mrf.mxu1  ;;  %v11425_v32 = vpack.c.bf16 %v14355_v9, %v14354_v54  ;;  %v8398_v48 = vadd.f32 %v8397_v19, %v8396_v26  ;;  %v11428_v16 = vadd.f32 %v8507_v13, %v2823_v41  ;;  %v14685_v54 = vld [vmem:[#allocation85_spill] sm:$0xff]  ;;  %v14687_v26 = vld [vmem:[#allocation88_spill] sm:$0xff] }
 0x2a1   : > { %v8399_v15 = vpop.f32.mrf.mxu0  ;;  %4217 = vmatmul.mubr.bf16.gmra.mxu0 %v10693_v10  ;;  %v8510_v31 = vadd.f32 %v8509_v35, %v8508_v29  ;;  %v2670_v2 = vadd.f32 %v14685_v54, %v11046_v8  ;;  %v8292_v19 = vadd.f32 %v14687_v26, %v14686_v3  ;;  %v14689_v3 = vld [vmem:[#allocation87_spill] sm:$0xff] }
 0x2a2   : > { %v8511_v18 = vpop.f32.mrf.mxu1  ;;  %14683 = vst [vmem:[#allocation73_spill] sm:$0xff] %v11428_v16  ;;  %v2826_v39 = vadd.f32 %v8398_v48, %v2665_v4  ;;  %4226 = vmatprep.mubr.bf16.mxu0 %v14684_v11  ;;  %v14359_v29 = vmax.f32 %v11428_v16, 0.0 }
 0x2a3   : > { %4084 = vmatmul.mubr.bf16.gmra.mxu1 %v11425_v32  ;;  %v8400_v23 = vpop.f32.mrf.mxu0  ;;  %v2673_v14 = vadd.f32 %v8292_v19, %v11046_v8 }
 0x2a4   : > { %v8512_v24 = vpop.f32.mrf.mxu1  ;;  %4093 = vmatprep.mubr.bf16.mxu1 %v14491_v17  ;;  %v11437_v9 = vadd.f32 %v8510_v31, %v2826_v39  ;;  %v8401_v10 = vadd.f32 %v8400_v23, %v8399_v15 }
 0x2a5   : > { %v8402_v41 = vpop.f32.mrf.mxu0  ;;  %v8513_v39 = vadd.f32 %v8512_v24, %v8511_v18  ;;  %v14693_v18 = vld [vmem:[#allocation91_spill] sm:$0xff] }
 0x2a6   : > { %14688 = vst [vmem:[#allocation74_spill] sm:$0xff] %v11437_v9  ;;  %v8514_v4 = vpop.f32.mrf.mxu1  ;;  %v14360_v35 = vmax.f32 %v11437_v9, 0.0  ;;  %v2831_v13 = vadd.f32 %v8401_v10, %v2670_v2  ;;  %v14691_v10 = vld [vmem:[#allocation89_spill] sm:$0xff] }
 0x2a7   : > { %v8403_v48 = vpop.f32.mrf.mxu0 }
 0x2a8   : > { %v8515_v11 = vpop.f32.mrf.mxu1  ;;  %v11446_v54 = vpack.c.bf16 %v14360_v35, %v14359_v29  ;;  %v8404_v31 = vadd.f32 %v8403_v48, %v8402_v41  ;;  %v11449_v26 = vadd.f32 %v8513_v39, %v2831_v13  ;;  %v14692_v29 = vld [vmem:[#allocation90_spill] sm:$0xff]  ;;  %v14694_v41 = vld [vmem:[#allocation93_spill] sm:$0xff] }
 0x2a9   : > { %v8405_v15 = vpop.f32.mrf.mxu0  ;;  %4227 = vmatmul.mubr.bf16.gmra.mxu0 %v14689_v3  ;;  %v8516_v2 = vadd.f32 %v8515_v11, %v8514_v4  ;;  %v2678_v24 = vadd.f32 %v14692_v29, %v11046_v8  ;;  %v8298_v48 = vadd.f32 %v14694_v41, %v14693_v18  ;;  %v14696_v18 = vld [vmem:[#allocation92_spill] sm:$0xff] }
 0x2aa   : > { %v8517_v23 = vpop.f32.mrf.mxu1  ;;  %14690 = vst [vmem:[#allocation79_spill] sm:$0xff] %v11449_v26  ;;  %v2834_v22 = vadd.f32 %v8404_v31, %v2673_v14  ;;  %4236 = vmatprep.mubr.bf16.mxu0 %v14691_v10  ;;  %v14364_v4 = vmax.f32 %v11449_v26, 0.0 }
 0x2ab   : > { %4094 = vmatmul.mubr.bf16.gmra.mxu1 %v11446_v54  ;;  %v8406_v19 = vpop.f32.mrf.mxu0  ;;  %v2681_v9 = vadd.f32 %v8298_v48, %v11046_v8 }
 0x2ac   : > { %v8518_v16 = vpop.f32.mrf.mxu1  ;;  %4103 = vmatprep.mubr.bf16.mxu1 %v14491_v17  ;;  %v11458_v35 = vadd.f32 %v8516_v2, %v2834_v22  ;;  %v8407_v13 = vadd.f32 %v8406_v19, %v8405_v15 }
 0x2ad   : > { %v8408_v39 = vpop.f32.mrf.mxu0  ;;  %v8519_v22 = vadd.f32 %v8518_v16, %v8517_v23  ;;  %v14700_v23 = vld [vmem:[#allocation96_spill] sm:$0xff] }
 0x2ae   : > { %14695 = vst [vmem:[#allocation82_spill] sm:$0xff] %v11458_v35  ;;  %v8520_v14 = vpop.f32.mrf.mxu1  ;;  %v14365_v11 = vmax.f32 %v11458_v35, 0.0  ;;  %v2839_v31 = vadd.f32 %v8407_v13, %v2678_v24  ;;  %v14698_v13 = vld [vmem:[#allocation94_spill] sm:$0xff] }
 0x2af   : > { %v8409_v3 = vpop.f32.mrf.mxu0 }
 0x2b0   : > { %v8521_v10 = vpop.f32.mrf.mxu1  ;;  %v11467_v29 = vpack.c.bf16 %v14365_v11, %v14364_v4  ;;  %v8410_v2 = vadd.f32 %v8409_v3, %v8408_v39  ;;  %v11470_v41 = vadd.f32 %v8519_v22, %v2839_v31  ;;  %v14699_v4 = vld [vmem:[#allocation95_spill] sm:$0xff]  ;;  %v14701_v39 = vld [vmem:[#allocation98_spill] sm:$0xff] }
 0x2b1   : > { %v8411_v15 = vpop.f32.mrf.mxu0  ;;  %4237 = vmatmul.mubr.bf16.gmra.mxu0 %v14696_v18  ;;  %v8522_v24 = vadd.f32 %v8521_v10, %v8520_v14  ;;  %v2686_v16 = vadd.f32 %v14699_v4, %v11046_v8  ;;  %v8304_v3 = vadd.f32 %v14701_v39, %v14700_v23  ;;  %v14703_v23 = vld [vmem:[#allocation97_spill] sm:$0xff] }
 0x2b2   : > { %v8523_v19 = vpop.f32.mrf.mxu1  ;;  %14697 = vst [vmem:[#allocation85_spill] sm:$0xff] %v11470_v41  ;;  %v2842_v63 = vadd.f32 %v8410_v2, %v2681_v9  ;;  %4246 = vmatprep.mubr.bf16.mxu0 %v14698_v13  ;;  %v14370_v14 = vmax.f32 %v11470_v41, 0.0 }
 0x2b3   : > { %4104 = vmatmul.mubr.bf16.gmra.mxu1 %v11467_v29  ;;  %v8412_v48 = vpop.f32.mrf.mxu0  ;;  %v2689_v35 = vadd.f32 %v8304_v3, %v11046_v8 }
 0x2b4   : > { %v8524_v26 = vpop.f32.mrf.mxu1  ;;  %4113 = vmatprep.mubr.bf16.mxu1 %v14491_v17  ;;  %v11479_v11 = vadd.f32 %v8522_v24, %v2842_v63  ;;  %v8413_v31 = vadd.f32 %v8412_v48, %v8411_v15 }
 0x2b5   : > { %v8414_v22 = vpop.f32.mrf.mxu0  ;;  %v8525_v63 = vadd.f32 %v8524_v26, %v8523_v19  ;;  %v14707_v19 = vld [vmem:[#allocation101_spill] sm:$0xff] }
 0x2b6   : > { %14702 = vst [vmem:[#allocation86_spill] sm:$0xff] %v11479_v11  ;;  %v8526_v9 = vpop.f32.mrf.mxu1  ;;  %v14369_v10 = vmax.f32 %v11479_v11, 0.0  ;;  %v2847_v2 = vadd.f32 %v8413_v31, %v2686_v16  ;;  %v14705_v31 = vld [vmem:[#allocation99_spill] sm:$0xff] }
 0x2b7   : > { %v8415_v18 = vpop.f32.mrf.mxu0 }
 0x2b8   : > { %v8527_v13 = vpop.f32.mrf.mxu1  ;;  %v11488_v4 = vpack.c.bf16 %v14369_v10, %v14370_v14  ;;  %v8416_v24 = vadd.f32 %v8415_v18, %v8414_v22  ;;  %v11491_v39 = vadd.f32 %v8525_v63, %v2847_v2  ;;  %v14706_v10 = vld [vmem:[#allocation100_spill] sm:$0xff]  ;;  %v14708_v22 = vld [vmem:[#allocation103_spill] sm:$0xff] }
 0x2b9   : > { %v8417_v15 = vpop.f32.mrf.mxu0  ;;  %4247 = vmatmul.mubr.bf16.gmra.mxu0 %v14703_v23  ;;  %v8528_v16 = vadd.f32 %v8527_v13, %v8526_v9  ;;  %v2694_v26 = vadd.f32 %v14706_v10, %v11046_v8  ;;  %v8310_v18 = vadd.f32 %v14708_v22, %v14707_v19  ;;  %v14710_v19 = vld [vmem:[#allocation102_spill] sm:$0xff] }
 0x2ba   : > { %v8529_v48 = vpop.f32.mrf.mxu1  ;;  %14704 = vst [vmem:[#allocation88_spill] sm:$0xff] %v11491_v39  ;;  %v2850_v20 = vadd.f32 %v8416_v24, %v2689_v35  ;;  %4256 = vmatprep.mubr.bf16.mxu0 %v14705_v31  ;;  %v14375_v9 = vmax.f32 %v11491_v39, 0.0 }
 0x2bb   : > { %4114 = vmatmul.mubr.bf16.gmra.mxu1 %v11488_v4  ;;  %v8418_v3 = vpop.f32.mrf.mxu0  ;;  %v2697_v11 = vadd.f32 %v8310_v18, %v11046_v8 }
 0x2bc   : > { %v8530_v41 = vpop.f32.mrf.mxu1  ;;  %4123 = vmatprep.mubr.bf16.mxu1 %v14491_v17  ;;  %v11500_v14 = vadd.f32 %v8528_v16, %v2850_v20  ;;  %v8419_v2 = vadd.f32 %v8418_v3, %v8417_v15 }
 0x2bd   : > { %v8420_v63 = vpop.f32.mrf.mxu0  ;;  %v8531_v20 = vadd.f32 %v8530_v41, %v8529_v48  ;;  %v2702_v41 = vadd.f32 %v10921_v1, %v11046_v8  ;;  %v14713_v48 = vld [vmem:[#allocation105_spill] sm:$0xff] }
 0x2be   : > { %14709 = vst [vmem:[#allocation87_spill] sm:$0xff] %v11500_v14  ;;  %v8532_v35 = vpop.f32.mrf.mxu1  ;;  %v14374_v13 = vmax.f32 %v11500_v14, 0.0  ;;  %v2855_v24 = vadd.f32 %v8419_v2, %v2694_v26  ;;  %v14712_v2 = vld [vmem:[#allocation104_spill] sm:$0xff] }
 0x2bf   : > { %v8421_v23 = vpop.f32.mrf.mxu0 }
 0x2c0   : > { %v8533_v31 = vpop.f32.mrf.mxu1  ;;  %v11509_v10 = vpack.c.bf16 %v14374_v13, %v14375_v9  ;;  %v8422_v16 = vadd.f32 %v8421_v23, %v8420_v63  ;;  %v11512_v22 = vadd.f32 %v8531_v20, %v2855_v24  ;;  %v8316_v63 = vadd.f32 %v10941_v12, %v14713_v48 }
 0x2c1   : > { %v8423_v15 = vpop.f32.mrf.mxu0  ;;  %4257 = vmatmul.mubr.bf16.gmra.mxu0 %v14710_v19  ;;  %v8534_v26 = vadd.f32 %v8533_v31, %v8532_v35 }
 0x2c2   : > { %v8535_v3 = vpop.f32.mrf.mxu1  ;;  %14711 = vst [vmem:[#allocation89_spill] sm:$0xff] %v11512_v22  ;;  %v2858_v60 = vadd.f32 %v8422_v16, %v2697_v11  ;;  %4266 = vmatprep.mubr.bf16.mxu0 %v14712_v2  ;;  %v14376_v35 = vmax.f32 %v11512_v22, 0.0  ;;  %v2705_v13 = vadd.f32 %v8316_v63, %v11046_v8 }
 0x2c3   : > { %4124 = vmatmul.mubr.bf16.gmra.mxu1 %v11509_v10  ;;  %v8424_v18 = vpop.f32.mrf.mxu0 }
 0x2c4   : > { %v8536_v39 = vpop.f32.mrf.mxu1  ;;  %4133 = vmatprep.mubr.bf16.mxu1 %v14491_v17  ;;  %v11521_v23 = vadd.f32 %v8534_v26, %v2858_v60  ;;  %v8425_v24 = vadd.f32 %v8424_v18, %v8423_v15  ;;  %v14715_v18 = vld [vmem:[#allocation106_spill] sm:$0xff] }
 0x2c5   : > { %v8426_v20 = vpop.f32.mrf.mxu0  ;;  %v8537_v12 = vadd.f32 %v8536_v39, %v8535_v3  ;;  %v2710_v39 = vadd.f32 %v10969_v46, %v11046_v8  ;;  %v14717_v3 = vld [vmem:[#allocation109_spill] sm:$0xff] }
 0x2c6   : > { %14714 = vst [vmem:[#allocation90_spill] sm:$0xff] %v11521_v23  ;;  %v8538_v11 = vpop.f32.mrf.mxu1  ;;  %v14377_v31 = vmax.f32 %v11521_v23, 0.0  ;;  %v2863_v16 = vadd.f32 %v8425_v24, %v2702_v41  ;;  %v14731_v23 = vld [vmem:[#allocation13_spill] sm:$0xff] }
 0x2c7   : > { %v8427_v19 = vpop.f32.mrf.mxu0 }
 0x2c8   : > { %v8539_v2 = vpop.f32.mrf.mxu1  ;;  %v11530_v1 = vpack.c.bf16 %v14377_v31, %v14376_v35  ;;  %v8428_v60 = vadd.f32 %v8427_v19, %v8426_v20  ;;  %v11533_v48 = vadd.f32 %v8537_v12, %v2863_v16  ;;  %v14718_v20 = vld [vmem:[#allocation111_spill] sm:$0xff] }
 0x2c9   : > { %v8429_v15 = vpop.f32.mrf.mxu0  ;;  %4267 = vmatmul.mubr.bf16.gmra.mxu0 %v14715_v18  ;;  %v8540_v41 = vadd.f32 %v8539_v2, %v8538_v11  ;;  %v8322_v19 = vadd.f32 %v14718_v20, %v14717_v3 }
 0x2ca   : > { %v8541_v26 = vpop.f32.mrf.mxu1  ;;  %14716 = vst [vmem:[#allocation91_spill] sm:$0xff] %v11533_v48  ;;  %v2866_v9 = vadd.f32 %v8428_v60, %v2705_v13  ;;  %4276 = vmatprep.mubr.bf16.mxu0 %v10951_v52  ;;  %v14380_v11 = vmax.f32 %v11533_v48, 0.0 }
 0x2cb   : > { %4134 = vmatmul.mubr.bf16.gmra.mxu1 %v11530_v1  ;;  %v8430_v63 = vpop.f32.mrf.mxu0  ;;  %v2713_v31 = vadd.f32 %v8322_v19, %v11046_v8 }
 0x2cc   : > { %v8542_v24 = vpop.f32.mrf.mxu1  ;;  %4143 = vmatprep.mubr.bf16.mxu1 %v14491_v17  ;;  %v11542_v35 = vadd.f32 %v8540_v41, %v2866_v9  ;;  %v8431_v16 = vadd.f32 %v8430_v63, %v8429_v15 }
 0x2cd   : > { %v8432_v12 = vpop.f32.mrf.mxu0  ;;  %v8543_v9 = vadd.f32 %v8542_v24, %v8541_v26  ;;  %v2718_v26 = vadd.f32 %v11020_v7, %v11046_v8  ;;  %v14722_v24 = vld [vmem:[#allocation115_spill] sm:$0xff] }
 0x2ce   : > { %14719 = vst [vmem:[#allocation93_spill] sm:$0xff] %v11542_v35  ;;  %v8544_v13 = vpop.f32.mrf.mxu1  ;;  %v14379_v2 = vmax.f32 %v11542_v35, 0.0  ;;  %v2871_v52 = vadd.f32 %v8431_v16, %v2710_v39  ;;  %v14721_v16 = vld [vmem:[#allocation113_spill] sm:$0xff] }
 0x2cf   : > { %v8433_v60 = vpop.f32.mrf.mxu0 }
 0x2d0   : > { %v8545_v18 = vpop.f32.mrf.mxu1  ;;  %v11551_v46 = vpack.c.bf16 %v14379_v2, %v14380_v11  ;;  %v8434_v41 = vadd.f32 %v8433_v60, %v8432_v12  ;;  %v11554_v3 = vadd.f32 %v8543_v9, %v2871_v52  ;;  %v14723_v12 = vld [vmem:[#allocation117_spill] sm:$0xff] }
 0x2d1   : > { %v8435_v15 = vpop.f32.mrf.mxu0  ;;  %4277 = vmatmul.mubr.bf16.gmra.mxu0 %v10981_v56  ;;  %v8546_v39 = vadd.f32 %v8545_v18, %v8544_v13  ;;  %v8328_v60 = vadd.f32 %v14723_v12, %v14722_v24 }
 0x2d2   : > { %v8547_v63 = vpop.f32.mrf.mxu1  ;;  %14720 = vst [vmem:[#allocation92_spill] sm:$0xff] %v11554_v3  ;;  %v2874_v20 = vadd.f32 %v8434_v41, %v2713_v31  ;;  %4286 = vmatprep.mubr.bf16.mxu0 %v14721_v16  ;;  %v14383_v13 = vmax.f32 %v11554_v3, 0.0 }
 0x2d3   : > { %4144 = vmatmul.mubr.bf16.gmra.mxu1 %v11551_v46  ;;  %v8436_v19 = vpop.f32.mrf.mxu0  ;;  %v2721_v11 = vadd.f32 %v8328_v60, %v11046_v8 }
 0x2d4   : > { %v8548_v22 = vpop.f32.mrf.mxu1  ;;  %4153 = vmatprep.mubr.bf16.mxu1 %v14491_v17  ;;  %v11563_v2 = vadd.f32 %v8546_v39, %v2874_v20  ;;  %v8437_v56 = vadd.f32 %v8436_v19, %v8435_v15  ;;  %v14725_v19 = vld [vmem:[#allocation116_spill] sm:$0xff] }
 0x2d5   : > { %v8438_v52 = vpop.f32.mrf.mxu0  ;;  %v8549_v20 = vadd.f32 %v8548_v22, %v8547_v63 }
 0x2d6   : > { %14724 = vst [vmem:[#allocation94_spill] sm:$0xff] %v11563_v2  ;;  %v8550_v31 = vpop.f32.mrf.mxu1  ;;  %v14384_v18 = vmax.f32 %v11563_v2, 0.0  ;;  %v2879_v9 = vadd.f32 %v8437_v56, %v2718_v26  ;;  %v14727_v56 = vld [vmem:[#allocation119_spill] sm:$0xff] }
 0x2d7   : > { %v8439_v41 = vpop.f32.mrf.mxu0 }
 0x2d8   : > { %v8551_v16 = vpop.f32.mrf.mxu1  ;;  %v11572_v7 = vpack.c.bf16 %v14384_v18, %v14383_v13  ;;  %v8440_v39 = vadd.f32 %v8439_v41, %v8438_v52  ;;  %v11577_v24 = vadd.f32 %v8549_v20, %v2879_v9 }
 0x2d9   : > { %v11574_v15 = vpop.f32.mrf.mxu0  ;;  %4287 = vmatmul.mubr.bf16.gmra.mxu0 %v14725_v19  ;;  %v8552_v26 = vadd.f32 %v8551_v16, %v8550_v31 }
 0x2da   : > { %14726 = vst [vmem:[#allocation95_spill] sm:$0xff] %v11577_v24  ;;  %v2882_v12 = vadd.f32 %v8440_v39, %v2721_v11  ;;  %4296 = vmatprep.mubr.bf16.mxu0 %v14727_v56  ;;  %v14382_v63 = vmax.f32 %v11577_v24, 0.0  ;;  %v11696_v24 = vld [vmem:[%s14198_s4] sm:$0xf] }
 0x2db   : > { %4154 = vmatmul.mubr.bf16.gmra.mxu1 %v11572_v7  ;;  %v11581_v8 = vpop.f32.mrf.mxu0  ;;  %14729 = vst [vmem:[#allocation98_spill] sm:$0xff] %v11696_v24  ;;  %v11710_v48 = vrot.slane %v11696_v24, %v14731_v23 }
 0x2dc   : > { %4163 = vmatprep.mubr.bf16.mxu1 %v14491_v17  ;;  %v11584_v60 = vadd.f32 %v8552_v26, %v2882_v12 }
 0x2dd   : > { %v11586_v22 = vpop.f32.mrf.mxu0  ;;  %v3825_v38 = vadd.f32 %v11581_v8, %v11710_v48 }
 0x2de   : > { %14728 = vst [vmem:[#allocation96_spill] sm:$0xff] %v11584_v60  ;;  %v14381_v52 = vmax.f32 %v11584_v60, 0.0 }
 0x2df   : > { %v11590_v9 = vpop.f32.mrf.mxu0 }
 0x2e0   : > { %v11596_v11 = vpack.c.bf16 %v14381_v52, %v14382_v63 }
 0x2e1   : > { %v11598_v31 = vpop.f32.mrf.mxu0  ;;  %4297 = vmatmul.mubr.bf16.gmra.mxu0 %v11080_v30 }
 0x2e2   : > { %4306 = vmatprep.mubr.bf16.mxu0 %v11094_v49 }
 0x2e3   : > { %4164 = vmatmul.mubr.bf16.gmra.mxu1 %v11596_v11  ;;  %v11603_v41 = vpop.f32.mrf.mxu0 }
 0x2e4   : > { %4399 = vmatprep.mubr.bf16.mxu1 %v14491_v17 }
 0x2e5   : > { %v11606_v16 = vpop.f32.mrf.mxu0 }
 0x2e7   : > { %v11608_v20 = vpop.f32.mrf.mxu0 }
 0x2e9   : > { %v11610_v39 = vpop.f32.mrf.mxu0  ;;  %4307 = vmatmul.mubr.bf16.gmra.mxu0 %v11124_v5 }
 0x2ea   : > { %4316 = vmatprep.mubr.bf16.mxu0 %v11144_v61 }
 0x2eb   : > { %4400 = vmatmul.mubr.bf16.vlgmr.msra.gmra.mxu1 %v11138_v36  ;;  %v11615_v30 = vpop.f32.mrf.mxu0 }
 0x2ec   : > { %4409 = vmatprep.mubr.bf16.mxu1 %v14491_v17 }
 0x2ed   : > { %v11618_v49 = vpop.f32.mrf.mxu0 }
 0x2ef   : > { %v11620_v19 = vpop.f32.mrf.mxu0 }
 0x2f1   : > { %v11622_v12 = vpop.f32.mrf.mxu0  ;;  %4317 = vmatmul.mubr.bf16.gmra.mxu0 %v11176_v43 }
 0x2f2   : > { %4326 = vmatprep.mubr.bf16.mxu0 %v11186_v33 }
 0x2f3   : > { %4410 = vmatmul.mubr.bf16.gmra.mxu1 %v11196_v55  ;;  %v11627_v5 = vpop.f32.mrf.mxu0 }
 0x2f4   : > { %4419 = vmatprep.mubr.bf16.mxu1 %v14491_v17 }
 0x2f5   : > { %v11630_v36 = vpop.f32.mrf.mxu0 }
 0x2f7   : > { %v11632_v61 = vpop.f32.mrf.mxu0 }
 0x2f9   : > { %v11634_v26 = vpop.f32.mrf.mxu0  ;;  %4327 = vmatmul.mubr.bf16.gmra.mxu0 %v11228_v34 }
 0x2fa   : > { %4336 = vmatprep.mubr.bf16.mxu0 %v11248_v44 }
 0x2fb   : > { %4420 = vmatmul.mubr.bf16.gmra.mxu1 %v11242_v58  ;;  %v11639_v43 = vpop.f32.mrf.mxu0 }
 0x2fc   : > { %4429 = vmatprep.mubr.bf16.mxu1 %v14491_v17 }
 0x2fd   : > { %v11642_v33 = vpop.f32.mrf.mxu0 }
 0x2ff   : > { %v11644_v55 = vpop.f32.mrf.mxu0 }
 0x301   : > { %v11646_v56 = vpop.f32.mrf.mxu0  ;;  %4337 = vmatmul.mubr.bf16.gmra.mxu0 %v11281_v57 }
 0x302   : > { %4346 = vmatprep.mubr.bf16.mxu0 %v11291_v53 }
 0x303   : > { %4430 = vmatmul.mubr.bf16.gmra.mxu1 %v11301_v25  ;;  %v11651_v34 = vpop.f32.mrf.mxu0 }
 0x304   : > { %4439 = vmatprep.mubr.bf16.mxu1 %v14491_v17 }
 0x305   : > { %v11654_v58 = vpop.f32.mrf.mxu0 }
 0x307   : > { %v11656_v44 = vpop.f32.mrf.mxu0 }
 0x309   : > { %v11658_v52 = vpop.f32.mrf.mxu0  ;;  %4347 = vmatmul.mubr.bf16.gmra.mxu0 %v11334_v6 }
 0x30a   : > { %4356 = vmatprep.mubr.bf16.mxu0 %v11350_v59 }
 0x30b   : > { %4440 = vmatmul.mubr.bf16.gmra.mxu1 %v11344_v42  ;;  %v11663_v57 = vpop.f32.mrf.mxu0 }
 0x30c   : > { %4449 = vmatprep.mubr.bf16.mxu1 %v14491_v17 }
 0x30d   : > { %v11666_v53 = vpop.f32.mrf.mxu0 }
 0x30f   : > { %v11668_v25 = vpop.f32.mrf.mxu0 }
 0x311   : > { %v11670_v63 = vpop.f32.mrf.mxu0  ;;  %4357 = vmatmul.mubr.bf16.gmra.mxu0 %v11376_v62 }
 0x313   : > { %4450 = vmatmul.mubr.bf16.gmra.mxu1 %v11383_v51  ;;  %v11674_v13 = vpop.f32.mrf.mxu0 }
 0x314   : > { %4459 = vmatprep.mubr.bf16.mxu1 %v14491_v17 }
 0x315   : > { %v11677_v6 = vpop.f32.mrf.mxu0 }
 0x317   : > { %v11679_v42 = vpop.f32.mrf.mxu0 }
 0x319   : > { %v11681_v59 = vpop.f32.mrf.mxu0 }
 0x31b   : > { %4460 = vmatmul.mubr.bf16.gmra.mxu1 %v11404_v21  ;;  %v11684_v18 = vpop.f32.mrf.mxu0  ;;  %v14730_v21 = vld [vmem:[#allocation12_spill] sm:$0xff] }
 0x31c   : > { %4469 = vmatprep.mubr.bf16.mxu1 %v14491_v17  ;;  %v11704_v2 = vrot.slane %v11696_v24, %v14730_v21 }
 0x31d   : > { %v11687_v60 = vpop.f32.mrf.mxu0 }
 0x31e   : > { %v3823_v45 = vadd.f32 %v11574_v15, %v11704_v2  ;;  %v3827_v37 = vadd.f32 %v11586_v22, %v11704_v2  ;;  %v3833_v8 = vadd.f32 %v11598_v31, %v11704_v2 }
 0x31f   : > { %v11689_v62 = vpop.f32.mrf.mxu0 }
 0x321   : > { %v11691_v51 = vpop.f32.mrf.mxu0 }
 0x323   : > { %4470 = vmatmul.mubr.bf16.gmra.mxu1 %v11425_v32  ;;  %v11699_v3 = vpop.f32.mrf.mxu0 }
 0x324   : > { %4479 = vmatprep.mubr.bf16.mxu1 %v14491_v17 }
 0x325   : > { %v11706_v35 = vpop.f32.mrf.mxu0 }
 0x327   : > { %v11712_v14 = vpop.f32.mrf.mxu0 }
 0x329   : > { %v11716_v32 = vpop.f32.mrf.mxu0 }
 0x32a   : > { %v4015_v28 = vpop.f32.mrf.mxu1 }
 0x32b   : > { %4480 = vmatmul.mubr.bf16.gmra.mxu1 %v11446_v54  ;;  %v11721_v40 = vadd.f32 %v4015_v28, %v3823_v45  ;;  %v11723_v27 = vpop.f32.mrf.mxu0  ;;  %v3829_v54 = vadd.f32 %v11590_v9, %v11710_v48  ;;  %v3837_v9 = vadd.f32 %v11606_v16, %v11704_v2 }
 0x32c   : > { %4489 = vmatprep.mubr.bf16.mxu1 %v14491_v17  ;;  %v4017_v0 = vpop.f32.mrf.mxu1 }
 0x32d   : > { %v11728_v47 = vadd.f32 %v4017_v0, %v3825_v38  ;;  %v11730_v15 = vpop.f32.mrf.mxu0  ;;  %v3835_v38 = vadd.f32 %v11603_v41, %v11710_v48  ;;  %9105 = vtanh.f32 %v11721_v40 }
 0x32e   : > { %v4019_v50 = vpop.f32.mrf.mxu1 }
 0x32f   : > { %v11734_v23 = vadd.f32 %v4019_v50, %v3827_v37  ;;  %v11736_v28 = vpop.f32.mrf.mxu0  ;;  %9107 = vtanh.f32 %v11728_v47 }
 0x330   : > { %v4021_v45 = vpop.f32.mrf.mxu1 }
 0x331   : > { %v11740_v21 = vadd.f32 %v4021_v45, %v3829_v54  ;;  %v11742_v24 = vpop.f32.mrf.mxu0  ;;  %9109 = vtanh.f32 %v11734_v23 }
 0x333   : > { %14732 = vst [vmem:[#allocation97_spill] sm:$0xff] %v11740_v21  ;;  %v4025_v0 = vpop.f32.mrf.mxu1  ;;  %4490 = vmatmul.mubr.bf16.gmra.mxu1 %v11467_v29  ;;  %v11749_v50 = vpop.f32.mrf.mxu0  ;;  %v3839_v29 = vadd.f32 %v11608_v20, %v11710_v48 }
 0x334   : > { %v11747_v22 = vadd.f32 %v4025_v0, %v3833_v8  ;;  %14734 = vst [vmem:[#allocation100_spill] sm:$0xff] %v11749_v50  ;;  %4499 = vmatprep.mubr.bf16.mxu1 %v14491_v17  ;;  %v3843_v0 = vadd.f32 %v11610_v39, %v11704_v2  ;;  %v3847_v39 = vadd.f32 %v11618_v49, %v11704_v2 }
 0x335   : > { %v4027_v37 = vpop.f32.mrf.mxu1  ;;  %v11756_v54 = vpop.f32.mrf.mxu0 }
 0x336   : > { %14733 = vst [vmem:[#allocation99_spill] sm:$0xff] %v11747_v22  ;;  %v11754_v31 = vadd.f32 %v4027_v37, %v3835_v38  ;;  %v3845_v38 = vadd.f32 %v11615_v30, %v11710_v48 }
 0x337   : > { %v4029_v45 = vpop.f32.mrf.mxu1  ;;  %v11762_v41 = vpop.f32.mrf.mxu0 }
 0x338   : > { %v11760_v21 = vadd.f32 %v4029_v45, %v3837_v9 }
 0x339   : > { %v4031_v8 = vpop.f32.mrf.mxu1  ;;  %v11768_v22 = vpop.f32.mrf.mxu0 }
 0x33a   : > { %v11766_v50 = vadd.f32 %v4031_v8, %v3839_v29  ;;  %14735 = vst [vmem:[#allocation101_spill] sm:$0xff] %v11768_v22  ;;  %v14763_v40 = vld [vmem:[#allocation97_spill] sm:$0xff] }
 0x33b   : > { %v4035_v16 = vpop.f32.mrf.mxu1  ;;  %4500 = vmatmul.mubr.bf16.gmra.mxu1 %v11488_v4  ;;  %v11775_v20 = vpop.f32.mrf.mxu0  ;;  %v3849_v4 = vadd.f32 %v11620_v19, %v11710_v48  ;;  %9111 = vtanh.f32 %v14763_v40 }
 0x33c   : > { %v11773_v37 = vadd.f32 %v4035_v16, %v3843_v0  ;;  %14737 = vst [vmem:[#allocation102_spill] sm:$0xff] %v11775_v20  ;;  %4509 = vmatprep.mubr.bf16.mxu1 %v14491_v17  ;;  %v3853_v16 = vadd.f32 %v11622_v12, %v11704_v2  ;;  %v3857_v12 = vadd.f32 %v11630_v36, %v11704_v2 }
 0x33d   : > { %v4037_v9 = vpop.f32.mrf.mxu1  ;;  %v11782_v29 = vpop.f32.mrf.mxu0 }
 0x33e   : > { %14736 = vst [vmem:[#allocation103_spill] sm:$0xff] %v11773_v37  ;;  %v11780_v45 = vadd.f32 %v4037_v9, %v3845_v38  ;;  %v3855_v38 = vadd.f32 %v11627_v5, %v11710_v48 }
 0x33f   : > { %v4039_v8 = vpop.f32.mrf.mxu1  ;;  %v11788_v30 = vpop.f32.mrf.mxu0 }
 0x340   : > { %v11786_v22 = vadd.f32 %v4039_v8, %v3847_v39  ;;  %14738 = vst [vmem:[#allocation104_spill] sm:$0xff] %v11788_v30 }
 0x341   : > { %v4041_v0 = vpop.f32.mrf.mxu1  ;;  %v11794_v37 = vpop.f32.mrf.mxu0 }
 0x342   : > { %v11792_v20 = vadd.f32 %v4041_v0, %v3849_v4  ;;  %14739 = vst [vmem:[#allocation105_spill] sm:$0xff] %v11794_v37 }
 0x343   : > { %v4045_v49 = vpop.f32.mrf.mxu1  ;;  %4510 = vmatmul.mubr.bf16.gmra.mxu1 %v11509_v10  ;;  %v11801_v19 = vpop.f32.mrf.mxu0  ;;  %v3859_v10 = vadd.f32 %v11632_v61, %v11710_v48 }
 0x344   : > { %v11799_v9 = vadd.f32 %v4045_v49, %v3853_v16  ;;  %14740 = vst [vmem:[#allocation106_spill] sm:$0xff] %v11801_v19  ;;  %4519 = vmatprep.mubr.bf16.mxu1 %v14491_v17  ;;  %v3863_v49 = vadd.f32 %v11634_v26, %v11704_v2  ;;  %v3867_v26 = vadd.f32 %v11642_v33, %v11704_v2 }
 0x345   : > { %v4047_v39 = vpop.f32.mrf.mxu1  ;;  %v11808_v4 = vpop.f32.mrf.mxu0 }
 0x346   : > { %v11806_v8 = vadd.f32 %v4047_v39, %v3855_v38  ;;  %v3865_v38 = vadd.f32 %v11639_v43, %v11710_v48 }
 0x347   : > { %v4049_v0 = vpop.f32.mrf.mxu1  ;;  %v11814_v5 = vpop.f32.mrf.mxu0 }
 0x348   : > { %v11812_v37 = vadd.f32 %v4049_v0, %v3857_v12  ;;  %14741 = vst [vmem:[#allocation109_spill] sm:$0xff] %v11814_v5 }
 0x349   : > { %v4051_v16 = vpop.f32.mrf.mxu1  ;;  %v11820_v30 = vpop.f32.mrf.mxu0 }
 0x34a   : > { %v11818_v19 = vadd.f32 %v4051_v16, %v3859_v10  ;;  %14742 = vst [vmem:[#allocation111_spill] sm:$0xff] %v11820_v30 }
 0x34b   : > { %v4055_v36 = vpop.f32.mrf.mxu1  ;;  %4520 = vmatmul.mubr.bf16.gmra.mxu1 %v11530_v1  ;;  %v11827_v61 = vpop.f32.mrf.mxu0  ;;  %v3869_v1 = vadd.f32 %v11644_v55, %v11710_v48 }
 0x34c   : > { %v11825_v39 = vadd.f32 %v4055_v36, %v3863_v49  ;;  %14743 = vst [vmem:[#allocation113_spill] sm:$0xff] %v11827_v61  ;;  %4529 = vmatprep.mubr.bf16.mxu1 %v14491_v17  ;;  %v3873_v36 = vadd.f32 %v11646_v56, %v11704_v2  ;;  %v3877_v56 = vadd.f32 %v11654_v58, %v11704_v2 }
 0x34d   : > { %v4057_v12 = vpop.f32.mrf.mxu1  ;;  %v11834_v10 = vpop.f32.mrf.mxu0 }
 0x34e   : > { %v11832_v0 = vadd.f32 %v4057_v12, %v3865_v38  ;;  %v3875_v38 = vadd.f32 %v11651_v34, %v11710_v48 }
 0x34f   : > { %v4059_v16 = vpop.f32.mrf.mxu1  ;;  %v11840_v43 = vpop.f32.mrf.mxu0 }
 0x350   : > { %v11838_v30 = vadd.f32 %v4059_v16, %v3867_v26  ;;  %14744 = vst [vmem:[#allocation115_spill] sm:$0xff] %v11840_v43 }
 0x351   : > { %v4061_v49 = vpop.f32.mrf.mxu1  ;;  %v11846_v5 = vpop.f32.mrf.mxu0 }
 0x352   : > { %v11844_v61 = vadd.f32 %v4061_v49, %v3869_v1  ;;  %14745 = vst [vmem:[#allocation117_spill] sm:$0xff] %v11846_v5 }
 0x353   : > { %v4065_v33 = vpop.f32.mrf.mxu1  ;;  %4530 = vmatmul.mubr.bf16.gmra.mxu1 %v11551_v46  ;;  %v11853_v55 = vpop.f32.mrf.mxu0  ;;  %v3879_v46 = vadd.f32 %v11656_v44, %v11710_v48 }
 0x354   : > { %v11851_v12 = vadd.f32 %v4065_v33, %v3873_v36  ;;  %14746 = vst [vmem:[#allocation116_spill] sm:$0xff] %v11853_v55  ;;  %4539 = vmatprep.mubr.bf16.mxu1 %v14491_v17  ;;  %v3883_v33 = vadd.f32 %v11658_v52, %v11704_v2  ;;  %v3887_v52 = vadd.f32 %v11666_v53, %v11704_v2 }
 0x355   : > { %v4067_v26 = vpop.f32.mrf.mxu1  ;;  %v11860_v1 = vpop.f32.mrf.mxu0 }
 0x356   : > { %v11858_v16 = vadd.f32 %v4067_v26, %v3875_v38  ;;  %v3885_v38 = vadd.f32 %v11663_v57, %v11710_v48 }
 0x357   : > { %v4069_v49 = vpop.f32.mrf.mxu1  ;;  %v11866_v34 = vpop.f32.mrf.mxu0 }
 0x358   : > { %v11864_v5 = vadd.f32 %v4069_v49, %v3877_v56 }
 0x359   : > { %v4071_v36 = vpop.f32.mrf.mxu1  ;;  %v11872_v43 = vpop.f32.mrf.mxu0 }
 0x35a   : > { %v11870_v55 = vadd.f32 %v4071_v36, %v3879_v46  ;;  %14747 = vst [vmem:[#allocation119_spill] sm:$0xff] %v11872_v43 }
 0x35b   : > { %v4075_v58 = vpop.f32.mrf.mxu1  ;;  %4540 = vmatmul.mubr.bf16.gmra.mxu1 %v11572_v7  ;;  %v11879_v44 = vpop.f32.mrf.mxu0  ;;  %v3889_v7 = vadd.f32 %v11668_v25, %v11710_v48 }
 0x35c   : > { %v11877_v26 = vadd.f32 %v4075_v58, %v3883_v33  ;;  %14748 = vst [vmem:[#allocation128_spill] sm:$0xff] %v11879_v44  ;;  %4549 = vmatprep.mubr.bf16.mxu1 %v14491_v17  ;;  %v3893_v17 = vadd.f32 %v11670_v63, %v11704_v2 }
 0x35d   : > { %v4077_v56 = vpop.f32.mrf.mxu1  ;;  %v11886_v46 = vpop.f32.mrf.mxu0 }
 0x35e   : > { %v11884_v49 = vadd.f32 %v4077_v56, %v3885_v38  ;;  %v3895_v38 = vadd.f32 %v11674_v13, %v11710_v48 }
 0x35f   : > { %v4079_v36 = vpop.f32.mrf.mxu1  ;;  %v11892_v57 = vpop.f32.mrf.mxu0 }
 0x360   : > { %v11890_v43 = vadd.f32 %v4079_v36, %v3887_v52  ;;  %14749 = vst [vmem:[#allocation129_spill] sm:$0xff] %v11892_v57  ;;  %v3897_v36 = vadd.f32 %v11677_v6, %v11704_v2 }
 0x361   : > { %v4081_v33 = vpop.f32.mrf.mxu1  ;;  %v11898_v44 = vpop.f32.mrf.mxu0 }
 0x362   : > { %v11896_v58 = vadd.f32 %v4081_v33, %v3889_v7  ;;  %14750 = vst [vmem:[#allocation130_spill] sm:$0xff] %v11898_v44  ;;  %v3899_v33 = vadd.f32 %v11679_v42, %v11710_v48 }
 0x363   : > { %v4085_v53 = vpop.f32.mrf.mxu1  ;;  %4550 = vmatmul.mubr.bf16.gmra.mxu1 %v11596_v11  ;;  %v11905_v25 = vpop.f32.mrf.mxu0 }
 0x364   : > { %v11903_v56 = vadd.f32 %v4085_v53, %v3893_v17  ;;  %14751 = vst [vmem:[#allocation131_spill] sm:$0xff] %v11905_v25  ;;  %v3903_v17 = vadd.f32 %v11681_v59, %v11704_v2 }
 0x365   : > { %v4087_v52 = vpop.f32.mrf.mxu1  ;;  %v11911_v63 = vpop.f32.mrf.mxu0 }
 0x366   : > { %v11909_v57 = vadd.f32 %v4087_v52, %v3895_v38  ;;  %14752 = vst [vmem:[#allocation132_spill] sm:$0xff] %v11911_v63  ;;  %v3905_v38 = vadd.f32 %v11684_v18, %v11710_v48 }
 0x367   : > { %v4089_v7 = vpop.f32.mrf.mxu1  ;;  %v11917_v44 = vpop.f32.mrf.mxu0 }
 0x368   : > { %v11915_v11 = vadd.f32 %v4089_v7, %v3897_v36  ;;  %14753 = vst [vmem:[#allocation133_spill] sm:$0xff] %v11917_v44  ;;  %v3907_v36 = vadd.f32 %v11687_v60, %v11704_v2 }
 0x369   : > { %v4091_v13 = vpop.f32.mrf.mxu1  ;;  %v11923_v25 = vpop.f32.mrf.mxu0 }
 0x36a   : > { %v11921_v53 = vadd.f32 %v4091_v13, %v3899_v33  ;;  %14754 = vst [vmem:[#allocation134_spill] sm:$0xff] %v11923_v25  ;;  %v3909_v33 = vadd.f32 %v11689_v62, %v11710_v48 }
 0x36b   : > { %v4095_v6 = vpop.f32.mrf.mxu1  ;;  %v11929_v63 = vpop.f32.mrf.mxu0 }
 0x36c   : > { %v11927_v52 = vadd.f32 %v4095_v6, %v3903_v17  ;;  %14755 = vst [vmem:[#allocation135_spill] sm:$0xff] %v11929_v63  ;;  %v3913_v17 = vadd.f32 %v11691_v51, %v11704_v2 }
 0x36d   : > { %v4097_v42 = vpop.f32.mrf.mxu1  ;;  %v11935_v44 = vpop.f32.mrf.mxu0 }
 0x36e   : > { %v11933_v7 = vadd.f32 %v4097_v42, %v3905_v38  ;;  %14756 = vst [vmem:[#allocation136_spill] sm:$0xff] %v11935_v44  ;;  %v3915_v38 = vadd.f32 %v11699_v3, %v11710_v48 }
 0x36f   : > { %v4099_v59 = vpop.f32.mrf.mxu1  ;;  %v11941_v25 = vpop.f32.mrf.mxu0 }
 0x370   : > { %v11939_v13 = vadd.f32 %v4099_v59, %v3907_v36  ;;  %14757 = vst [vmem:[#allocation137_spill] sm:$0xff] %v11941_v25  ;;  %v3917_v36 = vadd.f32 %v11706_v35, %v11704_v2 }
 0x371   : > { %v4101_v18 = vpop.f32.mrf.mxu1  ;;  %v11947_v63 = vpop.f32.mrf.mxu0 }
 0x372   : > { %v11945_v6 = vadd.f32 %v4101_v18, %v3909_v33  ;;  %14758 = vst [vmem:[#allocation138_spill] sm:$0xff] %v11947_v63  ;;  %v3919_v33 = vadd.f32 %v11712_v14, %v11710_v48 }
 0x373   : > { %v4105_v60 = vpop.f32.mrf.mxu1  ;;  %v11953_v44 = vpop.f32.mrf.mxu0 }
 0x374   : > { %v11951_v42 = vadd.f32 %v4105_v60, %v3913_v17  ;;  %14759 = vst [vmem:[#allocation139_spill] sm:$0xff] %v11953_v44  ;;  %v3923_v17 = vadd.f32 %v11716_v32, %v11704_v2 }
 0x375   : > { %v4107_v62 = vpop.f32.mrf.mxu1  ;;  %v11959_v25 = vpop.f32.mrf.mxu0 }
 0x376   : > { %v11957_v59 = vadd.f32 %v4107_v62, %v3915_v38  ;;  %14760 = vst [vmem:[#allocation140_spill] sm:$0xff] %v11959_v25  ;;  %v3925_v38 = vadd.f32 %v11723_v27, %v11710_v48 }
 0x377   : > { %v4109_v51 = vpop.f32.mrf.mxu1  ;;  %v11965_v63 = vpop.f32.mrf.mxu0 }
 0x378   : > { %v11963_v18 = vadd.f32 %v4109_v51, %v3917_v36  ;;  %14761 = vst [vmem:[#allocation141_spill] sm:$0xff] %v11965_v63  ;;  %v3927_v36 = vadd.f32 %v11730_v15, %v11704_v2  ;;  %v3933_v15 = vadd.f32 %v11742_v24, %v11704_v2  ;;  %v3937_v24 = vadd.f32 %v11756_v54, %v11704_v2 }
 0x379   : > { %v4111_v3 = vpop.f32.mrf.mxu1  ;;  %v11971_v44 = vpop.f32.mrf.mxu0 }
 0x37a   : > { %v11969_v60 = vadd.f32 %v4111_v3, %v3919_v33  ;;  %v3929_v33 = vadd.f32 %v11736_v28, %v11710_v48  ;;  %v14764_v28 = vld [vmem:[#allocation99_spill] sm:$0xff] }
 0x37b   : > { %v4115_v35 = vpop.f32.mrf.mxu1  ;;  %v11977_v25 = vpop.f32.mrf.mxu0  ;;  %9113 = vtanh.f32 %v14764_v28 }
 0x37c   : > { %v11975_v62 = vadd.f32 %v4115_v35, %v3923_v17  ;;  %9115 = vtanh.f32 %v11754_v31 }
 0x37d   : > { %v4117_v14 = vpop.f32.mrf.mxu1  ;;  %v11983_v63 = vpop.f32.mrf.mxu0  ;;  %9117 = vtanh.f32 %v11760_v21  ;;  %v14767_v21 = vld [vmem:[#allocation101_spill] sm:$0xff] }
 0x37e   : > { %v11981_v51 = vadd.f32 %v4117_v14, %v3925_v38  ;;  %9119 = vtanh.f32 %v11766_v50 }
 0x37f   : > { %v4119_v32 = vpop.f32.mrf.mxu1  ;;  %v11990_v27 = vpop.f32.mrf.mxu0 }
 0x380   : > { %v11988_v3 = vadd.f32 %v4119_v32, %v3927_v36  ;;  %14762 = vst [vmem:[#allocation142_spill] sm:$0xff] %v11990_v27  ;;  %v14765_v36 = vld [vmem:[#allocation100_spill] sm:$0xff] }
 0x381   : > { %v4121_v17 = vpop.f32.mrf.mxu1  ;;  %v11998_v38 = vpop.f32.mrf.mxu0  ;;  %v3935_v32 = vadd.f32 %v14765_v36, %v11710_v48  ;;  %v3943_v36 = vadd.f32 %v14767_v21, %v11704_v2 }
 0x382   : > { %v11996_v35 = vadd.f32 %v4121_v17, %v3929_v33 }
 0x383   : > { %v4125_v14 = vpop.f32.mrf.mxu1  ;;  %v12006_v47 = vpop.f32.mrf.mxu0 }
 0x384   : > { %v12004_v27 = vadd.f32 %v4125_v14, %v3933_v15  ;;  %v3939_v15 = vadd.f32 %v11762_v41, %v11710_v48  ;;  %v14766_v14 = vld [vmem:[#allocation103_spill] sm:$0xff] }
 0x385   : > { %v4127_v23 = vpop.f32.mrf.mxu1  ;;  %v12014_v17 = vpop.f32.mrf.mxu0  ;;  %9121 = vtanh.f32 %v14766_v14 }
 0x386   : > { %v12012_v33 = vadd.f32 %v4127_v23, %v3935_v32  ;;  %9123 = vtanh.f32 %v11780_v45  ;;  %v14768_v23 = vld [vmem:[#allocation102_spill] sm:$0xff]  ;;  %v12040_v14 = vpop.eup %9105 }
 0x387   : > { %v4129_v40 = vpop.f32.mrf.mxu1  ;;  %v12022_v31 = vpop.f32.mrf.mxu0  ;;  %9125 = vtanh.f32 %v11786_v22 }
 0x388   : > { %v12020_v28 = vadd.f32 %v4129_v40, %v3937_v24  ;;  %9127 = vtanh.f32 %v11792_v20  ;;  %v3945_v24 = vadd.f32 %v14768_v23, %v11710_v48  ;;  %v3947_v20 = vadd.f32 %v11782_v29, %v11704_v2 }
 0x389   : > { %v4131_v54 = vpop.f32.mrf.mxu1  ;;  %v12030_v50 = vpop.f32.mrf.mxu0  ;;  %9129 = vtanh.f32 %v11799_v9 }
 0x38a   : > { %v12028_v32 = vadd.f32 %v4131_v54, %v3939_v15  ;;  %9131 = vtanh.f32 %v11806_v8  ;;  %v12043_v15 = vpop.eup %9107  ;;  %v14772_v8 = vld [vmem:[#allocation104_spill] sm:$0xff] }
 0x38b   : > { %v4135_v41 = vpop.f32.mrf.mxu1  ;;  %v12038_v45 = vpop.f32.mrf.mxu0  ;;  %14769 = vst [vmem:[#allocation97_spill] sm:$0xff] %v12043_v15  ;;  %9133 = vtanh.f32 %v11812_v37  ;;  %v3949_v23 = vadd.f32 %v14772_v8, %v11710_v48 }
 0x38c   : > { %v12036_v40 = vadd.f32 %v4135_v41, %v3943_v36  ;;  %v12052_v9 = vpop.eup %9109  ;;  %9135 = vtanh.f32 %v11818_v19  ;;  %v14775_v19 = vld [vmem:[#allocation105_spill] sm:$0xff] }
 0x38d   : > { %v4137_v22 = vpop.f32.mrf.mxu1  ;;  %v12050_v21 = vpop.f32.mrf.mxu0  ;;  %14770 = vst [vmem:[#allocation99_spill] sm:$0xff] %v12052_v9  ;;  %9137 = vtanh.f32 %v11825_v39  ;;  %v3953_v9 = vadd.f32 %v14775_v19, %v11704_v2 }
 0x38e   : > { %v12048_v54 = vadd.f32 %v4137_v22, %v3945_v24  ;;  %v12055_v41 = vpop.eup %9111  ;;  %9139 = vtanh.f32 %v11832_v0  ;;  %v14777_v0 = vld [vmem:[#allocation106_spill] sm:$0xff] }
 0x38f   : > { %v4139_v36 = vpop.f32.mrf.mxu1  ;;  %14771 = vst [vmem:[#allocation100_spill] sm:$0xff] %v12055_v41  ;;  %v12062_v29 = vpop.f32.mrf.mxu0  ;;  %9141 = vtanh.f32 %v11838_v30 }
 0x390   : > { %v12060_v15 = vadd.f32 %v4139_v36, %v3947_v20  ;;  %v12064_v37 = vpop.eup %9113  ;;  %9143 = vtanh.f32 %v11844_v61  ;;  %v3957_v61 = vadd.f32 %v11808_v4, %v11704_v2 }
 0x391   : > { %14773 = vst [vmem:[#allocation103_spill] sm:$0xff] %v12064_v37  ;;  %v4141_v24 = vpop.f32.mrf.mxu1  ;;  %v12067_v22 = vpop.eup %9115  ;;  %v3955_v37 = vadd.f32 %v14777_v0, %v11710_v48  ;;  %9145 = vtanh.f32 %v11851_v12 }
 0x392   : > { %14774 = vst [vmem:[#allocation101_spill] sm:$0xff] %v12067_v22  ;;  %v12072_v41 = vadd.f32 %v4141_v24, %v3949_v23  ;;  %v12074_v8 = vpop.f32.mrf.mxu0  ;;  %v12076_v39 = vpop.eup %9117  ;;  %9147 = vtanh.f32 %v11858_v16  ;;  %v14781_v16 = vld [vmem:[#allocation109_spill] sm:$0xff] }
 0x393   : > { %v4145_v20 = vpop.f32.mrf.mxu1  ;;  %v12079_v36 = vpop.eup %9119  ;;  %9149 = vtanh.f32 %v11864_v5 }
 0x394   : > { %14776 = vst [vmem:[#allocation102_spill] sm:$0xff] %v12079_v36  ;;  %v12084_v22 = vadd.f32 %v4145_v20, %v3953_v9  ;;  %v12086_v19 = vpop.eup %9121  ;;  %v12094_v24 = vpop.f32.mrf.mxu0  ;;  %9151 = vtanh.f32 %v11870_v55  ;;  %v3959_v20 = vadd.f32 %v14781_v16, %v11710_v48 }
 0x395   : > { %v4147_v30 = vpop.f32.mrf.mxu1  ;;  %v12089_v23 = vpop.eup %9123  ;;  %9153 = vtanh.f32 %v11877_v26 }
 0x396   : > { %14778 = vst [vmem:[#allocation104_spill] sm:$0xff] %v12089_v23  ;;  %v12096_v36 = vadd.f32 %v4147_v30, %v3955_v37  ;;  %v12098_v0 = vpop.eup %9125  ;;  %9155 = vtanh.f32 %v11884_v49  ;;  %v14783_v30 = vld [vmem:[#allocation111_spill] sm:$0xff]  ;;  %v14785_v49 = vld [vmem:[#allocation113_spill] sm:$0xff] }
 0x397   : > { %14779 = vst [vmem:[#allocation105_spill] sm:$0xff] %v12098_v0  ;;  %v4149_v12 = vpop.f32.mrf.mxu1  ;;  %v12101_v9 = vpop.eup %9127  ;;  %v3963_v55 = vadd.f32 %v14783_v30, %v11704_v2  ;;  %9157 = vtanh.f32 %v11890_v43 }
 0x398   : > { %14780 = vst [vmem:[#allocation106_spill] sm:$0xff] %v12101_v9  ;;  %v12106_v23 = vadd.f32 %v4149_v12, %v3957_v61  ;;  %v12108_v4 = vpop.eup %9129  ;;  %v12116_v9 = vpop.f32.mrf.mxu0  ;;  %9159 = vtanh.f32 %v11896_v58  ;;  %v3965_v12 = vadd.f32 %v14785_v49, %v11710_v48  ;;  %v3967_v58 = vadd.f32 %v11834_v10, %v11704_v2 }
 0x399   : > { %v4151_v5 = vpop.f32.mrf.mxu1  ;;  %v12111_v37 = vpop.eup %9131  ;;  %9161 = vtanh.f32 %v11903_v56 }
 0x39a   : > { %14782 = vst [vmem:[#allocation109_spill] sm:$0xff] %v12111_v37  ;;  %v12118_v0 = vadd.f32 %v4151_v5, %v3959_v20  ;;  %v12120_v16 = vpop.eup %9133  ;;  %9163 = vtanh.f32 %v11909_v57  ;;  %v12138_v5 = vpop.f32.mrf.mxu0  ;;  %v14789_v57 = vld [vmem:[#allocation115_spill] sm:$0xff] }
 0x39b   : > { %v4155_v26 = vpop.f32.mrf.mxu1  ;;  %v12123_v61 = vpop.eup %9135  ;;  %9165 = vtanh.f32 %v11915_v11 }
 0x39c   : > { %14784 = vst [vmem:[#allocation111_spill] sm:$0xff] %v12123_v61  ;;  %v12128_v37 = vadd.f32 %v4155_v26, %v3963_v55  ;;  %v12130_v30 = vpop.eup %9137  ;;  %9167 = vtanh.f32 %v11921_v53  ;;  %v3969_v26 = vadd.f32 %v14789_v57, %v11710_v48 }
 0x39d   : > { %v4157_v43 = vpop.f32.mrf.mxu1  ;;  %v12133_v20 = vpop.eup %9139  ;;  %9169 = vtanh.f32 %v11927_v52 }
 0x39e   : > { %14786 = vst [vmem:[#allocation113_spill] sm:$0xff] %v12128_v37  ;;  %v12140_v61 = vadd.f32 %v4157_v43, %v3965_v12  ;;  %v12142_v49 = vpop.eup %9141  ;;  %9171 = vtanh.f32 %v11933_v7  ;;  %v14792_v43 = vld [vmem:[#allocation117_spill] sm:$0xff]  ;;  %v14795_v7 = vld [vmem:[#allocation116_spill] sm:$0xff] }
 0x39f   : > { %v4159_v56 = vpop.f32.mrf.mxu1  ;;  %v12145_v55 = vpop.eup %9143  ;;  %v3973_v53 = vadd.f32 %v14792_v43, %v11704_v2  ;;  %9173 = vtanh.f32 %v11939_v13 }
 0x3a0   : > { %14787 = vst [vmem:[#allocation143_spill] sm:$0xff] %v12140_v61  ;;  %14788 = vst [vmem:[#allocation144_spill] sm:$0xff] %v12145_v55  ;;  %v12150_v37 = vadd.f32 %v4159_v56, %v3967_v58  ;;  %v12152_v10 = vpop.eup %9145  ;;  %v12160_v61 = vpop.f32.mrf.mxu0  ;;  %9175 = vtanh.f32 %v11945_v6  ;;  %v3975_v56 = vadd.f32 %v14795_v7, %v11710_v48  ;;  %v3977_v6 = vadd.f32 %v11860_v1, %v11704_v2 }
 0x3a1   : > { %v4161_v11 = vpop.f32.mrf.mxu1  ;;  %v12155_v12 = vpop.eup %9147  ;;  %9177 = vtanh.f32 %v11951_v42  ;;  %v3979_v2 = vadd.f32 %v11866_v34, %v11710_v48 }
 0x3a2   : > { %14790 = vst [vmem:[#allocation115_spill] sm:$0xff] %v12150_v37  ;;  %14791 = vst [vmem:[#allocation145_spill] sm:$0xff] %v12155_v12  ;;  %v12162_v55 = vadd.f32 %v4161_v11, %v3969_v26  ;;  %v12164_v57 = vpop.eup %9149  ;;  %v14796_v37 = vld [vmem:[#allocation11_spill] sm:$0xff]  ;;  %9179 = vtanh.f32 %v11957_v59 }
 0x3a3   : > { %v4165_v52 = vpop.f32.mrf.mxu1  ;;  %v12167_v58 = vpop.eup %9151  ;;  %v12172_v12 = vsub.s32 3, %v14796_v37  ;;  %9181 = vtanh.f32 %v11963_v18 }
 0x3a4   : > { %14793 = vst [vmem:[#allocation117_spill] sm:$0xff] %v12162_v55  ;;  %14794 = vst [vmem:[#allocation146_spill] sm:$0xff] %v12167_v58  ;;  %v12175_v13 = vadd.f32 %v4165_v52, %v3973_v53  ;;  %v12177_v43 = vpop.eup %9153  ;;  %v14799_v55 = vld [vmem:[#allocation114_spill] sm:$0xff]  ;;  %v12189_v37 = vpop.f32.mrf.mxu0  ;;  %9183 = vtanh.f32 %v11969_v60 }
 0x3a5   : > { %14797 = vst [vmem:[#allocation116_spill] sm:$0xff] %v12172_v12  ;;  %v4167_v26 = vpop.f32.mrf.mxu1  ;;  %v12180_v11 = vpop.eup %9155  ;;  %v14800_v58 = vld [vmem:[#allocation98_spill] sm:$0xff]  ;;  %9185 = vtanh.f32 %v11975_v62 }
 0x3a6   : > { %14798 = vst [vmem:[#allocation147_spill] sm:$0xff] %v12175_v13  ;;  %v12186_v7 = vrot.slane %v14800_v58, %v14799_v55  ;;  %v12191_v42 = vadd.f32 %v4167_v26, %v3975_v56  ;;  %v12193_v53 = vpop.eup %9157  ;;  %v12202_v1 = vrot.slane %v14800_v58, %v12172_v12  ;;  %9187 = vtanh.f32 %v11981_v51  ;;  %v14805_v55 = vld [vmem:[#allocation119_spill] sm:$0xff]  ;;  %v12215_v48 = vpop.f32.mrf.mxu0  ;;  %v14809_v51 = vld [vmem:[#allocation128_spill] sm:$0xff] }
 0x3a7   : > { %v4169_v59 = vpop.f32.mrf.mxu1  ;;  %v12196_v52 = vpop.eup %9159  ;;  %9189 = vtanh.f32 %v11988_v3 }
 0x3a8   : > { %14801 = vst [vmem:[#allocation98_spill] sm:$0xff] %v12191_v42  ;;  %v12205_v18 = vadd.f32 %v4169_v59, %v3977_v6  ;;  %v12207_v56 = vpop.eup %9161  ;;  %v4209_v42 = vadd.f32 %v14805_v55, %v12186_v7  ;;  %9191 = vtanh.f32 %v11996_v35  ;;  %v4211_v59 = vadd.f32 %v14809_v51, %v12202_v1  ;;  %v12235_v35 = vpop.f32.mrf.mxu0 }
 0x3a9   : > { %14803 = vst [vmem:[#allocation149_spill] sm:$0xff] %v12207_v56  ;;  %v4171_v26 = vpop.f32.mrf.mxu1  ;;  %v12210_v60 = vpop.eup %9163  ;;  %9193 = vtanh.f32 %v12004_v27 }
 0x3aa   : > { %14802 = vst [vmem:[#allocation148_spill] sm:$0xff] %v12205_v18  ;;  %14804 = vst [vmem:[#allocation150_spill] sm:$0xff] %v12210_v60  ;;  %v12217_v34 = vadd.f32 %v4171_v26, %v3979_v2  ;;  %v12219_v58 = vpop.eup %9165  ;;  %9195 = vtanh.f32 %v12012_v33  ;;  %v4213_v26 = vadd.f32 %v11886_v46, %v12186_v7  ;;  %v14814_v33 = vld [vmem:[#allocation129_spill] sm:$0xff] }
 0x3ab   : > { %14807 = vst [vmem:[#allocation151_spill] sm:$0xff] %v12219_v58  ;;  %v4401_v62 = vpop.f32.mrf.mxu1  ;;  %v12222_v6 = vpop.eup %9167  ;;  %9197 = vtanh.f32 %v12020_v28 }
 0x3ac   : > { %14806 = vst [vmem:[#allocation119_spill] sm:$0xff] %v12217_v34  ;;  %14808 = vst [vmem:[#allocation152_spill] sm:$0xff] %v12222_v6  ;;  %v4402_v12 = vadd.f32 %v4401_v62, %v4209_v42  ;;  %v12227_v55 = vpop.eup %9169  ;;  %9199 = vtanh.f32 %v12028_v32  ;;  %v4215_v62 = vadd.f32 %v14814_v33, %v12202_v1  ;;  %v12251_v32 = vpop.f32.mrf.mxu0 }
 0x3ad   : > { %14810 = vst [vmem:[#allocation128_spill] sm:$0xff] %v12227_v55  ;;  %v4403_v3 = vpop.f32.mrf.mxu1  ;;  %v12230_v2 = vpop.eup %9171 }
 0x3ae   : > { %14811 = vst [vmem:[#allocation153_spill] sm:$0xff] %v12230_v2  ;;  %v8149_v34 = vmul.f32 -1.442695, %v4402_v12  ;;  %v4404_v18 = vadd.f32 %v4403_v3, %v4211_v59  ;;  %v12237_v51 = vpop.eup %9173  ;;  %v14817_v59 = vld [vmem:[#allocation130_spill] sm:$0xff] }
 0x3af   : > { %14812 = vst [vmem:[#allocation154_spill] sm:$0xff] %v12237_v51  ;;  %v4405_v27 = vpop.f32.mrf.mxu1  ;;  %v12240_v42 = vpop.eup %9175  ;;  %v4219_v3 = vadd.f32 %v14817_v59, %v12186_v7 }
 0x3b0   : > { %14813 = vst [vmem:[#allocation155_spill] sm:$0xff] %v12240_v42  ;;  %9201 = vpow2.f32 %v8149_v34  ;;  %v8150_v13 = vmul.f32 -1.442695, %v4404_v18  ;;  %v4406_v2 = vadd.f32 %v4405_v27, %v4213_v26  ;;  %v12244_v46 = vpop.eup %9177 }
 0x3b1   : > { %14815 = vst [vmem:[#allocation129_spill] sm:$0xff] %v12244_v46  ;;  %9203 = vtanh.f32 %v12036_v40  ;;  %v4407_v28 = vpop.f32.mrf.mxu1  ;;  %v12247_v12 = vpop.eup %9179  ;;  %v14820_v40 = vld [vmem:[#allocation131_spill] sm:$0xff] }
 0x3b2   : > { %14816 = vst [vmem:[#allocation156_spill] sm:$0xff] %v12247_v12  ;;  %9205 = vpow2.f32 %v8150_v13  ;;  %v8151_v42 = vmul.f32 -1.442695, %v4406_v2  ;;  %v4408_v51 = vadd.f32 %v4407_v28, %v4215_v62  ;;  %v12253_v55 = vpop.eup %9181  ;;  %v4221_v26 = vadd.f32 %v14820_v40, %v12202_v1  ;;  %v14823_v62 = vld [vmem:[#allocation132_spill] sm:$0xff] }
 0x3b3   : > { %14818 = vst [vmem:[#allocation130_spill] sm:$0xff] %v12253_v55  ;;  %9207 = vtanh.f32 %v12048_v54  ;;  %v4411_v18 = vpop.f32.mrf.mxu1  ;;  %v12256_v34 = vpop.eup %9183  ;;  %v4223_v28 = vadd.f32 %v14823_v62, %v12186_v7 }
 0x3b4   : > { %14819 = vst [vmem:[#allocation157_spill] sm:$0xff] %v12256_v34  ;;  %9209 = vpow2.f32 %v8151_v42  ;;  %v8152_v27 = vmul.f32 -1.442695, %v4408_v51  ;;  %v4412_v33 = vadd.f32 %v4411_v18, %v4219_v3  ;;  %v12260_v12 = vpop.eup %9185  ;;  %v12267_v54 = vpop.f32.mrf.mxu0  ;;  %v5072_v51 = vld [vmem:[%s14199_s5] sm:$0x3]  ;;  %v14826_v18 = vld [vmem:[#allocation133_spill] sm:$0xff] }
 0x3b5   : > { %14821 = vst [vmem:[#allocation131_spill] sm:$0xff] %v12260_v12  ;;  %9211 = vtanh.f32 %v12060_v15  ;;  %v4413_v13 = vpop.f32.mrf.mxu1  ;;  %v12263_v2 = vpop.eup %9187  ;;  %v4225_v40 = vadd.f32 %v14826_v18, %v12202_v1 }
 0x3b6   : > { %14822 = vst [vmem:[#allocation158_spill] sm:$0xff] %v12263_v2  ;;  %9213 = vpow2.f32 %v8152_v27  ;;  %v8153_v59 = vmul.f32 -1.442695, %v4412_v33  ;;  %v4414_v34 = vadd.f32 %v4413_v13, %v4221_v26  ;;  %v12272_v42 = vpop.eup %9189  ;;  %v14828_v33 = vld [vmem:[#allocation12_spill] sm:$0xff] }
 0x3b7   : > { %14824 = vst [vmem:[#allocation132_spill] sm:$0xff] %v12272_v42  ;;  %9215 = vtanh.f32 %v12072_v41  ;;  %v4415_v15 = vpop.f32.mrf.mxu1  ;;  %v12275_v3 = vpop.eup %9191  ;;  %v12283_v13 = vrot.slane %v5072_v51, %v14828_v33  ;;  %v14830_v41 = vld [vmem:[#allocation134_spill] sm:$0xff] }
 0x3b8   : > { %14825 = vst [vmem:[#allocation159_spill] sm:$0xff] %v12275_v3  ;;  %9217 = vpow2.f32 %v8153_v59  ;;  %v8154_v62 = vmul.f32 -1.442695, %v4414_v34  ;;  %v4416_v2 = vadd.f32 %v4415_v15, %v4223_v28  ;;  %v12279_v27 = vpop.eup %9193  ;;  %v4229_v12 = vadd.f32 %v14830_v41, %v12186_v7  ;;  %v12289_v3 = vpop.f32.mrf.mxu0  ;;  %v14832_v28 = vld [vmem:[#allocation135_spill] sm:$0xff] }
 0x3b9   : > { %14827 = vst [vmem:[#allocation133_spill] sm:$0xff] %v12279_v27  ;;  %9219 = vtanh.f32 %v12084_v22  ;;  %v4417_v26 = vpop.f32.mrf.mxu1  ;;  %v12285_v42 = vpop.eup %9195  ;;  %v4231_v15 = vadd.f32 %v14832_v28, %v12202_v1  ;;  %v14833_v22 = vld [vmem:[#allocation136_spill] sm:$0xff]  ;;  %v14837_v28 = vld [vmem:[#allocation138_spill] sm:$0xff] }
 0x3ba   : > { %14829 = vst [vmem:[#allocation160_spill] sm:$0xff] %v12285_v42  ;;  %9221 = vpow2.f32 %v8154_v62  ;;  %v8155_v18 = vmul.f32 -1.442695, %v4416_v2  ;;  %v4418_v59 = vadd.f32 %v4417_v26, %v4225_v40  ;;  %v12291_v34 = vpop.eup %9197  ;;  %v4233_v27 = vadd.f32 %v14833_v22, %v12186_v7  ;;  %v14834_v42 = vld [vmem:[#allocation13_spill] sm:$0xff]  ;;  %v14838_v22 = vld [vmem:[#allocation139_spill] sm:$0xff] }
 0x3bb   : > { %14831 = vst [vmem:[#allocation134_spill] sm:$0xff] %v12291_v34  ;;  %9223 = vtanh.f32 %v12096_v36  ;;  %v4421_v33 = vpop.f32.mrf.mxu1  ;;  %v12299_v55 = vrot.slane %v5072_v51, %v14834_v42  ;;  %v12301_v41 = vpop.eup %9199  ;;  %v14836_v62 = vld [vmem:[#allocation137_spill] sm:$0xff]  ;;  %v4239_v46 = vadd.f32 %v14837_v28, %v12186_v7  ;;  %v4241_v6 = vadd.f32 %v14838_v22, %v12202_v1  ;;  %v14839_v36 = vld [vmem:[#allocation140_spill] sm:$0xff] }
 0x3bc   : > { %14835 = vst [vmem:[#allocation135_spill] sm:$0xff] %v12301_v41  ;;  %v4235_v2 = vadd.f32 %v14836_v62, %v12202_v1  ;;  %9225 = vpow2.f32 %v8155_v18  ;;  %v8156_v40 = vmul.f32 -1.442695, %v4418_v59  ;;  %v4422_v26 = vadd.f32 %v4421_v33, %v4229_v12  ;;  %v12316_v62 = vpop.f32.mrf.mxu0  ;;  %v14841_v28 = vld [vmem:[#allocation141_spill] sm:$0xff] }
 0x3bd   : > { %v9202_v34 = vpop.eup %9201  ;;  %v12311_v58 = vadd.f32 %v14839_v36, %v12186_v7  ;;  %9227 = vtanh.f32 %v12106_v23  ;;  %v4423_v51 = vpop.f32.mrf.mxu1  ;;  %v12320_v41 = vadd.f32 %v14841_v28, %v12202_v1  ;;  %v12324_v22 = vadd.f32 %v11971_v44, %v12186_v7  ;;  %v14843_v44 = vld [vmem:[#allocation142_spill] sm:$0xff] }
 0x3be   : > { %v12314_v42 = vpop.eup %9203  ;;  %v4816_v18 = vadd.f32 1.0, %v9202_v34  ;;  %9229 = vpow2.f32 %v8156_v40  ;;  %v8157_v12 = vmul.f32 -1.442695, %v4422_v26  ;;  %v4424_v33 = vadd.f32 %v4423_v51, %v4231_v15 }
 0x3bf   : > { %14840 = vst [vmem:[#allocation136_spill] sm:$0xff] %v12314_v42  ;;  %v9206_v59 = vpop.eup %9205  ;;  %v12328_v23 = vadd.f32 %v11977_v25, %v12202_v1  ;;  %9231 = vtanh.f32 %v12118_v0  ;;  %v4425_v36 = vpop.f32.mrf.mxu1  ;;  %v12335_v28 = vadd.f32 %v11983_v63, %v12186_v7  ;;  %v12339_v42 = vadd.f32 %v14843_v44, %v12202_v1 }
 0x3c0   : > { %v12331_v34 = vpop.eup %9207  ;;  %9233 = vrcp.f32 %v4816_v18  ;;  %v4817_v15 = vadd.f32 1.0, %v9206_v59  ;;  %v8158_v40 = vmul.f32 -1.442695, %v4424_v33  ;;  %v4426_v26 = vadd.f32 %v4425_v36, %v4233_v27  ;;  %v12347_v18 = vpop.f32.mrf.mxu0 }
 0x3c1   : > { %14842 = vst [vmem:[#allocation137_spill] sm:$0xff] %v12331_v34  ;;  %v9210_v51 = vpop.eup %9209  ;;  %v12343_v25 = vadd.f32 %v11998_v38, %v12186_v7  ;;  %9235 = vpow2.f32 %v8157_v12  ;;  %v4427_v0 = vpop.f32.mrf.mxu1  ;;  %v12351_v36 = vadd.f32 %v12006_v47, %v12202_v1  ;;  %v12355_v44 = vadd.f32 %v12014_v17, %v12186_v7 }
 0x3c2   : > { %v12345_v34 = vpop.eup %9211  ;;  %9237 = vrcp.f32 %v4817_v15  ;;  %v4818_v27 = vadd.f32 1.0, %v9210_v51  ;;  %v8159_v33 = vmul.f32 -1.442695, %v4426_v26  ;;  %v4428_v59 = vadd.f32 %v4427_v0, %v4235_v2 }
 0x3c3   : > { %14844 = vst [vmem:[#allocation138_spill] sm:$0xff] %v12345_v34  ;;  %v9214_v63 = vpop.eup %9213  ;;  %v12359_v38 = vadd.f32 %v12022_v31, %v12202_v1  ;;  %9239 = vpow2.f32 %v8158_v40  ;;  %v4431_v12 = vpop.f32.mrf.mxu1  ;;  %v12365_v47 = vadd.f32 %v12030_v50, %v12186_v7  ;;  %v12369_v17 = vadd.f32 %v12038_v45, %v12202_v1 }
 0x3c4   : > { %v12361_v34 = vpop.eup %9215  ;;  %9241 = vrcp.f32 %v4818_v27  ;;  %v4819_v15 = vadd.f32 1.0, %v9214_v63  ;;  %v8160_v2 = vmul.f32 -1.442695, %v4428_v59  ;;  %v4432_v26 = vadd.f32 %v4431_v12, %v4239_v46  ;;  %v12377_v27 = vpop.f32.mrf.mxu0 }
 0x3c5   : > { %14845 = vst [vmem:[#allocation139_spill] sm:$0xff] %v12361_v34  ;;  %v9218_v51 = vpop.eup %9217  ;;  %v12373_v31 = vadd.f32 %v12050_v21, %v12186_v7  ;;  %9243 = vpow2.f32 %v8159_v33  ;;  %v4433_v40 = vpop.f32.mrf.mxu1  ;;  %v12381_v12 = vadd.f32 %v12062_v29, %v12202_v1  ;;  %v12385_v45 = vadd.f32 %v12074_v8, %v12186_v7 }
 0x3c6   : > { %v12375_v0 = vpop.eup %9219  ;;  %9245 = vrcp.f32 %v4819_v15  ;;  %v4820_v46 = vadd.f32 1.0, %v9218_v51  ;;  %v8161_v59 = vmul.f32 -1.442695, %v4432_v26  ;;  %v4434_v63 = vadd.f32 %v4433_v40, %v4241_v6 }
 0x3c7   : > { %14846 = vst [vmem:[#allocation140_spill] sm:$0xff] %v12375_v0  ;;  %v9222_v50 = vpop.eup %9221  ;;  %v12389_v21 = vadd.f32 %v12094_v24, %v12202_v1  ;;  %9247 = vpow2.f32 %v8160_v2  ;;  %v4435_v33 = vpop.f32.mrf.mxu1  ;;  %v12396_v29 = vadd.f32 %v12116_v9, %v12186_v7  ;;  %v12400_v8 = vadd.f32 %v12138_v5, %v12202_v1 }
 0x3c8   : > { %v12391_v0 = vpop.eup %9223  ;;  %9249 = vrcp.f32 %v4820_v46  ;;  %v4821_v15 = vadd.f32 1.0, %v9222_v50  ;;  %v8162_v6 = vmul.f32 -1.442695, %v4434_v63  ;;  %v4436_v26 = vadd.f32 %v4435_v33, %v12311_v58  ;;  %v4312_v46 = vpop.f32.mrf.mxu0 }
 0x3c9   : > { %14847 = vst [vmem:[#allocation141_spill] sm:$0xff] %v12391_v0  ;;  %v9226_v51 = vpop.eup %9225  ;;  %v12404_v24 = vadd.f32 %v12160_v61, %v12186_v7  ;;  %9251 = vpow2.f32 %v8161_v59  ;;  %v4437_v2 = vpop.f32.mrf.mxu1  ;;  %v12411_v33 = vadd.f32 %v12189_v37, %v12202_v1  ;;  %v12415_v5 = vadd.f32 %v12215_v48, %v12186_v7 }
 0x3ca   : > { %v12406_v40 = vpop.eup %9227  ;;  %9253 = vrcp.f32 %v4821_v15  ;;  %v4822_v58 = vadd.f32 1.0, %v9226_v51  ;;  %v8163_v63 = vmul.f32 -1.442695, %v4436_v26  ;;  %v4438_v50 = vadd.f32 %v4437_v2, %v12320_v41 }
 0x3cb   : > { %14848 = vst [vmem:[#allocation142_spill] sm:$0xff] %v12406_v40  ;;  %v9230_v9 = vpop.eup %9229  ;;  %v12419_v61 = vadd.f32 %v12235_v35, %v12202_v1  ;;  %9255 = vpow2.f32 %v8162_v6  ;;  %v4441_v59 = vpop.f32.mrf.mxu1  ;;  %v12426_v37 = vadd.f32 %v12251_v32, %v12186_v7  ;;  %v12430_v48 = vadd.f32 %v12267_v54, %v12202_v1 }
 0x3cc   : > { %v12421_v15 = vpop.eup %9231  ;;  %9257 = vrcp.f32 %v4822_v58  ;;  %v4823_v26 = vadd.f32 1.0, %v9230_v9  ;;  %v8164_v41 = vmul.f32 -1.442695, %v4438_v50  ;;  %v4442_v51 = vadd.f32 %v4441_v59, %v12324_v22  ;;  %v4314_v9 = vpop.f32.mrf.mxu0 }
 0x3cd   : > { %14849 = vst [vmem:[#allocation161_spill] sm:$0xff] %v12421_v15  ;;  %v9234_v2 = vpop.eup %9233  ;;  %v12434_v35 = vadd.f32 %v12289_v3, %v12186_v7  ;;  %9259 = vpow2.f32 %v8163_v63  ;;  %v4443_v6 = vpop.f32.mrf.mxu1  ;;  %v12440_v15 = vadd.f32 %v12316_v62, %v12202_v1  ;;  %v12444_v54 = vadd.f32 %v12347_v18, %v12186_v7 }
 0x3ce   : > { %v9236_v58 = vpop.eup %9235  ;;  %9261 = vrcp.f32 %v4823_v26  ;;  %v8165_v50 = vmul.f32 -1.442695, %v4442_v51  ;;  %v4444_v22 = vadd.f32 %v4443_v6, %v12328_v23  ;;  %v5008_v59 = vmul.f32 %v9234_v2, %v12040_v14  ;;  %v14850_v23 = vld [vmem:[#allocation97_spill] sm:$0xff] }
 0x3cf   : > { %v9238_v32 = vpop.eup %9237  ;;  %v4824_v3 = vadd.f32 1.0, %v9236_v58  ;;  %9263 = vpow2.f32 %v8164_v41  ;;  %v4445_v63 = vpop.f32.mrf.mxu1  ;;  %v12450_v2 = vadd.f32 %v12377_v27, %v12202_v1 }
 0x3d0   : > { %v9240_v40 = vpop.eup %9239  ;;  %9265 = vpow2.f32 %v8165_v50  ;;  %v8166_v26 = vmul.f32 -1.442695, %v4444_v22  ;;  %v4446_v51 = vadd.f32 %v4445_v63, %v12335_v28  ;;  %v5009_v6 = vmul.f32 %v9238_v32, %v14850_v23  ;;  %v4318_v41 = vpop.f32.mrf.mxu0 }
 0x3d1   : > { %v9242_v14 = vpop.eup %9241  ;;  %9267 = vrcp.f32 %v4824_v3  ;;  %v4825_v62 = vadd.f32 1.0, %v9240_v40  ;;  %v4447_v0 = vpop.f32.mrf.mxu1  ;;  %v5084_v18 = vmul.f32 %v12283_v13, %v5008_v59  ;;  %v12456_v32 = vadd.f32 %v4312_v46, %v12186_v7  ;;  %v14851_v3 = vld [vmem:[#allocation99_spill] sm:$0xff]  ;;  %v14852_v46 = vld [vmem:[#allocation100_spill] sm:$0xff] }
 0x3d2   : > { %v9244_v58 = vpop.eup %9243  ;;  %9269 = vpow2.f32 %v8166_v26  ;;  %v8167_v34 = vmul.f32 -1.442695, %v4446_v51  ;;  %v4448_v50 = vadd.f32 %v4447_v0, %v12339_v42  ;;  %v5085_v28 = vmul.f32 %v12299_v55, %v5009_v6 }
 0x3d3   : > { %v9246_v22 = vpop.eup %9245  ;;  %9271 = vrcp.f32 %v4825_v62  ;;  %v4826_v27 = vadd.f32 1.0, %v9244_v58  ;;  %v4451_v63 = vpop.f32.mrf.mxu1  ;;  %v5010_v40 = vmul.f32 %v9242_v14, %v14851_v3  ;;  %v12461_v42 = vadd.f32 %v4314_v9, %v12202_v1  ;;  %v14853_v3 = vld [vmem:[#allocation103_spill] sm:$0xff] }
 0x3d4   : > { %v9248_v23 = vpop.eup %9247  ;;  %9273 = vpow2.f32 %v8167_v34  ;;  %v8168_v59 = vmul.f32 -1.442695, %v4448_v50  ;;  %v4452_v60 = vadd.f32 %v4451_v63, %v12343_v25  ;;  %v5148_v26 = vadd.f32 %v5085_v28, %v5084_v18  ;;  %v4320_v14 = vpop.f32.mrf.mxu0 }
 0x3d5   : > { %v9250_v51 = vpop.eup %9249  ;;  %9275 = vrcp.f32 %v4826_v27  ;;  %v4827_v0 = vadd.f32 1.0, %v9248_v23  ;;  %v4453_v6 = vpop.f32.mrf.mxu1  ;;  %v5011_v56 = vmul.f32 %v9246_v22, %v14852_v46  ;;  %v12465_v58 = vadd.f32 %v4318_v41, %v12186_v7  ;;  %v14854_v46 = vld [vmem:[#allocation101_spill] sm:$0xff] }
 0x3d6   : > { %v9252_v62 = vpop.eup %9251  ;;  %9277 = vpow2.f32 %v8168_v59  ;;  %v8169_v34 = vmul.f32 -1.442695, %v4452_v60  ;;  %v4454_v50 = vadd.f32 %v4453_v6, %v12351_v36  ;;  %5149 = vadd.xlane.f32.xlu0 %v5148_v26  ;;  %v5086_v28 = vmul.f32 %v12283_v13, %v5010_v40 }
 0x3d7   : > { %v9254_v25 = vpop.eup %9253  ;;  %9279 = vrcp.f32 %v4827_v0  ;;  %v4828_v18 = vadd.f32 1.0, %v9252_v62  ;;  %v4455_v9 = vpop.f32.mrf.mxu1  ;;  %v5087_v27 = vmul.f32 %v12299_v55, %v5011_v56  ;;  %v5012_v23 = vmul.f32 %v9250_v51, %v14853_v3 }
 0x3d8   : > { %v9256_v63 = vpop.eup %9255  ;;  %9281 = vpow2.f32 %v8169_v34  ;;  %v8170_v22 = vmul.f32 -1.442695, %v4454_v50  ;;  %v4456_v41 = vadd.f32 %v4455_v9, %v12355_v44  ;;  %v12473_v60 = vadd.f32 %v4320_v14, %v12202_v1 }
 0x3d9   : > { %v9258_v59 = vpop.eup %9257  ;;  %9283 = vrcp.f32 %v4828_v18  ;;  %v4829_v36 = vadd.f32 1.0, %v9256_v63  ;;  %v4457_v26 = vpop.f32.mrf.mxu1  ;;  %v5151_v0 = vadd.f32 %v5087_v27, %v5086_v28  ;;  %v5013_v62 = vmul.f32 %v9254_v25, %v14854_v46 }
 0x3da   : > { %v9260_v6 = vpop.eup %9259  ;;  %9285 = vpow2.f32 %v8170_v22  ;;  %v8171_v40 = vmul.f32 -1.442695, %v4456_v41  ;;  %v4458_v56 = vadd.f32 %v4457_v26, %v12359_v38  ;;  %v5088_v50 = vmul.f32 %v12283_v13, %v5012_v23  ;;  %v14855_v22 = vld [vmem:[#allocation102_spill] sm:$0xff]  ;;  %v4322_v26 = vpop.f32.mrf.mxu0 }
 0x3db   : > { %v9262_v34 = vpop.eup %9261  ;;  %9287 = vrcp.f32 %v4829_v36  ;;  %v4830_v44 = vadd.f32 1.0, %v9260_v6  ;;  %5152 = vadd.xlane.f32.xlu0 %v5151_v0  ;;  %v4461_v51 = vpop.f32.mrf.mxu1  ;;  %v5014_v14 = vmul.f32 %v9258_v59, %v12076_v39  ;;  %v5089_v27 = vmul.f32 %v12299_v55, %v5013_v62 }
 0x3dc   : > { %v9264_v18 = vpop.eup %9263  ;;  %9289 = vpow2.f32 %v8171_v40  ;;  %v8172_v9 = vmul.f32 -1.442695, %v4458_v56  ;;  %v4462_v28 = vadd.f32 %v4461_v51, %v12365_v47  ;;  %v5015_v41 = vmul.f32 %v9262_v34, %v14855_v22 }
 0x3dd   : > { %v9266_v63 = vpop.eup %9265  ;;  %9291 = vrcp.f32 %v4830_v44  ;;  %v4831_v38 = vadd.f32 1.0, %v9264_v18  ;;  %v4463_v25 = vpop.f32.mrf.mxu1  ;;  %v5090_v3 = vmul.f32 %v12283_v13, %v5014_v14  ;;  %v5154_v47 = vadd.f32 %v5089_v27, %v5088_v50  ;;  %v14856_v50 = vld [vmem:[#allocation104_spill] sm:$0xff] }
 0x3de   : > { %v9268_v36 = vpop.eup %9267  ;;  %v4832_v23 = vadd.f32 1.0, %v9266_v63  ;;  %9293 = vpow2.f32 %v8172_v9  ;;  %v8173_v39 = vmul.f32 -1.442695, %v4462_v28  ;;  %v4464_v59 = vadd.f32 %v4463_v25, %v12369_v17  ;;  %v4324_v27 = vpop.f32.mrf.mxu0 }
 0x3df   : > { %v9270_v0 = vpop.eup %9269  ;;  %9295 = vrcp.f32 %v4831_v38  ;;  %v4465_v6 = vpop.f32.mrf.mxu1  ;;  %v5091_v40 = vmul.f32 %v12299_v55, %v5015_v41  ;;  %v5016_v56 = vmul.f32 %v9268_v36, %v12086_v19  ;;  %v12488_v14 = vadd.f32 %v4322_v26, %v12186_v7  ;;  %5155 = vadd.xlane.f32.xlu1 %v5154_v47  ;;  %v14857_v36 = vld [vmem:[#allocation105_spill] sm:$0xff] }
 0x3e0   : > { %v9272_v46 = vpop.eup %9271  ;;  %9297 = vrcp.f32 %v4832_v23  ;;  %v4833_v62 = vadd.f32 1.0, %v9270_v0  ;;  %v8174_v34 = vmul.f32 -1.442695, %v4464_v59  ;;  %v4466_v44 = vadd.f32 %v4465_v6, %v12373_v31 }
 0x3e1   : > { %v9274_v51 = vpop.eup %9273  ;;  %9299 = vpow2.f32 %v8173_v39  ;;  %v4467_v17 = vpop.f32.mrf.mxu1  ;;  %v5157_v18 = vadd.f32 %v5091_v40, %v5090_v3  ;;  %v5017_v9 = vmul.f32 %v9272_v46, %v14856_v50  ;;  %v5092_v22 = vmul.f32 %v12283_v13, %v5016_v56  ;;  %v14858_v40 = vld [vmem:[#allocation106_spill] sm:$0xff] }
 0x3e2   : > { %v9276_v28 = vpop.eup %9275  ;;  %9301 = vrcp.f32 %v4833_v62  ;;  %v4834_v19 = vadd.f32 1.0, %v9274_v51  ;;  %v8175_v63 = vmul.f32 -1.442695, %v4466_v44  ;;  %v4468_v38 = vadd.f32 %v4467_v17, %v12381_v12  ;;  %v4328_v62 = vpop.f32.mrf.mxu0 }
 0x3e3   : > { %v9278_v25 = vpop.eup %9277  ;;  %9303 = vpow2.f32 %v8174_v34  ;;  %v4471_v31 = vpop.f32.mrf.mxu1  ;;  %v5093_v41 = vmul.f32 %v12299_v55, %v5017_v9  ;;  %v5018_v26 = vmul.f32 %v9276_v28, %v14857_v36  ;;  %v12497_v47 = vadd.f32 %v4324_v27, %v12202_v1  ;;  %5158 = vadd.xlane.f32.xlu1 %v5157_v18 }
 0x3e4   : > { %v9280_v23 = vpop.eup %9279  ;;  %9305 = vrcp.f32 %v4834_v19  ;;  %v4835_v3 = vadd.f32 1.0, %v9278_v25  ;;  %v8176_v39 = vmul.f32 -1.442695, %v4468_v38  ;;  %v4472_v59 = vadd.f32 %v4471_v31, %v12385_v45 }
 0x3e5   : > { %v9282_v0 = vpop.eup %9281  ;;  %9307 = vpow2.f32 %v8175_v63  ;;  %v4473_v12 = vpop.f32.mrf.mxu1  ;;  %v5160_v6 = vadd.f32 %v5093_v41, %v5092_v22  ;;  %v5019_v56 = vmul.f32 %v9280_v23, %v14858_v40  ;;  %v5094_v50 = vmul.f32 %v12283_v13, %v5018_v26  ;;  %v14859_v22 = vld [vmem:[#allocation109_spill] sm:$0xff] }
 0x3e6   : > { %v9284_v46 = vpop.eup %9283  ;;  %9309 = vrcp.f32 %v4835_v3  ;;  %v4836_v34 = vadd.f32 1.0, %v9282_v0  ;;  %v8177_v44 = vmul.f32 -1.442695, %v4472_v59  ;;  %v4474_v51 = vadd.f32 %v4473_v12, %v12389_v21  ;;  %v4330_v26 = vpop.f32.mrf.mxu0 }
 0x3e7   : > { %v9286_v17 = vpop.eup %9285  ;;  %9311 = vpow2.f32 %v8176_v39  ;;  %v4475_v45 = vpop.f32.mrf.mxu1  ;;  %v5095_v9 = vmul.f32 %v12299_v55, %v5019_v56  ;;  %v5020_v18 = vmul.f32 %v9284_v46, %v12108_v4  ;;  %v12506_v25 = vadd.f32 %v4328_v62, %v12186_v7  ;;  %5161 = vadd.xlane.f32.xlu1 %v5160_v6 }
 0x3e8   : > { %v9288_v28 = vpop.eup %9287  ;;  %9313 = vrcp.f32 %v4836_v34  ;;  %v4837_v27 = vadd.f32 1.0, %v9286_v17  ;;  %v8178_v19 = vmul.f32 -1.442695, %v4474_v51  ;;  %v4476_v63 = vadd.f32 %v4475_v45, %v12396_v29  ;;  %v14860_v51 = vld [vmem:[#allocation111_spill] sm:$0xff] }
 0x3e9   : > { %v9290_v38 = vpop.eup %9289  ;;  %9315 = vpow2.f32 %v8177_v44  ;;  %v4477_v21 = vpop.f32.mrf.mxu1  ;;  %v5163_v31 = vadd.f32 %v5095_v9, %v5094_v50  ;;  %v5021_v41 = vmul.f32 %v9288_v28, %v14859_v22  ;;  %v5096_v59 = vmul.f32 %v12283_v13, %v5020_v18 }
 0x3ea   : > { %v9292_v36 = vpop.eup %9291  ;;  %9317 = vrcp.f32 %v4837_v27  ;;  %v4838_v4 = vadd.f32 1.0, %v9290_v38  ;;  %v8179_v23 = vmul.f32 -1.442695, %v4476_v63  ;;  %v4478_v3 = vadd.f32 %v4477_v21, %v12400_v8  ;;  %v4332_v50 = vpop.f32.mrf.mxu0 }
 0x3eb   : > { %v9294_v39 = vpop.eup %9293  ;;  %9319 = vpow2.f32 %v8178_v19  ;;  %5164 = vadd.xlane.f32.xlu0 %v5163_v31  ;;  %v4481_v29 = vpop.f32.mrf.mxu1  ;;  %v5097_v0 = vmul.f32 %v12299_v55, %v5021_v41  ;;  %v5022_v12 = vmul.f32 %v9292_v36, %v12120_v16  ;;  %v12515_v34 = vadd.f32 %v4330_v26, %v12202_v1 }
 0x3ec   : > { %v9296_v6 = vpop.eup %9295  ;;  %9321 = vrcp.f32 %v4838_v4  ;;  %v4839_v40 = vadd.f32 1.0, %v9294_v39  ;;  %v8180_v56 = vmul.f32 -1.442695, %v4478_v3  ;;  %v4482_v46 = vadd.f32 %v4481_v29, %v12404_v24 }
 0x3ed   : > { %v9298_v62 = vpop.eup %9297  ;;  %9323 = vpow2.f32 %v8179_v23  ;;  %v4483_v8 = vpop.f32.mrf.mxu1  ;;  %v5166_v44 = vadd.f32 %v5097_v0, %v5096_v59  ;;  %v5023_v17 = vmul.f32 %v9296_v6, %v14860_v51  ;;  %v5098_v19 = vmul.f32 %v12283_v13, %v5022_v12  ;;  %v14861_v51 = vld [vmem:[#allocation144_spill] sm:$0xff] }
 0x3ee   : > { %v9300_v45 = vpop.eup %9299  ;;  %9325 = vrcp.f32 %v4839_v40  ;;  %v8181_v9 = vmul.f32 -1.442695, %v4482_v46  ;;  %v4484_v16 = vadd.f32 %v4483_v8, %v12411_v33  ;;  %v5024_v18 = vmul.f32 %v9298_v62, %v12130_v30  ;;  %v4334_v23 = vpop.f32.mrf.mxu0 }
 0x3ef   : > { %v9302_v28 = vpop.eup %9301  ;;  %v4840_v27 = vadd.f32 1.0, %v9300_v45  ;;  %9327 = vpow2.f32 %v8180_v56  ;;  %5167 = vadd.xlane.f32.xlu0 %v5166_v44  ;;  %v4485_v24 = vpop.f32.mrf.mxu1  ;;  %v5099_v63 = vmul.f32 %v12299_v55, %v5023_v17 }
 0x3f0   : > { %v9304_v38 = vpop.eup %9303  ;;  %9329 = vpow2.f32 %v8181_v9  ;;  %v8182_v21 = vmul.f32 -1.442695, %v4484_v16  ;;  %v4486_v31 = vadd.f32 %v4485_v24, %v12415_v5  ;;  %v5025_v22 = vmul.f32 %v9302_v28, %v12133_v20 }
 0x3f1   : > { %v9306_v41 = vpop.eup %9305  ;;  %9331 = vrcp.f32 %v4840_v27  ;;  %v4841_v33 = vadd.f32 1.0, %v9304_v38  ;;  %v4487_v30 = vpop.f32.mrf.mxu1  ;;  %v5169_v36 = vadd.f32 %v5099_v63, %v5098_v19  ;;  %v5100_v26 = vmul.f32 %v12283_v13, %v5024_v18 }
 0x3f2   : > { %v9308_v4 = vpop.eup %9307  ;;  %9333 = vpow2.f32 %v8182_v21  ;;  %v8183_v3 = vmul.f32 -1.442695, %v4486_v31  ;;  %v4488_v39 = vadd.f32 %v4487_v30, %v12419_v61  ;;  %v5101_v29 = vmul.f32 %v12299_v55, %v5025_v22  ;;  %v14862_v21 = vld [vmem:[#allocation145_spill] sm:$0xff] }
 0x3f3   : > { %v9310_v59 = vpop.eup %9309  ;;  %v12528_v5 = vadd.f32 %v4332_v50, %v12186_v7  ;;  %9335 = vrcp.f32 %v4841_v33  ;;  %v4842_v20 = vadd.f32 1.0, %v9308_v4  ;;  %5170 = vadd.xlane.f32.xlu0 %v5169_v36  ;;  %v4491_v0 = vpop.f32.mrf.mxu1  ;;  %v5026_v12 = vmul.f32 %v9306_v41, %v12142_v49 }
 0x3f4   : > { %v9312_v6 = vpop.eup %9311  ;;  %9337 = vpow2.f32 %v8183_v3  ;;  %v8184_v40 = vmul.f32 -1.442695, %v4488_v39  ;;  %v4492_v56 = vadd.f32 %v4491_v0, %v12426_v37  ;;  %v5172_v46 = vadd.f32 %v5101_v29, %v5100_v26  ;;  %v4338_v50 = vpop.f32.mrf.mxu0 }
 0x3f5   : > { %v9314_v62 = vpop.eup %9313  ;;  %v12533_v61 = vadd.f32 %v4334_v23, %v12202_v1  ;;  %9339 = vrcp.f32 %v4842_v20  ;;  %v4843_v8 = vadd.f32 1.0, %v9312_v6  ;;  %v4493_v44 = vpop.f32.mrf.mxu1  ;;  %v5027_v17 = vmul.f32 %v9310_v59, %v14861_v51 }
 0x3f6   : > { %v9316_v45 = vpop.eup %9315  ;;  %9341 = vpow2.f32 %v8184_v40  ;;  %v8185_v9 = vmul.f32 -1.442695, %v4492_v56  ;;  %v4494_v49 = vadd.f32 %v4493_v44, %v12430_v48  ;;  %5173 = vadd.xlane.f32.xlu1 %v5172_v46  ;;  %v5028_v16 = vmul.f32 %v9314_v62, %v12152_v10  ;;  %v4340_v36 = vpop.f32.mrf.mxu0  ;;  %v14863_v62 = vld [vmem:[#allocation146_spill] sm:$0xff] }
 0x3f7   : > { %v9318_v37 = vpop.eup %9317  ;;  %9343 = vrcp.f32 %v4843_v8  ;;  %v4844_v18 = vadd.f32 1.0, %v9316_v45  ;;  %v4495_v28 = vpop.f32.mrf.mxu1  ;;  %v5102_v27 = vmul.f32 %v12283_v13, %v5026_v12  ;;  %v5103_v24 = vmul.f32 %v12299_v55, %v5027_v17 }
 0x3f8   : > { %v9320_v19 = vpop.eup %9319  ;;  %9345 = vpow2.f32 %v8185_v9  ;;  %v8186_v63 = vmul.f32 -1.442695, %v4494_v49  ;;  %v4496_v38 = vadd.f32 %v4495_v28, %v12434_v35  ;;  %v5029_v31 = vmul.f32 %v9318_v37, %v14862_v21  ;;  %v4342_v51 = vpop.f32.mrf.mxu0 }
 0x3f9   : > { %v9322_v22 = vpop.eup %9321  ;;  %9347 = vrcp.f32 %v4844_v18  ;;  %v4845_v48 = vadd.f32 1.0, %v9320_v19  ;;  %v4497_v41 = vpop.f32.mrf.mxu1  ;;  %v5175_v10 = vadd.f32 %v5103_v24, %v5102_v27  ;;  %v5104_v33 = vmul.f32 %v12283_v13, %v5028_v16 }
 0x3fa   : > { %v9324_v30 = vpop.eup %9323  ;;  %9349 = vpow2.f32 %v8186_v63  ;;  %v8187_v26 = vmul.f32 -1.442695, %v4496_v38  ;;  %v4498_v4 = vadd.f32 %v4497_v41, %v12440_v15  ;;  %v5105_v23 = vmul.f32 %v12299_v55, %v5029_v31  ;;  %v4344_v31 = vpop.f32.mrf.mxu0 }
 0x3fb   : > { %v9326_v3 = vpop.eup %9325  ;;  %v12546_v35 = vadd.f32 %v4338_v50, %v12186_v7  ;;  %9351 = vrcp.f32 %v4845_v48  ;;  %v4846_v39 = vadd.f32 1.0, %v9324_v30  ;;  %5176 = vadd.xlane.f32.xlu0 %v5175_v10  ;;  %v4501_v29 = vpop.f32.mrf.mxu1  ;;  %v5030_v59 = vmul.f32 %v9322_v22, %v12164_v57 }
 0x3fc   : > { %v9328_v20 = vpop.eup %9327  ;;  %9353 = vpow2.f32 %v8187_v26  ;;  %v8188_v0 = vmul.f32 -1.442695, %v4498_v4  ;;  %v4502_v12 = vadd.f32 %v4501_v29, %v12444_v54  ;;  %v5178_v6 = vadd.f32 %v5105_v23, %v5104_v33 }
 0x3fd   : > { %v9330_v40 = vpop.eup %9329  ;;  %v12551_v15 = vadd.f32 %v4340_v36, %v12202_v1  ;;  %9355 = vrcp.f32 %v4846_v39  ;;  %v4847_v56 = vadd.f32 1.0, %v9328_v20  ;;  %v4503_v46 = vpop.f32.mrf.mxu1  ;;  %v5031_v8 = vmul.f32 %v9326_v3, %v14863_v62 }
 0x3fe   : > { %v9332_v44 = vpop.eup %9331  ;;  %v4848_v17 = vadd.f32 1.0, %v9330_v40  ;;  %9357 = vpow2.f32 %v8188_v0  ;;  %v8189_v57 = vmul.f32 -1.442695, %v4502_v12  ;;  %v4504_v45 = vadd.f32 %v4503_v46, %v12450_v2  ;;  %v4348_v20 = vpop.f32.mrf.mxu0  ;;  %v14864_v46 = vld [vmem:[#allocation149_spill] sm:$0xff] }
 0x3ff   : > { %v9334_v50 = vpop.eup %9333  ;;  %9359 = vrcp.f32 %v4847_v56  ;;  %5179 = vadd.xlane.f32.xlu0 %v5178_v6  ;;  %v4505_v54 = vpop.f32.mrf.mxu1  ;;  %v5106_v9 = vmul.f32 %v12283_v13, %v5030_v59  ;;  %v5107_v49 = vmul.f32 %v12299_v55, %v5031_v8  ;;  %v5032_v16 = vmul.f32 %v9332_v44, %v12177_v43 }
 0x400   : > { %v9336_v37 = vpop.eup %9335  ;;  %9361 = vrcp.f32 %v4848_v17  ;;  %v4849_v18 = vadd.f32 1.0, %v9334_v50  ;;  %v8190_v28 = vmul.f32 -1.442695, %v4504_v45  ;;  %v4506_v27 = vadd.f32 %v4505_v54, %v12456_v32  ;;  %v14865_v50 = vld [vmem:[#allocation150_spill] sm:$0xff] }
 0x401   : > { %v9338_v24 = vpop.eup %9337  ;;  %v12560_v19 = vadd.f32 %v4342_v51, %v12186_v7  ;;  %9363 = vpow2.f32 %v8189_v57  ;;  %v4507_v2 = vpop.f32.mrf.mxu1  ;;  %v5181_v63 = vadd.f32 %v5107_v49, %v5106_v9  ;;  %v5033_v38 = vmul.f32 %v9336_v37, %v12180_v11 }
 0x402   : > { %v9340_v21 = vpop.eup %9339  ;;  %9365 = vrcp.f32 %v4849_v18  ;;  %v4850_v22 = vadd.f32 1.0, %v9338_v24  ;;  %v8191_v43 = vmul.f32 -1.442695, %v4506_v27  ;;  %v4508_v48 = vadd.f32 %v4507_v2, %v12461_v42  ;;  %v4350_v49 = vpop.f32.mrf.mxu0  ;;  %v14866_v2 = vld [vmem:[#allocation151_spill] sm:$0xff] }
 0x403   : > { %v9342_v41 = vpop.eup %9341  ;;  %9367 = vpow2.f32 %v8190_v28  ;;  %5182 = vadd.xlane.f32.xlu0 %v5181_v63  ;;  %v4511_v32 = vpop.f32.mrf.mxu1  ;;  %v5108_v10 = vmul.f32 %v12283_v13, %v5032_v16  ;;  %v5109_v33 = vmul.f32 %v12299_v55, %v5033_v38  ;;  %v5034_v30 = vmul.f32 %v9340_v21, %v12193_v53 }
 0x404   : > { %v9344_v36 = vpop.eup %9343  ;;  %9369 = vrcp.f32 %v4850_v22  ;;  %v4851_v11 = vadd.f32 1.0, %v9342_v41  ;;  %v8192_v26 = vmul.f32 -1.442695, %v4508_v48  ;;  %v4512_v4 = vadd.f32 %v4511_v32, %v12465_v58  ;;  %v14867_v32 = vld [vmem:[#allocation152_spill] sm:$0xff] }
 0x405   : > { %v9346_v23 = vpop.eup %9345  ;;  %v12569_v3 = vadd.f32 %v4344_v31, %v12202_v1  ;;  %9371 = vpow2.f32 %v8191_v43  ;;  %v4513_v42 = vpop.f32.mrf.mxu1  ;;  %v5184_v39 = vadd.f32 %v5109_v33, %v5108_v10  ;;  %v5035_v29 = vmul.f32 %v9344_v36, %v12196_v52 }
 0x406   : > { %v9348_v59 = vpop.eup %9347  ;;  %9373 = vrcp.f32 %v4851_v11  ;;  %v4852_v0 = vadd.f32 1.0, %v9346_v23  ;;  %v8193_v53 = vmul.f32 -1.442695, %v4512_v4  ;;  %v4514_v12 = vadd.f32 %v4513_v42, %v12473_v60 }
 0x407   : > { %v9350_v6 = vpop.eup %9349  ;;  %9375 = vpow2.f32 %v8192_v26  ;;  %5185 = vadd.xlane.f32.xlu1 %v5184_v39  ;;  %v4515_v58 = vpop.f32.mrf.mxu1  ;;  %v5110_v40 = vmul.f32 %v12283_v13, %v5034_v30  ;;  %v5111_v56 = vmul.f32 %v12299_v55, %v5035_v29  ;;  %v5036_v62 = vmul.f32 %v9348_v59, %v14864_v46  ;;  %v14868_v26 = vld [vmem:[#allocation128_spill] sm:$0xff] }
 0x408   : > { %v9352_v8 = vpop.eup %9351  ;;  %9377 = vrcp.f32 %v4852_v0  ;;  %v4853_v52 = vadd.f32 1.0, %v9350_v6  ;;  %v8194_v44 = vmul.f32 -1.442695, %v4514_v12  ;;  %v4516_v51 = vadd.f32 %v4515_v58, %v12488_v14  ;;  %v4352_v30 = vpop.f32.mrf.mxu0 }
 0x409   : > { %v9354_v17 = vpop.eup %9353  ;;  %v12578_v57 = vadd.f32 %v4348_v20, %v12186_v7  ;;  %9379 = vpow2.f32 %v8193_v53  ;;  %v4517_v60 = vpop.f32.mrf.mxu1  ;;  %v5187_v45 = vadd.f32 %v5111_v56, %v5110_v40  ;;  %v5037_v54 = vmul.f32 %v9352_v8, %v14865_v50  ;;  %v14869_v53 = vld [vmem:[#allocation153_spill] sm:$0xff] }
 0x40a   : > { %v9356_v9 = vpop.eup %9355  ;;  %9381 = vrcp.f32 %v4853_v52  ;;  %v4854_v16 = vadd.f32 1.0, %v9354_v17  ;;  %v8195_v37 = vmul.f32 -1.442695, %v4516_v51  ;;  %v4518_v18 = vadd.f32 %v4517_v60, %v12497_v47 }
 0x40b   : > { %v9358_v28 = vpop.eup %9357  ;;  %9383 = vpow2.f32 %v8194_v44  ;;  %5188 = vadd.xlane.f32.xlu1 %v5187_v45  ;;  %v4521_v14 = vpop.f32.mrf.mxu1  ;;  %v5112_v27 = vmul.f32 %v12283_v13, %v5036_v62  ;;  %v5113_v24 = vmul.f32 %v12299_v55, %v5037_v54  ;;  %v5038_v63 = vmul.f32 %v9356_v9, %v14866_v2  ;;  %v14870_v45 = vld [vmem:[#allocation154_spill] sm:$0xff] }
 0x40c   : > { %v9360_v38 = vpop.eup %9359  ;;  %9385 = vrcp.f32 %v4854_v16  ;;  %v4855_v21 = vadd.f32 1.0, %v9358_v28  ;;  %v8196_v31 = vmul.f32 -1.442695, %v4518_v18  ;;  %v4522_v22 = vadd.f32 %v4521_v14, %v12506_v25  ;;  %v4354_v62 = vpop.f32.mrf.mxu0  ;;  %v14871_v14 = vld [vmem:[#allocation155_spill] sm:$0xff] }
 0x40d   : > { %v9362_v43 = vpop.eup %9361  ;;  %v12587_v48 = vadd.f32 %v4350_v49, %v12202_v1  ;;  %9387 = vpow2.f32 %v8195_v37  ;;  %v4523_v47 = vpop.f32.mrf.mxu1  ;;  %v5190_v41 = vadd.f32 %v5113_v24, %v5112_v27  ;;  %v5039_v10 = vmul.f32 %v9360_v38, %v14867_v32 }
 0x40e   : > { %v9364_v33 = vpop.eup %9363  ;;  %9389 = vrcp.f32 %v4855_v21  ;;  %v8197_v36 = vmul.f32 -1.442695, %v4522_v22  ;;  %v4524_v11 = vadd.f32 %v4523_v47, %v12515_v34  ;;  %v5040_v4 = vmul.f32 %v9362_v43, %v14868_v26  ;;  %v4358_v2 = vpop.f32.mrf.mxu0  ;;  %v14872_v21 = vld [vmem:[#allocation129_spill] sm:$0xff] }
 0x40f   : > { %v9366_v23 = vpop.eup %9365  ;;  %v4856_v42 = vadd.f32 1.0, %v9364_v33  ;;  %9391 = vpow2.f32 %v8196_v31  ;;  %5191 = vadd.xlane.f32.xlu1 %v5190_v41  ;;  %v4525_v25 = vpop.f32.mrf.mxu1  ;;  %v5114_v39 = vmul.f32 %v12283_v13, %v5038_v63  ;;  %v5115_v29 = vmul.f32 %v12299_v55, %v5039_v10 }
 0x410   : > { %v9368_v59 = vpop.eup %9367  ;;  %9393 = vpow2.f32 %v8197_v36  ;;  %v8198_v20 = vmul.f32 -1.442695, %v4524_v11  ;;  %v4526_v0 = vadd.f32 %v4525_v25, %v12528_v5  ;;  %v5041_v12 = vmul.f32 %v9366_v23, %v14869_v53  ;;  %v4360_v25 = vpop.f32.mrf.mxu0 }
 0x411   : > { %v9370_v6 = vpop.eup %9369  ;;  %9395 = vrcp.f32 %v4856_v42  ;;  %v4857_v34 = vadd.f32 1.0, %v9368_v59  ;;  %v4527_v58 = vpop.f32.mrf.mxu1  ;;  %v5193_v40 = vadd.f32 %v5115_v29, %v5114_v39  ;;  %v5116_v56 = vmul.f32 %v12283_v13, %v5040_v4 }
 0x412   : > { %v9372_v46 = vpop.eup %9371  ;;  %9397 = vpow2.f32 %v8198_v20  ;;  %v8199_v8 = vmul.f32 -1.442695, %v4526_v0  ;;  %v4528_v52 = vadd.f32 %v4527_v58, %v12533_v61  ;;  %v5117_v44 = vmul.f32 %v12299_v55, %v5041_v12  ;;  %v14874_v12 = vld [vmem:[#allocation130_spill] sm:$0xff] }
 0x413   : > { %v9374_v51 = vpop.eup %9373  ;;  %v12600_v5 = vadd.f32 %v4352_v30, %v12186_v7  ;;  %9399 = vrcp.f32 %v4857_v34  ;;  %v4858_v17 = vadd.f32 1.0, %v9372_v46  ;;  %5194 = vadd.xlane.f32.xlu0 %v5193_v40  ;;  %v4531_v60 = vpop.f32.mrf.mxu1  ;;  %v5042_v50 = vmul.f32 %v9370_v6, %v14870_v45  ;;  %v14873_v30 = vld [vmem:[#allocation156_spill] sm:$0xff] }
 0x414   : > { %v9376_v54 = vpop.eup %9375  ;;  %9401 = vpow2.f32 %v8199_v8  ;;  %v8200_v9 = vmul.f32 -1.442695, %v4528_v52  ;;  %v4532_v49 = vadd.f32 %v4531_v60, %v12546_v35  ;;  %v5196_v16 = vadd.f32 %v5117_v44, %v5116_v56  ;;  %v14875_v52 = vld [vmem:[#allocation157_spill] sm:$0xff] }
 0x415   : > { %v9378_v37 = vpop.eup %9377  ;;  %v12605_v61 = vadd.f32 %v4354_v62, %v12202_v1  ;;  %9403 = vrcp.f32 %v4858_v17  ;;  %v4859_v18 = vadd.f32 1.0, %v9376_v54  ;;  %v4533_v28 = vpop.f32.mrf.mxu1  ;;  %v5043_v27 = vmul.f32 %v9374_v51, %v14871_v14 }
 0x416   : > { %v9380_v24 = vpop.eup %9379  ;;  %9405 = vpow2.f32 %v8200_v9  ;;  %v8201_v63 = vmul.f32 -1.442695, %v4532_v49  ;;  %v4534_v38 = vadd.f32 %v4533_v28, %v12551_v15  ;;  %5197 = vadd.xlane.f32.xlu1 %v5196_v16  ;;  %v5044_v31 = vmul.f32 %v9378_v37, %v14872_v21  ;;  %v4362_v17 = vpop.f32.mrf.mxu0  ;;  %v14876_v16 = vld [vmem:[#allocation131_spill] sm:$0xff] }
 0x417   : > { %v9382_v35 = vpop.eup %9381  ;;  %9407 = vrcp.f32 %v4859_v18  ;;  %v4860_v22 = vadd.f32 1.0, %v9380_v24  ;;  %v4535_v43 = vpop.f32.mrf.mxu1  ;;  %v5118_v47 = vmul.f32 %v12283_v13, %v5042_v50  ;;  %v5119_v41 = vmul.f32 %v12299_v55, %v5043_v27 }
 0x418   : > { %v9384_v32 = vpop.eup %9383  ;;  %9409 = vpow2.f32 %v8201_v63  ;;  %v8202_v10 = vmul.f32 -1.442695, %v4534_v38  ;;  %v4536_v33 = vadd.f32 %v4535_v43, %v12560_v19  ;;  %v5045_v36 = vmul.f32 %v9382_v35, %v14873_v30  ;;  %v14877_v38 = vld [vmem:[#allocation158_spill] sm:$0xff]  ;;  %v4364_v35 = vpop.f32.mrf.mxu0 }
 0x419   : > { %v9386_v11 = vpop.eup %9385  ;;  %9411 = vrcp.f32 %v4860_v22  ;;  %v4861_v15 = vadd.f32 1.0, %v9384_v32  ;;  %v4537_v26 = vpop.f32.mrf.mxu1  ;;  %v5199_v4 = vadd.f32 %v5119_v41, %v5118_v47  ;;  %v5120_v23 = vmul.f32 %v12283_v13, %v5044_v31 }
 0x41a   : > { %v9388_v42 = vpop.eup %9387  ;;  %9413 = vpow2.f32 %v8202_v10  ;;  %v8203_v39 = vmul.f32 -1.442695, %v4536_v33  ;;  %v4538_v29 = vadd.f32 %v4537_v26, %v12569_v3  ;;  %v5121_v59 = vmul.f32 %v12299_v55, %v5045_v36  ;;  %v14878_v10 = vld [vmem:[#allocation132_spill] sm:$0xff] }
 0x41b   : > { %v9390_v20 = vpop.eup %9389  ;;  %v4359_v19 = vadd.f32 %v4358_v2, %v12186_v7  ;;  %9415 = vrcp.f32 %v4861_v15  ;;  %v4862_v0 = vadd.f32 1.0, %v9388_v42  ;;  %5200 = vadd.xlane.f32.xlu0 %v5199_v4  ;;  %v4541_v53 = vpop.f32.mrf.mxu1  ;;  %v5046_v6 = vmul.f32 %v9386_v11, %v14874_v12  ;;  %v14879_v42 = vld [vmem:[#allocation159_spill] sm:$0xff] }
 0x41c   : > { %v9392_v34 = vpop.eup %9391  ;;  %9417 = vpow2.f32 %v8203_v39  ;;  %v8204_v58 = vmul.f32 -1.442695, %v4538_v29  ;;  %v4542_v40 = vadd.f32 %v4541_v53, %v12578_v57  ;;  %v5202_v56 = vadd.f32 %v5121_v59, %v5120_v23 }
 0x41d   : > { %v9394_v46 = vpop.eup %9393  ;;  %v4361_v3 = vadd.f32 %v4360_v25, %v12202_v1  ;;  %9419 = vrcp.f32 %v4862_v0  ;;  %v4863_v62 = vadd.f32 1.0, %v9392_v34  ;;  %v4543_v8 = vpop.f32.mrf.mxu1  ;;  %v5047_v44 = vmul.f32 %v9390_v20, %v14875_v52 }
 0x41e   : > { %v9396_v51 = vpop.eup %9395  ;;  %v4864_v60 = vadd.f32 1.0, %v9394_v46  ;;  %9421 = vpow2.f32 %v8204_v58  ;;  %v8205_v45 = vmul.f32 -1.442695, %v4542_v40  ;;  %v4544_v50 = vadd.f32 %v4543_v8, %v12587_v48  ;;  %5203 = vadd.xlane.f32.xlu1 %v5202_v56 }
 0x41f   : > { %v9398_v54 = vpop.eup %9397  ;;  %9423 = vrcp.f32 %v4863_v62  ;;  %v4545_v57 = vpop.f32.mrf.mxu1  ;;  %v5122_v9 = vmul.f32 %v12283_v13, %v5046_v6  ;;  %v5123_v49 = vmul.f32 %v12299_v55, %v5047_v44  ;;  %v5048_v37 = vmul.f32 %v9396_v51, %v14876_v16  ;;  %v14880_v6 = vld [vmem:[#allocation133_spill] sm:$0xff] }
 0x420   : > { %v9400_v18 = vpop.eup %9399  ;;  %9425 = vrcp.f32 %v4864_v60  ;;  %v4865_v28 = vadd.f32 1.0, %v9398_v54  ;;  %v8206_v14 = vmul.f32 -1.442695, %v4544_v50  ;;  %v4546_v27 = vadd.f32 %v4545_v57, %v12600_v5  ;;  %v14882_v57 = vld [vmem:[#allocation134_spill] sm:$0xff] }
 0x421   : > { %v9402_v24 = vpop.eup %9401  ;;  %v4363_v2 = vadd.f32 %v4362_v17, %v12186_v7  ;;  %9427 = vpow2.f32 %v8205_v45  ;;  %v4547_v48 = vpop.f32.mrf.mxu1  ;;  %v5205_v63 = vadd.f32 %v5123_v49, %v5122_v9  ;;  %v5049_v21 = vmul.f32 %v9400_v18, %v14877_v38 }
 0x422   : > { %v9404_v31 = vpop.eup %9403  ;;  %9429 = vrcp.f32 %v4865_v28  ;;  %v4866_v22 = vadd.f32 1.0, %v9402_v24  ;;  %v8207_v43 = vmul.f32 -1.442695, %v4546_v27  ;;  %v4548_v47 = vadd.f32 %v4547_v48, %v12605_v61 }
 0x423   : > { %v9406_v41 = vpop.eup %9405  ;;  %9431 = vpow2.f32 %v8206_v14  ;;  %5206 = vadd.xlane.f32.xlu0 %v5205_v63  ;;  %v4551_v32 = vpop.f32.mrf.mxu1  ;;  %v5124_v5 = vmul.f32 %v12283_v13, %v5048_v37  ;;  %v5125_v7 = vmul.f32 %v12299_v55, %v5049_v21  ;;  %v5050_v33 = vmul.f32 %v9404_v31, %v14878_v10  ;;  %v14883_v14 = vld [vmem:[#allocation135_spill] sm:$0xff] }
 0x424   : > { %v9408_v30 = vpop.eup %9407  ;;  %9433 = vrcp.f32 %v4866_v22  ;;  %v4867_v36 = vadd.f32 1.0, %v9406_v41  ;;  %v8208_v11 = vmul.f32 -1.442695, %v4548_v47  ;;  %v4552_v15 = vadd.f32 %v4551_v32, %v4359_v19  ;;  %v14885_v22 = vld [vmem:[#allocation113_spill] sm:$0xff]  ;;  %v14887_v10 = vld [vmem:[#allocation143_spill] sm:$0xff] }
 0x425   : > { %v9410_v26 = vpop.eup %9409  ;;  %v4365_v4 = vadd.f32 %v4364_v35, %v12202_v1  ;;  %9435 = vpow2.f32 %v8207_v43  ;;  %v4553_v61 = vpop.f32.mrf.mxu1  ;;  %v5208_v23 = vadd.f32 %v5125_v7, %v5124_v5  ;;  %v5051_v25 = vmul.f32 %v9408_v30, %v14879_v42  ;;  %v14886_v43 = vld [vmem:[#allocation137_spill] sm:$0xff]  ;;  %v14890_v42 = vld [vmem:[#allocation139_spill] sm:$0xff] }
 0x426   : > { %v9412_v39 = vpop.eup %9411  ;;  %9437 = vrcp.f32 %v4867_v36  ;;  %v4868_v29 = vadd.f32 1.0, %v9410_v26  ;;  %v8209_v59 = vmul.f32 -1.442695, %v4552_v15  ;;  %v4554_v20 = vadd.f32 %v4553_v61, %v4361_v3  ;;  %v14881_v3 = vld [vmem:[#allocation160_spill] sm:$0xff]  ;;  %v14888_v36 = vld [vmem:[#allocation138_spill] sm:$0xff]  ;;  %v14889_v61 = vld [vmem:[#allocation115_spill] sm:$0xff] }
 0x427   : > { %v9414_v0 = vpop.eup %9413  ;;  %9439 = vpow2.f32 %v8208_v11  ;;  %5209 = vadd.xlane.f32.xlu0 %v5208_v23  ;;  %v4555_v53 = vpop.f32.mrf.mxu1  ;;  %v5126_v12 = vmul.f32 %v12283_v13, %v5050_v33  ;;  %v5127_v19 = vmul.f32 %v12299_v55, %v5051_v25  ;;  %v5052_v1 = vmul.f32 %v9412_v39, %v14880_v6 }
 0x428   : > { %v9416_v34 = vpop.eup %9415  ;;  %9441 = vrcp.f32 %v4868_v29  ;;  %v4869_v58 = vadd.f32 1.0, %v9414_v0  ;;  %v8210_v40 = vmul.f32 -1.442695, %v4554_v20  ;;  %v4556_v56 = vadd.f32 %v4555_v53, %v4363_v2  ;;  %v14884_v2 = vld [vmem:[#allocation136_spill] sm:$0xff]  ;;  %v14891_v20 = vld [vmem:[#allocation117_spill] sm:$0xff] }
 0x429   : > { %v9418_v46 = vpop.eup %9417  ;;  %9443 = vpow2.f32 %v8209_v59  ;;  %v4557_v62 = vpop.f32.mrf.mxu1  ;;  %v5211_v8 = vadd.f32 %v5127_v19, %v5126_v12  ;;  %v5053_v52 = vmul.f32 %v9416_v34, %v14881_v3  ;;  %v5128_v50 = vmul.f32 %v12283_v13, %v5052_v1  ;;  %v14892_v12 = vld [vmem:[#allocation140_spill] sm:$0xff] }
 0x42a   : > { %v9420_v44 = vpop.eup %9419  ;;  %9445 = vrcp.f32 %v4869_v58  ;;  %v4870_v51 = vadd.f32 1.0, %v9418_v46  ;;  %v8211_v17 = vmul.f32 -1.442695, %v4556_v56  ;;  %v4558_v60 = vadd.f32 %v4557_v62, %v4365_v4  ;;  %v14893_v58 = vld [vmem:[#allocation147_spill] sm:$0xff]  ;;  %v14894_v56 = vld [vmem:[#allocation141_spill] sm:$0xff] }
 0x42b   : > { %v9422_v45 = vpop.eup %9421  ;;  %9447 = vpow2.f32 %v8210_v40  ;;  %5212 = vadd.xlane.f32.xlu0 %v5211_v8  ;;  %v5129_v54 = vmul.f32 %v12299_v55, %v5053_v52  ;;  %v5054_v9 = vmul.f32 %v9420_v44, %v14882_v57  ;;  %v14895_v52 = vld [vmem:[#allocation98_spill] sm:$0xff]  ;;  %v14897_v57 = vld [vmem:[#allocation148_spill] sm:$0xff] }
 0x42c   : > { %v9424_v49 = vpop.eup %9423  ;;  %9449 = vrcp.f32 %v4870_v51  ;;  %v4871_v16 = vadd.f32 1.0, %v9422_v45  ;;  %v8212_v37 = vmul.f32 -1.442695, %v4558_v60 }
 0x42d   : > { %v9426_v18 = vpop.eup %9425  ;;  %9451 = vpow2.f32 %v8211_v17  ;;  %v5214_v28 = vadd.f32 %v5129_v54, %v5128_v50  ;;  %v5055_v27 = vmul.f32 %v9424_v49, %v14883_v14  ;;  %v5130_v21 = vmul.f32 %v12283_v13, %v5054_v9  ;;  %v14896_v17 = vld [vmem:[#allocation142_spill] sm:$0xff]  ;;  %v14898_v49 = vld [vmem:[#allocation161_spill] sm:$0xff]  ;;  %v14899_v14 = vld [vmem:[#allocation119_spill] sm:$0xff] }
 0x42e   : > { %v9428_v24 = vpop.eup %9427  ;;  %9453 = vrcp.f32 %v4871_v16  ;;  %v5056_v48 = vmul.f32 %v9426_v18, %v14884_v2 }
 0x42f   : > { %v9430_v63 = vpop.eup %9429  ;;  %v4872_v38 = vadd.f32 1.0, %v9428_v24  ;;  %9455 = vpow2.f32 %v8212_v37  ;;  %5215 = vadd.xlane.f32.xlu1 %v5214_v28  ;;  %v5131_v31 = vmul.f32 %v12299_v55, %v5055_v27 }
 0x430   : > { %v9432_v35 = vpop.eup %9431  ;;  %9457 = vtanh.f32 %v14885_v22  ;;  %v5057_v47 = vmul.f32 %v9430_v63, %v14886_v43  ;;  %v5132_v33 = vmul.f32 %v12283_v13, %v5056_v48 }
 0x431   : > { %v9434_v41 = vpop.eup %9433  ;;  %9459 = vrcp.f32 %v4872_v38  ;;  %v4873_v32 = vadd.f32 1.0, %v9432_v35  ;;  %v5217_v5 = vadd.f32 %v5131_v31, %v5130_v21 }
 0x432   : > { %v9436_v7 = vpop.eup %9435  ;;  %9461 = vtanh.f32 %v14887_v10  ;;  %v5133_v30 = vmul.f32 %v12299_v55, %v5057_v47  ;;  %v5058_v11 = vmul.f32 %v9434_v41, %v14888_v36 }
 0x433   : > { %v9438_v15 = vpop.eup %9437  ;;  %9463 = vrcp.f32 %v4873_v32  ;;  %v4874_v26 = vadd.f32 1.0, %v9436_v7 }
 0x434   : > { %v9440_v4 = vpop.eup %9439  ;;  %9465 = vtanh.f32 %v14889_v61  ;;  %v5220_v23 = vadd.f32 %v5133_v30, %v5132_v33  ;;  %v5059_v25 = vmul.f32 %v9438_v15, %v14890_v42  ;;  %v5134_v0 = vmul.f32 %v12283_v13, %v5058_v11 }
 0x435   : > { %v9442_v39 = vpop.eup %9441  ;;  %9467 = vrcp.f32 %v4874_v26  ;;  %v4875_v29 = vadd.f32 1.0, %v9440_v4 }
 0x436   : > { %v9444_v59 = vpop.eup %9443  ;;  %9469 = vtanh.f32 %v14891_v20  ;;  %5221 = vadd.xlane.f32.xlu0 %v5220_v23  ;;  %v5135_v53 = vmul.f32 %v12299_v55, %v5059_v25  ;;  %v5060_v19 = vmul.f32 %v9442_v39, %v14892_v12 }
 0x437   : > { %v9446_v6 = vpop.eup %9445  ;;  %9471 = vrcp.f32 %v4875_v29  ;;  %v4876_v1 = vadd.f32 1.0, %v9444_v59 }
 0x438   : > { %v9448_v34 = vpop.eup %9447  ;;  %9473 = vtanh.f32 %v14893_v58  ;;  %v5223_v40 = vadd.f32 %v5135_v53, %v5134_v0  ;;  %v5061_v46 = vmul.f32 %v9446_v6, %v14894_v56  ;;  %v5136_v44 = vmul.f32 %v12283_v13, %v5060_v19 }
 0x439   : > { %v9450_v62 = vpop.eup %9449  ;;  %9475 = vrcp.f32 %v4876_v1  ;;  %v4877_v8 = vadd.f32 1.0, %v9448_v34  ;;  %v8213_v1 = vld [vmem:[#allocation2] ss:$0 sm:$0xff] }
 0x43a   : > { %v9452_v3 = vpop.eup %9451  ;;  %9477 = vtanh.f32 %v14895_v52  ;;  %5224 = vadd.xlane.f32.xlu1 %v5223_v40  ;;  %5218 = vadd.xlane.f32.xlu0 %v5217_v5  ;;  %v5137_v51 = vmul.f32 %v12299_v55, %v5061_v46  ;;  %v5062_v60 = vmul.f32 %v9450_v62, %v14896_v17 }
 0x43b   : > { %v9454_v45 = vpop.eup %9453  ;;  %9479 = vrcp.f32 %v4877_v8  ;;  %v4878_v50 = vadd.f32 1.0, %v9452_v3 }
 0x43c   : > { %v9456_v54 = vpop.eup %9455  ;;  %9481 = vtanh.f32 %v14897_v57  ;;  %v5226_v9 = vadd.f32 %v5137_v51, %v5136_v44  ;;  %v5063_v16 = vmul.f32 %v9454_v45, %v14898_v49  ;;  %v5138_v27 = vmul.f32 %v12283_v13, %v5062_v60 }
 0x43d   : > { %v9458_v37 = vpop.eup %9457  ;;  %9483 = vrcp.f32 %v4878_v50  ;;  %v4879_v18 = vadd.f32 1.0, %v9456_v54 }
 0x43e   : > { %v9460_v28 = vpop.eup %9459  ;;  %9485 = vtanh.f32 %v14899_v14  ;;  %5227 = vadd.xlane.f32.xlu1 %v5226_v9  ;;  %v5139_v24 = vmul.f32 %v12299_v55, %v5063_v16 }
 0x43f   : > { %v9462_v2 = vpop.eup %9461  ;;  %9487 = vrcp.f32 %v4879_v18  ;;  %v5064_v48 = vmul.f32 %v9460_v28, %v9458_v37 }
 0x440   : > { %v9464_v63 = vpop.eup %9463  ;;  %v5229_v38 = vadd.f32 %v5139_v24, %v5138_v27  ;;  %v14900_v24 = vlaneseq }
 0x441   : > { %v9466_v21 = vpop.eup %9465  ;;  %v5065_v31 = vmul.f32 %v9464_v63, %v9462_v2  ;;  %v5140_v43 = vmul.f32 %v12283_v13, %v5064_v48 }
 0x442   : > { %v9468_v35 = vpop.eup %9467  ;;  %5230 = vadd.xlane.f32.xlu1 %v5229_v38  ;;  %v5319_v2 = vand.u32 127, %v14900_v24  ;;  %v14901_v38 = vld [vmem:[#allocation11_spill] sm:$0xff] }
 0x443   : > { %v9470_v22 = vpop.eup %9469  ;;  %v5141_v47 = vmul.f32 %v12299_v55, %v5065_v31  ;;  %v5066_v41 = vmul.f32 %v9468_v35, %v9466_v21 }
 0x444   : > { %v9472_v32 = vpop.eup %9471  ;;  %v12705_v21 = vsub.s32 %v5319_v2, %v14901_v38 }
 0x445   : > { %v9474_v5 = vpop.eup %9473  ;;  %v5232_v7 = vadd.f32 %v5141_v47, %v5140_v43  ;;  %v5067_v10 = vmul.f32 %v9472_v32, %v9470_v22  ;;  %v5142_v36 = vmul.f32 %v12283_v13, %v5066_v41 }
 0x446   : > { %v9476_v33 = vpop.eup %9475 }
 0x447   : > { %v9478_v30 = vpop.eup %9477  ;;  %5233 = vadd.xlane.f32.xlu1 %v5232_v7  ;;  %v5143_v11 = vmul.f32 %v12299_v55, %v5067_v10  ;;  %v5068_v15 = vmul.f32 %v9476_v33, %v9474_v5 }
 0x448   : > { %v9480_v26 = vpop.eup %9479 }
 0x449   : > { %v9482_v4 = vpop.eup %9481  ;;  %v5235_v61 = vadd.f32 %v5143_v11, %v5142_v36  ;;  %v5069_v23 = vmul.f32 %v9480_v26, %v9478_v30  ;;  %v5144_v39 = vmul.f32 %v12283_v13, %v5068_v15 }
 0x44a   : > { %v9484_v42 = vpop.eup %9483 }
 0x44b   : > { %v9486_v25 = vpop.eup %9485  ;;  %5236 = vadd.xlane.f32.xlu0 %v5235_v61  ;;  %v5145_v29 = vmul.f32 %v12299_v55, %v5069_v23  ;;  %v5070_v59 = vmul.f32 %v9484_v42, %v9482_v4 }
 0x44c   : > { %v9488_v20 = vpop.eup %9487 }
 0x44d   : > { %v5238_v0 = vadd.f32 %v5145_v29, %v5144_v39  ;;  %v5071_v53 = vmul.f32 %v9488_v20, %v9486_v25  ;;  %v5146_v12 = vmul.f32 %v12283_v13, %v5070_v59 }
 0x44f   : > { %5239 = vadd.xlane.f32.xlu0 %v5238_v0  ;;  %v5147_v19 = vmul.f32 %v12299_v55, %v5071_v53 }
 0x451   : > { %v5241_v6 = vadd.f32 %v5147_v19, %v5146_v12 }
 0x453   : > { %5242 = vadd.xlane.f32.xlu0 %v5241_v6 }
 0x458   : > { %5251 = vperm.xlu1 %8623, %v8213_v1  }
 0x45f   : > { %v5150_v34 = vpop.xlane.xlu0 %5149 }
 0x464   : > { %v5153_v58 = vpop.xlane.xlu0 %5152 }
 0x468   : > { %v5156_v56 = vpop.xlane.xlu1 %5155 }
 0x46c   : > { %v5159_v62 = vpop.xlane.xlu1 %5158 }
 0x470   : > { %v5162_v3 = vpop.xlane.xlu1 %5161 }
 0x474   : > { %v5165_v40 = vpop.xlane.xlu0 %5164 }
 0x478   : > { %v5168_v46 = vpop.xlane.xlu0 %5167 }
 0x47c   : > { %v5171_v8 = vpop.xlane.xlu0 %5170 }
 0x47f   : > { %v5174_v44 = vpop.xlane.xlu1 %5173 }
 0x484   : > { %v5177_v52 = vpop.xlane.xlu0 %5176 }
 0x488   : > { %v5180_v17 = vpop.xlane.xlu0 %5179 }
 0x48c   : > { %v5183_v13 = vpop.xlane.xlu0 %5182 }
 0x490   : > { %v5186_v51 = vpop.xlane.xlu1 %5185 }
 0x494   : > { %v5189_v60 = vpop.xlane.xlu1 %5188 }
 0x498   : > { %v5192_v55 = vpop.xlane.xlu1 %5191 }
 0x49c   : > { %v5195_v45 = vpop.xlane.xlu0 %5194 }
 0x49f   : > { %v12679_v54 = vpop.xlane.xlu1 %5197 }
 0x4a4   : > { %v12677_v50 = vpop.xlane.xlu0 %5200 }
 0x4a7   : > { %v12683_v9 = vpop.xlane.xlu1 %5203 }
 0x4ac   : > { %v12681_v57 = vpop.xlane.xlu0 %5206 }
 0x4b0   : > { %v12687_v16 = vpop.xlane.xlu0 %5209 }
 0x4b4   : > { %v12691_v18 = vpop.xlane.xlu0 %5212 }
 0x4b8   : > { %v12685_v49 = vpop.xlane.xlu1 %5215 }
 0x4bf   : > { %v12695_v14 = vpop.xlane.xlu0 %5221 }
 0x4c3   : > { %v12689_v37 = vpop.xlane.xlu1 %5224  ;;  %v12700_v48 = vpop.xlane.xlu0 %5218 }
 0x4c7   : > { %v12693_v28 = vpop.xlane.xlu1 %5227 }
 0x4cb   : > { %v12697_v27 = vpop.xlane.xlu1 %5230 }
 0x4d0   : > { %v12702_v63 = vpop.xlane.xlu1 %5233 }
 0x4d4   : > { %v12707_v31 = vpop.permute.xlu1 %5251  ;;  %v5237_v35 = vpop.xlane.xlu0 %5236 }
 0x4d5   : > { %v12710_v22 = vadd.f32 %v12707_v31, %v5150_v34  ;;  %v12713_v43 = vadd.f32 %v12707_v31, %v5153_v58  ;;  %v12716_v47 = vadd.f32 %v12707_v31, %v5156_v56  ;;  %v12719_v41 = vadd.f32 %v12707_v31, %v5159_v62 }
 0x4d6   : > { %v12722_v32 = vadd.f32 %v12707_v31, %v5162_v3  ;;  %v12725_v5 = vadd.f32 %v12707_v31, %v5165_v40  ;;  %v12732_v33 = vadd.f32 %v12707_v31, %v5237_v35  ;;  %v12735_v36 = vadd.f32 %v12707_v31, %v5168_v46 }
 0x4d7   : > { %v5323_v7 = vrot.slane %v12710_v22, %v12705_v21  ;;  %v5327_v10 = vrot.slane %v12713_v43, %v12705_v21  ;;  %v5331_v11 = vrot.slane %v12716_v47, %v12705_v21  ;;  %v12740_v15 = vadd.f32 %v12707_v31, %v5171_v8 }
 0x4d8   : > { %v5240_v30 = vpop.xlane.xlu0 %5239  ;;  %v5335_v26 = vrot.slane %v12719_v41, %v12705_v21  ;;  %v5339_v4 = vrot.slane %v12722_v32, %v12705_v21  ;;  %v12749_v42 = vadd.f32 %v12707_v31, %v5174_v44  ;;  %v12752_v25 = vadd.f32 %v12707_v31, %v5177_v52 }
 0x4d9   : > { %v5449_v61 = vsel %vm5448_vm0, %v5327_v10, %v5323_v7  ;;  %v12755_v39 = vadd.f32 %v12707_v31, %v5180_v17  ;;  %v5343_v29 = vrot.slane %v12725_v5, %v12705_v21  ;;  %v12761_v20 = vadd.f32 %v12707_v31, %v5183_v13 }
 0x4da   : > { %v5451_v23 = vsel %vm5450_vm1, %v5331_v11, %v5449_v61  ;;  %v12764_v0 = vadd.f32 %v12707_v31, %v5186_v51  ;;  %v12767_v53 = vadd.f32 %v12707_v31, %v5240_v30  ;;  %v5347_v19 = vrot.slane %v12735_v36, %v12705_v21 }
 0x4db   : > { %v5453_v59 = vsel %vm5452_vm2, %v5335_v26, %v5451_v23  ;;  %v12773_v1 = vadd.f32 %v12707_v31, %v5189_v60  ;;  %v5351_v34 = vrot.slane %v12740_v15, %v12705_v21  ;;  %v5355_v40 = vrot.slane %v12749_v42, %v12705_v21 }
 0x4dc   : > { %v5243_v12 = vpop.xlane.xlu0 %5242  ;;  %v5455_v6 = vsel %vm5454_vm3, %v5339_v4, %v5453_v59  ;;  %v5359_v56 = vrot.slane %v12752_v25, %v12705_v21  ;;  %v12784_v62 = vadd.f32 %v12707_v31, %v5192_v55  ;;  %v12787_v8 = vadd.f32 %v12707_v31, %v5195_v45 }
 0x4dd   : > { %v5457_v58 = vsel %vm5456_vm4, %v5343_v29, %v5455_v6  ;;  %v5363_v3 = vrot.slane %v12755_v39, %v12705_v21  ;;  %v12792_v52 = vadd.f32 %v12707_v31, %v5243_v12  ;;  %v5367_v51 = vrot.slane %v12761_v20, %v12705_v21 }
 0x4de   : > { %v5459_v46 = vsel %vm5458_vm5, %v5347_v19, %v5457_v58  ;;  %v5371_v17 = vrot.slane %v12764_v0, %v12705_v21  ;;  %v5375_v13 = vrot.slane %v12773_v1, %v12705_v21  ;;  %v5462_v45 = vsel %vm5448_vm0, %v5359_v56, %v5355_v40 }
 0x4df   : > { %v5461_v44 = vsel %vm5460_vm6, %v5351_v34, %v5459_v46  ;;  %v12805_v55 = vadd.f32 %v12707_v31, %v12679_v54  ;;  %v5463_v24 = vsel %vm5450_vm1, %v5363_v3, %v5462_v45  ;;  %v12810_v2 = vadd.f32 %v12707_v31, %v12677_v50 }
 0x4e0   : > { %v5488_v60 = vsel %vm5487_vm7, %v5461_v44, -inf  ;;  %v12814_v35 = vadd.f32 %v12707_v31, %v12683_v9  ;;  %v12818_v7 = vadd.f32 %v12707_v31, %v12681_v57  ;;  %v5379_v10 = vrot.slane %v12784_v62, %v12705_v21 }
 0x4e1   : > { %5489 = vmax.xlane.f32.xlu0 %v5488_v60  ;;  %v5464_v54 = vsel %vm5452_vm2, %v5367_v51, %v5463_v24  ;;  %v12825_v30 = vadd.f32 %v12707_v31, %v12687_v16  ;;  %v12829_v50 = vadd.f32 %v12707_v31, %v12691_v18  ;;  %v5383_v9 = vrot.slane %v12787_v8, %v12705_v21 }
 0x4e2   : > { %v5465_v11 = vsel %vm5454_vm3, %v5371_v17, %v5464_v54  ;;  %v5387_v57 = vrot.slane %v12805_v55, %v12705_v21  ;;  %v5391_v26 = vrot.slane %v12810_v2, %v12705_v21  ;;  %v12841_v16 = vadd.f32 %v12707_v31, %v12685_v49 }
 0x4e3   : > { %v5466_v4 = vsel %vm5456_vm4, %v5375_v13, %v5465_v11  ;;  %v12845_v18 = vadd.f32 %v12707_v31, %v12700_v48  ;;  %v5395_v61 = vrot.slane %v12814_v35, %v12705_v21  ;;  %v5399_v29 = vrot.slane %v12818_v7, %v12705_v21 }
 0x4e4   : > { %v5467_v23 = vsel %vm5458_vm5, %v5379_v10, %v5466_v4  ;;  %v5403_v59 = vrot.slane %v12825_v30, %v12705_v21  ;;  %v5407_v12 = vrot.slane %v12829_v50, %v12705_v21  ;;  %v5469_v19 = vsel %vm5448_vm0, %v5391_v26, %v5387_v57 }
 0x4e5   : > { %v5468_v49 = vsel %vm5460_vm6, %v5383_v9, %v5467_v23  ;;  %v12860_v48 = vadd.f32 %v12707_v31, %v12695_v14  ;;  %v12864_v6 = vadd.f32 %v12707_v31, %v12689_v37  ;;  %v5470_v58 = vsel %vm5450_vm1, %v5395_v61, %v5469_v19  ;;  %v14903_v19 = vld [vmem:[#allocation13_spill] sm:$0xff] }
 0x4e6   : > { %v5491_v34 = vsel %vm5487_vm7, %v5468_v49, -inf  ;;  %v12870_v40 = vadd.f32 %v12707_v31, %v12693_v28  ;;  %v12874_v56 = vadd.f32 %v12707_v31, %v12697_v27  ;;  %v5471_v14 = vsel %vm5452_vm2, %v5399_v29, %v5470_v58 }
 0x4e7   : > { %5492 = vmax.xlane.f32.xlu1 %v5491_v34  ;;  %v12879_v46 = vadd.f32 %v12707_v31, %v12702_v63  ;;  %v5419_v37 = vrot.slane %v12860_v48, %v12705_v21  ;;  %v5423_v3 = vrot.slane %v12864_v6, %v12705_v21  ;;  %v5411_v28 = vrot.slane %v12841_v16, %v12705_v21 }
 0x4e8   : > { %v5472_v44 = vsel %vm5454_vm3, %v5403_v59, %v5471_v14  ;;  %v5427_v27 = vrot.slane %v12870_v40, %v12705_v21  ;;  %v5415_v51 = vrot.slane %v12845_v18, %v12705_v21  ;;  %v5431_v31 = vrot.slane %v12874_v56, %v12705_v21  ;;  %v14904_v14 = vld [vmem:[#allocation114_spill] sm:$0xff] }
 0x4e9   : > { %v5473_v63 = vsel %vm5456_vm4, %v5407_v12, %v5472_v44  ;;  %v5476_v17 = vsel %vm5448_vm0, %v5423_v3, %v5419_v37  ;;  %v5443_v60 = vrot.slane %v12767_v53, %v12705_v21  ;;  %v5435_v45 = vrot.slane %v12879_v46, %v12705_v21  ;;  %v14902_v12 = vld [vmem:[#allocation12_spill] sm:$0xff] }
 0x4ea   : > { %v5474_v13 = vsel %vm5458_vm5, %v5411_v28, %v5473_v63  ;;  %v5477_v24 = vsel %vm5450_vm1, %v5427_v27, %v5476_v17  ;;  %v5439_v10 = vrot.slane %v12732_v33, %v12705_v21  ;;  %v5447_v54 = vrot.slane %v12792_v52, %v12705_v21 }
 0x4eb   : > { %v5475_v9 = vsel %vm5460_vm6, %v5415_v51, %v5474_v13  ;;  %v5478_v11 = vsel %vm5452_vm2, %v5431_v31, %v5477_v24  ;;  %v12920_v44 = vsub.s32 5, %v14901_v38  ;;  %v12924_v63 = vsub.s32 4, %v14901_v38  ;;  %v14905_v31 = vld [vmem:[#allocation116_spill] sm:$0xff] }
 0x4ec   : > { %v5494_v57 = vsel %vm5487_vm7, %v5475_v9, -inf  ;;  %v5479_v26 = vsel %vm5454_vm3, %v5435_v45, %v5478_v11 }
 0x4ed   : > { %5495 = vmax.xlane.f32.xlu0 %v5494_v57  ;;  %v5480_v4 = vsel %vm5456_vm4, %v5439_v10, %v5479_v26 }
 0x4ee   : > { %v5481_v61 = vsel %vm5458_vm5, %v5443_v60, %v5480_v4  ;;  %v12928_v60 = vsub.s32 6, %v14901_v38 }
 0x4ef   : > { %v5482_v23 = vsel %vm5460_vm6, %v5447_v54, %v5481_v61 }
 0x4f0   : > { %v5497_v29 = vsel %vm5487_vm7, %v5482_v23, -inf }
 0x4f1   : > { %5498 = vmax.xlane.f32.xlu0 %v5497_v29 }
 0x56a   : > { %v5490_v59 = vpop.xlane.xlu0 %5489 }
 0x56b   : > { %v5507_v49 = vrot.slane %v5490_v59, %v14902_v12  ;;  %v5511_v34 = vrot.slane %v5490_v59, %v14903_v19  ;;  %v5515_v37 = vrot.slane %v5490_v59, %v14904_v14  ;;  %v5519_v17 = vrot.slane %v5490_v59, %v14905_v31 }
 0x56c   : > { %v5523_v13 = vrot.slane %v5490_v59, %v12924_v63  ;;  %v5531_v10 = vrot.slane %v5490_v59, %v12928_v60 }
 0x56d   : > { %v5664_v58 = vsub.f32 %v12710_v22, %v5507_v49  ;;  %v5665_v3 = vsub.f32 %v12713_v43, %v5511_v34  ;;  %v5666_v27 = vsub.f32 %v12716_v47, %v5515_v37  ;;  %v5527_v22 = vrot.slane %v5490_v59, %v12920_v44 }
 0x56e   : > { %v5667_v45 = vsub.f32 %v12719_v41, %v5519_v17  ;;  %v12934_v47 = vsub.s32 7, %v14901_v38  ;;  %v5668_v11 = vsub.f32 %v12722_v32, %v5523_v13  ;;  %v5670_v41 = vsub.f32 %v12735_v36, %v5531_v10 }
 0x56f   : > { %v5696_v28 = vmul.f32 1.442695, %v5664_v58  ;;  %v5698_v51 = vmul.f32 1.442695, %v5665_v3  ;;  %v5700_v43 = vmul.f32 1.442695, %v5666_v27  ;;  %v5669_v54 = vsub.f32 %v12725_v5, %v5527_v22 }
 0x570   : > { %v5493_v24 = vpop.xlane.xlu1 %5492  ;;  %v5702_v57 = vmul.f32 1.442695, %v5667_v45  ;;  %v5535_v4 = vrot.slane %v5490_v59, %v12934_v47  ;;  %v5704_v5 = vmul.f32 1.442695, %v5668_v11  ;;  %v5708_v49 = vmul.f32 1.442695, %v5670_v41 }
 0x571   : > { %9489 = vpow2.f32 %v5696_v28  ;;  %v5539_v9 = vrot.slane %v5493_v24, %v14902_v12  ;;  %v5706_v61 = vmul.f32 1.442695, %v5669_v54  ;;  %v5555_v38 = vrot.slane %v5493_v24, %v12924_v63 }
 0x572   : > { %9491 = vpow2.f32 %v5698_v51  ;;  %v5543_v29 = vrot.slane %v5493_v24, %v14903_v19  ;;  %v5671_v32 = vsub.f32 %v12740_v15, %v5535_v4  ;;  %v5559_v59 = vrot.slane %v5493_v24, %v12920_v44 }
 0x573   : > { %9493 = vpow2.f32 %v5700_v43  ;;  %v5672_v23 = vsub.f32 %v12749_v42, %v5539_v9  ;;  %v5676_v36 = vsub.f32 %v12764_v0, %v5555_v38  ;;  %v5547_v42 = vrot.slane %v5493_v24, %v14904_v14 }
 0x574   : > { %9495 = vpow2.f32 %v5702_v57  ;;  %v5673_v37 = vsub.f32 %v12752_v25, %v5543_v29  ;;  %v5710_v3 = vmul.f32 1.442695, %v5671_v32  ;;  %v5563_v15 = vrot.slane %v5493_v24, %v12928_v60 }
 0x575   : > { %9497 = vpow2.f32 %v5706_v61  ;;  %v5712_v58 = vmul.f32 1.442695, %v5672_v23  ;;  %v5677_v27 = vsub.f32 %v12773_v1, %v5559_v59  ;;  %v5720_v51 = vmul.f32 1.442695, %v5676_v36 }
 0x576   : > { %9499 = vpow2.f32 %v5704_v5  ;;  %v12961_v0 = vpop.xlane.xlu0 %5495  ;;  %v5551_v17 = vrot.slane %v5493_v24, %v14905_v31  ;;  %v5674_v22 = vsub.f32 %v12755_v39, %v5547_v42  ;;  %v5714_v43 = vmul.f32 1.442695, %v5673_v37 }
 0x577   : > { %9501 = vpow2.f32 %v5708_v49  ;;  %v5678_v25 = vsub.f32 %v12784_v62, %v5563_v15  ;;  %v5722_v13 = vmul.f32 1.442695, %v5677_v27  ;;  %v5571_v45 = vrot.slane %v12961_v0, %v14902_v12 }
 0x578   : > { %9503 = vpow2.f32 %v5712_v58  ;;  %v5567_v10 = vrot.slane %v5493_v24, %v12934_v47  ;;  %v5675_v54 = vsub.f32 %v12761_v20, %v5551_v17  ;;  %v5716_v9 = vmul.f32 1.442695, %v5674_v22 }
 0x579   : > { %9505 = vpow2.f32 %v5710_v3  ;;  %v5724_v11 = vmul.f32 1.442695, %v5678_v25  ;;  %v5579_v62 = vrot.slane %v12961_v0, %v14904_v14  ;;  %v5680_v57 = vsub.f32 %v12805_v55, %v5571_v45 }
 0x57a   : > { %9507 = vpow2.f32 %v5720_v51  ;;  %v5679_v24 = vsub.f32 %v12787_v8, %v5567_v10  ;;  %v5718_v20 = vmul.f32 1.442695, %v5675_v54  ;;  %v5575_v41 = vrot.slane %v12961_v0, %v14903_v19  ;;  %v13005_v42 = vpop.xlane.xlu0 %5498 }
 0x57b   : > { %9509 = vpow2.f32 %v5714_v43  ;;  %v5595_v38 = vrot.slane %v12961_v0, %v12928_v60  ;;  %v5682_v55 = vsub.f32 %v12814_v35, %v5579_v62  ;;  %v5728_v23 = vmul.f32 1.442695, %v5680_v57 }
 0x57c   : > { %9511 = vpow2.f32 %v5722_v13  ;;  %v5726_v8 = vmul.f32 1.442695, %v5679_v24  ;;  %v5583_v29 = vrot.slane %v12961_v0, %v14905_v31  ;;  %v5681_v32 = vsub.f32 %v12810_v2, %v5575_v41 }
 0x57d   : > { %9513 = vpow2.f32 %v5716_v9  ;;  %v5599_v59 = vrot.slane %v12961_v0, %v12934_v47  ;;  %v5686_v35 = vsub.f32 %v12841_v16, %v5595_v38  ;;  %v5732_v36 = vmul.f32 1.442695, %v5682_v55 }
 0x57e   : > { %v12940_v26 = vpop.eup %9489  ;;  %9515 = vpow2.f32 %v5724_v11  ;;  %v5587_v2 = vrot.slane %v12961_v0, %v12924_v63  ;;  %v5683_v37 = vsub.f32 %v12818_v7, %v5583_v29  ;;  %v5730_v3 = vmul.f32 1.442695, %v5681_v32 }
 0x57f   : > { %5793 = vperm.xlu0 %8624, %v12940_v26   ;;  %v12949_v34 = vpop.eup %9491  ;;  %9517 = vpow2.f32 %v5718_v20  ;;  %v5687_v16 = vsub.f32 %v12845_v18, %v5599_v59  ;;  %v5740_v27 = vmul.f32 1.442695, %v5686_v35  ;;  %v5607_v51 = vrot.slane %v13005_v42, %v14903_v19 }
 0x580   : > { %5796 = vperm.xlu1 %8623, %v12949_v34   ;;  %v12956_v28 = vpop.eup %9493  ;;  %9519 = vpow2.f32 %v5728_v23  ;;  %v5591_v22 = vrot.slane %v12961_v0, %v12920_v44  ;;  %v5684_v7 = vsub.f32 %v12825_v30, %v5587_v2  ;;  %v5734_v43 = vmul.f32 1.442695, %v5683_v37 }
 0x581   : > { %v12968_v1 = vpop.eup %9495  ;;  %9521 = vpow2.f32 %v5726_v8  ;;  %v5742_v18 = vmul.f32 1.442695, %v5687_v16  ;;  %v5611_v13 = vrot.slane %v13005_v42, %v14904_v14  ;;  %v5689_v45 = vsub.f32 %v12864_v6, %v5607_v51 }
 0x582   : > { %v12973_v39 = vpop.eup %9497  ;;  %9523 = vpow2.f32 %v5732_v36  ;;  %v5685_v0 = vsub.f32 %v12829_v50, %v5591_v22  ;;  %v5736_v30 = vmul.f32 1.442695, %v5684_v7  ;;  %v5603_v54 = vrot.slane %v13005_v42, %v14902_v12 }
 0x583   : > { %5802 = vperm.xlu0 %8624, %v12968_v1   ;;  %v12979_v4 = vpop.eup %9499  ;;  %9525 = vpow2.f32 %v5730_v3  ;;  %v5615_v11 = vrot.slane %v13005_v42, %v14905_v31  ;;  %v5690_v6 = vsub.f32 %v12870_v40, %v5611_v13  ;;  %v5746_v62 = vmul.f32 1.442695, %v5689_v45 }
 0x584   : > { %5799 = vperm.xlu1 %8623, %v12956_v28   ;;  %v12985_v61 = vpop.eup %9501  ;;  %9527 = vpow2.f32 %v5740_v27  ;;  %v5738_v50 = vmul.f32 1.442695, %v5685_v0  ;;  %v5623_v24 = vrot.slane %v13005_v42, %v12920_v44  ;;  %v5688_v20 = vsub.f32 %v12860_v48, %v5603_v54 }
 0x585   : > { %v12991_v5 = vpop.eup %9503  ;;  %9529 = vpow2.f32 %v5734_v43  ;;  %v5619_v38 = vrot.slane %v13005_v42, %v12924_v63  ;;  %v5691_v40 = vsub.f32 %v12874_v56, %v5615_v11  ;;  %v5748_v55 = vmul.f32 1.442695, %v5690_v6 }
 0x586   : > { %v12997_v49 = vpop.eup %9505  ;;  %9531 = vpow2.f32 %v5742_v18  ;;  %v5627_v8 = vrot.slane %v13005_v42, %v12928_v60  ;;  %v5693_v48 = vsub.f32 %v12732_v33, %v5623_v24  ;;  %v5744_v29 = vmul.f32 1.442695, %v5688_v20 }
 0x587   : > { %5805 = vperm.xlu0 %8624, %v12979_v4   ;;  %v13003_v58 = vpop.eup %9507  ;;  %9533 = vpow2.f32 %v5736_v30  ;;  %v5631_v56 = vrot.slane %v13005_v42, %v12934_v47  ;;  %v5692_v59 = vsub.f32 %v12879_v46, %v5619_v38  ;;  %v5750_v35 = vmul.f32 1.442695, %v5691_v40 }
 0x588   : > { %5808 = vperm.xlu1 %8623, %v12973_v39   ;;  %v13011_v15 = vpop.eup %9509  ;;  %9535 = vpow2.f32 %v5746_v62  ;;  %v5694_v2 = vsub.f32 %v12767_v53, %v5627_v8  ;;  %v5754_v33 = vmul.f32 1.442695, %v5693_v48 }
 0x589   : > { %v13017_v17 = vpop.eup %9511  ;;  %9537 = vpow2.f32 %v5738_v50  ;;  %v5695_v3 = vsub.f32 %v12792_v52, %v5631_v56  ;;  %v5752_v42 = vmul.f32 1.442695, %v5692_v59 }
 0x58a   : > { %v13023_v25 = vpop.eup %9513  ;;  %9539 = vpow2.f32 %v5748_v55  ;;  %v5756_v16 = vmul.f32 1.442695, %v5694_v2 }
 0x58b   : > { %5817 = vperm.xlu0 %8624, %v12991_v5   ;;  %v13029_v10 = vpop.eup %9515  ;;  %9541 = vpow2.f32 %v5744_v29  ;;  %v5758_v53 = vmul.f32 1.442695, %v5695_v3 }
 0x58c   : > { %5811 = vperm.xlu1 %8623, %v12985_v61   ;;  %v13035_v9 = vpop.eup %9517  ;;  %9543 = vpow2.f32 %v5750_v35 }
 0x58d   : > { %v13041_v57 = vpop.eup %9519  ;;  %9545 = vpow2.f32 %v5754_v33 }
 0x58e   : > { %v13047_v41 = vpop.eup %9521  ;;  %9547 = vpow2.f32 %v5752_v42 }
 0x58f   : > { %5829 = vperm.xlu0 %8624, %v13003_v58   ;;  %v13053_v23 = vpop.eup %9523  ;;  %9549 = vpow2.f32 %v5756_v16 }
 0x590   : > { %5814 = vperm.xlu1 %8623, %v12997_v49   ;;  %v13059_v32 = vpop.eup %9525  ;;  %9551 = vpow2.f32 %v5758_v53 }
 0x591   : > { %v13065_v36 = vpop.eup %9527 }
 0x592   : > { %v13069_v37 = vpop.eup %9529 }
 0x593   : > { %5832 = vperm.xlu0 %8624, %v13017_v17   ;;  %v13073_v46 = vpop.eup %9531 }
 0x594   : > { %5820 = vperm.xlu1 %8623, %v13011_v15   ;;  %v13076_v27 = vpop.eup %9533 }
 0x595   : > { %v13079_v51 = vpop.eup %9535 }
 0x596   : > { %v13082_v52 = vpop.eup %9537 }
 0x597   : > { %5835 = vperm.xlu0 %8624, %v13029_v10   ;;  %v13085_v22 = vpop.eup %9539 }
 0x598   : > { %5823 = vperm.xlu1 %8623, %v13023_v25   ;;  %v13088_v7 = vpop.eup %9541 }
 0x599   : > { %v13091_v43 = vpop.eup %9543 }
 0x59a   : > { %v13094_v18 = vpop.eup %9545 }
 0x59b   : > { %5841 = vperm.xlu0 %8624, %v13041_v57   ;;  %v13097_v13 = vpop.eup %9547 }
 0x59c   : > { %5826 = vperm.xlu1 %8623, %v13035_v9   ;;  %v13100_v45 = vpop.eup %9549 }
 0x59d   : > { %v13103_v0 = vpop.eup %9551 }
 0x59f   : > { %5847 = vperm.xlu0 %8624, %v13053_v23  }
 0x5a0   : > { %5838 = vperm.xlu1 %8623, %v13047_v41  }
 0x5a3   : > { %5859 = vperm.xlu0 %8624, %v13065_v36  }
 0x5a4   : > { %5844 = vperm.xlu1 %8623, %v13059_v32  }
 0x5a7   : > { %5862 = vperm.xlu0 %8624, %v13073_v46  }
 0x5a8   : > { %5850 = vperm.xlu1 %8623, %v13069_v37  }
 0x5ab   : > { %5868 = vperm.xlu0 %8624, %v13079_v51  }
 0x5ac   : > { %5853 = vperm.xlu1 %8623, %v13076_v27  }
 0x5af   : > { %5871 = vperm.xlu0 %8624, %v13085_v22  }
 0x5b0   : > { %5856 = vperm.xlu1 %8623, %v13082_v52  }
 0x5b3   : > { %5874 = vperm.xlu0 %8624, %v13091_v43  }
 0x5b4   : > { %5865 = vperm.xlu1 %8623, %v13088_v7  }
 0x5b7   : > { %5877 = vperm.xlu0 %8624, %v13097_v13  }
 0x5b8   : > { %5880 = vperm.xlu1 %8623, %v13094_v18  }
 0x5bb   : > { %5886 = vperm.xlu0 %8624, %v13103_v0  }
 0x5bc   : > { %5883 = vperm.xlu1 %8623, %v13100_v45  }
 0x5fa   : > { %v5794_v54 = vpop.permute.xlu0 %5793 }
 0x5fb   : > { %v5797_v30 = vpop.permute.xlu1 %5796  ;;  %v5891_v62 = vrot.slane %v5794_v54, %v12705_v21 }
 0x5fc   : > { %v5895_v6 = vrot.slane %v5797_v30, %v12705_v21 }
 0x5fe   : > { %v5803_v24 = vpop.permute.xlu0 %5802  ;;  %v6016_v38 = vsel %vm5448_vm0, %v5895_v6, %v5891_v62 }
 0x5ff   : > { %v5800_v11 = vpop.permute.xlu1 %5799  ;;  %v5903_v40 = vrot.slane %v5803_v24, %v12705_v21 }
 0x600   : > { %v5899_v50 = vrot.slane %v5800_v11, %v12705_v21 }
 0x602   : > { %v6017_v55 = vsel %vm5450_vm1, %v5899_v50, %v6016_v38  ;;  %v5806_v8 = vpop.permute.xlu0 %5805 }
 0x603   : > { %v5809_v20 = vpop.permute.xlu1 %5808  ;;  %v5907_v48 = vrot.slane %v5806_v8, %v12705_v21  ;;  %v6018_v56 = vsel %vm5452_vm2, %v5903_v40, %v6017_v55 }
 0x604   : > { %v5911_v59 = vrot.slane %v5809_v20, %v12705_v21 }
 0x605   : > { %v6019_v35 = vsel %vm5454_vm3, %v5907_v48, %v6018_v56 }
 0x606   : > { %v5818_v33 = vpop.permute.xlu0 %5817  ;;  %v6020_v16 = vsel %vm5456_vm4, %v5911_v59, %v6019_v35 }
 0x607   : > { %v5812_v29 = vpop.permute.xlu1 %5811  ;;  %v5923_v40 = vrot.slane %v5818_v33, %v12705_v21 }
 0x608   : > { %v5915_v2 = vrot.slane %v5812_v29, %v12705_v21 }
 0x60a   : > { %v5830_v53 = vpop.permute.xlu0 %5829  ;;  %v6021_v30 = vsel %vm5458_vm5, %v5915_v2, %v6020_v16 }
 0x60b   : > { %v5815_v3 = vpop.permute.xlu1 %5814  ;;  %v5939_v29 = vrot.slane %v5830_v53, %v12705_v21 }
 0x60c   : > { %v5919_v42 = vrot.slane %v5815_v3, %v12705_v21 }
 0x60e   : > { %v6022_v54 = vsel %vm5460_vm6, %v5919_v42, %v6021_v30  ;;  %v5833_v62 = vpop.permute.xlu0 %5832 }
 0x60f   : > { %v5821_v11 = vpop.permute.xlu1 %5820  ;;  %v6048_v6 = vsel %vm5487_vm7, %v6022_v54, 0.0  ;;  %v5943_v35 = vrot.slane %v5833_v62, %v12705_v21 }
 0x610   : > { %6049 = vadd.xlane.f32.xlu1 %v6048_v6  ;;  %v5927_v24 = vrot.slane %v5821_v11, %v12705_v21 }
 0x612   : > { %v5836_v38 = vpop.permute.xlu0 %5835  ;;  %v6023_v8 = vsel %vm5448_vm0, %v5927_v24, %v5923_v40 }
 0x613   : > { %v5824_v50 = vpop.permute.xlu1 %5823  ;;  %v5947_v3 = vrot.slane %v5836_v38, %v12705_v21 }
 0x614   : > { %v5931_v20 = vrot.slane %v5824_v50, %v12705_v21 }
 0x616   : > { %v6024_v56 = vsel %vm5450_vm1, %v5931_v20, %v6023_v8  ;;  %v5842_v59 = vpop.permute.xlu0 %5841 }
 0x617   : > { %v5827_v55 = vpop.permute.xlu1 %5826  ;;  %v5955_v40 = vrot.slane %v5842_v59, %v12705_v21 }
 0x618   : > { %v5935_v48 = vrot.slane %v5827_v55, %v12705_v21 }
 0x61a   : > { %v6025_v2 = vsel %vm5452_vm2, %v5935_v48, %v6024_v56  ;;  %v5848_v54 = vpop.permute.xlu0 %5847 }
 0x61b   : > { %v6026_v42 = vsel %vm5454_vm3, %v5939_v29, %v6025_v2  ;;  %v5839_v16 = vpop.permute.xlu1 %5838  ;;  %v5963_v29 = vrot.slane %v5848_v54, %v12705_v21 }
 0x61c   : > { %v5951_v33 = vrot.slane %v5839_v16, %v12705_v21  ;;  %v6027_v30 = vsel %vm5456_vm4, %v5943_v35, %v6026_v42 }
 0x61d   : > { %v6028_v11 = vsel %vm5458_vm5, %v5947_v3, %v6027_v30 }
 0x61e   : > { %v6029_v53 = vsel %vm5460_vm6, %v5951_v33, %v6028_v11  ;;  %v5860_v62 = vpop.permute.xlu0 %5859 }
 0x61f   : > { %v5845_v6 = vpop.permute.xlu1 %5844  ;;  %v6051_v50 = vsel %vm5487_vm7, %v6029_v53, 0.0  ;;  %v5979_v33 = vrot.slane %v5860_v62, %v12705_v21 }
 0x620   : > { %6052 = vadd.xlane.f32.xlu0 %v6051_v50  ;;  %v5959_v20 = vrot.slane %v5845_v6, %v12705_v21 }
 0x622   : > { %v5863_v38 = vpop.permute.xlu0 %5862  ;;  %v6030_v8 = vsel %vm5448_vm0, %v5959_v20, %v5955_v40 }
 0x623   : > { %v5851_v24 = vpop.permute.xlu1 %5850  ;;  %v6031_v2 = vsel %vm5450_vm1, %v5963_v29, %v6030_v8  ;;  %v5983_v11 = vrot.slane %v5863_v38, %v12705_v21 }
 0x624   : > { %v5967_v48 = vrot.slane %v5851_v24, %v12705_v21 }
 0x626   : > { %v5869_v35 = vpop.permute.xlu0 %5868  ;;  %v6032_v42 = vsel %vm5452_vm2, %v5967_v48, %v6031_v2 }
 0x627   : > { %v5854_v55 = vpop.permute.xlu1 %5853  ;;  %v5991_v50 = vrot.slane %v5869_v35, %v12705_v21 }
 0x628   : > { %v5971_v56 = vrot.slane %v5854_v55, %v12705_v21 }
 0x62a   : > { %v6033_v59 = vsel %vm5454_vm3, %v5971_v56, %v6032_v42  ;;  %v5872_v30 = vpop.permute.xlu0 %5871 }
 0x62b   : > { %v5857_v3 = vpop.permute.xlu1 %5856  ;;  %v5995_v40 = vrot.slane %v5872_v30, %v12705_v21 }
 0x62c   : > { %v5975_v16 = vrot.slane %v5857_v3, %v12705_v21 }
 0x62e   : > { %v6034_v53 = vsel %vm5456_vm4, %v5975_v16, %v6033_v59  ;;  %v5875_v55 = vpop.permute.xlu0 %5874 }
 0x62f   : > { %v5866_v54 = vpop.permute.xlu1 %5865  ;;  %v6035_v6 = vsel %vm5458_vm5, %v5979_v33, %v6034_v53  ;;  %v5999_v48 = vrot.slane %v5875_v55, %v12705_v21 }
 0x630   : > { %v5987_v24 = vrot.slane %v5866_v54, %v12705_v21  ;;  %v6036_v20 = vsel %vm5460_vm6, %v5983_v11, %v6035_v6 }
 0x631   : > { %v6054_v62 = vsel %vm5487_vm7, %v6036_v20, 0.0 }
 0x632   : > { %v6037_v8 = vsel %vm5448_vm0, %v5991_v50, %v5987_v24  ;;  %6055 = vadd.xlane.f32.xlu0 %v6054_v62  ;;  %v5878_v2 = vpop.permute.xlu0 %5877 }
 0x633   : > { %v6038_v38 = vsel %vm5450_vm1, %v5995_v40, %v6037_v8  ;;  %v5881_v29 = vpop.permute.xlu1 %5880  ;;  %v6003_v3 = vrot.slane %v5878_v2, %v12705_v21 }
 0x634   : > { %v6039_v56 = vsel %vm5452_vm2, %v5999_v48, %v6038_v38  ;;  %v6007_v35 = vrot.slane %v5881_v29, %v12705_v21 }
 0x635   : > { %v6040_v16 = vsel %vm5454_vm3, %v6003_v3, %v6039_v56 }
 0x636   : > { %v5887_v59 = vpop.permute.xlu0 %5886  ;;  %v6041_v30 = vsel %vm5456_vm4, %v6007_v35, %v6040_v16 }
 0x637   : > { %v5884_v42 = vpop.permute.xlu1 %5883  ;;  %v6015_v11 = vrot.slane %v5887_v59, %v12705_v21 }
 0x638   : > { %v6011_v33 = vrot.slane %v5884_v42, %v12705_v21 }
 0x63a   : > { %v6042_v53 = vsel %vm5458_vm5, %v6011_v33, %v6041_v30 }
 0x63b   : > { %v6043_v54 = vsel %vm5460_vm6, %v6015_v11, %v6042_v53 }
 0x63c   : > { %v6057_v6 = vsel %vm5487_vm7, %v6043_v54, 0.0 }
 0x63d   : > { %6058 = vadd.xlane.f32.xlu1 %v6057_v6 }
 0x699   : > { %v6050_v50 = vpop.xlane.xlu1 %6049 }
 0x69a   : > { %9553 = vrcp.f32 %v6050_v50 }
 0x6a7   : > { %v9554_v24 = vpop.eup %9553 }
 0x6a8   : > { %v6071_v20 = vrot.slane %v9554_v24, %v14902_v12  ;;  %v6075_v40 = vrot.slane %v9554_v24, %v14903_v19  ;;  %v6087_v62 = vrot.slane %v9554_v24, %v12924_v63  ;;  %v6079_v48 = vrot.slane %v9554_v24, %v14904_v14 }
 0x6a9   : > { %v6053_v55 = vpop.xlane.xlu0 %6052  ;;  %v6095_v35 = vrot.slane %v9554_v24, %v12928_v60  ;;  %v6083_v2 = vrot.slane %v9554_v24, %v14905_v31 }
 0x6aa   : > { %9555 = vrcp.f32 %v6053_v55  ;;  %v6228_v8 = vmul.f32 %v12940_v26, %v6071_v20  ;;  %v6229_v38 = vmul.f32 %v12949_v34, %v6075_v40  ;;  %v6232_v29 = vmul.f32 %v12979_v4, %v6087_v62 }
 0x6ab   : > { %v6230_v56 = vmul.f32 %v12956_v28, %v6079_v48  ;;  %v6234_v3 = vmul.f32 %v12985_v61, %v6095_v35  ;;  %v6231_v26 = vmul.f32 %v12968_v1, %v6083_v2  ;;  %v6091_v34 = vrot.slane %v9554_v24, %v12920_v44 }
 0x6ac   : > { %6262 = vperm.xlu0 %8624, %v6228_v8   ;;  %6267 = vperm.xlu1 %8623, %v6229_v38   ;;  %v6099_v4 = vrot.slane %v9554_v24, %v12934_v47 }
 0x6ad   : > { %v6233_v42 = vmul.f32 %v12973_v39, %v6091_v34 }
 0x6ae   : > { %v6235_v33 = vmul.f32 %v12997_v49, %v6099_v4 }
 0x6b0   : > { %6282 = vperm.xlu0 %8624, %v6232_v29   ;;  %6272 = vperm.xlu1 %8623, %v6230_v56  }
 0x6b4   : > { %6292 = vperm.xlu0 %8624, %v6234_v3   ;;  %6277 = vperm.xlu1 %8623, %v6231_v26  }
 0x6b7   : > { %v9556_v16 = vpop.eup %9555 }
 0x6b8   : > { %6287 = vperm.xlu1 %8623, %v6233_v42   ;;  %v6107_v28 = vrot.slane %v9556_v16, %v14903_v19  ;;  %v6111_v61 = vrot.slane %v9556_v16, %v14904_v14  ;;  %v6103_v1 = vrot.slane %v9556_v16, %v14902_v12  ;;  %v6115_v53 = vrot.slane %v9556_v16, %v14905_v31 }
 0x6b9   : > { %v6123_v54 = vrot.slane %v9556_v16, %v12920_v44  ;;  %v6119_v6 = vrot.slane %v9556_v16, %v12924_v63  ;;  %v6131_v50 = vrot.slane %v9556_v16, %v12934_v47  ;;  %v6127_v24 = vrot.slane %v9556_v16, %v12928_v60 }
 0x6ba   : > { %v6237_v59 = vmul.f32 %v13011_v15, %v6107_v28  ;;  %v6238_v39 = vmul.f32 %v13023_v25, %v6111_v61  ;;  %v6236_v11 = vmul.f32 %v12991_v5, %v6103_v1  ;;  %v6239_v49 = vmul.f32 %v13035_v9, %v6115_v53  ;;  %v14912_v53 = vld [vmem:[#allocation70_spill] sm:$0xff] }
 0x6bb   : > { %v6056_v30 = vpop.xlane.xlu0 %6055  ;;  %v6241_v15 = vmul.f32 %v13017_v17, %v6123_v54  ;;  %v6240_v25 = vmul.f32 %v13003_v58, %v6119_v6  ;;  %v6243_v5 = vmul.f32 %v13047_v41, %v6131_v50  ;;  %v6242_v9 = vmul.f32 %v13029_v10, %v6127_v24  ;;  %v14916_v6 = vld [vmem:[#allocation123_spill] sm:$0xff] }
 0x6bc   : > { %9557 = vrcp.f32 %v6056_v30  ;;  %6297 = vperm.xlu1 %8623, %v6235_v33   ;;  %6307 = vperm.xlu0 %8624, %v6237_v59   ;;  %v14913_v54 = vmax.f32 %v14912_v53, 0.0  ;;  %v14917_v50 = vmax.f32 %v14916_v6, 0.0 }
 0x6c0   : > { %6312 = vperm.xlu0 %8624, %v6238_v39   ;;  %6302 = vperm.xlu1 %8623, %v6236_v11  }
 0x6c4   : > { %6317 = vperm.xlu0 %8624, %v6239_v49   ;;  %6327 = vperm.xlu1 %8623, %v6241_v15   ;;  %v14914_v49 = vld [vmem:[#allocation65_spill] sm:$0xff] }
 0x6c5   : > { %v14915_v15 = vmax.f32 %v14914_v49, 0.0 }
 0x6c6   : > { %v6059_v20 = vpop.xlane.xlu1 %6058 }
 0x6c7   : > { %9559 = vrcp.f32 %v6059_v20 }
 0x6c8   : > { %6322 = vperm.xlu0 %8624, %v6240_v25   ;;  %6337 = vperm.xlu1 %8623, %v6243_v5  }
 0x6c9   : > { %v9558_v40 = vpop.eup %9557 }
 0x6ca   : > { %v6139_v17 = vrot.slane %v9558_v40, %v14903_v19  ;;  %v6147_v55 = vrot.slane %v9558_v40, %v14905_v31  ;;  %v6143_v58 = vrot.slane %v9558_v40, %v14904_v14  ;;  %v6151_v8 = vrot.slane %v9558_v40, %v12924_v63 }
 0x6cb   : > { %v6135_v48 = vrot.slane %v9558_v40, %v14902_v12  ;;  %v6159_v29 = vrot.slane %v9558_v40, %v12928_v60  ;;  %v6155_v56 = vrot.slane %v9558_v40, %v12920_v44  ;;  %v6163_v2 = vrot.slane %v9558_v40, %v12934_v47 }
 0x6cc   : > { %6332 = vperm.xlu0 %8624, %v6242_v9   ;;  %v6245_v62 = vmul.f32 %v13059_v32, %v6139_v17  ;;  %v6247_v41 = vmul.f32 %v13069_v37, %v6147_v55  ;;  %v6246_v38 = vmul.f32 %v13053_v23, %v6143_v58  ;;  %v6248_v10 = vmul.f32 %v13076_v27, %v6151_v8 }
 0x6cd   : > { %v6244_v32 = vmul.f32 %v13041_v57, %v6135_v48  ;;  %v6250_v37 = vmul.f32 %v13065_v36, %v6159_v29  ;;  %v6249_v23 = vmul.f32 %v13082_v52, %v6155_v56  ;;  %v6251_v27 = vmul.f32 %v13073_v46, %v6163_v2 }
 0x6ce   : > { %6347 = vperm.xlu1 %8623, %v6245_v62  }
 0x6d0   : > { %6357 = vperm.xlu0 %8624, %v6247_v41  }
 0x6d2   : > { %6352 = vperm.xlu1 %8623, %v6246_v38  }
 0x6d4   : > { %6362 = vperm.xlu0 %8624, %v6248_v10   ;;  %v9560_v35 = vpop.eup %9559  ;;  %v14918_v10 = vld [vmem:[#allocation77_spill] sm:$0xff] }
 0x6d5   : > { %v6175_v3 = vrot.slane %v9560_v35, %v14904_v14  ;;  %v6171_v26 = vrot.slane %v9560_v35, %v14903_v19  ;;  %v6167_v34 = vrot.slane %v9560_v35, %v14902_v12  ;;  %v6179_v42 = vrot.slane %v9560_v35, %v14905_v31 }
 0x6d6   : > { %6342 = vperm.xlu1 %8623, %v6244_v32   ;;  %v6187_v4 = vrot.slane %v9560_v35, %v12920_v44  ;;  %v6183_v16 = vrot.slane %v9560_v35, %v12924_v63  ;;  %v6191_v28 = vrot.slane %v9560_v35, %v12928_v60  ;;  %v6195_v31 = vrot.slane %v9560_v35, %v12934_v47  ;;  %v7092_v63 = vld [vmem:[%s14201_s7] sm:$0x7] }
 0x6d7   : > { %v6254_v57 = vmul.f32 %v13085_v22, %v6175_v3  ;;  %v6253_v36 = vmul.f32 %v13079_v51, %v6171_v26  ;;  %v6252_v52 = vmul.f32 %v13088_v7, %v6167_v34  ;;  %v6255_v46 = vmul.f32 %v13091_v43, %v6179_v42  ;;  %v14906_v47 = vld [vmem:[#allocation67_spill] sm:$0xff] }
 0x6d8   : > { %6372 = vperm.xlu0 %8624, %v6250_v37   ;;  %v6257_v22 = vmul.f32 %v13094_v18, %v6187_v4  ;;  %v6256_v51 = vmul.f32 %v13097_v13, %v6183_v16  ;;  %v6258_v7 = vmul.f32 %v13100_v45, %v6191_v28  ;;  %v6259_v44 = vmul.f32 %v13103_v0, %v6195_v31  ;;  %v14908_v45 = vld [vmem:[#allocation64_spill] sm:$0xff]  ;;  %v14920_v37 = vld [vmem:[#allocation71_spill] sm:$0xff] }
 0x6d9   : > { %v13238_v43 = vrot.slane %v7092_v63, %v14902_v12  ;;  %v13241_v60 = vrot.slane %v7092_v63, %v14903_v19  ;;  %v14907_v33 = vmax.f32 %v14906_v47, 0.0  ;;  %v14909_v61 = vmax.f32 %v14908_v45, 0.0  ;;  %v14910_v0 = vld [vmem:[#allocation124_spill] sm:$0xff] }
 0x6da   : > { %6367 = vperm.xlu1 %8623, %v6249_v23   ;;  %v14911_v30 = vmax.f32 %v14910_v0, 0.0  ;;  %v13258_v24 = vrot.slane %v7092_v63, %v14904_v14  ;;  %v14919_v29 = vmax.f32 %v14918_v10, 0.0  ;;  %v14921_v2 = vmax.f32 %v14920_v37, 0.0 }
 0x6dc   : > { %6377 = vperm.xlu0 %8624, %v6251_v27  }
 0x6de   : > { %6392 = vperm.xlu1 %8623, %v6254_v57   ;;  %v14922_v57 = vld [vmem:[#allocation127_spill] sm:$0xff] }
 0x6df   : > { %v14923_v34 = vmax.f32 %v14922_v57, 0.0 }
 0x6e0   : > { %6387 = vperm.xlu0 %8624, %v6253_v36  }
 0x6e2   : > { %6382 = vperm.xlu1 %8623, %v6252_v52  }
 0x6e4   : > { %6397 = vperm.xlu0 %8624, %v6255_v46  }
 0x6e6   : > { %6407 = vperm.xlu1 %8623, %v6257_v22  }
 0x6e8   : > { %6402 = vperm.xlu0 %8624, %v6256_v51  }
 0x6ea   : > { %6412 = vperm.xlu1 %8623, %v6258_v7  }
 0x6ec   : > { %6417 = vperm.xlu0 %8624, %v6259_v44  }
 0x727   : > { %v6268_v18 = vpop.permute.xlu1 %6267  ;;  %v6263_v13 = vpop.permute.xlu0 %6262 }
 0x728   : > { %v6423_v59 = vmul.f32 %v6268_v18, %v14907_v33  ;;  %v6424_v1 = vmul.f32 %v6268_v18, %v14909_v61  ;;  %v6425_v39 = vmul.f32 %v6268_v18, %v14911_v30  ;;  %v7520_v11 = vrot.slane %v6268_v18, %v12705_v21 }
 0x729   : > { %v6420_v12 = vmul.f32 %v6263_v13, %v14913_v54  ;;  %v6421_v19 = vmul.f32 %v6263_v13, %v14915_v15  ;;  %v6422_v25 = vmul.f32 %v6263_v13, %v14917_v50  ;;  %v7516_v5 = vrot.slane %v6263_v13, %v12705_v21 }
 0x72a   : > { %v6534_v20 = vrot.slane %v6423_v59, 4  ;;  %v6540_v40 = vrot.slane %v6424_v1, 4  ;;  %v6546_v9 = vrot.slane %v6425_v39, 4 }
 0x72b   : > { %v6516_v17 = vrot.slane %v6420_v12, 4  ;;  %v6522_v55 = vrot.slane %v6421_v19, 4  ;;  %v6528_v62 = vrot.slane %v6422_v25, 4  ;;  %v13261_v58 = vsel %vm5448_vm0, %v7520_v11, %v7516_v5  ;;  %v13263_v41 = vpop.permute.xlu1 %6272 }
 0x72c   : > { %v6535_v8 = vadd.f32 %v6534_v20, %v6423_v59  ;;  %v6541_v38 = vadd.f32 %v6540_v40, %v6424_v1  ;;  %v6547_v48 = vadd.f32 %v6546_v9, %v6425_v39  ;;  %v6426_v32 = vmul.f32 %v13263_v41, %v14919_v29  ;;  %v14924_v29 = vld [vmem:[#allocation83_spill] sm:$0xff] }
 0x72d   : > { %v6517_v14 = vadd.f32 %v6516_v17, %v6420_v12  ;;  %v6523_v56 = vadd.f32 %v6522_v55, %v6421_v19  ;;  %v6529_v35 = vadd.f32 %v6528_v62, %v6422_v25  ;;  %v6427_v23 = vmul.f32 %v13263_v41, %v14921_v2  ;;  %v13277_v25 = vpop.permute.xlu0 %6282 }
 0x72e   : > { %v6536_v3 = vrot.slane %v6535_v8, 2  ;;  %v6542_v27 = vrot.slane %v6541_v38, 2  ;;  %v6548_v26 = vrot.slane %v6547_v48, 2  ;;  %v6428_v36 = vmul.f32 %v13263_v41, %v14923_v34 }
 0x72f   : > { %v6518_v42 = vrot.slane %v6517_v14, 2  ;;  %v6524_v52 = vrot.slane %v6523_v56, 2  ;;  %v6530_v4 = vrot.slane %v6529_v35, 2  ;;  %v6552_v46 = vrot.slane %v6426_v32, 4 }
 0x730   : > { %v6537_v16 = vadd.f32 %v6536_v3, %v6535_v8  ;;  %v6543_v22 = vadd.f32 %v6542_v27, %v6541_v38  ;;  %v6549_v28 = vadd.f32 %v6548_v26, %v6547_v48  ;;  %v6558_v51 = vrot.slane %v6427_v23, 4  ;;  %v14926_v26 = vld [vmem:[#allocation78_spill] sm:$0xff] }
 0x731   : > { %v6519_v31 = vadd.f32 %v6518_v42, %v6517_v14  ;;  %v6525_v7 = vadd.f32 %v6524_v52, %v6523_v56  ;;  %v6531_v44 = vadd.f32 %v6530_v4, %v6529_v35  ;;  %v6553_v63 = vadd.f32 %v6552_v46, %v6426_v32  ;;  %v14928_v52 = vld [vmem:[#allocation43_spill] sm:$0xff] }
 0x732   : > { %v6538_v18 = vrot.slane %v6537_v16, 1  ;;  %v6544_v13 = vrot.slane %v6543_v22, 1  ;;  %v6550_v47 = vrot.slane %v6549_v28, 1  ;;  %v6559_v33 = vadd.f32 %v6558_v51, %v6427_v23  ;;  %v6278_v23 = vpop.permute.xlu1 %6277 }
 0x733   : > { %v6520_v59 = vrot.slane %v6519_v31, 1  ;;  %v6526_v45 = vrot.slane %v6525_v7, 1  ;;  %v6532_v61 = vrot.slane %v6531_v44, 1  ;;  %v6554_v1 = vrot.slane %v6553_v63, 2 }
 0x734   : > { %v6539_v0 = vadd.f32 %v6538_v18, %v6537_v16  ;;  %v6545_v30 = vadd.f32 %v6544_v13, %v6543_v22  ;;  %v6551_v39 = vadd.f32 %v6550_v47, %v6549_v28  ;;  %v6560_v11 = vrot.slane %v6559_v33, 2  ;;  %v14932_v13 = vld [vmem:[#allocation68_spill] sm:$0xff] }
 0x735   : > { %v6521_v53 = vadd.f32 %v6520_v59, %v6519_v31  ;;  %v6527_v54 = vadd.f32 %v6526_v45, %v6525_v7  ;;  %v6533_v12 = vadd.f32 %v6532_v61, %v6531_v44  ;;  %v6555_v49 = vadd.f32 %v6554_v1, %v6553_v63  ;;  %v14934_v61 = vld [vmem:[#allocation54_spill] sm:$0xff] }
 0x736   : > { %v7112_v15 = vmul.f32 %v13238_v43, %v6539_v0  ;;  %v7113_v19 = vmul.f32 %v13241_v60, %v6545_v30  ;;  %v7114_v6 = vmul.f32 %v13258_v24, %v6551_v39  ;;  %v6561_v50 = vadd.f32 %v6560_v11, %v6559_v33 }
 0x737   : > { %v7109_v5 = vmul.f32 %v13238_v43, %v6521_v53  ;;  %v7110_v20 = vmul.f32 %v13241_v60, %v6527_v54  ;;  %v7111_v40 = vmul.f32 %v13258_v24, %v6533_v12  ;;  %v6556_v9 = vrot.slane %v6555_v49, 1 }
 0x738   : > { %v7301_v17 = vrot.slane %v7112_v15, 7  ;;  %v7315_v55 = vrot.slane %v7113_v19, 7  ;;  %v7329_v62 = vrot.slane %v7114_v6, 7  ;;  %v6562_v8 = vrot.slane %v6561_v50, 1  ;;  %v13321_v6 = vpop.permute.xlu0 %6292 }
 0x739   : > { %v6557_v38 = vadd.f32 %v6556_v9, %v6555_v49  ;;  %v6564_v48 = vrot.slane %v6428_v36, 4  ;;  %v7524_v10 = vrot.slane %v13263_v41, %v12705_v21  ;;  %v14925_v32 = vmax.f32 %v14924_v29, 0.0 }
 0x73a   : > { %v13288_v56 = vsel %vm5448_vm0, %v7301_v17, %v7109_v5  ;;  %v13291_v35 = vsel %vm5448_vm0, %v7315_v55, %v7110_v20  ;;  %v13294_v37 = vsel %vm5448_vm0, %v7329_v62, %v7111_v40  ;;  %v6563_v2 = vadd.f32 %v6562_v8, %v6561_v50 }
 0x73b   : > { %v6432_v14 = vmul.f32 %v13277_v25, %v14925_v32  ;;  %v6565_v3 = vadd.f32 %v6564_v48, %v6428_v36  ;;  %v13297_v27 = vmul.f32 %v13238_v43, %v6557_v38  ;;  %v7642_v41 = vsel %vm5450_vm1, %v7524_v10, %v13261_v58  ;;  %v14930_v58 = vld [vmem:[#allocation75_spill] sm:$0xff]  ;;  %v14936_v10 = vld [vmem:[#allocation14_spill] sm:$0xff] }
 0x73c   : > { %v14927_v57 = vmax.f32 %v14926_v26, 0.0  ;;  %v13305_v42 = vmul.f32 %v13241_v60, %v6563_v2  ;;  %v14929_v4 = vmax.f32 %v14928_v52, 0.0  ;;  %v7532_v36 = vrot.slane %v13277_v25, %v12705_v21 }
 0x73d   : > { %v6588_v16 = vrot.slane %v6432_v14, 4  ;;  %v6566_v22 = vrot.slane %v6565_v3, 2  ;;  %v14931_v31 = vmax.f32 %v14930_v58, 0.0  ;;  %v14933_v47 = vmax.f32 %v14932_v13, 0.0 }
 0x73e   : > { %v6433_v34 = vmul.f32 %v13277_v25, %v14927_v57  ;;  %v6434_v46 = vmul.f32 %v13277_v25, %v14929_v4  ;;  %v14935_v1 = vmax.f32 %v14934_v61, 0.0  ;;  %v7528_v54 = vrot.slane %v6278_v23, %v12705_v21 }
 0x73f   : > { %v6429_v7 = vmul.f32 %v6278_v23, %v14931_v31  ;;  %v6589_v63 = vadd.f32 %v6588_v16, %v6432_v14  ;;  %v6430_v33 = vmul.f32 %v6278_v23, %v14933_v47  ;;  %v6567_v59 = vadd.f32 %v6566_v22, %v6565_v3 }
 0x740   : > { %v6594_v51 = vrot.slane %v6433_v34, 4  ;;  %v6600_v18 = vrot.slane %v6434_v46, 4  ;;  %v6431_v0 = vmul.f32 %v6278_v23, %v14935_v1  ;;  %v13324_v40 = vsel %vm5452_vm2, %v7528_v54, %v7642_v41 }
 0x741   : > { %v6570_v30 = vrot.slane %v6429_v7, 4  ;;  %v6590_v39 = vrot.slane %v6589_v63, 2  ;;  %v6576_v53 = vrot.slane %v6430_v33, 4  ;;  %v6568_v12 = vrot.slane %v6567_v59, 1 }
 0x742   : > { %v6595_v45 = vadd.f32 %v6594_v51, %v6433_v34  ;;  %v6601_v11 = vadd.f32 %v6600_v18, %v6434_v46  ;;  %v6582_v19 = vrot.slane %v6431_v0, 4  ;;  %v14937_v29 = vmax.f32 %v14936_v10, 0.0  ;;  %v14938_v34 = vld [vmem:[#allocation84_spill] sm:$0xff] }
 0x743   : > { %v6571_v15 = vadd.f32 %v6570_v30, %v6429_v7  ;;  %v6591_v50 = vadd.f32 %v6590_v39, %v6589_v63  ;;  %v6577_v20 = vadd.f32 %v6576_v53, %v6430_v33  ;;  %v6569_v9 = vadd.f32 %v6568_v12, %v6567_v59  ;;  %v14940_v63 = vld [vmem:[#allocation47_spill] sm:$0xff]  ;;  %v6288_v39 = vpop.permute.xlu1 %6287 }
 0x744   : > { %v6596_v49 = vrot.slane %v6595_v45, 2  ;;  %v6602_v5 = vrot.slane %v6601_v11, 2  ;;  %v6583_v62 = vadd.f32 %v6582_v19, %v6431_v0  ;;  %v6438_v32 = vmul.f32 %v13321_v6, %v14937_v29 }
 0x745   : > { %v6572_v55 = vrot.slane %v6571_v15, 2  ;;  %v6592_v8 = vrot.slane %v6591_v50, 1  ;;  %v6578_v48 = vrot.slane %v6577_v20, 2  ;;  %v13330_v14 = vmul.f32 %v13258_v24, %v6569_v9 }
 0x746   : > { %v6597_v17 = vadd.f32 %v6596_v49, %v6595_v45  ;;  %v6603_v38 = vadd.f32 %v6602_v5, %v6601_v11  ;;  %v6584_v3 = vrot.slane %v6583_v62, 2  ;;  %v14939_v52 = vmax.f32 %v14938_v34, 0.0 }
 0x747   : > { %v6573_v23 = vadd.f32 %v6572_v55, %v6571_v15  ;;  %v6593_v26 = vadd.f32 %v6592_v8, %v6591_v50  ;;  %v6579_v57 = vadd.f32 %v6578_v48, %v6577_v20  ;;  %v14941_v18 = vmax.f32 %v14940_v63, 0.0 }
 0x748   : > { %v6598_v2 = vrot.slane %v6597_v17, 1  ;;  %v6604_v41 = vrot.slane %v6603_v38, 1  ;;  %v6439_v4 = vmul.f32 %v13321_v6, %v14939_v52  ;;  %v6585_v51 = vadd.f32 %v6584_v3, %v6583_v62 }
 0x749   : > { %v6574_v22 = vrot.slane %v6573_v23, 1  ;;  %v13337_v31 = vmul.f32 %v13238_v43, %v6593_v26  ;;  %v6580_v7 = vrot.slane %v6579_v57, 1  ;;  %v6440_v13 = vmul.f32 %v13321_v6, %v14941_v18  ;;  %v14946_v26 = vld [vmem:[#allocation56_spill] sm:$0xff] }
 0x74a   : > { %v6599_v16 = vadd.f32 %v6598_v2, %v6597_v17  ;;  %v6605_v58 = vadd.f32 %v6604_v41, %v6603_v38  ;;  %v6586_v59 = vrot.slane %v6585_v51, 1  ;;  %v6624_v45 = vrot.slane %v6438_v32, 4  ;;  %v14942_v38 = vld [vmem:[#allocation80_spill] sm:$0xff] }
 0x74b   : > { %v6575_v33 = vadd.f32 %v6574_v22, %v6573_v23  ;;  %v6581_v0 = vadd.f32 %v6580_v7, %v6579_v57  ;;  %v6630_v30 = vrot.slane %v6439_v4, 4  ;;  %v6636_v50 = vrot.slane %v6440_v13, 4  ;;  %v14944_v2 = vld [vmem:[#allocation76_spill] sm:$0xff] }
 0x74c   : > { %v13343_v47 = vmul.f32 %v13241_v60, %v6599_v16  ;;  %v13346_v61 = vmul.f32 %v13258_v24, %v6605_v58  ;;  %v6587_v53 = vadd.f32 %v6586_v59, %v6585_v51  ;;  %v6625_v12 = vadd.f32 %v6624_v45, %v6438_v32  ;;  %v6298_v16 = vpop.permute.xlu1 %6297 }
 0x74d   : > { %v13351_v54 = vmul.f32 %v13238_v43, %v6575_v33  ;;  %v13355_v15 = vmul.f32 %v13241_v60, %v6581_v0  ;;  %v6631_v19 = vadd.f32 %v6630_v30, %v6439_v4  ;;  %v7540_v17 = vrot.slane %v13321_v6, %v12705_v21  ;;  %v14948_v30 = vld [vmem:[#allocation15_spill] sm:$0xff] }
 0x74e   : > { %v13358_v5 = vmul.f32 %v13258_v24, %v6587_v53  ;;  %v6626_v9 = vrot.slane %v6625_v12, 2  ;;  %v6637_v8 = vadd.f32 %v6636_v50, %v6440_v13  ;;  %v14943_v48 = vmax.f32 %v14942_v38, 0.0 }
 0x74f   : > { %v6632_v62 = vrot.slane %v6631_v19, 2  ;;  %v14945_v23 = vmax.f32 %v14944_v2, 0.0  ;;  %v14947_v41 = vmax.f32 %v14946_v26, 0.0  ;;  %v7536_v6 = vrot.slane %v6288_v39, %v12705_v21 }
 0x750   : > { %v6435_v10 = vmul.f32 %v6288_v39, %v14943_v48  ;;  %v6627_v32 = vadd.f32 %v6626_v9, %v6625_v12  ;;  %v6638_v52 = vrot.slane %v6637_v8, 2  ;;  %v7644_v7 = vsel %vm5454_vm3, %v7532_v36, %v13324_v40  ;;  %v14950_v9 = vld [vmem:[#allocation81_spill] sm:$0xff] }
 0x751   : > { %v6436_v3 = vmul.f32 %v6288_v39, %v14945_v23  ;;  %v6437_v57 = vmul.f32 %v6288_v39, %v14947_v41  ;;  %v6633_v34 = vadd.f32 %v6632_v62, %v6631_v19  ;;  %v7645_v33 = vsel %vm5456_vm4, %v7536_v6, %v7644_v7 }
 0x752   : > { %v6606_v4 = vrot.slane %v6435_v10, 4  ;;  %v6628_v22 = vrot.slane %v6627_v32, 1  ;;  %v6639_v18 = vadd.f32 %v6638_v52, %v6637_v8  ;;  %v14949_v39 = vmax.f32 %v14948_v30, 0.0  ;;  %v14952_v8 = vld [vmem:[#allocation59_spill] sm:$0xff]  ;;  %v6308_v52 = vpop.permute.xlu0 %6307 }
 0x753   : > { %v6612_v51 = vrot.slane %v6436_v3, 4  ;;  %v6618_v58 = vrot.slane %v6437_v57, 4  ;;  %v6634_v63 = vrot.slane %v6633_v34, 1  ;;  %v14951_v62 = vmax.f32 %v14950_v9, 0.0 }
 0x754   : > { %v6607_v13 = vadd.f32 %v6606_v4, %v6435_v10  ;;  %v6629_v59 = vadd.f32 %v6628_v22, %v6627_v32  ;;  %v6441_v53 = vmul.f32 %v6298_v16, %v14949_v39  ;;  %v6640_v19 = vrot.slane %v6639_v18, 1 }
 0x755   : > { %v6613_v45 = vadd.f32 %v6612_v51, %v6436_v3  ;;  %v6619_v0 = vadd.f32 %v6618_v58, %v6437_v57  ;;  %v6635_v12 = vadd.f32 %v6634_v63, %v6633_v34  ;;  %v6442_v38 = vmul.f32 %v6298_v16, %v14951_v62 }
 0x756   : > { %v6608_v50 = vrot.slane %v6607_v13, 2  ;;  %v13383_v25 = vmul.f32 %v13238_v43, %v6629_v59  ;;  %v14953_v48 = vmax.f32 %v14952_v8, 0.0  ;;  %v13387_v32 = vadd.f32 %v6640_v19, %v6639_v18 }
 0x757   : > { %v6614_v36 = vrot.slane %v6613_v45, 2  ;;  %v6620_v40 = vrot.slane %v6619_v0, 2  ;;  %v13390_v2 = vmul.f32 %v13241_v60, %v6635_v12  ;;  %v6642_v3 = vrot.slane %v6441_v53, 4 }
 0x758   : > { %v6443_v10 = vmul.f32 %v6298_v16, %v14953_v48  ;;  %v6609_v23 = vadd.f32 %v6608_v50, %v6607_v13  ;;  %v6648_v57 = vrot.slane %v6442_v38, 4  ;;  %v7544_v22 = vrot.slane %v6298_v16, %v12705_v21 }
 0x759   : > { %v6615_v26 = vadd.f32 %v6614_v36, %v6613_v45  ;;  %v6621_v41 = vadd.f32 %v6620_v40, %v6619_v0  ;;  %v6643_v6 = vadd.f32 %v6642_v3, %v6441_v53  ;;  %v7646_v51 = vsel %vm5458_vm5, %v7540_v17, %v7645_v33  ;;  %v14954_v45 = vld [vmem:[#allocation18_spill] sm:$0xff]  ;;  %v14956_v33 = vld [vmem:[#allocation19_spill] sm:$0xff] }
 0x75a   : > { %v6654_v34 = vrot.slane %v6443_v10, 4  ;;  %v6610_v4 = vrot.slane %v6609_v23, 1  ;;  %v6649_v63 = vadd.f32 %v6648_v57, %v6442_v38  ;;  %v13395_v13 = vsel %vm5460_vm6, %v7544_v22, %v7646_v51  ;;  %v14958_v38 = vld [vmem:[#allocation51_spill] sm:$0xff] }
 0x75b   : > { %v6616_v58 = vrot.slane %v6615_v26, 1  ;;  %v6622_v7 = vrot.slane %v6621_v41, 1  ;;  %v6644_v30 = vrot.slane %v6643_v6, 2  ;;  %v14955_v0 = vmax.f32 %v14954_v45, 0.0  ;;  %v13417_v45 = vpop.permute.xlu0 %6312  ;;  %7673 = vst.msk [vmem:[%s13461_s30] sm:$0xff] %vm5487_vm7, %v13395_v13 }
 0x75c   : > { %v6655_v18 = vadd.f32 %v6654_v34, %v6443_v10  ;;  %v6611_v59 = vadd.f32 %v6610_v4, %v6609_v23  ;;  %v6650_v50 = vrot.slane %v6649_v63, 2  ;;  %v14957_v9 = vmax.f32 %v14956_v33, 0.0  ;;  %v6303_v34 = vpop.permute.xlu1 %6302 }
 0x75d   : > { %v6447_v39 = vmul.f32 %v6308_v52, %v14955_v0  ;;  %v6617_v12 = vadd.f32 %v6616_v58, %v6615_v26  ;;  %v6623_v19 = vadd.f32 %v6622_v7, %v6621_v41  ;;  %v6645_v17 = vadd.f32 %v6644_v30, %v6643_v6 }
 0x75e   : > { %v6656_v53 = vrot.slane %v6655_v18, 2  ;;  %v13400_v16 = vmul.f32 %v13238_v43, %v6611_v59  ;;  %v6448_v62 = vmul.f32 %v6308_v52, %v14957_v9  ;;  %v14959_v36 = vmax.f32 %v14958_v38, 0.0  ;;  %v14962_v9 = vld [vmem:[#allocation17_spill] sm:$0xff] }
 0x75f   : > { %v13407_v8 = vmul.f32 %v13241_v60, %v6617_v12  ;;  %v13410_v48 = vmul.f32 %v13258_v24, %v6623_v19  ;;  %v6651_v10 = vadd.f32 %v6650_v50, %v6649_v63  ;;  %v6646_v26 = vrot.slane %v6645_v17, 1  ;;  %v14960_v12 = vld [vmem:[#allocation16_spill] sm:$0xff] }
 0x760   : > { %v6449_v40 = vmul.f32 %v6308_v52, %v14959_v36  ;;  %v6657_v23 = vadd.f32 %v6656_v53, %v6655_v18  ;;  %v6678_v41 = vrot.slane %v6447_v39, 4  ;;  %v6684_v57 = vrot.slane %v6448_v62, 4  ;;  %v14964_v36 = vld [vmem:[#allocation46_spill] sm:$0xff] }
 0x761   : > { %v6652_v6 = vrot.slane %v6651_v10, 1  ;;  %v13414_v58 = vadd.f32 %v6646_v26, %v6645_v17  ;;  %v7552_v30 = vrot.slane %v6308_v52, %v12705_v21  ;;  %v14961_v19 = vmax.f32 %v14960_v12, 0.0 }
 0x762   : > { %v6658_v22 = vrot.slane %v6657_v23, 1  ;;  %v6690_v51 = vrot.slane %v6449_v40, 4  ;;  %v6679_v7 = vadd.f32 %v6678_v41, %v6447_v39  ;;  %v6685_v59 = vadd.f32 %v6684_v57, %v6448_v62 }
 0x763   : > { %v13419_v63 = vadd.f32 %v6652_v6, %v6651_v10  ;;  %v6444_v50 = vmul.f32 %v6303_v34, %v14961_v19  ;;  %v14963_v38 = vmax.f32 %v14962_v9, 0.0  ;;  %v14965_v39 = vmax.f32 %v14964_v36, 0.0  ;;  %v14966_v10 = vld [vmem:[#allocation20_spill] sm:$0xff] }
 0x764   : > { %v13421_v18 = vadd.f32 %v6658_v22, %v6657_v23  ;;  %v6691_v0 = vadd.f32 %v6690_v51, %v6449_v40  ;;  %v6680_v53 = vrot.slane %v6679_v7, 2  ;;  %v6686_v33 = vrot.slane %v6685_v59, 2 }
 0x765   : > { %v6445_v17 = vmul.f32 %v6303_v34, %v14963_v38  ;;  %v6446_v62 = vmul.f32 %v6303_v34, %v14965_v39  ;;  %v6660_v52 = vrot.slane %v6444_v50, 4  ;;  %v7548_v41 = vrot.slane %v6303_v34, %v12705_v21  ;;  %v14968_v38 = vld [vmem:[#allocation21_spill] sm:$0xff] }
 0x766   : > { %v6692_v26 = vrot.slane %v6691_v0, 2  ;;  %v14967_v57 = vmax.f32 %v14966_v10, 0.0  ;;  %v6681_v40 = vadd.f32 %v6680_v53, %v6679_v7  ;;  %v6687_v6 = vadd.f32 %v6686_v33, %v6685_v59 }
 0x767   : > { %v6666_v22 = vrot.slane %v6445_v17, 4  ;;  %v6672_v51 = vrot.slane %v6446_v62, 4  ;;  %v6661_v19 = vadd.f32 %v6660_v52, %v6444_v50  ;;  %v7648_v9 = vsel %vm5448_vm0, %v7552_v30, %v7548_v41 }
 0x768   : > { %v6450_v23 = vmul.f32 %v13417_v45, %v14967_v57  ;;  %v6693_v12 = vadd.f32 %v6692_v26, %v6691_v0  ;;  %v14969_v49 = vmax.f32 %v14968_v38, 0.0  ;;  %v6682_v39 = vrot.slane %v6681_v40, 1  ;;  %v14970_v57 = vld [vmem:[#allocation61_spill] sm:$0xff] }
 0x769   : > { %v6688_v29 = vrot.slane %v6687_v6, 1  ;;  %v6667_v34 = vadd.f32 %v6666_v22, %v6445_v17  ;;  %v6673_v46 = vadd.f32 %v6672_v51, %v6446_v62  ;;  %v6662_v4 = vrot.slane %v6661_v19, 2 }
 0x76a   : > { %v6451_v36 = vmul.f32 %v13417_v45, %v14969_v49  ;;  %v6694_v10 = vrot.slane %v6693_v12, 1  ;;  %v14971_v7 = vmax.f32 %v14970_v57, 0.0  ;;  %v6696_v53 = vrot.slane %v6450_v23, 4 }
 0x76b   : > { %v6683_v0 = vadd.f32 %v6682_v39, %v6681_v40  ;;  %v6689_v50 = vadd.f32 %v6688_v29, %v6687_v6  ;;  %v6668_v33 = vrot.slane %v6667_v34, 2  ;;  %v6674_v30 = vrot.slane %v6673_v46, 2 }
 0x76c   : > { %v6452_v59 = vmul.f32 %v13417_v45, %v14971_v7  ;;  %v6695_v26 = vadd.f32 %v6694_v10, %v6693_v12  ;;  %v6663_v52 = vadd.f32 %v6662_v4, %v6661_v19  ;;  %v6697_v41 = vadd.f32 %v6696_v53, %v6450_v23  ;;  %v13445_v23 = vpop.permute.xlu1 %6327 }
 0x76d   : > { %v6702_v49 = vrot.slane %v6451_v36, 4  ;;  %v7136_v17 = vmul.f32 %v13238_v43, %v6683_v0  ;;  %v7137_v62 = vmul.f32 %v13241_v60, %v6689_v50  ;;  %v6669_v22 = vadd.f32 %v6668_v33, %v6667_v34 }
 0x76e   : > { %v6675_v51 = vadd.f32 %v6674_v30, %v6673_v46  ;;  %v7138_v38 = vmul.f32 %v13258_v24, %v6695_v26  ;;  %v6664_v57 = vrot.slane %v6663_v52, 1  ;;  %v6698_v40 = vrot.slane %v6697_v41, 2  ;;  %v14972_v26 = vld [vmem:[#allocation26_spill] sm:$0xff] }
 0x76f   : > { %v6703_v29 = vadd.f32 %v6702_v49, %v6451_v36  ;;  %v7343_v6 = vrot.slane %v7136_v17, 7  ;;  %v7357_v39 = vrot.slane %v7137_v62, 7  ;;  %v6670_v12 = vrot.slane %v6669_v22, 1 }
 0x770   : > { %v6676_v4 = vrot.slane %v6675_v51, 1  ;;  %v7371_v19 = vrot.slane %v7138_v38, 7  ;;  %v6665_v10 = vadd.f32 %v6664_v57, %v6663_v52  ;;  %v6699_v34 = vadd.f32 %v6698_v40, %v6697_v41  ;;  %v14974_v57 = vld [vmem:[#allocation27_spill] sm:$0xff] }
 0x771   : > { %v6704_v46 = vrot.slane %v6703_v29, 2  ;;  %v6671_v7 = vadd.f32 %v6670_v12, %v6669_v22  ;;  %v6708_v0 = vrot.slane %v6452_v59, 4  ;;  %v7556_v36 = vrot.slane %v13417_v45, %v12705_v21  ;;  %v6318_v12 = vpop.permute.xlu0 %6317 }
 0x772   : > { %v6677_v53 = vadd.f32 %v6676_v4, %v6675_v51  ;;  %v7133_v50 = vmul.f32 %v13238_v43, %v6665_v10  ;;  %v6700_v33 = vrot.slane %v6699_v34, 1  ;;  %v14973_v49 = vmax.f32 %v14972_v26, 0.0  ;;  %v14978_v10 = vld [vmem:[#allocation66_spill] sm:$0xff] }
 0x773   : > { %v6705_v30 = vadd.f32 %v6704_v46, %v6703_v29  ;;  %v7134_v52 = vmul.f32 %v13241_v60, %v6671_v7  ;;  %v6709_v41 = vadd.f32 %v6708_v0, %v6452_v59  ;;  %v7649_v62 = vsel %vm5450_vm1, %v7556_v36, %v7648_v9 }
 0x774   : > { %v6459_v17 = vmul.f32 %v13445_v23, %v14973_v49  ;;  %v7135_v45 = vmul.f32 %v13258_v24, %v6677_v53  ;;  %v13470_v22 = vsel %vm5448_vm0, %v7343_v6, %v7133_v50  ;;  %v6701_v51 = vadd.f32 %v6700_v33, %v6699_v34  ;;  %v14981_v50 = vld [vmem:[#allocation22_spill] sm:$0xff] }
 0x775   : > { %v6706_v38 = vrot.slane %v6705_v30, 1  ;;  %v14975_v40 = vmax.f32 %v14974_v57, 0.0  ;;  %v13476_v4 = vsel %vm5448_vm0, %v7357_v39, %v7134_v52  ;;  %v6710_v9 = vrot.slane %v6709_v41, 2 }
 0x776   : > { %14976 = vst [vmem:[#allocation97_spill] sm:$0xff] %v13476_v4  ;;  %v13479_v59 = vsel %vm5448_vm0, %v7371_v19, %v7135_v45  ;;  %v14979_v46 = vmax.f32 %v14978_v10, 0.0  ;;  %v13485_v34 = vmul.f32 %v13238_v43, %v6701_v51  ;;  %v6750_v7 = vrot.slane %v6459_v17, 4 }
 0x777   : > { %v6460_v29 = vmul.f32 %v13445_v23, %v14975_v40  ;;  %14977 = vst [vmem:[#allocation99_spill] sm:$0xff] %v13479_v59  ;;  %v6707_v6 = vadd.f32 %v6706_v38, %v6705_v30  ;;  %v6711_v0 = vadd.f32 %v6710_v9, %v6709_v41  ;;  %v14982_v33 = vmax.f32 %v14981_v50, 0.0  ;;  %v14984_v38 = vld [vmem:[#allocation23_spill] sm:$0xff]  ;;  %v14986_v41 = vld [vmem:[#allocation52_spill] sm:$0xff] }
 0x778   : > { %v6461_v13 = vmul.f32 %v13445_v23, %v14979_v46  ;;  %14980 = vst [vmem:[#allocation100_spill] sm:$0xff] %v13485_v34  ;;  %v6751_v52 = vadd.f32 %v6750_v7, %v6459_v17  ;;  %v14985_v57 = vmax.f32 %v14984_v38, 0.0  ;;  %v14987_v9 = vmax.f32 %v14986_v41, 0.0 }
 0x779   : > { %v6756_v53 = vrot.slane %v6460_v29, 4  ;;  %v6453_v19 = vmul.f32 %v6318_v12, %v14982_v33  ;;  %v13492_v26 = vmul.f32 %v13241_v60, %v6707_v6  ;;  %v6712_v45 = vrot.slane %v6711_v0, 1 }
 0x77a   : > { %v6762_v36 = vrot.slane %v6461_v13, 4  ;;  %v6454_v40 = vmul.f32 %v6318_v12, %v14985_v57  ;;  %v6455_v10 = vmul.f32 %v6318_v12, %v14987_v9  ;;  %v6752_v11 = vrot.slane %v6751_v52, 2  ;;  %v13504_v57 = vpop.permute.xlu1 %6337 }
 0x77b   : > { %14983 = vst [vmem:[#allocation103_spill] sm:$0xff] %v13492_v26  ;;  %v6757_v30 = vadd.f32 %v6756_v53, %v6460_v29  ;;  %v6714_v33 = vrot.slane %v6453_v19, 4  ;;  %v6713_v3 = vadd.f32 %v6712_v45, %v6711_v0 }
 0x77c   : > { %v6763_v51 = vadd.f32 %v6762_v36, %v6461_v13  ;;  %v6720_v55 = vrot.slane %v6454_v40, 4  ;;  %v6726_v1 = vrot.slane %v6455_v10, 4  ;;  %v6753_v49 = vadd.f32 %v6752_v11, %v6751_v52 }
 0x77d   : > { %v6758_v50 = vrot.slane %v6757_v30, 2  ;;  %v6715_v29 = vadd.f32 %v6714_v33, %v6453_v19  ;;  %v7560_v13 = vrot.slane %v6318_v12, %v12705_v21  ;;  %v13502_v7 = vmul.f32 %v13258_v24, %v6713_v3  ;;  %v14989_v3 = vld [vmem:[#allocation30_spill] sm:$0xff] }
 0x77e   : > { %v6764_v6 = vrot.slane %v6763_v51, 2  ;;  %v6721_v36 = vadd.f32 %v6720_v55, %v6454_v40  ;;  %v6727_v38 = vadd.f32 %v6726_v1, %v6455_v10  ;;  %v6754_v41 = vrot.slane %v6753_v49, 1  ;;  %v14991_v10 = vld [vmem:[#allocation31_spill] sm:$0xff] }
 0x77f   : > { %v6759_v17 = vadd.f32 %v6758_v50, %v6757_v30  ;;  %14988 = vst [vmem:[#allocation101_spill] sm:$0xff] %v13502_v7  ;;  %v6716_v46 = vrot.slane %v6715_v29, 2  ;;  %v7650_v0 = vsel %vm5452_vm2, %v7560_v13, %v7649_v62  ;;  %v14990_v33 = vmax.f32 %v14989_v3, 0.0 }
 0x780   : > { %v6765_v53 = vadd.f32 %v6764_v6, %v6763_v51  ;;  %v6722_v52 = vrot.slane %v6721_v36, 2  ;;  %v6728_v19 = vrot.slane %v6727_v38, 2  ;;  %v6755_v30 = vadd.f32 %v6754_v41, %v6753_v49  ;;  %v6323_v41 = vpop.permute.xlu0 %6322 }
 0x781   : > { %v6760_v9 = vrot.slane %v6759_v17, 1  ;;  %v6717_v50 = vadd.f32 %v6716_v46, %v6715_v29  ;;  %v6465_v55 = vmul.f32 %v13504_v57, %v14990_v33  ;;  %v14992_v6 = vmax.f32 %v14991_v10, 0.0 }
 0x782   : > { %v6766_v11 = vrot.slane %v6765_v53, 1  ;;  %v6723_v51 = vadd.f32 %v6722_v52, %v6721_v36  ;;  %v6729_v40 = vadd.f32 %v6728_v19, %v6727_v38  ;;  %v13515_v62 = vmul.f32 %v13238_v43, %v6755_v30 }
 0x783   : > { %v6761_v12 = vadd.f32 %v6760_v9, %v6759_v17  ;;  %v6466_v44 = vmul.f32 %v13504_v57, %v14992_v6  ;;  %v6718_v49 = vrot.slane %v6717_v50, 1  ;;  %v14995_v17 = vld [vmem:[#allocation72_spill] sm:$0xff]  ;;  %v6786_v9 = vrot.slane %v6465_v55, 4 }
 0x784   : > { %v6767_v1 = vadd.f32 %v6766_v11, %v6765_v53  ;;  %14993 = vst [vmem:[#allocation102_spill] sm:$0xff] %v13515_v62  ;;  %v14996_v46 = vmax.f32 %v14995_v17, 0.0  ;;  %v6724_v36 = vrot.slane %v6723_v51, 1  ;;  %v6730_v38 = vrot.slane %v6729_v40, 1  ;;  %v6333_v52 = vpop.permute.xlu0 %6332 }
 0x785   : > { %v13518_v13 = vmul.f32 %v13241_v60, %v6761_v12  ;;  %v6719_v19 = vadd.f32 %v6718_v49, %v6717_v50  ;;  %v6792_v30 = vrot.slane %v6466_v44, 4  ;;  %v6787_v33 = vadd.f32 %v6786_v9, %v6465_v55  ;;  %v15005_v9 = vld [vmem:[#allocation50_spill] sm:$0xff] }
 0x786   : > { %v6467_v29 = vmul.f32 %v13504_v57, %v14996_v46  ;;  %v13524_v53 = vmul.f32 %v13258_v24, %v6767_v1  ;;  %v6725_v12 = vadd.f32 %v6724_v36, %v6723_v51  ;;  %v6731_v3 = vadd.f32 %v6730_v38, %v6729_v40  ;;  %v14999_v46 = vld [vmem:[#allocation24_spill] sm:$0xff]  ;;  %v15003_v36 = vld [vmem:[#allocation25_spill] sm:$0xff] }
 0x787   : > { %14994 = vst [vmem:[#allocation104_spill] sm:$0xff] %v13518_v13  ;;  %v13529_v6 = vmul.f32 %v13238_v43, %v6719_v19  ;;  %v6793_v17 = vadd.f32 %v6792_v30, %v6466_v44  ;;  %v15000_v45 = vmax.f32 %v14999_v46, 0.0  ;;  %v6788_v51 = vrot.slane %v6787_v33, 2 }
 0x788   : > { %14997 = vst [vmem:[#allocation105_spill] sm:$0xff] %v13524_v53  ;;  %v6798_v10 = vrot.slane %v6467_v29, 4  ;;  %v13536_v11 = vmul.f32 %v13241_v60, %v6725_v12  ;;  %v13539_v50 = vmul.f32 %v13258_v24, %v6731_v3  ;;  %v15004_v38 = vmax.f32 %v15003_v36, 0.0  ;;  %v15007_v36 = vld [vmem:[#allocation28_spill] sm:$0xff] }
 0x789   : > { %14998 = vst [vmem:[#allocation106_spill] sm:$0xff] %v13529_v6  ;;  %v6456_v20 = vmul.f32 %v6323_v41, %v15000_v45  ;;  %v6794_v49 = vrot.slane %v6793_v17, 2  ;;  %v15006_v19 = vmax.f32 %v15005_v9, 0.0  ;;  %v6789_v46 = vadd.f32 %v6788_v51, %v6787_v33 }
 0x78a   : > { %15001 = vst [vmem:[#allocation109_spill] sm:$0xff] %v13536_v11  ;;  %15002 = vst [vmem:[#allocation111_spill] sm:$0xff] %v13539_v50  ;;  %v6799_v40 = vadd.f32 %v6798_v10, %v6467_v29  ;;  %v6457_v44 = vmul.f32 %v6323_v41, %v15004_v38  ;;  %v7564_v53 = vrot.slane %v6323_v41, %v12705_v21  ;;  %v15008_v38 = vmax.f32 %v15007_v36, 0.0  ;;  %v13558_v11 = vpop.permute.xlu1 %6347 }
 0x78b   : > { %v6458_v30 = vmul.f32 %v6323_v41, %v15006_v19  ;;  %v6795_v3 = vadd.f32 %v6794_v49, %v6793_v17  ;;  %v6732_v1 = vrot.slane %v6456_v20, 4  ;;  %v6790_v10 = vrot.slane %v6789_v46, 1  ;;  %v15009_v17 = vld [vmem:[#allocation29_spill] sm:$0xff] }
 0x78c   : > { %v6800_v28 = vrot.slane %v6799_v40, 2  ;;  %v6738_v39 = vrot.slane %v6457_v44, 4  ;;  %v6462_v7 = vmul.f32 %v6333_v52, %v15008_v38  ;;  %v7651_v33 = vsel %vm5454_vm3, %v7564_v53, %v7650_v0 }
 0x78d   : > { %v6744_v29 = vrot.slane %v6458_v30, 4  ;;  %v6796_v9 = vrot.slane %v6795_v3, 1  ;;  %v6733_v19 = vadd.f32 %v6732_v1, %v6456_v20  ;;  %v13551_v45 = vadd.f32 %v6790_v10, %v6789_v46  ;;  %v15012_v1 = vld [vmem:[#allocation69_spill] sm:$0xff] }
 0x78e   : > { %v6801_v55 = vadd.f32 %v6800_v28, %v6799_v40  ;;  %v6739_v59 = vadd.f32 %v6738_v39, %v6457_v44  ;;  %v15010_v51 = vmax.f32 %v15009_v17, 0.0  ;;  %v15011_v20 = vrot.slane %v13445_v23, %v12705_v21  ;;  %v15014_v17 = vld [vmem:[#allocation110_spill] sm:$0xff] }
 0x78f   : > { %v6745_v13 = vadd.f32 %v6744_v29, %v6458_v30  ;;  %v13556_v50 = vadd.f32 %v6796_v9, %v6795_v3  ;;  %v6734_v28 = vrot.slane %v6733_v19, 2  ;;  %v15013_v44 = vmax.f32 %v15012_v1, 0.0 }
 0x790   : > { %v6802_v12 = vrot.slane %v6801_v55, 1  ;;  %v6463_v49 = vmul.f32 %v6333_v52, %v15010_v51  ;;  %v6740_v40 = vrot.slane %v6739_v59, 2  ;;  %v7652_v39 = vsel %vm5456_vm4, %v15011_v20, %v7651_v33 }
 0x791   : > { %v6746_v41 = vrot.slane %v6745_v13, 2  ;;  %v6464_v0 = vmul.f32 %v6333_v52, %v15013_v44  ;;  %v6768_v53 = vrot.slane %v6462_v7, 4  ;;  %v6735_v30 = vadd.f32 %v6734_v28, %v6733_v19 }
 0x792   : > { %v13560_v36 = vadd.f32 %v6802_v12, %v6801_v55  ;;  %v6741_v46 = vadd.f32 %v6740_v40, %v6739_v59  ;;  %v6774_v29 = vrot.slane %v6463_v49, 4  ;;  %v7572_v9 = vrot.slane %v6333_v52, %v12705_v21  ;;  %v15016_v59 = vld [vmem:[#allocation107_spill] sm:$0xff] }
 0x793   : > { %v6747_v3 = vadd.f32 %v6746_v41, %v6745_v13  ;;  %v6769_v10 = vadd.f32 %v6768_v53, %v6462_v7  ;;  %v6780_v38 = vrot.slane %v6464_v0, 4  ;;  %v15015_v55 = vmax.f32 %v15014_v17, 0.0 }
 0x794   : > { %v6736_v51 = vrot.slane %v6735_v30, 1  ;;  %v6742_v23 = vrot.slane %v6741_v46, 1  ;;  %v6775_v33 = vadd.f32 %v6774_v29, %v6463_v49  ;;  %v7653_v19 = vsel %vm5458_vm5, %v7572_v9, %v7652_v39  ;;  %v15019_v29 = vld [vmem:[#allocation74_spill] sm:$0xff]  ;;  %v13594_v9 = vpop.permute.xlu0 %6357 }
 0x795   : > { %v6471_v12 = vmul.f32 %v13558_v11, %v15015_v55  ;;  %v6748_v62 = vrot.slane %v6747_v3, 1  ;;  %v6770_v20 = vrot.slane %v6769_v10, 2  ;;  %v6781_v1 = vadd.f32 %v6780_v38, %v6464_v0 }
 0x796   : > { %v15017_v13 = vmax.f32 %v15016_v59, 0.0  ;;  %v6737_v28 = vadd.f32 %v6736_v51, %v6735_v30  ;;  %v6743_v40 = vadd.f32 %v6742_v23, %v6741_v46  ;;  %v6776_v41 = vrot.slane %v6775_v33, 2 }
 0x797   : > { %v6749_v52 = vadd.f32 %v6748_v62, %v6747_v3  ;;  %v6771_v44 = vadd.f32 %v6770_v20, %v6769_v10  ;;  %v6782_v53 = vrot.slane %v6781_v1, 2  ;;  %v15018_v17 = vrot.slane %v13504_v57, %v12705_v21 }
 0x798   : > { %v6472_v7 = vmul.f32 %v13558_v11, %v15017_v13  ;;  %v15020_v55 = vmax.f32 %v15019_v29, 0.0  ;;  %v13584_v39 = vmul.f32 %v13238_v43, %v6737_v28  ;;  %v13587_v38 = vmul.f32 %v13241_v60, %v6743_v40 }
 0x799   : > { %v7654_v49 = vsel %vm5460_vm6, %v15018_v17, %v7653_v19  ;;  %v13590_v62 = vmul.f32 %v13258_v24, %v6749_v52  ;;  %v6777_v30 = vadd.f32 %v6776_v41, %v6775_v33  ;;  %v6772_v46 = vrot.slane %v6771_v44, 1  ;;  %v15024_v41 = vld [vmem:[#allocation35_spill] sm:$0xff] }
 0x79a   : > { %v6473_v0 = vmul.f32 %v13558_v11, %v15020_v55  ;;  %15021 = vst [vmem:[#allocation144_spill] sm:$0xff] %v13584_v39  ;;  %15022 = vst [vmem:[#allocation145_spill] sm:$0xff] %v13587_v38  ;;  %v6783_v57 = vadd.f32 %v6782_v53, %v6781_v1  ;;  %v6822_v3 = vrot.slane %v6471_v12, 4  ;;  %v6828_v10 = vrot.slane %v6472_v7, 4 }
 0x79b   : > { %15023 = vst [vmem:[#allocation146_spill] sm:$0xff] %v13590_v62  ;;  %7674 = vst.msk [vmem:[%s13461_s30 + $0x8] sm:$0xff] %vm5487_vm7, %v7654_v49  ;;  %v6778_v19 = vrot.slane %v6777_v30, 1  ;;  %v6773_v59 = vadd.f32 %v6772_v46, %v6771_v44  ;;  %v15025_v53 = vmax.f32 %v15024_v41, 0.0  ;;  %v13609_v44 = vpop.permute.xlu1 %6352 }
 0x79c   : > { %v6784_v13 = vrot.slane %v6783_v57, 1  ;;  %v6823_v28 = vadd.f32 %v6822_v3, %v6471_v12  ;;  %v6829_v40 = vadd.f32 %v6828_v10, %v6472_v7  ;;  %v6834_v52 = vrot.slane %v6473_v0, 4  ;;  %v15030_v10 = vld [vmem:[#allocation82_spill] sm:$0xff] }
 0x79d   : > { %v6779_v33 = vadd.f32 %v6778_v19, %v6777_v30  ;;  %v6477_v17 = vmul.f32 %v13594_v9, %v15025_v53  ;;  %v13607_v29 = vmul.f32 %v13238_v43, %v6773_v59  ;;  %v15028_v30 = vld [vmem:[#allocation112_spill] sm:$0xff]  ;;  %v15031_v19 = vmax.f32 %v15030_v10, 0.0 }
 0x79e   : > { %v13604_v49 = vadd.f32 %v6784_v13, %v6783_v57  ;;  %v6824_v55 = vrot.slane %v6823_v28, 2  ;;  %v6830_v20 = vrot.slane %v6829_v40, 2  ;;  %v6835_v7 = vadd.f32 %v6834_v52, %v6473_v0 }
 0x79f   : > { %15026 = vst [vmem:[#allocation149_spill] sm:$0xff] %v13607_v29  ;;  %v13612_v12 = vmul.f32 %v13241_v60, %v6779_v33  ;;  %v15029_v46 = vmax.f32 %v15028_v30, 0.0  ;;  %v6479_v57 = vmul.f32 %v13594_v9, %v15031_v19  ;;  %v6858_v59 = vrot.slane %v6477_v17, 4  ;;  %v15032_v33 = vld [vmem:[#allocation33_spill] sm:$0xff] }
 0x7a0   : > { %v6825_v13 = vadd.f32 %v6824_v55, %v6823_v28  ;;  %v6831_v41 = vadd.f32 %v6830_v20, %v6829_v40  ;;  %v6836_v23 = vrot.slane %v6835_v7, 2  ;;  %v15033_v62 = vmax.f32 %v15032_v33, 0.0  ;;  %v15036_v55 = vld [vmem:[#allocation79_spill] sm:$0xff] }
 0x7a1   : > { %15027 = vst [vmem:[#allocation150_spill] sm:$0xff] %v13612_v12  ;;  %v6478_v3 = vmul.f32 %v13594_v9, %v15029_v46  ;;  %v6870_v1 = vrot.slane %v6479_v57, 4  ;;  %v6859_v46 = vadd.f32 %v6858_v59, %v6477_v17  ;;  %v15034_v12 = vld [vmem:[#allocation34_spill] sm:$0xff]  ;;  %v15037_v38 = vmax.f32 %v15036_v55, 0.0 }
 0x7a2   : > { %v6474_v0 = vmul.f32 %v13609_v44, %v15033_v62  ;;  %v6826_v52 = vrot.slane %v6825_v13, 1  ;;  %v6832_v30 = vrot.slane %v6831_v41, 1  ;;  %v15035_v10 = vmax.f32 %v15034_v12, 0.0 }
 0x7a3   : > { %v6864_v51 = vrot.slane %v6478_v3, 4  ;;  %v6837_v28 = vadd.f32 %v6836_v23, %v6835_v7  ;;  %v6871_v40 = vadd.f32 %v6870_v1, %v6479_v57  ;;  %v6476_v53 = vmul.f32 %v13609_v44, %v15037_v38 }
 0x7a4   : > { %v6475_v19 = vmul.f32 %v13609_v44, %v15035_v10  ;;  %v6827_v26 = vadd.f32 %v6826_v52, %v6825_v13  ;;  %v6833_v4 = vadd.f32 %v6832_v30, %v6831_v41  ;;  %v6860_v39 = vrot.slane %v6859_v46, 2 }
 0x7a5   : > { %v6865_v20 = vadd.f32 %v6864_v51, %v6478_v3  ;;  %v6840_v33 = vrot.slane %v6474_v0, 4  ;;  %v6838_v6 = vrot.slane %v6837_v28, 1  ;;  %v6872_v29 = vrot.slane %v6871_v40, 2 }
 0x7a6   : > { %v6846_v34 = vrot.slane %v6475_v19, 4  ;;  %v13632_v17 = vmul.f32 %v13238_v43, %v6827_v26  ;;  %v13635_v12 = vmul.f32 %v13241_v60, %v6833_v4  ;;  %v6861_v51 = vadd.f32 %v6860_v39, %v6859_v46 }
 0x7a7   : > { %v6866_v62 = vrot.slane %v6865_v20, 2  ;;  %v6841_v23 = vadd.f32 %v6840_v33, %v6474_v0  ;;  %v6839_v1 = vadd.f32 %v6838_v6, %v6837_v28  ;;  %v6873_v3 = vadd.f32 %v6872_v29, %v6871_v40 }
 0x7a8   : > { %v6847_v38 = vadd.f32 %v6846_v34, %v6475_v19  ;;  %v7385_v57 = vrot.slane %v13632_v17, 7  ;;  %v7399_v13 = vrot.slane %v13635_v12, 7  ;;  %v6862_v41 = vrot.slane %v6861_v51, 1 }
 0x7a9   : > { %v6867_v7 = vadd.f32 %v6866_v62, %v6865_v20  ;;  %v6842_v59 = vrot.slane %v6841_v23, 2  ;;  %v13640_v52 = vmul.f32 %v13258_v24, %v6839_v1  ;;  %v6874_v30 = vrot.slane %v6873_v3, 1 }
 0x7aa   : > { %v6848_v10 = vrot.slane %v6847_v38, 2  ;;  %v6863_v4 = vadd.f32 %v6862_v41, %v6861_v51  ;;  %v6852_v39 = vrot.slane %v6476_v53, 4  ;;  %v7588_v6 = vrot.slane %v13609_v44, %v12705_v21 }
 0x7ab   : > { %v6868_v26 = vrot.slane %v6867_v7, 1  ;;  %v6843_v55 = vadd.f32 %v6842_v59, %v6841_v23  ;;  %v7413_v34 = vrot.slane %v13640_v52, 7  ;;  %v6875_v0 = vadd.f32 %v6874_v30, %v6873_v3 }
 0x7ac   : > { %v6849_v46 = vadd.f32 %v6848_v10, %v6847_v38  ;;  %v13646_v19 = vmul.f32 %v13238_v43, %v6863_v4  ;;  %v6853_v20 = vadd.f32 %v6852_v39, %v6476_v53  ;;  %v7129_v40 = vmul.f32 %v13258_v24, %v13387_v32 }
 0x7ad   : > { %v6869_v29 = vadd.f32 %v6868_v26, %v6867_v7  ;;  %v6844_v28 = vrot.slane %v6843_v55, 1  ;;  %v13654_v62 = vmul.f32 %v13258_v24, %v6875_v0  ;;  %v7130_v23 = vmul.f32 %v13238_v43, %v13414_v58 }
 0x7ae   : > { %v6850_v51 = vrot.slane %v6849_v46, 1  ;;  %v6854_v3 = vrot.slane %v6853_v20, 2  ;;  %v7131_v53 = vmul.f32 %v13241_v60, %v13419_v63  ;;  %v7132_v59 = vmul.f32 %v13258_v24, %v13421_v18 }
 0x7af   : > { %v13651_v33 = vmul.f32 %v13241_v60, %v6869_v29  ;;  %v6845_v7 = vadd.f32 %v6844_v28, %v6843_v55  ;;  %v15038_v58 = vrot.slane %v13297_v27, 6  ;;  %v7311_v4 = vrot.slane %v13383_v25, 2 }
 0x7b0   : > { %v6851_v41 = vadd.f32 %v6850_v51, %v6849_v46  ;;  %v6855_v26 = vadd.f32 %v6854_v3, %v6853_v20  ;;  %v15039_v55 = vrot.slane %v13351_v54, 5  ;;  %v7313_v29 = vrot.slane %v7130_v23, 1 }
 0x7b1   : > { %v13666_v30 = vmul.f32 %v13238_v43, %v6845_v7  ;;  %v7304_v10 = vsel %vm5450_vm1, %v15038_v58, %v13288_v56  ;;  %v15040_v18 = vrot.slane %v13305_v42, 6  ;;  %v15041_v56 = vrot.slane %v13337_v31, 4 }
 0x7b2   : > { %v13674_v63 = vmul.f32 %v13241_v60, %v6851_v41  ;;  %v7306_v39 = vsel %vm5452_vm2, %v15039_v55, %v7304_v10  ;;  %v6856_v46 = vrot.slane %v6855_v26, 1  ;;  %v15042_v28 = vrot.slane %v13355_v15, 5  ;;  %v13702_v10 = vpop.permute.xlu0 %6362 }
 0x7b3   : > { %v7318_v0 = vsel %vm5450_vm1, %v15040_v18, %v13291_v35  ;;  %v7308_v25 = vsel %vm5454_vm3, %v15041_v56, %v7306_v39  ;;  %v15043_v51 = vrot.slane %v13400_v16, 3  ;;  %v15044_v42 = vrot.slane %v13343_v47, 4 }
 0x7b4   : > { %v7320_v20 = vsel %vm5452_vm2, %v15042_v28, %v7318_v0  ;;  %v7325_v7 = vrot.slane %v13390_v2, 2  ;;  %v6857_v3 = vadd.f32 %v6856_v46, %v6855_v26  ;;  %v15045_v41 = vrot.slane %v13407_v8, 3 }
 0x7b5   : > { %v7310_v23 = vsel %vm5456_vm4, %v15043_v51, %v7308_v25  ;;  %v7322_v35 = vsel %vm5454_vm3, %v15044_v42, %v7320_v20  ;;  %v7327_v58 = vrot.slane %v7131_v53, 1  ;;  %v15046_v47 = vrot.slane %v13330_v14, 6  ;;  %v15051_v51 = vld [vmem:[#allocation120_spill] sm:$0xff] }
 0x7b6   : > { %v7312_v31 = vsel %vm5458_vm5, %v7311_v4, %v7310_v23  ;;  %v7324_v15 = vsel %vm5456_vm4, %v15045_v41, %v7322_v35  ;;  %v7337_v2 = vrot.slane %v13410_v48, 3  ;;  %v13712_v26 = vmul.f32 %v13258_v24, %v6857_v3  ;;  %v15055_v3 = vld [vmem:[#allocation32_spill] sm:$0xff] }
 0x7b7   : > { %v7314_v16 = vsel %vm5460_vm6, %v7313_v29, %v7312_v31  ;;  %v7326_v55 = vsel %vm5458_vm5, %v7325_v7, %v7324_v15  ;;  %v7332_v39 = vsel %vm5450_vm1, %v15046_v47, %v13294_v37  ;;  %v15047_v53 = vrot.slane %v13358_v5, 5  ;;  %v6343_v29 = vpop.permute.xlu1 %6342  ;;  %v15049_v37 = vld [vmem:[#allocation36_spill] sm:$0xff] }
 0x7b8   : > { %v7328_v8 = vsel %vm5460_vm6, %v7327_v58, %v7326_v55  ;;  %v7339_v18 = vrot.slane %v7129_v40, 2  ;;  %v15048_v0 = vrot.slane %v13346_v61, 4  ;;  %v7341_v14 = vrot.slane %v7132_v59, 1  ;;  %v15053_v40 = vld [vmem:[#allocation85_spill] sm:$0xff]  ;;  %v15057_v55 = vld [vmem:[#allocation108_spill] sm:$0xff] }
 0x7b9   : > { %v7334_v4 = vsel %vm5452_vm2, %v15047_v53, %v7332_v39  ;;  %v7481_v56 = vadd.f32 %v7328_v8, %v7314_v16  ;;  %v15050_v25 = vmax.f32 %v15049_v37, 0.0  ;;  %v15052_v5 = vmax.f32 %v15051_v51, 0.0 }
 0x7ba   : > { %v7336_v46 = vsel %vm5454_vm3, %v15048_v0, %v7334_v4  ;;  %v15054_v42 = vmax.f32 %v15053_v40, 0.0  ;;  %v7596_v7 = vrot.slane %v13702_v10, %v12705_v21  ;;  %v15056_v31 = vmax.f32 %v15055_v3, 0.0  ;;  %v15059_v4 = vld [vmem:[#allocation73_spill] sm:$0xff] }
 0x7bb   : > { %v6480_v48 = vmul.f32 %v13702_v10, %v15050_v25  ;;  %v7338_v20 = vsel %vm5456_vm4, %v7337_v2, %v7336_v46  ;;  %v6481_v23 = vmul.f32 %v13702_v10, %v15052_v5  ;;  %v15058_v47 = vmax.f32 %v15057_v55, 0.0  ;;  %v13740_v2 = vpop.permute.xlu0 %6372 }
 0x7bc   : > { %v6482_v61 = vmul.f32 %v13702_v10, %v15054_v42  ;;  %v7340_v35 = vsel %vm5458_vm5, %v7339_v18, %v7338_v20  ;;  %v6468_v41 = vmul.f32 %v6343_v29, %v15056_v31  ;;  %v15060_v18 = vmax.f32 %v15059_v4, 0.0  ;;  %v15061_v42 = vld [vmem:[#allocation37_spill] sm:$0xff] }
 0x7bd   : > { %v6876_v59 = vrot.slane %v6480_v48, 4  ;;  %v7342_v15 = vsel %vm5460_vm6, %v7341_v14, %v7340_v35  ;;  %v6882_v58 = vrot.slane %v6481_v23, 4  ;;  %v6469_v39 = vmul.f32 %v6343_v29, %v15058_v47  ;;  %v15064_v47 = vld [vmem:[#allocation38_spill] sm:$0xff] }
 0x7be   : > { %v6888_v16 = vrot.slane %v6482_v61, 4  ;;  %v7482_v8 = vadd.f32 %v7481_v56, %v7342_v15  ;;  %v6470_v0 = vmul.f32 %v6343_v29, %v15060_v18  ;;  %v6804_v46 = vrot.slane %v6468_v41, 4 }
 0x7bf   : > { %v6877_v53 = vadd.f32 %v6876_v59, %v6480_v48  ;;  %v6883_v37 = vadd.f32 %v6882_v58, %v6481_v23  ;;  %v6810_v20 = vrot.slane %v6469_v39, 4  ;;  %v7580_v51 = vrot.slane %v6343_v29, %v12705_v21 }
 0x7c0   : > { %v6889_v25 = vadd.f32 %v6888_v16, %v6482_v61  ;;  %7483 = vadd.xlane.f32.xlu1 %v7482_v8  ;;  %v6805_v5 = vadd.f32 %v6804_v46, %v6468_v41  ;;  %v6816_v40 = vrot.slane %v6470_v0, 4  ;;  %v15062_v35 = vmax.f32 %v15061_v42, 0.0  ;;  %v15066_v46 = vld [vmem:[#allocation88_spill] sm:$0xff] }
 0x7c1   : > { %v6878_v14 = vrot.slane %v6877_v53, 2  ;;  %v6884_v31 = vrot.slane %v6883_v37, 2  ;;  %v6811_v48 = vadd.f32 %v6810_v20, %v6469_v39  ;;  %v15063_v59 = vrot.slane %v13558_v11, %v12705_v21 }
 0x7c2   : > { %v6486_v3 = vmul.f32 %v13740_v2, %v15062_v35  ;;  %v6890_v56 = vrot.slane %v6889_v25, 2  ;;  %v6806_v15 = vrot.slane %v6805_v5, 2  ;;  %v6817_v58 = vadd.f32 %v6816_v40, %v6470_v0 }
 0x7c3   : > { %v7655_v23 = vsel %vm5448_vm0, %v15063_v59, %v7580_v51  ;;  %v6879_v61 = vadd.f32 %v6878_v14, %v6877_v53  ;;  %v6885_v41 = vadd.f32 %v6884_v31, %v6883_v37  ;;  %v6812_v55 = vrot.slane %v6811_v48, 2 }
 0x7c4   : > { %v7656_v29 = vsel %vm5450_vm1, %v7588_v6, %v7655_v23  ;;  %v6891_v16 = vadd.f32 %v6890_v56, %v6889_v25  ;;  %v15065_v8 = vmax.f32 %v15064_v47, 0.0  ;;  %v6807_v18 = vadd.f32 %v6806_v15, %v6805_v5 }
 0x7c5   : > { %v6880_v4 = vrot.slane %v6879_v61, 1  ;;  %v6818_v11 = vrot.slane %v6817_v58, 2  ;;  %v15067_v20 = vmax.f32 %v15066_v46, 0.0  ;;  %v6886_v0 = vrot.slane %v6885_v41, 1 }
 0x7c6   : > { %v6487_v39 = vmul.f32 %v13740_v2, %v15065_v8  ;;  %v6892_v51 = vrot.slane %v6891_v16, 1  ;;  %v6813_v14 = vadd.f32 %v6812_v55, %v6811_v48  ;;  %v6912_v44 = vrot.slane %v6486_v3, 4  ;;  %v6368_v8 = vpop.permute.xlu1 %6367 }
 0x7c7   : > { %v6488_v53 = vmul.f32 %v13740_v2, %v15067_v20  ;;  %v6881_v40 = vadd.f32 %v6880_v4, %v6879_v61  ;;  %v6808_v6 = vrot.slane %v6807_v18, 1  ;;  %v6819_v37 = vadd.f32 %v6818_v11, %v6817_v58 }
 0x7c8   : > { %v6918_v25 = vrot.slane %v6487_v39, 4  ;;  %v6887_v42 = vadd.f32 %v6886_v0, %v6885_v41  ;;  %v6893_v35 = vadd.f32 %v6892_v51, %v6891_v16  ;;  %v6814_v31 = vrot.slane %v6813_v14, 1 }
 0x7c9   : > { %v6913_v56 = vadd.f32 %v6912_v44, %v6486_v3  ;;  %v13763_v59 = vmul.f32 %v13238_v43, %v6881_v40  ;;  %v6809_v5 = vadd.f32 %v6808_v6, %v6807_v18  ;;  %v6820_v23 = vrot.slane %v6819_v37, 1  ;;  %v15068_v6 = vld [vmem:[#allocation121_spill] sm:$0xff] }
 0x7ca   : > { %v6919_v15 = vadd.f32 %v6918_v25, %v6487_v39  ;;  %v13766_v47 = vmul.f32 %v13241_v60, %v6887_v42  ;;  %v13769_v48 = vmul.f32 %v13258_v24, %v6893_v35  ;;  %v6815_v61 = vadd.f32 %v6814_v31, %v6813_v14  ;;  %v15070_v35 = vld [vmem:[#allocation118_spill] sm:$0xff] }
 0x7cb   : > { %v6914_v55 = vrot.slane %v6913_v56, 2  ;;  %v6821_v41 = vadd.f32 %v6820_v23, %v6819_v37  ;;  %v7157_v16 = vmul.f32 %v13238_v43, %v6809_v5  ;;  %v6924_v51 = vrot.slane %v6488_v53, 4 }
 0x7cc   : > { %v6920_v3 = vrot.slane %v6919_v15, 2  ;;  %v7158_v39 = vmul.f32 %v13241_v60, %v6815_v61  ;;  %v7604_v40 = vrot.slane %v13740_v2, %v12705_v21  ;;  %v15069_v37 = vmax.f32 %v15068_v6, 0.0  ;;  %v15075_v6 = vld [vmem:[#allocation39_spill] sm:$0xff] }
 0x7cd   : > { %v6915_v11 = vadd.f32 %v6914_v55, %v6913_v56  ;;  %v7159_v46 = vmul.f32 %v13258_v24, %v6821_v41  ;;  %v13780_v20 = vsel %vm5448_vm0, %v7385_v57, %v7157_v16  ;;  %v6925_v42 = vadd.f32 %v6924_v51, %v6488_v53  ;;  %v6378_v16 = vpop.permute.xlu0 %6377 }
 0x7ce   : > { %v6921_v0 = vadd.f32 %v6920_v3, %v6919_v15  ;;  %v13785_v14 = vsel %vm5448_vm0, %v7399_v13, %v7158_v39  ;;  %v6483_v25 = vmul.f32 %v6368_v8, %v15069_v37  ;;  %v15071_v31 = vmax.f32 %v15070_v35, 0.0  ;;  %v15072_v13 = vld [vmem:[#allocation86_spill] sm:$0xff] }
 0x7cf   : > { %v6916_v44 = vrot.slane %v6915_v11, 1  ;;  %v13794_v17 = vsel %vm5448_vm0, %v7413_v34, %v7159_v46  ;;  %v15073_v5 = vmax.f32 %v15072_v13, 0.0  ;;  %v7600_v2 = vrot.slane %v6368_v8, %v12705_v21 }
 0x7d0   : > { %v6922_v57 = vrot.slane %v6921_v0, 1  ;;  %v6484_v12 = vmul.f32 %v6368_v8, %v15071_v31  ;;  %v6894_v15 = vrot.slane %v6483_v25, 4  ;;  %v6926_v55 = vrot.slane %v6925_v42, 2  ;;  %v15077_v31 = vld [vmem:[#allocation122_spill] sm:$0xff] }
 0x7d1   : > { %v6917_v56 = vadd.f32 %v6916_v44, %v6915_v11  ;;  %v6485_v23 = vmul.f32 %v6368_v8, %v15073_v5  ;;  %v15074_v52 = vrot.slane %v13594_v9, %v12705_v21  ;;  %v15076_v37 = vmax.f32 %v15075_v6, 0.0 }
 0x7d2   : > { %v6923_v61 = vadd.f32 %v6922_v57, %v6921_v0  ;;  %v6900_v41 = vrot.slane %v6484_v12, 4  ;;  %v6895_v3 = vadd.f32 %v6894_v15, %v6483_v25  ;;  %v6927_v8 = vadd.f32 %v6926_v55, %v6925_v42 }
 0x7d3   : > { %v7657_v34 = vsel %vm5452_vm2, %v15074_v52, %v7656_v29  ;;  %v13806_v53 = vmul.f32 %v13238_v43, %v6917_v56  ;;  %v6906_v39 = vrot.slane %v6485_v23, 4  ;;  %v6489_v25 = vmul.f32 %v6378_v16, %v15076_v37 }
 0x7d4   : > { %v7658_v11 = vsel %vm5454_vm3, %v7596_v7, %v7657_v34  ;;  %v13813_v46 = vmul.f32 %v13241_v60, %v6923_v61  ;;  %v6901_v0 = vadd.f32 %v6900_v41, %v6484_v12  ;;  %v6896_v51 = vrot.slane %v6895_v3, 2  ;;  %v15079_v7 = vld [vmem:[#allocation87_spill] sm:$0xff] }
 0x7d5   : > { %v7659_v9 = vsel %vm5456_vm4, %v7600_v2, %v7658_v11  ;;  %v6907_v29 = vadd.f32 %v6906_v39, %v6485_v23  ;;  %v6928_v57 = vrot.slane %v6927_v8, 1  ;;  %v15078_v10 = vmax.f32 %v15077_v31, 0.0  ;;  %v13824_v23 = vpop.permute.xlu1 %6392 }
 0x7d6   : > { %v7660_v44 = vsel %vm5458_vm5, %v7604_v40, %v7659_v9  ;;  %v6902_v35 = vrot.slane %v6901_v0, 2  ;;  %v15080_v42 = vmax.f32 %v15079_v7, 0.0  ;;  %v6897_v5 = vadd.f32 %v6896_v51, %v6895_v3  ;;  %v15081_v51 = vld [vmem:[#allocation49_spill] sm:$0xff] }
 0x7d7   : > { %v6490_v56 = vmul.f32 %v6378_v16, %v15078_v10  ;;  %v6908_v15 = vrot.slane %v6907_v29, 2  ;;  %v6930_v12 = vrot.slane %v6489_v25, 4  ;;  %v7608_v2 = vrot.slane %v6378_v16, %v12705_v21 }
 0x7d8   : > { %v6491_v13 = vmul.f32 %v6378_v16, %v15080_v42  ;;  %v13826_v40 = vadd.f32 %v6928_v57, %v6927_v8  ;;  %v6903_v61 = vadd.f32 %v6902_v35, %v6901_v0  ;;  %v6898_v52 = vrot.slane %v6897_v5, 1  ;;  %v15083_v0 = vld [vmem:[#allocation40_spill] sm:$0xff] }
 0x7d9   : > { %v6936_v55 = vrot.slane %v6490_v56, 4  ;;  %v6909_v34 = vadd.f32 %v6908_v15, %v6907_v29  ;;  %v6931_v39 = vadd.f32 %v6930_v12, %v6489_v25  ;;  %v7661_v11 = vsel %vm5460_vm6, %v7608_v2, %v7660_v44  ;;  %v15085_v44 = vld [vmem:[#allocation91_spill] sm:$0xff] }
 0x7da   : > { %v6942_v41 = vrot.slane %v6491_v13, 4  ;;  %v6904_v9 = vrot.slane %v6903_v61, 1  ;;  %v15082_v37 = vmax.f32 %v15081_v51, 0.0  ;;  %7675 = vst.msk [vmem:[%s13461_s30 + $0x10] sm:$0xff] %vm5487_vm7, %v7661_v11  ;;  %v6899_v16 = vadd.f32 %v6898_v52, %v6897_v5 }
 0x7db   : > { %v6937_v6 = vadd.f32 %v6936_v55, %v6490_v56  ;;  %v6910_v8 = vrot.slane %v6909_v34, 1  ;;  %v6932_v57 = vrot.slane %v6931_v39, 2  ;;  %v15084_v35 = vmax.f32 %v15083_v0, 0.0 }
 0x7dc   : > { %v6943_v3 = vadd.f32 %v6942_v41, %v6491_v13  ;;  %v6498_v31 = vmul.f32 %v13824_v23, %v15082_v37  ;;  %v6905_v29 = vadd.f32 %v6904_v9, %v6903_v61  ;;  %v15086_v42 = vmax.f32 %v15085_v44, 0.0  ;;  %v13850_v37 = vpop.permute.xlu0 %6387 }
 0x7dd   : > { %v6499_v10 = vmul.f32 %v13824_v23, %v15084_v35  ;;  %v6938_v25 = vrot.slane %v6937_v6, 2  ;;  %v6911_v13 = vadd.f32 %v6910_v8, %v6909_v34  ;;  %v13841_v15 = vmul.f32 %v13238_v43, %v6899_v16  ;;  %v13857_v35 = vpop.permute.xlu1 %6382 }
 0x7de   : > { %v6944_v7 = vrot.slane %v6943_v3, 2  ;;  %v6500_v56 = vmul.f32 %v13824_v23, %v15086_v42  ;;  %v6933_v12 = vadd.f32 %v6932_v57, %v6931_v39  ;;  %v6984_v2 = vrot.slane %v6498_v31, 4 }
 0x7df   : > { %v13844_v5 = vmul.f32 %v13241_v60, %v6905_v29  ;;  %v6939_v55 = vadd.f32 %v6938_v25, %v6937_v6  ;;  %v6990_v52 = vrot.slane %v6499_v10, 4  ;;  %v13847_v61 = vmul.f32 %v13258_v24, %v6911_v13 }
 0x7e0   : > { %v6945_v41 = vadd.f32 %v6944_v7, %v6943_v3  ;;  %v6934_v9 = vrot.slane %v6933_v12, 1  ;;  %v6985_v51 = vadd.f32 %v6984_v2, %v6498_v31  ;;  %v6996_v6 = vrot.slane %v6500_v56, 4  ;;  %v15087_v7 = vld [vmem:[#allocation55_spill] sm:$0xff] }
 0x7e1   : > { %v6940_v16 = vrot.slane %v6939_v55, 1  ;;  %v6991_v8 = vadd.f32 %v6990_v52, %v6499_v10  ;;  %v15088_v44 = vmax.f32 %v15087_v7, 0.0 }
 0x7e2   : > { %v6946_v39 = vrot.slane %v6945_v41, 1  ;;  %v13853_v57 = vadd.f32 %v6934_v9, %v6933_v12  ;;  %v6986_v0 = vrot.slane %v6985_v51, 2  ;;  %v6997_v10 = vadd.f32 %v6996_v6, %v6500_v56  ;;  %v15089_v12 = vld [vmem:[#allocation125_spill] sm:$0xff]  ;;  %v15091_v9 = vld [vmem:[#allocation90_spill] sm:$0xff] }
 0x7e3   : > { %v13859_v29 = vadd.f32 %v6940_v16, %v6939_v55  ;;  %v6992_v31 = vrot.slane %v6991_v8, 2  ;;  %v6495_v42 = vmul.f32 %v13850_v37, %v15088_v44  ;;  %v15090_v2 = vmax.f32 %v15089_v12, 0.0  ;;  %v15093_v16 = vld [vmem:[#allocation45_spill] sm:$0xff] }
 0x7e4   : > { %v13861_v25 = vadd.f32 %v6946_v39, %v6945_v41  ;;  %v6987_v13 = vadd.f32 %v6986_v0, %v6985_v51  ;;  %v15092_v18 = vmax.f32 %v15091_v9, 0.0  ;;  %v7616_v41 = vrot.slane %v13850_v37, %v12705_v21 }
 0x7e5   : > { %v6496_v52 = vmul.f32 %v13850_v37, %v15090_v2  ;;  %v6993_v34 = vadd.f32 %v6992_v31, %v6991_v8  ;;  %v6966_v55 = vrot.slane %v6495_v42, 4  ;;  %v15094_v39 = vmax.f32 %v15093_v16, 0.0  ;;  %v15095_v2 = vld [vmem:[#allocation126_spill] sm:$0xff] }
 0x7e6   : > { %v6497_v32 = vmul.f32 %v13850_v37, %v15092_v18  ;;  %v6988_v44 = vrot.slane %v6987_v13, 1  ;;  %v6998_v51 = vrot.slane %v6997_v10, 2  ;;  %v15096_v28 = vmax.f32 %v15095_v2, 0.0  ;;  %v15097_v18 = vld [vmem:[#allocation89_spill] sm:$0xff] }
 0x7e7   : > { %v6492_v7 = vmul.f32 %v13857_v35, %v15094_v39  ;;  %v6972_v56 = vrot.slane %v6496_v52, 4  ;;  %v6994_v6 = vrot.slane %v6993_v34, 1  ;;  %v6967_v12 = vadd.f32 %v6966_v55, %v6495_v42 }
 0x7e8   : > { %v6978_v0 = vrot.slane %v6497_v32, 4  ;;  %v6493_v9 = vmul.f32 %v13857_v35, %v15096_v28  ;;  %v15098_v8 = vmax.f32 %v15097_v18, 0.0  ;;  %v6989_v4 = vadd.f32 %v6988_v44, %v6987_v13 }
 0x7e9   : > { %v6999_v37 = vadd.f32 %v6998_v51, %v6997_v10  ;;  %v6973_v38 = vadd.f32 %v6972_v56, %v6496_v52  ;;  %v6995_v54 = vadd.f32 %v6994_v6, %v6993_v34  ;;  %v6968_v39 = vrot.slane %v6967_v12, 2 }
 0x7ea   : > { %v6494_v31 = vmul.f32 %v13857_v35, %v15098_v8  ;;  %v6979_v16 = vadd.f32 %v6978_v0, %v6497_v32  ;;  %v6948_v11 = vrot.slane %v6492_v7, 4  ;;  %v6954_v58 = vrot.slane %v6493_v9, 4 }
 0x7eb   : > { %v7000_v1 = vrot.slane %v6999_v37, 1  ;;  %v13884_v27 = vmul.f32 %v13238_v43, %v6989_v4  ;;  %v6974_v42 = vrot.slane %v6973_v38, 2  ;;  %v13887_v28 = vmul.f32 %v13241_v60, %v6995_v54 }
 0x7ec   : > { %v6980_v55 = vrot.slane %v6979_v16, 2  ;;  %v6969_v2 = vadd.f32 %v6968_v39, %v6967_v12  ;;  %v6949_v18 = vadd.f32 %v6948_v11, %v6492_v7  ;;  %v6955_v8 = vadd.f32 %v6954_v58, %v6493_v9 }
 0x7ed   : > { %15099 = vst [vmem:[#allocation151_spill] sm:$0xff] %v13887_v28  ;;  %v7001_v13 = vadd.f32 %v7000_v1, %v6999_v37  ;;  %v6975_v32 = vadd.f32 %v6974_v42, %v6973_v38  ;;  %v6960_v54 = vrot.slane %v6494_v31, 4  ;;  %v7612_v1 = vrot.slane %v13857_v35, %v12705_v21  ;;  %v6398_v37 = vpop.permute.xlu0 %6397  ;;  %v15106_v38 = vld [vmem:[#allocation93_spill] sm:$0xff] }
 0x7ee   : > { %v6981_v34 = vadd.f32 %v6980_v55, %v6979_v16  ;;  %v6970_v44 = vrot.slane %v6969_v2, 1  ;;  %v6950_v51 = vrot.slane %v6949_v18, 2  ;;  %v6956_v56 = vrot.slane %v6955_v8, 2 }
 0x7ef   : > { %v13892_v4 = vmul.f32 %v13258_v24, %v7001_v13  ;;  %v6976_v0 = vrot.slane %v6975_v32, 1  ;;  %v6961_v9 = vadd.f32 %v6960_v54, %v6494_v31  ;;  %v7662_v55 = vsel %vm5448_vm0, %v7616_v41, %v7612_v1  ;;  %v15104_v41 = vld [vmem:[#allocation41_spill] sm:$0xff] }
 0x7f0   : > { %v6982_v6 = vrot.slane %v6981_v34, 1  ;;  %v6971_v3 = vadd.f32 %v6970_v44, %v6969_v2  ;;  %v6951_v12 = vadd.f32 %v6950_v51, %v6949_v18  ;;  %v6957_v11 = vadd.f32 %v6956_v56, %v6955_v8  ;;  %v15102_v44 = vld [vmem:[#allocation57_spill] sm:$0xff] }
 0x7f1   : > { %15100 = vst [vmem:[#allocation152_spill] sm:$0xff] %v13892_v4  ;;  %v6977_v58 = vadd.f32 %v6976_v0, %v6975_v32  ;;  %v6962_v18 = vrot.slane %v6961_v9, 2  ;;  %v15101_v35 = vrot.slane %v13824_v23, %v12705_v21  ;;  %v15103_v51 = vmax.f32 %v15102_v44, 0.0 }
 0x7f2   : > { %v6983_v7 = vadd.f32 %v6982_v6, %v6981_v34  ;;  %v7184_v16 = vmul.f32 %v13238_v43, %v6971_v3  ;;  %v6952_v39 = vrot.slane %v6951_v12, 1  ;;  %v6958_v42 = vrot.slane %v6957_v11, 1 }
 0x7f3   : > { %v7185_v13 = vmul.f32 %v13241_v60, %v6977_v58  ;;  %v7663_v8 = vsel %vm5450_vm1, %v15101_v35, %v7662_v55  ;;  %v6501_v3 = vmul.f32 %v6398_v37, %v15103_v51  ;;  %v6963_v6 = vadd.f32 %v6962_v18, %v6961_v9 }
 0x7f4   : > { %v7186_v2 = vmul.f32 %v13258_v24, %v6983_v7  ;;  %v7427_v32 = vrot.slane %v7184_v16, 7  ;;  %v6953_v34 = vadd.f32 %v6952_v39, %v6951_v12  ;;  %v6959_v31 = vadd.f32 %v6958_v42, %v6957_v11 }
 0x7f5   : > { %v7441_v56 = vrot.slane %v7185_v13, 7  ;;  %v15105_v54 = vmax.f32 %v15104_v41, 0.0  ;;  %v15107_v23 = vmax.f32 %v15106_v38, 0.0  ;;  %v7002_v55 = vrot.slane %v6501_v3, 4 }
 0x7f6   : > { %v7455_v0 = vrot.slane %v7186_v2, 7  ;;  %v7181_v58 = vmul.f32 %v13238_v43, %v6953_v34  ;;  %v7182_v7 = vmul.f32 %v13241_v60, %v6959_v31  ;;  %v6964_v16 = vrot.slane %v6963_v6, 1 }
 0x7f7   : > { %v6502_v1 = vmul.f32 %v6398_v37, %v15105_v54  ;;  %v6503_v52 = vmul.f32 %v6398_v37, %v15107_v23  ;;  %v7624_v11 = vrot.slane %v6398_v37, %v12705_v21  ;;  %v7153_v39 = vmul.f32 %v13258_v24, %v13604_v49  ;;  %v15114_v23 = vld [vmem:[#allocation144_spill] sm:$0xff] }
 0x7f8   : > { %v13917_v9 = vsel %vm5448_vm0, %v7427_v32, %v7181_v58  ;;  %v13920_v42 = vsel %vm5448_vm0, %v7441_v56, %v7182_v7  ;;  %v7003_v13 = vadd.f32 %v7002_v55, %v6501_v3  ;;  %v6965_v18 = vadd.f32 %v6964_v16, %v6963_v6  ;;  %v15108_v3 = vld [vmem:[#allocation100_spill] sm:$0xff]  ;;  %v15110_v6 = vld [vmem:[#allocation149_spill] sm:$0xff] }
 0x7f9   : > { %v7008_v12 = vrot.slane %v6502_v1, 4  ;;  %v7014_v2 = vrot.slane %v6503_v52, 4  ;;  %v13923_v38 = vsel %vm5452_vm2, %v7624_v11, %v7663_v8  ;;  %v7154_v34 = vmul.f32 %v13238_v43, %v13551_v45  ;;  %v15117_v11 = vld [vmem:[#allocation103_spill] sm:$0xff] }
 0x7fa   : > { %v7004_v37 = vrot.slane %v7003_v13, 2  ;;  %v7155_v49 = vmul.f32 %v13241_v60, %v13556_v50  ;;  %v7156_v32 = vmul.f32 %v13258_v24, %v13560_v36  ;;  %v7183_v44 = vmul.f32 %v13258_v24, %v6965_v18 }
 0x7fb   : > { %v7009_v35 = vadd.f32 %v7008_v12, %v6502_v1  ;;  %v7015_v31 = vadd.f32 %v7014_v2, %v6503_v52  ;;  %v15109_v56 = vrot.slane %v15108_v3, 6  ;;  %v7353_v41 = vrot.slane %v15110_v6, 2  ;;  %v15111_v1 = vld [vmem:[#allocation106_spill] sm:$0xff]  ;;  %v15116_v12 = vld [vmem:[#allocation97_spill] sm:$0xff] }
 0x7fc   : > { %v7005_v54 = vadd.f32 %v7004_v37, %v7003_v13  ;;  %v15112_v52 = vrot.slane %v15111_v1, 5  ;;  %v7355_v50 = vrot.slane %v7154_v34, 1  ;;  %v13941_v7 = vsel %vm5448_vm0, %v7455_v0, %v7183_v44  ;;  %v15119_v37 = vld [vmem:[#allocation102_spill] sm:$0xff]  ;;  %v15121_v34 = vld [vmem:[#allocation109_spill] sm:$0xff] }
 0x7fd   : > { %v7010_v51 = vrot.slane %v7009_v35, 2  ;;  %v7346_v8 = vsel %vm5450_vm1, %v15109_v56, %v13470_v22  ;;  %v7016_v45 = vrot.slane %v7015_v31, 2  ;;  %15113 = vst [vmem:[#allocation128_spill] sm:$0xff] %v13941_v7  ;;  %v15115_v55 = vrot.slane %v15114_v23, 4 }
 0x7fe   : > { %v7348_v58 = vsel %vm5452_vm2, %v15112_v52, %v7346_v8  ;;  %v15118_v22 = vrot.slane %v15117_v11, 6  ;;  %v7006_v13 = vrot.slane %v7005_v54, 1  ;;  %v15120_v3 = vrot.slane %v15119_v37, 3  ;;  %v15125_v52 = vld [vmem:[#allocation150_spill] sm:$0xff]  ;;  %v13965_v11 = vpop.permute.xlu1 %6407  ;;  %v15128_v37 = vld [vmem:[#allocation99_spill] sm:$0xff] }
 0x7ff   : > { %v7011_v36 = vadd.f32 %v7010_v51, %v7009_v35  ;;  %v7350_v16 = vsel %vm5454_vm3, %v15115_v55, %v7348_v58  ;;  %v7017_v18 = vadd.f32 %v7016_v45, %v7015_v31  ;;  %v15122_v8 = vrot.slane %v15121_v34, 5  ;;  %v15123_v51 = vld [vmem:[#allocation145_spill] sm:$0xff]  ;;  %v15126_v45 = vld [vmem:[#allocation104_spill] sm:$0xff] }
 0x800   : > { %v7360_v2 = vsel %vm5450_vm1, %v15118_v22, %v15116_v12  ;;  %v7352_v56 = vsel %vm5456_vm4, %v15120_v3, %v7350_v16  ;;  %v15124_v6 = vrot.slane %v15123_v51, 4  ;;  %v7367_v58 = vrot.slane %v15125_v52, 2  ;;  %v15129_v3 = vld [vmem:[#allocation101_spill] sm:$0xff] }
 0x801   : > { %v7362_v0 = vsel %vm5452_vm2, %v15122_v8, %v7360_v2  ;;  %v7012_v35 = vrot.slane %v7011_v36, 1  ;;  %v7354_v44 = vsel %vm5458_vm5, %v7353_v41, %v7352_v56  ;;  %v7007_v23 = vadd.f32 %v7006_v13, %v7005_v54 }
 0x802   : > { %v7364_v1 = vsel %vm5454_vm3, %v15124_v6, %v7362_v0  ;;  %v7018_v55 = vrot.slane %v7017_v18, 1  ;;  %v7356_v31 = vsel %vm5460_vm6, %v7355_v50, %v7354_v44  ;;  %v15127_v12 = vrot.slane %v15126_v45, 3  ;;  %v15132_v50 = vld [vmem:[#allocation111_spill] sm:$0xff]  ;;  %v15134_v44 = vld [vmem:[#allocation105_spill] sm:$0xff]  ;;  %v6403_v45 = vpop.permute.xlu0 %6402 }
 0x803   : > { %v7013_v22 = vadd.f32 %v7012_v35, %v7011_v36  ;;  %v7369_v41 = vrot.slane %v7155_v49, 1  ;;  %v15130_v56 = vrot.slane %v15129_v3, 6  ;;  %v13973_v54 = vmul.f32 %v13238_v43, %v7007_v23  ;;  %v15136_v35 = vld [vmem:[#allocation146_spill] sm:$0xff] }
 0x804   : > { %v7366_v16 = vsel %vm5456_vm4, %v15127_v12, %v7364_v1  ;;  %v7019_v8 = vadd.f32 %v7018_v55, %v7017_v18  ;;  %v15133_v13 = vrot.slane %v15132_v50, 5  ;;  %v7379_v51 = vrot.slane %v15134_v44, 3  ;;  %v15143_v50 = vld [vmem:[#allocation94_spill] sm:$0xff] }
 0x805   : > { %v7368_v2 = vsel %vm5458_vm5, %v7367_v58, %v7366_v16  ;;  %v7374_v34 = vsel %vm5450_vm1, %v15130_v56, %v15128_v37  ;;  %15131 = vst [vmem:[#allocation153_spill] sm:$0xff] %v13973_v54  ;;  %v13980_v36 = vmul.f32 %v13241_v60, %v7013_v22  ;;  %v15137_v6 = vrot.slane %v15136_v35, 4  ;;  %v15141_v56 = vld [vmem:[#allocation44_spill] sm:$0xff] }
 0x806   : > { %v7376_v0 = vsel %vm5452_vm2, %v15133_v13, %v7374_v34  ;;  %v7370_v49 = vsel %vm5460_vm6, %v7369_v41, %v7368_v2  ;;  %v7381_v52 = vrot.slane %v7153_v39, 2  ;;  %v13987_v18 = vmul.f32 %v13258_v24, %v7019_v8  ;;  %v15139_v2 = vld [vmem:[#allocation60_spill] sm:$0xff] }
 0x807   : > { %15135 = vst [vmem:[#allocation154_spill] sm:$0xff] %v13980_v36  ;;  %v7378_v1 = vsel %vm5454_vm3, %v15137_v6, %v7376_v0  ;;  %v7383_v55 = vrot.slane %v7156_v32, 1  ;;  %v7485_v22 = vadd.f32 %v7370_v49, %v7356_v31  ;;  %v15140_v41 = vmax.f32 %v15139_v2, 0.0  ;;  %v14004_v0 = vpop.permute.xlu1 %6412  ;;  %v15145_v49 = vld [vmem:[#allocation48_spill] sm:$0xff] }
 0x808   : > { %15138 = vst [vmem:[#allocation155_spill] sm:$0xff] %v13987_v18  ;;  %v7380_v23 = vsel %vm5456_vm4, %v7379_v51, %v7378_v1  ;;  %v15142_v34 = vmax.f32 %v15141_v56, 0.0  ;;  %v15144_v32 = vmax.f32 %v15143_v50, 0.0  ;;  %v15146_v35 = vmax.f32 %v15145_v49, 0.0  ;;  %v15149_v2 = vld [vmem:[#allocation92_spill] sm:$0xff] }
 0x809   : > { %v7382_v16 = vsel %vm5458_vm5, %v7381_v52, %v7380_v23  ;;  %v6507_v37 = vmul.f32 %v13965_v11, %v15140_v41  ;;  %v15147_v23 = vld [vmem:[#allocation42_spill] sm:$0xff]  ;;  %v15150_v41 = vmax.f32 %v15149_v2, 0.0 }
 0x80a   : > { %v7384_v3 = vsel %vm5460_vm6, %v7383_v55, %v7382_v16  ;;  %v6508_v8 = vmul.f32 %v13965_v11, %v15142_v34  ;;  %v6509_v13 = vmul.f32 %v13965_v11, %v15144_v32  ;;  %v6504_v6 = vmul.f32 %v6403_v45, %v15146_v35 }
 0x80b   : > { %v7486_v44 = vadd.f32 %v7485_v22, %v7384_v3  ;;  %v7038_v31 = vrot.slane %v6507_v37, 4  ;;  %v15148_v55 = vmax.f32 %v15147_v23, 0.0  ;;  %v6506_v56 = vmul.f32 %v6403_v45, %v15150_v41  ;;  %v15151_v3 = vld [vmem:[#allocation63_spill] sm:$0xff] }
 0x80c   : > { %v7044_v1 = vrot.slane %v6508_v8, 4  ;;  %v7050_v52 = vrot.slane %v6509_v13, 4  ;;  %v7020_v50 = vrot.slane %v6504_v6, 4  ;;  %v7628_v22 = vrot.slane %v6403_v45, %v12705_v21 }
 0x80d   : > { %v6505_v16 = vmul.f32 %v6403_v45, %v15148_v55  ;;  %7487 = vadd.xlane.f32.xlu0 %v7486_v44  ;;  %v7039_v34 = vadd.f32 %v7038_v31, %v6507_v37  ;;  %v15152_v32 = vmax.f32 %v15151_v3, 0.0  ;;  %v7032_v58 = vrot.slane %v6506_v56, 4  ;;  %v15153_v55 = vld [vmem:[#allocation53_spill] sm:$0xff] }
 0x80e   : > { %v7045_v12 = vadd.f32 %v7044_v1, %v6508_v8  ;;  %v7051_v49 = vadd.f32 %v7050_v52, %v6509_v13  ;;  %v7021_v51 = vadd.f32 %v7020_v50, %v6504_v6  ;;  %v7665_v23 = vsel %vm5454_vm3, %v7628_v22, %v13923_v38 }
 0x80f   : > { %v6510_v39 = vmul.f32 %v14004_v0, %v15152_v32  ;;  %v7026_v35 = vrot.slane %v6505_v16, 4  ;;  %v7040_v10 = vrot.slane %v7039_v34, 2  ;;  %v15154_v2 = vmax.f32 %v15153_v55, 0.0  ;;  %v15155_v32 = vld [vmem:[#allocation95_spill] sm:$0xff] }
 0x810   : > { %v7046_v44 = vrot.slane %v7045_v12, 2  ;;  %v7052_v31 = vrot.slane %v7051_v49, 2  ;;  %v7033_v41 = vadd.f32 %v7032_v58, %v6506_v56  ;;  %v7022_v18 = vrot.slane %v7021_v51, 2 }
 0x811   : > { %v6511_v37 = vmul.f32 %v14004_v0, %v15154_v2  ;;  %v7027_v45 = vadd.f32 %v7026_v35, %v6505_v16  ;;  %v7041_v3 = vadd.f32 %v7040_v10, %v7039_v34  ;;  %v15156_v8 = vmax.f32 %v15155_v32, 0.0 }
 0x812   : > { %v7056_v1 = vrot.slane %v6510_v39, 4  ;;  %v7047_v52 = vadd.f32 %v7046_v44, %v7045_v12  ;;  %v7053_v6 = vadd.f32 %v7052_v31, %v7051_v49  ;;  %v7034_v4 = vrot.slane %v7033_v41, 2 }
 0x813   : > { %v6512_v13 = vmul.f32 %v14004_v0, %v15156_v8  ;;  %v7028_v50 = vrot.slane %v7027_v45, 2  ;;  %v7042_v38 = vrot.slane %v7041_v3, 1  ;;  %v7023_v22 = vadd.f32 %v7022_v18, %v7021_v51 }
 0x814   : > { %v7057_v55 = vadd.f32 %v7056_v1, %v6510_v39  ;;  %v7062_v7 = vrot.slane %v6511_v37, 4  ;;  %v7048_v2 = vrot.slane %v7047_v52, 1  ;;  %v7054_v36 = vrot.slane %v7053_v6, 1 }
 0x815   : > { %v7029_v54 = vadd.f32 %v7028_v50, %v7027_v45  ;;  %v7035_v16 = vadd.f32 %v7034_v4, %v7033_v41  ;;  %v7043_v58 = vadd.f32 %v7042_v38, %v7041_v3  ;;  %v7024_v10 = vrot.slane %v7023_v22, 1 }
 0x816   : > { %v7058_v56 = vrot.slane %v7057_v55, 2  ;;  %v7063_v34 = vadd.f32 %v7062_v7, %v6511_v37  ;;  %v7049_v35 = vadd.f32 %v7048_v2, %v7047_v52  ;;  %v7055_v32 = vadd.f32 %v7054_v36, %v7053_v6  ;;  %v6418_v6 = vpop.permute.xlu0 %6417 }
 0x817   : > { %v7030_v8 = vrot.slane %v7029_v54, 1  ;;  %v7036_v28 = vrot.slane %v7035_v16, 1  ;;  %v14027_v12 = vmul.f32 %v13238_v43, %v7043_v58  ;;  %v7025_v49 = vadd.f32 %v7024_v10, %v7023_v22 }
 0x818   : > { %v7059_v44 = vadd.f32 %v7058_v56, %v7057_v55  ;;  %v7064_v18 = vrot.slane %v7063_v34, 2  ;;  %v14030_v39 = vmul.f32 %v13241_v60, %v7049_v35  ;;  %v14033_v51 = vmul.f32 %v13258_v24, %v7055_v32  ;;  %v15158_v35 = vld [vmem:[#allocation62_spill] sm:$0xff] }
 0x819   : > { %v7031_v4 = vadd.f32 %v7030_v8, %v7029_v54  ;;  %v7037_v31 = vadd.f32 %v7036_v28, %v7035_v16  ;;  %v7435_v7 = vrot.slane %v14027_v12, 3  ;;  %v14037_v36 = vmul.f32 %v13238_v43, %v7025_v49  ;;  %v15160_v49 = vld [vmem:[#allocation58_spill] sm:$0xff] }
 0x81a   : > { %v7060_v37 = vrot.slane %v7059_v44, 1  ;;  %v7065_v45 = vadd.f32 %v7064_v18, %v7063_v34  ;;  %v7449_v41 = vrot.slane %v14030_v39, 3  ;;  %v7068_v52 = vrot.slane %v6512_v13, 4 }
 0x81b   : > { %v14041_v3 = vmul.f32 %v13241_v60, %v7031_v4  ;;  %v14044_v1 = vmul.f32 %v13258_v24, %v7037_v31  ;;  %v7433_v54 = vrot.slane %v14037_v36, 4  ;;  %v7636_v38 = vrot.slane %v14004_v0, %v12705_v21  ;;  %v15183_v36 = vld [vmem:[#allocation152_spill] sm:$0xff] }
 0x81c   : > { %v7061_v28 = vadd.f32 %v7060_v37, %v7059_v44  ;;  %v7066_v50 = vrot.slane %v7065_v45, 1  ;;  %v7069_v2 = vadd.f32 %v7068_v52, %v6512_v13  ;;  %v15157_v16 = vrot.slane %v13965_v11, %v12705_v21  ;;  %v15162_v13 = vld [vmem:[#allocation96_spill] sm:$0xff] }
 0x81d   : > { %v7447_v22 = vrot.slane %v14041_v3, 4  ;;  %v7461_v55 = vrot.slane %v14044_v1, 4  ;;  %v15159_v32 = vmax.f32 %v15158_v35, 0.0  ;;  %v15161_v44 = vmax.f32 %v15160_v49, 0.0 }
 0x81e   : > { %v7666_v58 = vsel %vm5456_vm4, %v15157_v16, %v7665_v23  ;;  %v7067_v10 = vadd.f32 %v7066_v50, %v7065_v45  ;;  %v14056_v56 = vmul.f32 %v13238_v43, %v7061_v28  ;;  %v7070_v0 = vrot.slane %v7069_v2, 2 }
 0x81f   : > { %v7667_v34 = vsel %vm5458_vm5, %v7636_v38, %v7666_v58  ;;  %v6513_v8 = vmul.f32 %v6418_v6, %v15159_v32  ;;  %v6514_v18 = vmul.f32 %v6418_v6, %v15161_v44  ;;  %v15163_v4 = vmax.f32 %v15162_v13, 0.0 }
 0x820   : > { %v7640_v11 = vrot.slane %v6418_v6, %v12705_v21  ;;  %v14067_v23 = vmul.f32 %v13241_v60, %v7067_v10  ;;  %v7177_v45 = vmul.f32 %v13258_v24, %v13826_v40  ;;  %v7178_v52 = vmul.f32 %v13238_v43, %v13853_v57 }
 0x821   : > { %v6515_v31 = vmul.f32 %v6418_v6, %v15163_v4  ;;  %v7074_v37 = vrot.slane %v6513_v8, 4  ;;  %v7071_v28 = vadd.f32 %v7070_v0, %v7069_v2  ;;  %v7080_v50 = vrot.slane %v6514_v18, 4 }
 0x822   : > { %v7668_v16 = vsel %vm5460_vm6, %v7640_v11, %v7667_v34  ;;  %v7179_v35 = vmul.f32 %v13241_v60, %v13859_v29  ;;  %v7180_v21 = vmul.f32 %v13258_v24, %v13861_v25  ;;  %v15164_v6 = vrot.slane %v13666_v30, 6 }
 0x823   : > { %v7086_v38 = vrot.slane %v6515_v31, 4  ;;  %v7075_v58 = vadd.f32 %v7074_v37, %v6513_v8  ;;  %7676 = vst.msk [vmem:[%s13461_s30 + $0x18] sm:$0xff] %vm5487_vm7, %v7668_v16  ;;  %v7072_v57 = vrot.slane %v7071_v28, 1  ;;  %v7081_v2 = vadd.f32 %v7080_v50, %v6514_v18 }
 0x824   : > { %v7388_v40 = vsel %vm5450_vm1, %v15164_v6, %v13780_v20  ;;  %v15165_v32 = vrot.slane %v13646_v19, 5  ;;  %v15166_v29 = vrot.slane %v13763_v59, 4  ;;  %v7395_v25 = vrot.slane %v13806_v53, 2 }
 0x825   : > { %v7087_v10 = vadd.f32 %v7086_v38, %v6515_v31  ;;  %v7076_v8 = vrot.slane %v7075_v58, 2  ;;  %v7397_v49 = vrot.slane %v7178_v52, 1  ;;  %v7073_v30 = vadd.f32 %v7072_v57, %v7071_v28 }
 0x826   : > { %v7390_v34 = vsel %vm5452_vm2, %v15165_v32, %v7388_v40  ;;  %v7082_v44 = vrot.slane %v7081_v2, 2  ;;  %v15167_v13 = vrot.slane %v13841_v15, 3  ;;  %v15168_v31 = vrot.slane %v13674_v63, 6 }
 0x827   : > { %v7392_v0 = vsel %vm5454_vm3, %v15166_v29, %v7390_v34  ;;  %v7088_v20 = vrot.slane %v7087_v10, 2  ;;  %v7077_v4 = vadd.f32 %v7076_v8, %v7075_v58  ;;  %v7409_v11 = vrot.slane %v13813_v46, 2 }
 0x828   : > { %v7394_v18 = vsel %vm5456_vm4, %v15167_v13, %v7392_v0  ;;  %v7402_v59 = vsel %vm5450_vm1, %v15168_v31, %v13785_v14  ;;  %v7083_v37 = vadd.f32 %v7082_v44, %v7081_v2  ;;  %v15169_v28 = vrot.slane %v13651_v33, 5 }
 0x829   : > { %v7396_v19 = vsel %vm5458_vm5, %v7395_v25, %v7394_v18  ;;  %v7089_v53 = vadd.f32 %v7088_v20, %v7087_v10  ;;  %v7078_v50 = vrot.slane %v7077_v4, 1  ;;  %v15170_v38 = vrot.slane %v13766_v47, 4  ;;  %v15176_v18 = vld [vmem:[#allocation151_spill] sm:$0xff] }
 0x82a   : > { %v7398_v52 = vsel %vm5460_vm6, %v7397_v49, %v7396_v19  ;;  %v7404_v15 = vsel %vm5452_vm2, %v15169_v28, %v7402_v59  ;;  %v7411_v58 = vrot.slane %v7179_v35, 1  ;;  %v15171_v63 = vrot.slane %v13712_v26, 6  ;;  %v15180_v59 = vld [vmem:[#allocation154_spill] sm:$0xff]  ;;  %v15182_v28 = vld [vmem:[#allocation128_spill] sm:$0xff] }
 0x82b   : > { %v7406_v16 = vsel %vm5454_vm3, %v15170_v38, %v7404_v15  ;;  %v7084_v46 = vrot.slane %v7083_v37, 1  ;;  %v7090_v6 = vrot.slane %v7089_v53, 1  ;;  %v15172_v40 = vrot.slane %v13844_v5, 3 }
 0x82c   : > { %v7416_v14 = vsel %vm5450_vm1, %v15171_v63, %v13794_v17  ;;  %v15173_v33 = vrot.slane %v13654_v62, 5  ;;  %v7079_v10 = vadd.f32 %v7078_v50, %v7077_v4  ;;  %v15174_v35 = vrot.slane %v13769_v48, 4  ;;  %v15185_v50 = vld [vmem:[#allocation155_spill] sm:$0xff] }
 0x82d   : > { %v7408_v57 = vsel %vm5456_vm4, %v15172_v40, %v7406_v16  ;;  %v7421_v26 = vrot.slane %v13847_v61, 3  ;;  %v7085_v17 = vadd.f32 %v7084_v46, %v7083_v37  ;;  %v7091_v34 = vadd.f32 %v7090_v6, %v7089_v53  ;;  %v8214_v40 = vld [vmem:[#allocation3] ss:$0 sm:$0xff] }
 0x82e   : > { %v7418_v2 = vsel %vm5452_vm2, %v15173_v33, %v7416_v14  ;;  %v7410_v47 = vsel %vm5458_vm5, %v7409_v11, %v7408_v57  ;;  %v7423_v5 = vrot.slane %v7177_v45, 2  ;;  %v7425_v0 = vrot.slane %v7180_v21, 1 }
 0x82f   : > { %v7420_v32 = vsel %vm5454_vm3, %v15174_v35, %v7418_v2  ;;  %v7412_v8 = vsel %vm5460_vm6, %v7411_v58, %v7410_v47  ;;  %v7201_v25 = vmul.f32 %v13258_v24, %v7073_v30  ;;  %v7202_v44 = vmul.f32 %v13238_v43, %v7079_v10  ;;  %v15178_v43 = vld [vmem:[#allocation153_spill] sm:$0xff] }
 0x830   : > { %v7422_v29 = vsel %vm5456_vm4, %v7421_v26, %v7420_v32  ;;  %v7489_v62 = vadd.f32 %v7412_v8, %v7398_v52  ;;  %v7203_v48 = vmul.f32 %v13241_v60, %v7085_v17  ;;  %v7204_v20 = vmul.f32 %v13258_v24, %v7091_v34 }
 0x831   : > { %v7424_v49 = vsel %vm5458_vm5, %v7423_v5, %v7422_v29  ;;  %v15175_v13 = vrot.slane %v13884_v27, 6  ;;  %v7437_v21 = vrot.slane %v14056_v56, 2  ;;  %v15177_v30 = vrot.slane %v15176_v18, 6 }
 0x832   : > { %v7426_v61 = vsel %vm5460_vm6, %v7425_v0, %v7424_v49  ;;  %v15179_v31 = vrot.slane %v15178_v43, 5  ;;  %v7439_v24 = vrot.slane %v7202_v44, 1  ;;  %v15181_v11 = vrot.slane %v15180_v59, 5 }
 0x833   : > { %v7430_v45 = vsel %vm5450_vm1, %v15175_v13, %v13917_v9  ;;  %v7444_v4 = vsel %vm5450_vm1, %v15177_v30, %v13920_v42  ;;  %v7490_v19 = vadd.f32 %v7489_v62, %v7426_v61  ;;  %v7451_v42 = vrot.slane %v14067_v23, 2 }
 0x834   : > { %v7432_v60 = vsel %vm5452_vm2, %v15179_v31, %v7430_v45  ;;  %v7446_v37 = vsel %vm5452_vm2, %v15181_v11, %v7444_v4  ;;  %v7453_v56 = vrot.slane %v7203_v48, 1  ;;  %v15184_v15 = vrot.slane %v15183_v36, 6 }
 0x835   : > { %v7434_v27 = vsel %vm5454_vm3, %v7433_v54, %v7432_v60  ;;  %v7448_v9 = vsel %vm5454_vm3, %v7447_v22, %v7446_v37  ;;  %7491 = vadd.xlane.f32.xlu0 %v7490_v19  ;;  %v7463_v3 = vrot.slane %v14033_v51, 3  ;;  %v15186_v12 = vrot.slane %v15185_v50, 5 }
 0x836   : > { %v7436_v53 = vsel %vm5456_vm4, %v7435_v7, %v7434_v27  ;;  %v7450_v52 = vsel %vm5456_vm4, %v7449_v41, %v7448_v9  ;;  %v7458_v54 = vsel %vm5450_vm1, %v15184_v15, %v15182_v28  ;;  %v7465_v38 = vrot.slane %v7201_v25, 2 }
 0x837   : > { %v7438_v22 = vsel %vm5458_vm5, %v7437_v21, %v7436_v53  ;;  %v7452_v23 = vsel %vm5458_vm5, %v7451_v42, %v7450_v52  ;;  %v7460_v7 = vsel %vm5452_vm2, %v15186_v12, %v7458_v54  ;;  %v7467_v58 = vrot.slane %v7204_v20, 1 }
 0x838   : > { %v7440_v39 = vsel %vm5460_vm6, %v7439_v24, %v7438_v22  ;;  %v7454_v41 = vsel %vm5460_vm6, %v7453_v56, %v7452_v23  ;;  %v7462_v16 = vsel %vm5454_vm3, %v7461_v55, %v7460_v7 }
 0x839   : > { %v7464_v51 = vsel %vm5456_vm4, %v7463_v3, %v7462_v16  ;;  %v7493_v63 = vadd.f32 %v7454_v41, %v7440_v39 }
 0x83a   : > { %v7466_v14 = vsel %vm5458_vm5, %v7465_v38, %v7464_v51 }
 0x83b   : > { %v7468_v46 = vsel %vm5460_vm6, %v7467_v58, %v7466_v14 }
 0x83c   : > { %v7494_v6 = vadd.f32 %v7493_v63, %v7468_v46 }
 0x83e   : > { %7495 = vadd.xlane.f32.xlu1 %v7494_v6 }
 0x849   : > { %v7484_v1 = vpop.xlane.xlu1 %7483 }
 0x84a   : > { %v7504_v57 = vadd.f32 %v8214_v40, %v7484_v1 }
 0x84c   : > { %7509 = vst.msk [vmem:[%s422_s29] sm:$0xff] %vm7508_vm8, %v7504_v57 }
 0x896   : > { %v7488_v55 = vpop.xlane.xlu0 %7487 }
 0x897   : > { %v7505_v33 = vadd.f32 %v8214_v40, %v7488_v55 }
 0x899   : > { %7510 = vst.msk [vmem:[%s422_s29 + $0x8] sm:$0xff] %vm7508_vm8, %v7505_v33 }
 0x8be   : > { %v7492_v2 = vpop.xlane.xlu0 %7491 }
 0x8bf   : > { %v7506_v10 = vadd.f32 %v8214_v40, %v7492_v2 }
 0x8c1   : > { %7511 = vst.msk [vmem:[%s422_s29 + $0x10] sm:$0xff] %vm7508_vm8, %v7506_v10 }
 0x8c7   : > { %v7496_v47 = vpop.xlane.xlu1 %7495 }
 0x8c8   : > { %v7507_v35 = vadd.f32 %v8214_v40, %v7496_v47 }
 0x8ca   : > { %7512 = vst.msk [vmem:[%s422_s29 + $0x18] sm:$0xff] %vm7508_vm8, %v7507_v35 }
 0x8cb PF: > { %p26_p10 = scmp.ge.s32.totalorder %s9851_s23, 4   ;;  %s15187_s17 = smov %s9705_s18 }
 0x8cc   : > { %s15188_s18 = smov %s9709_s19  ;;  %s15189_s19 = smov %s9860_s28 }
 0x8cd   : > { %s15190_s20 = smov %s9851_s23  ;;  %28 = sbr.rel (!%p26_p10) target bundleno = 7 (0x7), region = 116 }
 0x8d2   :  { %7716 = vsyncpa [#allocation5], 1 }
 0x8d3   :  { %7718 = vsyncpa [#allocation5 + $0x1], 1 }
 0x8d4   :  { %7719 = vsyncpa [#allocation7], 1 }

</bundles_post_ra>
